<compile_context>
chip_gen: v7x
topology: tpu7x:2x2x1
jax: 0.10.0
libtpu: 0.0.40
codegen_flags: <defaults>
</compile_context>

<pallas_src>
import jax
import jax.numpy as jnp
from jax.experimental import pallas as pl
from jax.experimental.pallas import tpu as pltpu

K = 20                      # conv kernel size
PAD_L = (K - 1) // 2        # 9  (PyTorch padding='same', even kernel)
PAD_R = (K - 1) - PAD_L     # 10
C = 32                      # conv channels
L_IN = 420                  # input length
L1 = L_IN                   # conv1 output length
L1P = L1 // 2               # 210 after pool1
L2 = L1P                    # conv2 output length
L2P = L2 // 2               # 105 after pool2
P1_W = 256                  # lane-padded pooled-1 width (embeds 9/10 'same' pad)
P2_W = 128                  # lane-padded pooled-2 width (105 -> 128)
HID = 128                   # lane-padded MLP hidden (100 -> 128)
OUT = 128                   # lane-padded MLP output (5 -> 128)

B_CONV = 4                  # samples per grid step, conv kernel (4*32 = 128 rows)
B_MLP = 8                   # samples per grid step, MLP kernel


# --------------------------- fused conv stack kernel -------------------------
def _conv_stack_kernel(col1_ref, w1_ref, s1_ref, h1_ref, w2_ref, s2_ref, h2_ref,
                       sel1_ref, sel2_ref, out_ref):
    """conv1+BN+ReLU+pool -> conv2+BN+ReLU+pool for B_CONV samples."""
    B = col1_ref.shape[0]

    # ---- stage 1: conv1 (1->32, k=20) as per-sample (32,K)x(K,L1+1) matmul ---
    # (one extra column is computed so the maxpool "right neighbour" is a slice)
    w1 = w1_ref[...]                                            # (32, K) bf16
    y1 = jnp.concatenate(
        [jnp.dot(w1, col1_ref[b], preferred_element_type=jnp.float32)
         for b in range(B)], axis=0)                            # (B*32, L1+1) f32
    y1 = jnp.maximum(y1 * s1_ref[...] + h1_ref[...], 0.0)       # folded BN + ReLU

    # maxpool(2,2): pairwise max, then one 0/1 even-column selection matmul.
    # sel1 also lays the result into conv2's 'same'-padded frame (9 zeros left).
    y1m = jnp.maximum(y1[:, :L1], y1[:, 1:L1 + 1]).astype(jnp.bfloat16)
    p1 = jnp.dot(y1m, sel1_ref[...],
                 preferred_element_type=jnp.float32).astype(jnp.bfloat16)  # (B*32, 256)

    # ---- stage 2: conv2 (32->32, k=20) as per-sample (32,640)x(640,L2+1) -----
    w2 = w2_ref[...]                                            # (32, 640) bf16
    slabs = [p1[:, j:j + L2 + 1] for j in range(K)]             # K x (B*32, L2+1)
    y2 = jnp.concatenate(
        [jnp.dot(w2,
                 jnp.concatenate([s[b * C:(b + 1) * C, :] for s in slabs],
                                 axis=0),                       # im2col (640, L2+1)
                 preferred_element_type=jnp.float32)
         for b in range(B)], axis=0)                            # (B*32, L2+1) f32
    y2 = jnp.maximum(y2 * s2_ref[...] + h2_ref[...], 0.0)

    y2m = jnp.maximum(y2[:, :L2], y2[:, 1:L2 + 1]).astype(jnp.bfloat16)
    out_ref[...] = jnp.dot(y2m, sel2_ref[...],
                           preferred_element_type=jnp.float32)  # (B*32, 128)


# --------------------------------- MLP kernel --------------------------------
def _mlp_kernel(x_ref, w1_ref, b1_ref, w2_ref, b2_ref, out_ref):
    x = x_ref[...].astype(jnp.bfloat16)
    h = jnp.dot(x, w1_ref[...], preferred_element_type=jnp.float32) + b1_ref[...]
    h = jnp.maximum(h, 0.0).astype(jnp.bfloat16)
    out_ref[...] = jnp.dot(h, w2_ref[...],
                           preferred_element_type=jnp.float32) + b2_ref[...]


# --------------------------------- wrappers ----------------------------------
def _fold_bn(bias, gamma, beta, mean, var, eps=1e-5):
    scale = gamma / jnp.sqrt(var + eps)
    shift = (bias - mean) * scale + beta
    return scale.astype(jnp.float32), shift.astype(jnp.float32)


def _even_select(l_in, l_out, col_off, n_keep):
    """(l_in, l_out) 0/1 matrix mapping input column 2c -> output column col_off+c."""
    c = jnp.arange(n_keep)
    m = jnp.zeros((l_in, l_out), jnp.float32).at[2 * c, col_off + c].set(1.0)
    return m.astype(jnp.bfloat16)


def conv_stack(x, params, n_pad):
    """Fused conv blocks.  Returns (n_pad*32, 128) f32: row s*32+c, col l holds
    pooled2[sample s, channel c, position l] for l < 105 and 0 otherwise."""
    N = x.shape[0]
    # 'same' padding (9, 10) + one extra right zero for the pairwise-max slice.
    xpad = jnp.pad(x.astype(jnp.float32),
                   ((0, n_pad - N), (0, 0), (PAD_L, PAD_R + 1)))  # (n_pad,1,440)

    # im2col for conv1 (Cin == 1), built on the XLA side:  (n_pad, K, L1+1)
    col1 = jnp.stack([xpad[:, 0, j:j + L1 + 1] for j in range(K)],
                     axis=1).astype(jnp.bfloat16)

    w1 = params["w_c1"].reshape(C, K).astype(jnp.bfloat16)       # (32, K)
    # conv2 weight flattened so its columns match the in-kernel im2col rows:
    #   w2f[co, j*32 + ci] = w_c2[co, ci, j]
    w2 = jnp.transpose(params["w_c2"], (0, 2, 1)).reshape(C, C * K).astype(jnp.bfloat16)

    s1, h1 = _fold_bn(params["b_c1"], params["g1"], params["be1"],
                      params["rm1"], params["rv1"])
    s2, h2 = _fold_bn(params["b_c2"], params["g2"], params["be2"],
                      params["rm2"], params["rv2"])
    # tile per-channel scale/shift to the (B*32, 1) row layout used in-kernel
    s1 = jnp.tile(s1.reshape(C, 1), (B_CONV, 1))
    h1 = jnp.tile(h1.reshape(C, 1), (B_CONV, 1))
    s2 = jnp.tile(s2.reshape(C, 1), (B_CONV, 1))
    h2 = jnp.tile(h2.reshape(C, 1), (B_CONV, 1))

    sel1 = _even_select(L1, P1_W, PAD_L, L1P)   # pool1 + conv2 'same' framing
    sel2 = _even_select(L2, P2_W, 0, L2P)       # pool2 + lane padding 105 -> 128

    rows = B_CONV * C
    return pl.pallas_call(
        _conv_stack_kernel,
        out_shape=jax.ShapeDtypeStruct((n_pad * C, P2_W), jnp.float32),
        grid=(n_pad // B_CONV,),
        in_specs=[
            pl.BlockSpec((B_CONV, K, L1 + 1), lambda n: (n, 0, 0)),  # batch tile
            pl.BlockSpec((C, K), lambda n: (0, 0)),                  # resident
            pl.BlockSpec((rows, 1), lambda n: (0, 0)),
            pl.BlockSpec((rows, 1), lambda n: (0, 0)),
            pl.BlockSpec((C, C * K), lambda n: (0, 0)),
            pl.BlockSpec((rows, 1), lambda n: (0, 0)),
            pl.BlockSpec((rows, 1), lambda n: (0, 0)),
            pl.BlockSpec((L1, P1_W), lambda n: (0, 0)),
            pl.BlockSpec((L2, P2_W), lambda n: (0, 0)),
        ],
        out_specs=pl.BlockSpec((rows, P2_W), lambda n: (n, 0)),
        compiler_params=pltpu.CompilerParams(
            dimension_semantics=("parallel",)),
    )(col1, w1, s1, h1, w2, s2, h2, sel1, sel2)


def mlp(x_flat, params):
    """Linear(4096->128 padded) + ReLU + Linear(128->128 padded), batch-tiled."""
    n_pad = x_flat.shape[0]
    w1 = params["w_l1"].reshape(C, L2P, 100)
    w1 = jnp.pad(w1, ((0, 0), (0, P2_W - L2P), (0, HID - 100)))
    w1 = w1.reshape(C * P2_W, HID).astype(jnp.bfloat16)                  # (4096,128)
    b1 = jnp.pad(params["b_l1"], (0, HID - 100)).reshape(1, HID).astype(jnp.float32)
    w2 = jnp.pad(params["w_l2"], ((0, HID - 100), (0, OUT - 5))).astype(jnp.bfloat16)
    b2 = jnp.pad(params["b_l2"], (0, OUT - 5)).reshape(1, OUT).astype(jnp.float32)

    return pl.pallas_call(
        _mlp_kernel,
        out_shape=jax.ShapeDtypeStruct((n_pad, OUT), jnp.float32),
        grid=(n_pad // B_MLP,),
        in_specs=[
            pl.BlockSpec((B_MLP, C * P2_W), lambda n: (n, 0)),
            pl.BlockSpec((C * P2_W, HID), lambda n: (0, 0)),
            pl.BlockSpec((1, HID), lambda n: (0, 0)),
            pl.BlockSpec((HID, OUT), lambda n: (0, 0)),
            pl.BlockSpec((1, OUT), lambda n: (0, 0)),
        ],
        out_specs=pl.BlockSpec((B_MLP, OUT), lambda n: (n, 0)),
        compiler_params=pltpu.CompilerParams(
            dimension_semantics=("parallel",)),
    )(x_flat, w1, b1, w2, b2)


def con_net_forward(x, params):
    N, c_in, L = x.shape
    assert c_in == 1 and L == L_IN, \
        "Con_net hard-codes Linear(32*105, 100): input length must be 420"
    n_pad = -(-N // B_MLP) * B_MLP          # multiple of both B_MLP and B_CONV
    h = conv_stack(x, params, n_pad)        # (n_pad*32, 128)
    x_flat = h.reshape(n_pad, C * P2_W)     # channel-major flatten (free reshape)
    logits = mlp(x_flat, params)            # (n_pad, 128)
    return logits[:N, :5]


# ------------------------------ pure-JAX reference ---------------------------
def _reference(x, p, eps=1e-5):
    def block(h, w, b, g, be, rm, rv):
        y = jax.lax.conv_general_dilated(
            h, w, window_strides=(1,), padding=[(PAD_L, PAD_R)],
            dimension_numbers=("NCH", "OIH", "NCH"))
        y = y + b[None, :, None]
        y = (y - rm[None, :, None]) / jnp.sqrt(rv[None, :, None] + eps)
        y = y * g[None, :, None] + be[None, :, None]
        y = jnp.maximum(y, 0.0)
        n, c, l = y.shape
        return y.reshape(n, c, l // 2, 2).max(axis=-1)

    h = block(x.astype(jnp.float32), p["w_c1"], p["b_c1"], p["g1"], p["be1"],
              p["rm1"], p["rv1"])
    h = block(h, p["w_c2"], p["b_c2"], p["g2"], p["be2"], p["rm2"], p["rv2"])
    h = h.reshape(h.shape[0], -1)
    h = jnp.maximum(h @ p["w_l1"] + p["b_l1"], 0.0)
    return h @ p["w_l2"] + p["b_l2"]


if __name__ == "__main__":
    key = jax.random.PRNGKey(0)
    ks = jax.random.split(key, 11)
    N = 8   # small batch; length 420 is required by the module (32*105 Linear)
    x = jax.random.normal(ks[0], (N, 1, L_IN), dtype=jnp.float32)

    params = dict(
        # conv block 1
        w_c1=0.10 * jax.random.normal(ks[1], (C, 1, K), jnp.float32),
        b_c1=0.10 * jax.random.normal(ks[2], (C,), jnp.float32),
        g1=1.0 + 0.10 * jax.random.normal(ks[3], (C,), jnp.float32),
        be1=0.10 * jax.random.normal(ks[4], (C,), jnp.float32),
        rm1=jnp.zeros((C,), jnp.float32),
        rv1=jnp.ones((C,), jnp.float32),
        # conv block 2
        w_c2=0.05 * jax.random.normal(ks[5], (C, C, K), jnp.float32),
        b_c2=0.10 * jax.random.normal(ks[6], (C,), jnp.float32),
        g2=1.0 + 0.10 * jax.random.normal(ks[7], (C,), jnp.float32),
        be2=0.10 * jax.random.normal(ks[8], (C,), jnp.float32),
        rm2=jnp.zeros((C,), jnp.float32),
        rv2=jnp.ones((C,), jnp.float32),
        # MLP head (weights stored as (in, out), i.e. torch weight transposed)
        w_l1=0.02 * jax.random.normal(ks[9], (C * L2P, 100), jnp.float32),
        b_l1=jnp.zeros((100,), jnp.float32),
        w_l2=0.10 * jax.random.normal(ks[10], (100, 5), jnp.float32),
        b_l2=jnp.zeros((5,), jnp.float32),
    )

    out = jax.jit(con_net_forward)(x, params)
    jax.block_until_ready(out)
    assert out.shape == (N, 5)

    ref = jax.jit(_reference)(x, params)
    assert jnp.allclose(out, ref, rtol=0.1, atol=0.1), (
        f"max abs err {jnp.max(jnp.abs(out - ref))}")

    # TODO(synk): BatchNorm1d is implemented in eval mode (running stats folded
    # into a per-channel scale/shift); training-mode batch statistics and
    # running-stat updates are not reproduced.
    print("KERNEL_OK")
</pallas_src>

<mosaic_0001>
module attributes {stable_mosaic.version = 11 : i64} {
  func.func @_conv_stack_kernel(%arg0: i32, %arg1: memref<4x20x421xbf16, #tpu.memory_space<vmem>>, %arg2: memref<32x20xbf16, #tpu.memory_space<vmem>>, %arg3: memref<128x1xf32, #tpu.memory_space<vmem>>, %arg4: memref<128x1xf32, #tpu.memory_space<vmem>>, %arg5: memref<32x640xbf16, #tpu.memory_space<vmem>>, %arg6: memref<128x1xf32, #tpu.memory_space<vmem>>, %arg7: memref<128x1xf32, #tpu.memory_space<vmem>>, %arg8: memref<420x256xbf16, #tpu.memory_space<vmem>>, %arg9: memref<210x128xbf16, #tpu.memory_space<vmem>>, %arg10: memref<128x128xf32, #tpu.memory_space<vmem>>) attributes {dimension_semantics = [#tpu.dimension_semantics<parallel>], iteration_bounds = array<i64: 2>, scalar_prefetch = 0 : i64, scratch_operands = 0 : i64, tpu.core_type = #tpu.core_type<tc>, window_params = [{transform_indices = @transform_0, window_bounds = array<i64: 4, 20, 421>}, {pipeline_mode = #tpu.pipeline_mode<synchronous>, transform_indices = @transform_1, window_bounds = array<i64: 32, 20>}, {pipeline_mode = #tpu.pipeline_mode<synchronous>, transform_indices = @transform_2, window_bounds = array<i64: 128, 1>}, {pipeline_mode = #tpu.pipeline_mode<synchronous>, transform_indices = @transform_3, window_bounds = array<i64: 128, 1>}, {pipeline_mode = #tpu.pipeline_mode<synchronous>, transform_indices = @transform_4, window_bounds = array<i64: 32, 640>}, {pipeline_mode = #tpu.pipeline_mode<synchronous>, transform_indices = @transform_5, window_bounds = array<i64: 128, 1>}, {pipeline_mode = #tpu.pipeline_mode<synchronous>, transform_indices = @transform_6, window_bounds = array<i64: 128, 1>}, {pipeline_mode = #tpu.pipeline_mode<synchronous>, transform_indices = @transform_7, window_bounds = array<i64: 420, 256>}, {pipeline_mode = #tpu.pipeline_mode<synchronous>, transform_indices = @transform_8, window_bounds = array<i64: 210, 128>}, {transform_indices = @transform_9, window_bounds = array<i64: 128, 128>}]} {
    %c0 = arith.constant 0 : index
    %c0_0 = arith.constant 0 : index
    %0 = vector.load %arg2[%c0, %c0_0] : memref<32x20xbf16, #tpu.memory_space<vmem>>, vector<32x20xbf16>
    %c0_1 = arith.constant 0 : index
    %c0_2 = arith.constant 0 : index
    %c0_3 = arith.constant 0 : index
    %1 = vector.load %arg1[%c0_1, %c0_2, %c0_3] : memref<4x20x421xbf16, #tpu.memory_space<vmem>>, vector<1x20x421xbf16>
    %2 = vector.shape_cast %1 : vector<1x20x421xbf16> to vector<20x421xbf16>
    %cst = arith.constant dense<0.000000e+00> : vector<32x421xf32>
    %3 = tpu.matmul %0, %2, %cst {dimension_numbers = #tpu.dot_dimension_numbers<[1], [0], [0], [1], [0, 0, 1, 1], [], []>} : vector<32x20xbf16>, vector<20x421xbf16>, vector<32x421xf32> -> vector<32x421xf32>
    %c1 = arith.constant 1 : index
    %c0_4 = arith.constant 0 : index
    %c0_5 = arith.constant 0 : index
    %4 = vector.load %arg1[%c1, %c0_4, %c0_5] : memref<4x20x421xbf16, #tpu.memory_space<vmem>>, vector<1x20x421xbf16>
    %5 = vector.shape_cast %4 : vector<1x20x421xbf16> to vector<20x421xbf16>
    %cst_6 = arith.constant dense<0.000000e+00> : vector<32x421xf32>
    %6 = tpu.matmul %0, %5, %cst_6 {dimension_numbers = #tpu.dot_dimension_numbers<[1], [0], [0], [1], [0, 0, 1, 1], [], []>} : vector<32x20xbf16>, vector<20x421xbf16>, vector<32x421xf32> -> vector<32x421xf32>
    %c2 = arith.constant 2 : index
    %c0_7 = arith.constant 0 : index
    %c0_8 = arith.constant 0 : index
    %7 = vector.load %arg1[%c2, %c0_7, %c0_8] : memref<4x20x421xbf16, #tpu.memory_space<vmem>>, vector<1x20x421xbf16>
    %8 = vector.shape_cast %7 : vector<1x20x421xbf16> to vector<20x421xbf16>
    %cst_9 = arith.constant dense<0.000000e+00> : vector<32x421xf32>
    %9 = tpu.matmul %0, %8, %cst_9 {dimension_numbers = #tpu.dot_dimension_numbers<[1], [0], [0], [1], [0, 0, 1, 1], [], []>} : vector<32x20xbf16>, vector<20x421xbf16>, vector<32x421xf32> -> vector<32x421xf32>
    %c3 = arith.constant 3 : index
    %c0_10 = arith.constant 0 : index
    %c0_11 = arith.constant 0 : index
    %10 = vector.load %arg1[%c3, %c0_10, %c0_11] : memref<4x20x421xbf16, #tpu.memory_space<vmem>>, vector<1x20x421xbf16>
    %11 = vector.shape_cast %10 : vector<1x20x421xbf16> to vector<20x421xbf16>
    %cst_12 = arith.constant dense<0.000000e+00> : vector<32x421xf32>
    %12 = tpu.matmul %0, %11, %cst_12 {dimension_numbers = #tpu.dot_dimension_numbers<[1], [0], [0], [1], [0, 0, 1, 1], [], []>} : vector<32x20xbf16>, vector<20x421xbf16>, vector<32x421xf32> -> vector<32x421xf32>
    %13 = tpu.concatenate %3, %6, %9, %12 in 0 : vector<32x421xf32>, vector<32x421xf32>, vector<32x421xf32>, vector<32x421xf32> -> vector<128x421xf32>
    %c0_13 = arith.constant 0 : index
    %c0_14 = arith.constant 0 : index
    %14 = vector.load %arg3[%c0_13, %c0_14] : memref<128x1xf32, #tpu.memory_space<vmem>>, vector<128x1xf32>
    %15 = vector.broadcast %14 : vector<128x1xf32> to vector<128x421xf32>
    %16 = arith.mulf %13, %15 : vector<128x421xf32>
    %c0_15 = arith.constant 0 : index
    %c0_16 = arith.constant 0 : index
    %17 = vector.load %arg4[%c0_15, %c0_16] : memref<128x1xf32, #tpu.memory_space<vmem>>, vector<128x1xf32>
    %18 = vector.broadcast %17 : vector<128x1xf32> to vector<128x421xf32>
    %19 = arith.addf %16, %18 : vector<128x421xf32>
    %cst_17 = arith.constant 0.000000e+00 : f32
    %20 = vector.broadcast %cst_17 : f32 to vector<128x421xf32>
    %21 = arith.maximumf %19, %20 : vector<128x421xf32>
    %22 = vector.extract_strided_slice %21 {offsets = [0, 0], sizes = [128, 420], strides = [1, 1]} : vector<128x421xf32> to vector<128x420xf32>
    %23 = vector.extract_strided_slice %21 {offsets = [0, 1], sizes = [128, 420], strides = [1, 1]} : vector<128x421xf32> to vector<128x420xf32>
    %24 = arith.maximumf %22, %23 : vector<128x420xf32>
    %25 = arith.truncf %24 : vector<128x420xf32> to vector<128x420xbf16>
    %c0_18 = arith.constant 0 : index
    %c0_19 = arith.constant 0 : index
    %26 = vector.load %arg8[%c0_18, %c0_19] : memref<420x256xbf16, #tpu.memory_space<vmem>>, vector<420x256xbf16>
    %cst_20 = arith.constant dense<0.000000e+00> : vector<128x256xf32>
    %27 = tpu.matmul %25, %26, %cst_20 {dimension_numbers = #tpu.dot_dimension_numbers<[1], [0], [0], [1], [0, 0, 1, 1], [], []>} : vector<128x420xbf16>, vector<420x256xbf16>, vector<128x256xf32> -> vector<128x256xf32>
    %28 = arith.truncf %27 : vector<128x256xf32> to vector<128x256xbf16>
    %c0_21 = arith.constant 0 : index
    %c0_22 = arith.constant 0 : index
    %29 = vector.load %arg5[%c0_21, %c0_22] : memref<32x640xbf16, #tpu.memory_space<vmem>>, vector<32x640xbf16>
    %30 = vector.extract_strided_slice %28 {offsets = [0, 0], sizes = [128, 211], strides = [1, 1]} : vector<128x256xbf16> to vector<128x211xbf16>
    %31 = vector.extract_strided_slice %28 {offsets = [0, 1], sizes = [128, 211], strides = [1, 1]} : vector<128x256xbf16> to vector<128x211xbf16>
    %32 = vector.extract_strided_slice %28 {offsets = [0, 2], sizes = [128, 211], strides = [1, 1]} : vector<128x256xbf16> to vector<128x211xbf16>
    %33 = vector.extract_strided_slice %28 {offsets = [0, 3], sizes = [128, 211], strides = [1, 1]} : vector<128x256xbf16> to vector<128x211xbf16>
    %34 = vector.extract_strided_slice %28 {offsets = [0, 4], sizes = [128, 211], strides = [1, 1]} : vector<128x256xbf16> to vector<128x211xbf16>
    %35 = vector.extract_strided_slice %28 {offsets = [0, 5], sizes = [128, 211], strides = [1, 1]} : vector<128x256xbf16> to vector<128x211xbf16>
    %36 = vector.extract_strided_slice %28 {offsets = [0, 6], sizes = [128, 211], strides = [1, 1]} : vector<128x256xbf16> to vector<128x211xbf16>
    %37 = vector.extract_strided_slice %28 {offsets = [0, 7], sizes = [128, 211], strides = [1, 1]} : vector<128x256xbf16> to vector<128x211xbf16>
    %38 = vector.extract_strided_slice %28 {offsets = [0, 8], sizes = [128, 211], strides = [1, 1]} : vector<128x256xbf16> to vector<128x211xbf16>
    %39 = vector.extract_strided_slice %28 {offsets = [0, 9], sizes = [128, 211], strides = [1, 1]} : vector<128x256xbf16> to vector<128x211xbf16>
    %40 = vector.extract_strided_slice %28 {offsets = [0, 10], sizes = [128, 211], strides = [1, 1]} : vector<128x256xbf16> to vector<128x211xbf16>
    %41 = vector.extract_strided_slice %28 {offsets = [0, 11], sizes = [128, 211], strides = [1, 1]} : vector<128x256xbf16> to vector<128x211xbf16>
    %42 = vector.extract_strided_slice %28 {offsets = [0, 12], sizes = [128, 211], strides = [1, 1]} : vector<128x256xbf16> to vector<128x211xbf16>
    %43 = vector.extract_strided_slice %28 {offsets = [0, 13], sizes = [128, 211], strides = [1, 1]} : vector<128x256xbf16> to vector<128x211xbf16>
    %44 = vector.extract_strided_slice %28 {offsets = [0, 14], sizes = [128, 211], strides = [1, 1]} : vector<128x256xbf16> to vector<128x211xbf16>
    %45 = vector.extract_strided_slice %28 {offsets = [0, 15], sizes = [128, 211], strides = [1, 1]} : vector<128x256xbf16> to vector<128x211xbf16>
    %46 = vector.extract_strided_slice %28 {offsets = [0, 16], sizes = [128, 211], strides = [1, 1]} : vector<128x256xbf16> to vector<128x211xbf16>
    %47 = vector.extract_strided_slice %28 {offsets = [0, 17], sizes = [128, 211], strides = [1, 1]} : vector<128x256xbf16> to vector<128x211xbf16>
    %48 = vector.extract_strided_slice %28 {offsets = [0, 18], sizes = [128, 211], strides = [1, 1]} : vector<128x256xbf16> to vector<128x211xbf16>
    %49 = vector.extract_strided_slice %28 {offsets = [0, 19], sizes = [128, 211], strides = [1, 1]} : vector<128x256xbf16> to vector<128x211xbf16>
    %50 = vector.extract_strided_slice %30 {offsets = [0, 0], sizes = [32, 211], strides = [1, 1]} : vector<128x211xbf16> to vector<32x211xbf16>
    %51 = vector.extract_strided_slice %31 {offsets = [0, 0], sizes = [32, 211], strides = [1, 1]} : vector<128x211xbf16> to vector<32x211xbf16>
    %52 = vector.extract_strided_slice %32 {offsets = [0, 0], sizes = [32, 211], strides = [1, 1]} : vector<128x211xbf16> to vector<32x211xbf16>
    %53 = vector.extract_strided_slice %33 {offsets = [0, 0], sizes = [32, 211], strides = [1, 1]} : vector<128x211xbf16> to vector<32x211xbf16>
    %54 = vector.extract_strided_slice %34 {offsets = [0, 0], sizes = [32, 211], strides = [1, 1]} : vector<128x211xbf16> to vector<32x211xbf16>
    %55 = vector.extract_strided_slice %35 {offsets = [0, 0], sizes = [32, 211], strides = [1, 1]} : vector<128x211xbf16> to vector<32x211xbf16>
    %56 = vector.extract_strided_slice %36 {offsets = [0, 0], sizes = [32, 211], strides = [1, 1]} : vector<128x211xbf16> to vector<32x211xbf16>
    %57 = vector.extract_strided_slice %37 {offsets = [0, 0], sizes = [32, 211], strides = [1, 1]} : vector<128x211xbf16> to vector<32x211xbf16>
    %58 = vector.extract_strided_slice %38 {offsets = [0, 0], sizes = [32, 211], strides = [1, 1]} : vector<128x211xbf16> to vector<32x211xbf16>
    %59 = vector.extract_strided_slice %39 {offsets = [0, 0], sizes = [32, 211], strides = [1, 1]} : vector<128x211xbf16> to vector<32x211xbf16>
    %60 = vector.extract_strided_slice %40 {offsets = [0, 0], sizes = [32, 211], strides = [1, 1]} : vector<128x211xbf16> to vector<32x211xbf16>
    %61 = vector.extract_strided_slice %41 {offsets = [0, 0], sizes = [32, 211], strides = [1, 1]} : vector<128x211xbf16> to vector<32x211xbf16>
    %62 = vector.extract_strided_slice %42 {offsets = [0, 0], sizes = [32, 211], strides = [1, 1]} : vector<128x211xbf16> to vector<32x211xbf16>
    %63 = vector.extract_strided_slice %43 {offsets = [0, 0], sizes = [32, 211], strides = [1, 1]} : vector<128x211xbf16> to vector<32x211xbf16>
    %64 = vector.extract_strided_slice %44 {offsets = [0, 0], sizes = [32, 211], strides = [1, 1]} : vector<128x211xbf16> to vector<32x211xbf16>
    %65 = vector.extract_strided_slice %45 {offsets = [0, 0], sizes = [32, 211], strides = [1, 1]} : vector<128x211xbf16> to vector<32x211xbf16>
    %66 = vector.extract_strided_slice %46 {offsets = [0, 0], sizes = [32, 211], strides = [1, 1]} : vector<128x211xbf16> to vector<32x211xbf16>
    %67 = vector.extract_strided_slice %47 {offsets = [0, 0], sizes = [32, 211], strides = [1, 1]} : vector<128x211xbf16> to vector<32x211xbf16>
    %68 = vector.extract_strided_slice %48 {offsets = [0, 0], sizes = [32, 211], strides = [1, 1]} : vector<128x211xbf16> to vector<32x211xbf16>
    %69 = vector.extract_strided_slice %49 {offsets = [0, 0], sizes = [32, 211], strides = [1, 1]} : vector<128x211xbf16> to vector<32x211xbf16>
    %70 = tpu.concatenate %50, %51, %52, %53, %54, %55, %56, %57, %58, %59, %60, %61, %62, %63, %64, %65 in 0 : vector<32x211xbf16>, vector<32x211xbf16>, vector<32x211xbf16>, vector<32x211xbf16>, vector<32x211xbf16>, vector<32x211xbf16>, vector<32x211xbf16>, vector<32x211xbf16>, vector<32x211xbf16>, vector<32x211xbf16>, vector<32x211xbf16>, vector<32x211xbf16>, vector<32x211xbf16>, vector<32x211xbf16>, vector<32x211xbf16>, vector<32x211xbf16> -> vector<512x211xbf16>
    %71 = tpu.concatenate %66, %67, %68, %69 in 0 : vector<32x211xbf16>, vector<32x211xbf16>, vector<32x211xbf16>, vector<32x211xbf16> -> vector<128x211xbf16>
    %72 = tpu.concatenate %70, %71 in 0 : vector<512x211xbf16>, vector<128x211xbf16> -> vector<640x211xbf16>
    %cst_23 = arith.constant dense<0.000000e+00> : vector<32x211xf32>
    %73 = tpu.matmul %29, %72, %cst_23 {dimension_numbers = #tpu.dot_dimension_numbers<[1], [0], [0], [1], [0, 0, 1, 1], [], []>} : vector<32x640xbf16>, vector<640x211xbf16>, vector<32x211xf32> -> vector<32x211xf32>
    %74 = vector.extract_strided_slice %30 {offsets = [32, 0], sizes = [32, 211], strides = [1, 1]} : vector<128x211xbf16> to vector<32x211xbf16>
    %75 = vector.extract_strided_slice %31 {offsets = [32, 0], sizes = [32, 211], strides = [1, 1]} : vector<128x211xbf16> to vector<32x211xbf16>
    %76 = vector.extract_strided_slice %32 {offsets = [32, 0], sizes = [32, 211], strides = [1, 1]} : vector<128x211xbf16> to vector<32x211xbf16>
    %77 = vector.extract_strided_slice %33 {offsets = [32, 0], sizes = [32, 211], strides = [1, 1]} : vector<128x211xbf16> to vector<32x211xbf16>
    %78 = vector.extract_strided_slice %34 {offsets = [32, 0], sizes = [32, 211], strides = [1, 1]} : vector<128x211xbf16> to vector<32x211xbf16>
    %79 = vector.extract_strided_slice %35 {offsets = [32, 0], sizes = [32, 211], strides = [1, 1]} : vector<128x211xbf16> to vector<32x211xbf16>
    %80 = vector.extract_strided_slice %36 {offsets = [32, 0], sizes = [32, 211], strides = [1, 1]} : vector<128x211xbf16> to vector<32x211xbf16>
    %81 = vector.extract_strided_slice %37 {offsets = [32, 0], sizes = [32, 211], strides = [1, 1]} : vector<128x211xbf16> to vector<32x211xbf16>
    %82 = vector.extract_strided_slice %38 {offsets = [32, 0], sizes = [32, 211], strides = [1, 1]} : vector<128x211xbf16> to vector<32x211xbf16>
    %83 = vector.extract_strided_slice %39 {offsets = [32, 0], sizes = [32, 211], strides = [1, 1]} : vector<128x211xbf16> to vector<32x211xbf16>
    %84 = vector.extract_strided_slice %40 {offsets = [32, 0], sizes = [32, 211], strides = [1, 1]} : vector<128x211xbf16> to vector<32x211xbf16>
    %85 = vector.extract_strided_slice %41 {offsets = [32, 0], sizes = [32, 211], strides = [1, 1]} : vector<128x211xbf16> to vector<32x211xbf16>
    %86 = vector.extract_strided_slice %42 {offsets = [32, 0], sizes = [32, 211], strides = [1, 1]} : vector<128x211xbf16> to vector<32x211xbf16>
    %87 = vector.extract_strided_slice %43 {offsets = [32, 0], sizes = [32, 211], strides = [1, 1]} : vector<128x211xbf16> to vector<32x211xbf16>
    %88 = vector.extract_strided_slice %44 {offsets = [32, 0], sizes = [32, 211], strides = [1, 1]} : vector<128x211xbf16> to vector<32x211xbf16>
    %89 = vector.extract_strided_slice %45 {offsets = [32, 0], sizes = [32, 211], strides = [1, 1]} : vector<128x211xbf16> to vector<32x211xbf16>
    %90 = vector.extract_strided_slice %46 {offsets = [32, 0], sizes = [32, 211], strides = [1, 1]} : vector<128x211xbf16> to vector<32x211xbf16>
    %91 = vector.extract_strided_slice %47 {offsets = [32, 0], sizes = [32, 211], strides = [1, 1]} : vector<128x211xbf16> to vector<32x211xbf16>
    %92 = vector.extract_strided_slice %48 {offsets = [32, 0], sizes = [32, 211], strides = [1, 1]} : vector<128x211xbf16> to vector<32x211xbf16>
    %93 = vector.extract_strided_slice %49 {offsets = [32, 0], sizes = [32, 211], strides = [1, 1]} : vector<128x211xbf16> to vector<32x211xbf16>
    %94 = tpu.concatenate %74, %75, %76, %77, %78, %79, %80, %81, %82, %83, %84, %85, %86, %87, %88, %89 in 0 : vector<32x211xbf16>, vector<32x211xbf16>, vector<32x211xbf16>, vector<32x211xbf16>, vector<32x211xbf16>, vector<32x211xbf16>, vector<32x211xbf16>, vector<32x211xbf16>, vector<32x211xbf16>, vector<32x211xbf16>, vector<32x211xbf16>, vector<32x211xbf16>, vector<32x211xbf16>, vector<32x211xbf16>, vector<32x211xbf16>, vector<32x211xbf16> -> vector<512x211xbf16>
    %95 = tpu.concatenate %90, %91, %92, %93 in 0 : vector<32x211xbf16>, vector<32x211xbf16>, vector<32x211xbf16>, vector<32x211xbf16> -> vector<128x211xbf16>
    %96 = tpu.concatenate %94, %95 in 0 : vector<512x211xbf16>, vector<128x211xbf16> -> vector<640x211xbf16>
    %cst_24 = arith.constant dense<0.000000e+00> : vector<32x211xf32>
    %97 = tpu.matmul %29, %96, %cst_24 {dimension_numbers = #tpu.dot_dimension_numbers<[1], [0], [0], [1], [0, 0, 1, 1], [], []>} : vector<32x640xbf16>, vector<640x211xbf16>, vector<32x211xf32> -> vector<32x211xf32>
    %98 = vector.extract_strided_slice %30 {offsets = [64, 0], sizes = [32, 211], strides = [1, 1]} : vector<128x211xbf16> to vector<32x211xbf16>
    %99 = vector.extract_strided_slice %31 {offsets = [64, 0], sizes = [32, 211], strides = [1, 1]} : vector<128x211xbf16> to vector<32x211xbf16>
    %100 = vector.extract_strided_slice %32 {offsets = [64, 0], sizes = [32, 211], strides = [1, 1]} : vector<128x211xbf16> to vector<32x211xbf16>
    %101 = vector.extract_strided_slice %33 {offsets = [64, 0], sizes = [32, 211], strides = [1, 1]} : vector<128x211xbf16> to vector<32x211xbf16>
    %102 = vector.extract_strided_slice %34 {offsets = [64, 0], sizes = [32, 211], strides = [1, 1]} : vector<128x211xbf16> to vector<32x211xbf16>
    %103 = vector.extract_strided_slice %35 {offsets = [64, 0], sizes = [32, 211], strides = [1, 1]} : vector<128x211xbf16> to vector<32x211xbf16>
    %104 = vector.extract_strided_slice %36 {offsets = [64, 0], sizes = [32, 211], strides = [1, 1]} : vector<128x211xbf16> to vector<32x211xbf16>
    %105 = vector.extract_strided_slice %37 {offsets = [64, 0], sizes = [32, 211], strides = [1, 1]} : vector<128x211xbf16> to vector<32x211xbf16>
    %106 = vector.extract_strided_slice %38 {offsets = [64, 0], sizes = [32, 211], strides = [1, 1]} : vector<128x211xbf16> to vector<32x211xbf16>
    %107 = vector.extract_strided_slice %39 {offsets = [64, 0], sizes = [32, 211], strides = [1, 1]} : vector<128x211xbf16> to vector<32x211xbf16>
    %108 = vector.extract_strided_slice %40 {offsets = [64, 0], sizes = [32, 211], strides = [1, 1]} : vector<128x211xbf16> to vector<32x211xbf16>
    %109 = vector.extract_strided_slice %41 {offsets = [64, 0], sizes = [32, 211], strides = [1, 1]} : vector<128x211xbf16> to vector<32x211xbf16>
    %110 = vector.extract_strided_slice %42 {offsets = [64, 0], sizes = [32, 211], strides = [1, 1]} : vector<128x211xbf16> to vector<32x211xbf16>
    %111 = vector.extract_strided_slice %43 {offsets = [64, 0], sizes = [32, 211], strides = [1, 1]} : vector<128x211xbf16> to vector<32x211xbf16>
    %112 = vector.extract_strided_slice %44 {offsets = [64, 0], sizes = [32, 211], strides = [1, 1]} : vector<128x211xbf16> to vector<32x211xbf16>
    %113 = vector.extract_strided_slice %45 {offsets = [64, 0], sizes = [32, 211], strides = [1, 1]} : vector<128x211xbf16> to vector<32x211xbf16>
    %114 = vector.extract_strided_slice %46 {offsets = [64, 0], sizes = [32, 211], strides = [1, 1]} : vector<128x211xbf16> to vector<32x211xbf16>
    %115 = vector.extract_strided_slice %47 {offsets = [64, 0], sizes = [32, 211], strides = [1, 1]} : vector<128x211xbf16> to vector<32x211xbf16>
    %116 = vector.extract_strided_slice %48 {offsets = [64, 0], sizes = [32, 211], strides = [1, 1]} : vector<128x211xbf16> to vector<32x211xbf16>
    %117 = vector.extract_strided_slice %49 {offsets = [64, 0], sizes = [32, 211], strides = [1, 1]} : vector<128x211xbf16> to vector<32x211xbf16>
    %118 = tpu.concatenate %98, %99, %100, %101, %102, %103, %104, %105, %106, %107, %108, %109, %110, %111, %112, %113 in 0 : vector<32x211xbf16>, vector<32x211xbf16>, vector<32x211xbf16>, vector<32x211xbf16>, vector<32x211xbf16>, vector<32x211xbf16>, vector<32x211xbf16>, vector<32x211xbf16>, vector<32x211xbf16>, vector<32x211xbf16>, vector<32x211xbf16>, vector<32x211xbf16>, vector<32x211xbf16>, vector<32x211xbf16>, vector<32x211xbf16>, vector<32x211xbf16> -> vector<512x211xbf16>
    %119 = tpu.concatenate %114, %115, %116, %117 in 0 : vector<32x211xbf16>, vector<32x211xbf16>, vector<32x211xbf16>, vector<32x211xbf16> -> vector<128x211xbf16>
    %120 = tpu.concatenate %118, %119 in 0 : vector<512x211xbf16>, vector<128x211xbf16> -> vector<640x211xbf16>
    %cst_25 = arith.constant dense<0.000000e+00> : vector<32x211xf32>
    %121 = tpu.matmul %29, %120, %cst_25 {dimension_numbers = #tpu.dot_dimension_numbers<[1], [0], [0], [1], [0, 0, 1, 1], [], []>} : vector<32x640xbf16>, vector<640x211xbf16>, vector<32x211xf32> -> vector<32x211xf32>
    %122 = vector.extract_strided_slice %30 {offsets = [96, 0], sizes = [32, 211], strides = [1, 1]} : vector<128x211xbf16> to vector<32x211xbf16>
    %123 = vector.extract_strided_slice %31 {offsets = [96, 0], sizes = [32, 211], strides = [1, 1]} : vector<128x211xbf16> to vector<32x211xbf16>
    %124 = vector.extract_strided_slice %32 {offsets = [96, 0], sizes = [32, 211], strides = [1, 1]} : vector<128x211xbf16> to vector<32x211xbf16>
    %125 = vector.extract_strided_slice %33 {offsets = [96, 0], sizes = [32, 211], strides = [1, 1]} : vector<128x211xbf16> to vector<32x211xbf16>
    %126 = vector.extract_strided_slice %34 {offsets = [96, 0], sizes = [32, 211], strides = [1, 1]} : vector<128x211xbf16> to vector<32x211xbf16>
    %127 = vector.extract_strided_slice %35 {offsets = [96, 0], sizes = [32, 211], strides = [1, 1]} : vector<128x211xbf16> to vector<32x211xbf16>
    %128 = vector.extract_strided_slice %36 {offsets = [96, 0], sizes = [32, 211], strides = [1, 1]} : vector<128x211xbf16> to vector<32x211xbf16>
    %129 = vector.extract_strided_slice %37 {offsets = [96, 0], sizes = [32, 211], strides = [1, 1]} : vector<128x211xbf16> to vector<32x211xbf16>
    %130 = vector.extract_strided_slice %38 {offsets = [96, 0], sizes = [32, 211], strides = [1, 1]} : vector<128x211xbf16> to vector<32x211xbf16>
    %131 = vector.extract_strided_slice %39 {offsets = [96, 0], sizes = [32, 211], strides = [1, 1]} : vector<128x211xbf16> to vector<32x211xbf16>
    %132 = vector.extract_strided_slice %40 {offsets = [96, 0], sizes = [32, 211], strides = [1, 1]} : vector<128x211xbf16> to vector<32x211xbf16>
    %133 = vector.extract_strided_slice %41 {offsets = [96, 0], sizes = [32, 211], strides = [1, 1]} : vector<128x211xbf16> to vector<32x211xbf16>
    %134 = vector.extract_strided_slice %42 {offsets = [96, 0], sizes = [32, 211], strides = [1, 1]} : vector<128x211xbf16> to vector<32x211xbf16>
    %135 = vector.extract_strided_slice %43 {offsets = [96, 0], sizes = [32, 211], strides = [1, 1]} : vector<128x211xbf16> to vector<32x211xbf16>
    %136 = vector.extract_strided_slice %44 {offsets = [96, 0], sizes = [32, 211], strides = [1, 1]} : vector<128x211xbf16> to vector<32x211xbf16>
    %137 = vector.extract_strided_slice %45 {offsets = [96, 0], sizes = [32, 211], strides = [1, 1]} : vector<128x211xbf16> to vector<32x211xbf16>
    %138 = vector.extract_strided_slice %46 {offsets = [96, 0], sizes = [32, 211], strides = [1, 1]} : vector<128x211xbf16> to vector<32x211xbf16>
    %139 = vector.extract_strided_slice %47 {offsets = [96, 0], sizes = [32, 211], strides = [1, 1]} : vector<128x211xbf16> to vector<32x211xbf16>
    %140 = vector.extract_strided_slice %48 {offsets = [96, 0], sizes = [32, 211], strides = [1, 1]} : vector<128x211xbf16> to vector<32x211xbf16>
    %141 = vector.extract_strided_slice %49 {offsets = [96, 0], sizes = [32, 211], strides = [1, 1]} : vector<128x211xbf16> to vector<32x211xbf16>
    %142 = tpu.concatenate %122, %123, %124, %125, %126, %127, %128, %129, %130, %131, %132, %133, %134, %135, %136, %137 in 0 : vector<32x211xbf16>, vector<32x211xbf16>, vector<32x211xbf16>, vector<32x211xbf16>, vector<32x211xbf16>, vector<32x211xbf16>, vector<32x211xbf16>, vector<32x211xbf16>, vector<32x211xbf16>, vector<32x211xbf16>, vector<32x211xbf16>, vector<32x211xbf16>, vector<32x211xbf16>, vector<32x211xbf16>, vector<32x211xbf16>, vector<32x211xbf16> -> vector<512x211xbf16>
    %143 = tpu.concatenate %138, %139, %140, %141 in 0 : vector<32x211xbf16>, vector<32x211xbf16>, vector<32x211xbf16>, vector<32x211xbf16> -> vector<128x211xbf16>
    %144 = tpu.concatenate %142, %143 in 0 : vector<512x211xbf16>, vector<128x211xbf16> -> vector<640x211xbf16>
    %cst_26 = arith.constant dense<0.000000e+00> : vector<32x211xf32>
    %145 = tpu.matmul %29, %144, %cst_26 {dimension_numbers = #tpu.dot_dimension_numbers<[1], [0], [0], [1], [0, 0, 1, 1], [], []>} : vector<32x640xbf16>, vector<640x211xbf16>, vector<32x211xf32> -> vector<32x211xf32>
    %146 = tpu.concatenate %73, %97, %121, %145 in 0 : vector<32x211xf32>, vector<32x211xf32>, vector<32x211xf32>, vector<32x211xf32> -> vector<128x211xf32>
    %c0_27 = arith.constant 0 : index
    %c0_28 = arith.constant 0 : index
    %147 = vector.load %arg6[%c0_27, %c0_28] : memref<128x1xf32, #tpu.memory_space<vmem>>, vector<128x1xf32>
    %148 = vector.broadcast %147 : vector<128x1xf32> to vector<128x211xf32>
    %149 = arith.mulf %146, %148 : vector<128x211xf32>
    %c0_29 = arith.constant 0 : index
    %c0_30 = arith.constant 0 : index
    %150 = vector.load %arg7[%c0_29, %c0_30] : memref<128x1xf32, #tpu.memory_space<vmem>>, vector<128x1xf32>
    %151 = vector.broadcast %150 : vector<128x1xf32> to vector<128x211xf32>
    %152 = arith.addf %149, %151 : vector<128x211xf32>
    %cst_31 = arith.constant 0.000000e+00 : f32
    %153 = vector.broadcast %cst_31 : f32 to vector<128x211xf32>
    %154 = arith.maximumf %152, %153 : vector<128x211xf32>
    %155 = vector.extract_strided_slice %154 {offsets = [0, 0], sizes = [128, 210], strides = [1, 1]} : vector<128x211xf32> to vector<128x210xf32>
    %156 = vector.extract_strided_slice %154 {offsets = [0, 1], sizes = [128, 210], strides = [1, 1]} : vector<128x211xf32> to vector<128x210xf32>
    %157 = arith.maximumf %155, %156 : vector<128x210xf32>
    %158 = arith.truncf %157 : vector<128x210xf32> to vector<128x210xbf16>
    %c0_32 = arith.constant 0 : index
    %c0_33 = arith.constant 0 : index
    %159 = vector.load %arg9[%c0_32, %c0_33] : memref<210x128xbf16, #tpu.memory_space<vmem>>, vector<210x128xbf16>
    %cst_34 = arith.constant dense<0.000000e+00> : vector<128x128xf32>
    %160 = tpu.matmul %158, %159, %cst_34 {dimension_numbers = #tpu.dot_dimension_numbers<[1], [0], [0], [1], [0, 0, 1, 1], [], []>} : vector<128x210xbf16>, vector<210x128xbf16>, vector<128x128xf32> -> vector<128x128xf32>
    %c0_35 = arith.constant 0 : index
    %c0_36 = arith.constant 0 : index
    %161 = vector.load %arg10[%c0_35, %c0_36] : memref<128x128xf32, #tpu.memory_space<vmem>>, vector<128x128xf32>
    tpu.vector_store %arg10[%c0_35, %c0_36], %160 {strides = array<i32>} : memref<128x128xf32, #tpu.memory_space<vmem>>, vector<128x128xf32>,
    return
  }
  func.func @transform_0(%arg0: i32) -> (i32, i32, i32) {
    %c0_i32 = arith.constant 0 : i32
    %c0_i32_0 = arith.constant 0 : i32
    %c0_i32_1 = arith.constant 0 : i32
    return %arg0, %c0_i32, %c0_i32_0 : i32, i32, i32
  }
  func.func @transform_1(%arg0: i32) -> (i32, i32) {
    %c0_i32 = arith.constant 0 : i32
    %c0_i32_0 = arith.constant 0 : i32
    %c0_i32_1 = arith.constant 0 : i32
    return %c0_i32, %c0_i32_0 : i32, i32
  }
  func.func @transform_2(%arg0: i32) -> (i32, i32) {
    %c0_i32 = arith.constant 0 : i32
    %c0_i32_0 = arith.constant 0 : i32
    %c0_i32_1 = arith.constant 0 : i32
    return %c0_i32, %c0_i32_0 : i32, i32
  }
  func.func @transform_3(%arg0: i32) -> (i32, i32) {
    %c0_i32 = arith.constant 0 : i32
    %c0_i32_0 = arith.constant 0 : i32
    %c0_i32_1 = arith.constant 0 : i32
    return %c0_i32, %c0_i32_0 : i32, i32
  }
  func.func @transform_4(%arg0: i32) -> (i32, i32) {
    %c0_i32 = arith.constant 0 : i32
    %c0_i32_0 = arith.constant 0 : i32
    %c0_i32_1 = arith.constant 0 : i32
    return %c0_i32, %c0_i32_0 : i32, i32
  }
  func.func @transform_5(%arg0: i32) -> (i32, i32) {
    %c0_i32 = arith.constant 0 : i32
    %c0_i32_0 = arith.constant 0 : i32
    %c0_i32_1 = arith.constant 0 : i32
    return %c0_i32, %c0_i32_0 : i32, i32
  }
  func.func @transform_6(%arg0: i32) -> (i32, i32) {
    %c0_i32 = arith.constant 0 : i32
    %c0_i32_0 = arith.constant 0 : i32
    %c0_i32_1 = arith.constant 0 : i32
    return %c0_i32, %c0_i32_0 : i32, i32
  }
  func.func @transform_7(%arg0: i32) -> (i32, i32) {
    %c0_i32 = arith.constant 0 : i32
    %c0_i32_0 = arith.constant 0 : i32
    %c0_i32_1 = arith.constant 0 : i32
    return %c0_i32, %c0_i32_0 : i32, i32
  }
  func.func @transform_8(%arg0: i32) -> (i32, i32) {
    %c0_i32 = arith.constant 0 : i32
    %c0_i32_0 = arith.constant 0 : i32
    %c0_i32_1 = arith.constant 0 : i32
    return %c0_i32, %c0_i32_0 : i32, i32
  }
  func.func @transform_9(%arg0: i32) -> (i32, i32) {
    %c0_i32 = arith.constant 0 : i32
    %c0_i32_0 = arith.constant 0 : i32
    return %arg0, %c0_i32 : i32, i32
  }
}

module attributes {stable_mosaic.version = 11 : i64} {
  func.func @_mlp_kernel(%arg0: i32, %arg1: memref<8x4096xf32, #tpu.memory_space<vmem>>, %arg2: memref<4096x128xbf16, #tpu.memory_space<vmem>>, %arg3: memref<1x128xf32, #tpu.memory_space<vmem>>, %arg4: memref<128x128xbf16, #tpu.memory_space<vmem>>, %arg5: memref<1x128xf32, #tpu.memory_space<vmem>>, %arg6: memref<8x128xf32, #tpu.memory_space<vmem>>) attributes {dimension_semantics = [#tpu.dimension_semantics<parallel>], iteration_bounds = array<i64: 1>, scalar_prefetch = 0 : i64, scratch_operands = 0 : i64, tpu.core_type = #tpu.core_type<tc>, window_params = [{transform_indices = @transform_0, window_bounds = array<i64: 8, 4096>}, {pipeline_mode = #tpu.pipeline_mode<synchronous>, transform_indices = @transform_1, window_bounds = array<i64: 4096, 128>}, {pipeline_mode = #tpu.pipeline_mode<synchronous>, transform_indices = @transform_2, window_bounds = array<i64: 1, 128>}, {pipeline_mode = #tpu.pipeline_mode<synchronous>, transform_indices = @transform_3, window_bounds = array<i64: 128, 128>}, {pipeline_mode = #tpu.pipeline_mode<synchronous>, transform_indices = @transform_4, window_bounds = array<i64: 1, 128>}, {transform_indices = @transform_5, window_bounds = array<i64: 8, 128>}]} {
    %c0 = arith.constant 0 : index
    %c0_0 = arith.constant 0 : index
    %0 = vector.load %arg1[%c0, %c0_0] : memref<8x4096xf32, #tpu.memory_space<vmem>>, vector<8x4096xf32>
    %1 = arith.truncf %0 : vector<8x4096xf32> to vector<8x4096xbf16>
    %c0_1 = arith.constant 0 : index
    %c0_2 = arith.constant 0 : index
    %2 = vector.load %arg2[%c0_1, %c0_2] : memref<4096x128xbf16, #tpu.memory_space<vmem>>, vector<4096x128xbf16>
    %cst = arith.constant dense<0.000000e+00> : vector<8x128xf32>
    %3 = tpu.matmul %1, %2, %cst {dimension_numbers = #tpu.dot_dimension_numbers<[1], [0], [0], [1], [0, 0, 1, 1], [], []>} : vector<8x4096xbf16>, vector<4096x128xbf16>, vector<8x128xf32> -> vector<8x128xf32>
    %c0_3 = arith.constant 0 : index
    %c0_4 = arith.constant 0 : index
    %4 = vector.load %arg3[%c0_3, %c0_4] : memref<1x128xf32, #tpu.memory_space<vmem>>, vector<1x128xf32>
    %5 = vector.broadcast %4 : vector<1x128xf32> to vector<8x128xf32>
    %6 = arith.addf %3, %5 : vector<8x128xf32>
    %cst_5 = arith.constant 0.000000e+00 : f32
    %7 = vector.broadcast %cst_5 : f32 to vector<8x128xf32>
    %8 = arith.maximumf %6, %7 : vector<8x128xf32>
    %9 = arith.truncf %8 : vector<8x128xf32> to vector<8x128xbf16>
    %c0_6 = arith.constant 0 : index
    %c0_7 = arith.constant 0 : index
    %10 = vector.load %arg4[%c0_6, %c0_7] : memref<128x128xbf16, #tpu.memory_space<vmem>>, vector<128x128xbf16>
    %cst_8 = arith.constant dense<0.000000e+00> : vector<8x128xf32>
    %11 = tpu.matmul %9, %10, %cst_8 {dimension_numbers = #tpu.dot_dimension_numbers<[1], [0], [0], [1], [0, 0, 1, 1], [], []>} : vector<8x128xbf16>, vector<128x128xbf16>, vector<8x128xf32> -> vector<8x128xf32>
    %c0_9 = arith.constant 0 : index
    %c0_10 = arith.constant 0 : index
    %12 = vector.load %arg5[%c0_9, %c0_10] : memref<1x128xf32, #tpu.memory_space<vmem>>, vector<1x128xf32>
    %13 = vector.broadcast %12 : vector<1x128xf32> to vector<8x128xf32>
    %14 = arith.addf %11, %13 : vector<8x128xf32>
    %c0_11 = arith.constant 0 : index
    %c0_12 = arith.constant 0 : index
    %15 = vector.load %arg6[%c0_11, %c0_12] : memref<8x128xf32, #tpu.memory_space<vmem>>, vector<8x128xf32>
    tpu.vector_store %arg6[%c0_11, %c0_12], %14 {strides = array<i32>} : memref<8x128xf32, #tpu.memory_space<vmem>>, vector<8x128xf32>,
    return
  }
  func.func @transform_0(%arg0: i32) -> (i32, i32) {
    %c0_i32 = arith.constant 0 : i32
    %c0_i32_0 = arith.constant 0 : i32
    return %arg0, %c0_i32 : i32, i32
  }
  func.func @transform_1(%arg0: i32) -> (i32, i32) {
    %c0_i32 = arith.constant 0 : i32
    %c0_i32_0 = arith.constant 0 : i32
    %c0_i32_1 = arith.constant 0 : i32
    return %c0_i32, %c0_i32_0 : i32, i32
  }
  func.func @transform_2(%arg0: i32) -> (i32, i32) {
    %c0_i32 = arith.constant 0 : i32
    %c0_i32_0 = arith.constant 0 : i32
    %c0_i32_1 = arith.constant 0 : i32
    return %c0_i32, %c0_i32_0 : i32, i32
  }
  func.func @transform_3(%arg0: i32) -> (i32, i32) {
    %c0_i32 = arith.constant 0 : i32
    %c0_i32_0 = arith.constant 0 : i32
    %c0_i32_1 = arith.constant 0 : i32
    return %c0_i32, %c0_i32_0 : i32, i32
  }
  func.func @transform_4(%arg0: i32) -> (i32, i32) {
    %c0_i32 = arith.constant 0 : i32
    %c0_i32_0 = arith.constant 0 : i32
    %c0_i32_1 = arith.constant 0 : i32
    return %c0_i32, %c0_i32_0 : i32, i32
  }
  func.func @transform_5(%arg0: i32) -> (i32, i32) {
    %c0_i32 = arith.constant 0 : i32
    %c0_i32_0 = arith.constant 0 : i32
    return %arg0, %c0_i32 : i32, i32
  }
}

</mosaic_0001>

<bundles_post_ra>
// kernel: con_net_forward.2
= control target key start
LH: loop header
LB: loop body
LE: loop exit
PB: predicated region body
PF: predicated region fallthrough
CT: control target
= control target key end

     0   :  { %s5718_s30 = smov 0   ;;  %s9316_s0 = inlined_call_operand.vmem [shape: bf16[8,20,421], index: 0, kind: input, shape index: {}]   ;;  %s9317_s1 = inlined_call_operand.vmem [shape: bf16[32,20], index: 1, kind: input, shape index: {}]   ;;  %s9318_s2 = inlined_call_operand.vmem [shape: f32[128,1], index: 2, kind: input, shape index: {}]   ;;  %s9319_s3 = inlined_call_operand.vmem [shape: f32[128,1], index: 3, kind: input, shape index: {}]   ;;  %s9320_s4 = inlined_call_operand.vmem [shape: bf16[32,640], index: 4, kind: input, shape index: {}]   ;;  %s9321_s5 = inlined_call_operand.vmem [shape: f32[128,1], index: 5, kind: input, shape index: {}]   ;;  %s9322_s6 = inlined_call_operand.vmem [shape: f32[128,1], index: 6, kind: input, shape index: {}]   ;;  %s9323_s7 = inlined_call_operand.vmem [shape: bf16[420,256], index: 7, kind: input, shape index: {}]   ;;  %s9324_s8 = inlined_call_operand.vmem [shape: bf16[210,128], index: 8, kind: input, shape index: {}]   ;;  %s9325_s9 = inlined_call_operand.vmem [shape: f32[256,128], index: 9, kind: output, shape index: {}]  }
   0x1 LB: > { %s9419_s10 = sadd.s32 4294967295, %s5649_s30   ;;  %p4943_p0 = scmp.ge.s32.totalorder %s5649_s30, 1  ;;  %s5649_s30 = sphi %s5718_s30, %s19_s30  }
   0x2   : > { %p289_p1 = scmp.lt.s32.totalorder %s5649_s30, 3 }
   0x4   : > { %p290_p2 = pnand %p4943_p0, %p289_p1 }
   0x6   : > { %293 = sbr.rel (%p290_p2) target bundleno = 1965 (0x7ad), region = 56 }
   0xd   : > { %s4944_s11 = sshll.u32 %s9419_s10, 2  ;;  %v9326_v0 = vmov 0   ;;  %v1141_v1 = vld [vmem:[%s9319_s3] sm:$0xff]  ;;  %v1142_v3 = vld [vmem:[%s9319_s3 + $0x8] sm:$0xff]  ;;  %v984_v5 = vld [vmem:[%s9318_s2 + $0x18] sm:$0xff]  ;;  %vm397_vm0 = vcmask 1041408  }
   0xe   : > { %p327_p3 = scmp.lt.s32.totalorder %s4944_s11, 7  ;;  %442 = vmatprep.mubr.bf16.mxu1 %v9326_v0  ;;  %597 = vmatprep.mubr.bf16.mxu0 %v9326_v0  ;;  %v981_v2 = vld [vmem:[%s9318_s2] sm:$0xff]  ;;  %v982_v4 = vld [vmem:[%s9318_s2 + $0x8] sm:$0xff]  ;;  %v983_v7 = vld [vmem:[%s9318_s2 + $0x10] sm:$0xff]  ;;  %vm390_vm1 = vcmask 162816   ;;  %s5652_s19 = smov 127  }
   0xf   : > { %5244 = vset.pattern.permute.xlu1 %v9326_v0  ;;  %5243 = vset.pattern.permute.xlu0 %v9326_v0  ;;  %v1144_v17 = vld [vmem:[%s9319_s3 + $0x18] sm:$0xff]  ;;  %v5769_v19 = vld [vmem:[%s9317_s1] sm:$0xff]   ;;  %v1143_v25 = vld [vmem:[%s9319_s3 + $0x10] sm:$0xff]  ;;  %vm1557_vm2 = vcmask 1039360   ;;  %vm2084_vm3 = vcmask 293888   ;;  %s5653_s25 = smov 126  }
  0x10   : > { %s9699_s11 = smov (!%p327_p3, %s4944_s11), 7  ;;  %1159 = vperm.xlu1 %5244, %v1141_v1   ;;  %999 = vperm.xlu0 %5243, %v981_v2   ;;  %v986_v32 = vld [vmem:[%s9318_s2 + $0x28] sm:$0xff]  ;;  %v985_v33 = vld [vmem:[%s9318_s2 + $0x20] sm:$0xff]  ;;  %v988_v41 = vld [vmem:[%s9318_s2 + $0x38] sm:$0xff]  ;;  %s5654_s26 = smov 125   ;;  %vm2396_vm4 = vcmask 1031168  }
  0x11   : > { %s5217_s18 = smul.u32 48, %s9699_s11  ;;  %v5800_v36 = vld [vmem:[%s9317_s1 + $0x8] sm:$0xff]   ;;  %v1145_v40 = vld [vmem:[%s9319_s3 + $0x20] sm:$0xff]  ;;  %v987_v43 = vld [vmem:[%s9318_s2 + $0x30] sm:$0xff]  ;;  %s5655_s27 = smov 124   ;;  %vm2411_vm5 = vcmask 1022976  }
  0x12   : > { %v1146_v38 = vld [vmem:[%s9319_s3 + $0x28] sm:$0xff]  ;;  %v1148_v44 = vld [vmem:[%s9319_s3 + $0x38] sm:$0xff]  ;;  %v1147_v50 = vld [vmem:[%s9319_s3 + $0x30] sm:$0xff]  ;;  %s5656_s28 = smov 123   ;;  %s5657_s29 = smov 122   ;;  %vm2426_vm6 = vcmask 1014784  }
  0x13   : > { %s5747_s23 = scalar_lea.vmem %s9316_s0, %s5217_s18  ;;  %v990_v51 = vld [vmem:[%s9318_s2 + $0x48] sm:$0xff]  ;;  %v989_v57 = vld [vmem:[%s9318_s2 + $0x40] sm:$0xff]  ;;  %v992_v62 = vld [vmem:[%s9318_s2 + $0x58] sm:$0xff]  ;;  %s5659_s11 = smov 120   ;;  %vm2441_vm7 = vcmask 1006592   ;;  %vm2456_vm8 = vcmask 998400  }
  0x14   : > { %1164 = vperm.xlu1 %5244, %v1142_v3   ;;  %v5485_v6 = vld [vmem:[%s5747_s23 + $0x4] ss:$16 sps:$4 sm:$0xff]   ;;  %1004 = vperm.xlu0 %5243, %v982_v4   ;;  %v5489_v9 = vld [vmem:[%s5747_s23] ss:$16 sps:$4 sm:$0xff]   ;;  %v5498_v20 = vld [vmem:[%s5747_s23 + $0xc] ss:$16 sps:$4 sm:$0xff]  }
  0x15   : > { %v5487_v8 = vld [vmem:[%s5747_s23 + $0x34] ss:$16 sps:$4 sm:$0xff]   ;;  %410 = vmatprep.subr.bf16.mxu1 %v5485_v6  ;;  %v5490_v10 = vld [vmem:[%s5747_s23 + $0x30] ss:$16 sps:$4 sm:$0xff]   ;;  %v349_v22 = vld [vmem:[%s5747_s23 + $0x28] sm:$0x33] }
  0x16   : > { %v348_v11 = vld [vmem:[%s5747_s23 + $0x20] sm:$0x33]  ;;  %565 = vmatprep.subr.bf16.mxu0 %v5487_v8  ;;  %v4968_v13 = vld [vmem:[%s5747_s23 + $0x50] sm:$0x33]  ;;  %411 = vmatpush1.bf16.msra.mxu1 %v5489_v9  ;;  %v5496_v24 = vld [vmem:[%s5747_s23 + $0x8] ss:$16 sps:$4 sm:$0xff]   ;;  %v4957_v27 = vcombine.high %v349_v22, %v349_v22  ;;  %v4956_v28 = vcombine.low %v349_v22, %v349_v22 }
  0x17   : > { %v4955_v12 = vcombine.high %v348_v11, %v348_v11  ;;  %v4954_v14 = vcombine.low %v348_v11, %v348_v11  ;;  %566 = vmatpush1.bf16.msra.mxu0 %v5490_v10  ;;  %v4975_v15 = vcombine.high %v4968_v13, %v4968_v13  ;;  %v4974_v16 = vcombine.low %v4968_v13, %v4968_v13  ;;  %v5503_v23 = vld [vmem:[%s5747_s23 + $0x64] ss:$16 sps:$4 sm:$0xff]   ;;  %v5501_v29 = vld [vmem:[%s5747_s23 + $0x60] ss:$16 sps:$4 sm:$0xff]   ;;  %v5509_v35 = vld [vmem:[%s5747_s23 + $0x3c] ss:$16 sps:$4 sm:$0xff]  }
  0x18   : > { %1014 = vperm.xlu1 %5244, %v984_v5   ;;  %1009 = vperm.xlu0 %5243, %v983_v7   ;;  %v4988_v26 = vld [vmem:[%s5747_s23 + $0x80] sm:$0x33]  ;;  %v405_v34 = vsel %vm397_vm0, %v4956_v28, 0  ;;  %v4969_v42 = vld [vmem:[%s5747_s23 + $0x58] sm:$0x33]  ;;  %v1150_v59 = vld [vmem:[%s9319_s3 + $0x48] sm:$0xff] }
  0x19   : > { %4958 = vmatprep.subr.msk.bf16.mxu1 %vm397_vm0, %v4955_v12  ;;  %v399_v18 = vsel %vm397_vm0, %v4954_v14, 0  ;;  %4978 = vmatprep.subr.msk.bf16.mxu0 %vm397_vm0, %v4975_v15  ;;  %v554_v21 = vsel %vm397_vm0, %v4974_v16, 0  ;;  %v4995_v30 = vcombine.high %v4988_v26, %v4988_v26  ;;  %v4994_v31 = vcombine.low %v4988_v26, %v4988_v26  ;;  %v5513_v39 = vld [vmem:[%s5747_s23 + $0x94] ss:$16 sps:$4 sm:$0xff]   ;;  %v5507_v45 = vld [vmem:[%s5747_s23 + $0x38] ss:$16 sps:$4 sm:$0xff]  }
  0x1a   : > { %413 = vmatpush1.bf16.msra.mxu1 %v399_v18  ;;  %v5008_v46 = vld [vmem:[%s5747_s23 + $0xb0] sm:$0x33]  ;;  %v4977_v48 = vcombine.high %v4969_v42, %v4969_v42  ;;  %v4976_v49 = vcombine.low %v4969_v42, %v4969_v42  ;;  %v5519_v54 = vld [vmem:[%s5747_s23 + $0x6c] ss:$16 sps:$4 sm:$0xff]   ;;  %v1149_v60 = vld [vmem:[%s9319_s3 + $0x40] sm:$0xff]  ;;  %s5660_s12 = smov 119  }
  0x1b   : > { %568 = vmatpush1.bf16.msra.mxu0 %v554_v21  ;;  %463 = vmatprep.subr.bf16.mxu1 %v5498_v20  ;;  %v709_v37 = vsel %vm397_vm0, %v4994_v31, 0  ;;  %v5511_v47 = vld [vmem:[%s5747_s23 + $0x90] ss:$16 sps:$4 sm:$0xff]   ;;  %v5015_v52 = vcombine.high %v5008_v46, %v5008_v46  ;;  %v5014_v53 = vcombine.low %v5008_v46, %v5008_v46  ;;  %v4989_v56 = vld [vmem:[%s5747_s23 + $0x88] sm:$0x33]  ;;  %v1152_v4 = vld [vmem:[%s9319_s3 + $0x58] sm:$0xff] }
  0x1c   : > { %1174 = vperm.xlu1 %5244, %v1144_v17   ;;  %720 = vmatprep.subr.bf16.mxu0 %v5503_v23  ;;  %v560_v55 = vsel %vm397_vm0, %v4976_v49, 0  ;;  %v4996_v61 = vcombine.low %v4989_v56, %v4989_v56  ;;  %v991_v63 = vld [vmem:[%s9318_s2 + $0x50] sm:$0xff]  ;;  %v5517_v1 = vld [vmem:[%s5747_s23 + $0x68] ss:$16 sps:$4 sm:$0xff]   ;;  %v4997_v3 = vcombine.high %v4989_v56, %v4989_v56  ;;  %v5524_v6 = vld [vmem:[%s5747_s23 + $0x9c] ss:$16 sps:$4 sm:$0xff]  }
  0x1d   : > { %1169 = vperm.xlu0 %5243, %v1143_v25   ;;  %4959 = vmatmul.mubr.msk.bf16.vlgmr.msra.gmra.mrb[0].mxu1 %vm390_vm1, %v5769_v19  ;;  %v864_v58 = vsel %vm397_vm0, %v5014_v53, 0  ;;  %v1151_v5 = vld [vmem:[%s9319_s3 + $0x50] sm:$0xff]  ;;  %v994_v7 = vld [vmem:[%s9318_s2 + $0x68] sm:$0xff]  ;;  %v993_v8 = vld [vmem:[%s9318_s2 + $0x60] sm:$0xff]  ;;  %s5661_s13 = smov 118   ;;  %s5662_s14 = smov 117  }
  0x1e   : > { %4979 = vmatmul.mubr.msk.bf16.vlgmr.msra.gmra.mrb[0].mxu0 %vm390_vm1, %v5769_v19  ;;  %464 = vmatpush1.bf16.msra.mxu1 %v5496_v24  ;;  %v715_v2 = vsel %vm397_vm0, %v4996_v61, 0  ;;  %v1154_v9 = vld [vmem:[%s9319_s3 + $0x68] sm:$0xff]  ;;  %v1153_v10 = vld [vmem:[%s9319_s3 + $0x60] sm:$0xff]  ;;  %v5009_v11 = vld [vmem:[%s5747_s23 + $0xb8] sm:$0x33]  ;;  %s5663_s15 = smov 116  }
  0x1f   : > { %452 = vmatprep.mubr.bf16.mxu1 %v9326_v0  ;;  %607 = vmatprep.mubr.bf16.mxu0 %v9326_v0  ;;  %v996_v12 = vld [vmem:[%s9318_s2 + $0x78] sm:$0xff]  ;;  %v995_v13 = vld [vmem:[%s9318_s2 + $0x70] sm:$0xff]  ;;  %v5017_v15 = vcombine.high %v5009_v11, %v5009_v11  ;;  %v5016_v16 = vcombine.low %v5009_v11, %v5009_v11  ;;  %v5527_v21 = vld [vmem:[%s9323_s7] ss:$8 sps:$4 sm:$0xff]   ;;  %s5664_s16 = smov 115   ;;  %s5665_s17 = smov 114  }
  0x20   : > { %4961 = vmatprep.subr.msk.bf16.mxu1 %vm397_vm0, %v4957_v27  ;;  %721 = vmatpush1.bf16.msra.mxu0 %v5501_v29  ;;  %v5522_v14 = vld [vmem:[%s5747_s23 + $0x98] ss:$16 sps:$4 sm:$0xff]   ;;  %v1155_v18 = vld [vmem:[%s9319_s3 + $0x70] sm:$0xff]  ;;  %v5529_v22 = vld [vmem:[%s9323_s7 + $0x4] ss:$8 sps:$4 sm:$0xff]   ;;  %s5658_s23 = smov 121  }
  0x21   : > { %1024 = vperm.xlu1 %5244, %v986_v32   ;;  %4998 = vmatprep.subr.msk.bf16.mxu0 %vm397_vm0, %v4995_v30  ;;  %v1156_v17 = vld [vmem:[%s9319_s3 + $0x78] sm:$0xff]  ;;  %v870_v20 = vsel %vm397_vm0, %v5016_v16, 0  ;;  %v5533_v27 = vld [vmem:[%s9323_s7 + $0x20] ss:$8 sps:$4 sm:$0xff]   ;;  %v5535_v28 = vld [vmem:[%s9323_s7 + $0x24] ss:$8 sps:$4 sm:$0xff]  }
  0x22   : > { %1019 = vperm.xlu0 %5243, %v985_v33   ;;  %466 = vmatpush1.bf16.msra.mxu1 %v405_v34  ;;  %v5532_v24 = vld [vmem:[%s9323_s7 + $0x14] ss:$8 sps:$4 sm:$0xff]   ;;  %v5536_v29 = vld [vmem:[%s9323_s7 + $0x30] ss:$8 sps:$4 sm:$0xff]   ;;  %v5541_v31 = vld [vmem:[%s9323_s7 + $0x44] ss:$8 sps:$4 sm:$0xff]  }
  0x23   : > { %618 = vmatprep.subr.bf16.mxu1 %v5509_v35  ;;  %v5538_v30 = vld [vmem:[%s9323_s7 + $0x34] ss:$8 sps:$4 sm:$0xff]   ;;  %v5539_v34 = vld [vmem:[%s9323_s7 + $0x40] ss:$8 sps:$4 sm:$0xff]   ;;  %v5560_v56 = vld [vmem:[%s9323_s7 + $0xb0] ss:$8 sps:$4 sm:$0xff]  }
  0x24   : > { %723 = vmatpush1.bf16.msra.mxu0 %v709_v37  ;;  %v5544_v35 = vld [vmem:[%s9323_s7 + $0x54] ss:$8 sps:$4 sm:$0xff]   ;;  %v5551_v46 = vld [vmem:[%s9323_s7 + $0x80] ss:$8 sps:$4 sm:$0xff]   ;;  %s5666_s18 = smov 113   ;;  %s5667_s20 = smov 112  }
  0x25   : > { %1184 = vperm.xlu1 %5244, %v1146_v38   ;;  %4960 = vmatmul.mubr.msk.bf16.gmra.mrb[4].mxu1 %vm390_vm1, %v5800_v36  ;;  %v5556_v49 = vld [vmem:[%s9323_s7 + $0x94] ss:$8 sps:$4 sm:$0xff]   ;;  %vm2471_vm9 = vcmask 990208   ;;  %vm2486_vm10 = vcmask 982016   ;;  %vm2501_vm11 = vcmask 973824   ;;  %vm2516_vm12 = vcmask 965632  }
  0x26   : > { %4980 = vmatmul.mubr.msk.bf16.gmra.mrb[4].mxu0 %vm390_vm1, %v5800_v36  ;;  %495 = vmatprep.mubr.bf16.mxu1 %v9326_v0  ;;  %vm2531_vm13 = vcmask 957440   ;;  %vm2546_vm14 = vcmask 949248   ;;  %vm2561_vm15 = vcmask 941056  }
  0x27   : > { %752 = vmatprep.mubr.bf16.mxu0 %v9326_v0  ;;  %875 = vmatprep.subr.bf16.mxu0 %v5513_v39  ;;  %v5547_v39 = vld [vmem:[%s9323_s7 + $0x64] ss:$8 sps:$4 sm:$0xff]  }
  0x28   : > { %1179 = vperm.xlu0 %5243, %v1145_v40   ;;  %v5545_v40 = vld [vmem:[%s9323_s7 + $0x60] ss:$8 sps:$4 sm:$0xff]  }
  0x29   : > { %1034 = vperm.xlu1 %5244, %v988_v41   ;;  %v5550_v41 = vld [vmem:[%s9323_s7 + $0x74] ss:$8 sps:$4 sm:$0xff]  }
  0x2c   : > { %1029 = vperm.xlu0 %5243, %v987_v43  }
  0x2d   : > { %1194 = vperm.xlu1 %5244, %v1148_v44   ;;  %4962 = vmatmul.mubr.msk.bf16.vlgmr.msra.gmra.mrb[8].mxu1 %vm390_vm1, %v5769_v19  ;;  %v5548_v44 = vld [vmem:[%s9323_s7 + $0x70] ss:$8 sps:$4 sm:$0xff]  }
  0x2e   : > { %4999 = vmatmul.mubr.msk.bf16.vlgmr.msra.gmra.mrb[8].mxu0 %vm390_vm1, %v5769_v19  ;;  %619 = vmatpush1.bf16.msra.mxu1 %v5507_v45  ;;  %v5553_v45 = vld [vmem:[%s9323_s7 + $0x84] ss:$8 sps:$4 sm:$0xff]  }
  0x2f   : > { %505 = vmatprep.mubr.bf16.mxu1 %v9326_v0  ;;  %762 = vmatprep.mubr.bf16.mxu0 %v9326_v0 }
  0x30   : > { %4981 = vmatprep.subr.msk.bf16.mxu1 %vm397_vm0, %v4977_v48  ;;  %876 = vmatpush1.bf16.msra.mxu0 %v5511_v47 }
  0x31   : > { %1189 = vperm.xlu0 %5243, %v1147_v50   ;;  %5018 = vmatprep.subr.msk.bf16.mxu0 %vm397_vm0, %v5015_v52  ;;  %v5554_v50 = vld [vmem:[%s9323_s7 + $0x90] ss:$8 sps:$4 sm:$0xff]  }
  0x32   : > { %1044 = vperm.xlu1 %5244, %v990_v51   ;;  %621 = vmatpush1.bf16.msra.mxu1 %v560_v55  ;;  %v5559_v51 = vld [vmem:[%s9323_s7 + $0xa4] ss:$8 sps:$4 sm:$0xff]   ;;  %v5562_v55 = vld [vmem:[%s9323_s7 + $0xb4] ss:$8 sps:$4 sm:$0xff]  }
  0x33   : > { %773 = vmatprep.subr.bf16.mxu1 %v5519_v54  ;;  %v5557_v54 = vld [vmem:[%s9323_s7 + $0xa0] ss:$8 sps:$4 sm:$0xff]  }
  0x34   : > { %878 = vmatpush1.bf16.msra.mxu0 %v864_v58 }
  0x35   : > { %1039 = vperm.xlu0 %5243, %v989_v57   ;;  %4963 = vmatmul.mubr.msk.bf16.gmra.mrb[12].mxu1 %vm390_vm1, %v5800_v36 }
  0x36   : > { %5000 = vmatmul.mubr.msk.bf16.gmra.mrb[12].mxu0 %vm390_vm1, %v5800_v36  ;;  %650 = vmatprep.mubr.bf16.mxu1 %v9326_v0 }
  0x37   : > { %907 = vmatprep.mubr.bf16.mxu0 %v9326_v0  ;;  %1204 = vperm.xlu1 %5244, %v1150_v59   ;;  %v5565_v59 = vld [vmem:[%s9323_s7 + $0xc4] ss:$8 sps:$4 sm:$0xff]  }
  0x38   : > { %2115 = vmatprep.subr.bf16.mxu0 %v5529_v22 }
  0x39   : > { %1199 = vperm.xlu0 %5243, %v1149_v60  }
  0x3b   : > { %1054 = vperm.xlu1 %5244, %v992_v62  }
  0x3d   : > { %1049 = vperm.xlu0 %5243, %v991_v63   ;;  %4982 = vmatmul.mubr.msk.bf16.vlgmr.msra.gmra.mrb[16].mxu1 %vm390_vm1, %v5769_v19 }
  0x3e   : > { %5019 = vmatmul.mubr.msk.bf16.vlgmr.msra.gmra.mrb[16].mxu0 %vm390_vm1, %v5769_v19  ;;  %774 = vmatpush1.bf16.msra.mxu1 %v5517_v1 }
  0x3f   : > { %660 = vmatprep.mubr.bf16.mxu1 %v9326_v0  ;;  %917 = vmatprep.mubr.bf16.mxu0 %v9326_v0 }
  0x40   : > { %5001 = vmatprep.subr.msk.bf16.mxu1 %vm397_vm0, %v4997_v3  ;;  %1214 = vperm.xlu1 %5244, %v1152_v4   ;;  %v5563_v3 = vld [vmem:[%s9323_s7 + $0xc0] ss:$8 sps:$4 sm:$0xff]  }
  0x41   : > { %1209 = vperm.xlu0 %5243, %v1151_v5   ;;  %2116 = vmatpush1.bf16.msra.mxu0 %v5527_v21 }
  0x42   : > { %776 = vmatpush1.bf16.msra.mxu1 %v715_v2  ;;  %2117 = vmatprep.subr.bf16.mxu0 %v5532_v24 }
  0x43   : > { %928 = vmatprep.subr.bf16.mxu1 %v5524_v6  ;;  %v5568_v6 = vld [vmem:[%s9323_s7 + $0xd4] ss:$8 sps:$4 sm:$0xff]  }
  0x44   : > { %1064 = vperm.xlu1 %5244, %v994_v7   ;;  %v5566_v7 = vld [vmem:[%s9323_s7 + $0xd0] ss:$8 sps:$4 sm:$0xff]  }
  0x45   : > { %1059 = vperm.xlu0 %5243, %v993_v8   ;;  %4983 = vmatmul.mubr.msk.bf16.gmra.mrb[20].mxu1 %vm390_vm1, %v5800_v36 }
  0x46   : > { %5020 = vmatmul.mubr.msk.bf16.gmra.mrb[20].mxu0 %vm390_vm1, %v5800_v36  ;;  %805 = vmatprep.mubr.bf16.mxu1 %v9326_v0 }
  0x48   : > { %1224 = vperm.xlu1 %5244, %v1154_v9  }
  0x49   : > { %1219 = vperm.xlu0 %5243, %v1153_v10  }
  0x4c   : > { %1074 = vperm.xlu1 %5244, %v996_v12  }
  0x4d   : > { %1069 = vperm.xlu0 %5243, %v995_v13   ;;  %5002 = vmatmul.mubr.msk.bf16.vlgmr.msra.gmra.mrb[24].mxu1 %vm390_vm1, %v5769_v19 }
  0x4e   : > { %929 = vmatpush1.bf16.msra.mxu1 %v5522_v14  ;;  %815 = vmatprep.mubr.bf16.mxu1 %v9326_v0 }
  0x4f   : > { %5021 = vmatprep.subr.msk.bf16.mxu1 %vm397_vm0, %v5017_v15 }
  0x50   : > { %1234 = vperm.xlu1 %5244, %v1156_v17  }
  0x51   : > { %1229 = vperm.xlu0 %5243, %v1155_v18  }
  0x52   : > { %931 = vmatpush1.bf16.msra.mxu1 %v870_v20  ;;  %v5571_v20 = vld [vmem:[%s9323_s7 + $0xe4] ss:$8 sps:$4 sm:$0xff]  }
  0x55   : > { %5003 = vmatmul.mubr.msk.bf16.gmra.mrb[28].mxu1 %vm390_vm1, %v5800_v36 }
  0x56   : > { %960 = vmatprep.mubr.bf16.mxu1 %v9326_v0 }
  0x5d   : > { %5022 = vmatmul.mubr.msk.bf16.vlgmr.msra.gmra.mrb[32].mxu1 %vm390_vm1, %v5769_v19  ;;  %v5530_v19 = vld [vmem:[%s9323_s7 + $0x10] ss:$8 sps:$4 sm:$0xff]  }
  0x5e   : > { %970 = vmatprep.mubr.bf16.mxu1 %v9326_v0  ;;  %2118 = vmatpush1.bf16.msra.mxu0 %v5530_v19  ;;  %v5569_v19 = vld [vmem:[%s9323_s7 + $0xe0] ss:$8 sps:$4 sm:$0xff]  }
  0x5f   : > { %2119 = vmatprep.subr.bf16.mxu0 %v5535_v28 }
  0x62   : > { %2120 = vmatpush1.bf16.msra.mxu0 %v5533_v27 }
  0x63   : > { %2121 = vmatprep.subr.bf16.mxu0 %v5538_v30 }
  0x65   : > { %5023 = vmatmul.mubr.msk.bf16.gmra.mrb[36].mxu1 %vm390_vm1, %v5800_v36  ;;  %v5542_v36 = vld [vmem:[%s9323_s7 + $0x50] ss:$8 sps:$4 sm:$0xff]   ;;  %vm2591_vm1 = vcmask 924672  }
  0x66   : > { %2122 = vmatpush1.bf16.msra.mxu0 %v5536_v29 }
  0x67   : > { %2123 = vmatprep.subr.bf16.mxu0 %v5541_v31 }
  0x6a   : > { %2124 = vmatpush1.bf16.msra.mxu0 %v5539_v34 }
  0x6b   : > { %2125 = vmatprep.subr.bf16.mxu0 %v5544_v35 }
  0x6e   : > { %2126 = vmatpush1.bf16.msra.mxu0 %v5542_v36 }
  0x6f   : > { %2127 = vmatprep.subr.bf16.mxu0 %v5547_v39  ;;  %v5574_v39 = vld [vmem:[%s9323_s7 + $0xf4] ss:$8 sps:$4 sm:$0xff]  }
  0x72   : > { %2128 = vmatpush1.bf16.msra.mxu0 %v5545_v40 }
  0x73   : > { %2129 = vmatprep.subr.bf16.mxu0 %v5550_v41 }
  0x76   : > { %2130 = vmatpush1.bf16.msra.mxu0 %v5548_v44 }
  0x77   : > { %2131 = vmatprep.subr.bf16.mxu0 %v5553_v45 }
  0x7a   : > { %2132 = vmatpush1.bf16.msra.mxu0 %v5551_v46  ;;  %v5572_v46 = vld [vmem:[%s9323_s7 + $0xf0] ss:$8 sps:$4 sm:$0xff]  }
  0x7b   : > { %2133 = vmatprep.subr.bf16.mxu0 %v5556_v49 }
  0x7e   : > { %2134 = vmatpush1.bf16.msra.mxu0 %v5554_v50 }
  0x7f   : > { %2135 = vmatprep.subr.bf16.mxu0 %v5559_v51 }
  0x82   : > { %2136 = vmatpush1.bf16.msra.mxu0 %v5557_v54 }
  0x83   : > { %2137 = vmatprep.subr.bf16.mxu0 %v5562_v55 }
  0x86   : > { %2138 = vmatpush1.bf16.msra.mxu0 %v5560_v56 }
  0x87   : > { %2139 = vmatprep.subr.bf16.mxu0 %v5565_v59 }
  0x8a   : > { %2140 = vmatpush1.bf16.msra.mxu0 %v5563_v3 }
  0x8b   : > { %2141 = vmatprep.subr.bf16.mxu0 %v5568_v6 }
  0x8e   : > { %2142 = vmatpush1.bf16.msra.mxu0 %v5566_v7 }
  0x8f   : > { %v5935_v23 = vpop.permute.xlu1 %1159  ;;  %v5943_v25 = vpop.permute.xlu0 %999  ;;  %2143 = vmatprep.subr.bf16.mxu0 %v5571_v20 }
  0x92   : > { %2144 = vmatpush1.bf16.msra.mxu0 %v5569_v19 }
  0x93   : > { %v5945_v26 = vpop.permute.xlu1 %1164  ;;  %v5962_v32 = vpop.permute.xlu0 %1004  ;;  %2145 = vmatprep.subr.bf16.mxu0 %v5574_v39 }
  0x96   : > { %2146 = vmatpush1.bf16.msra.mxu0 %v5572_v46 }
  0x97   : > { %v5964_v33 = vpop.permute.xlu1 %1014  ;;  %v5975_v37 = vpop.permute.xlu0 %1009 }
  0x9b   : > { %v5977_v38 = vpop.permute.xlu1 %1174 }
  0x9c   : > { %v5988_v42 = vpop.permute.xlu0 %1169 }
  0xa0   : > { %v5990_v43 = vpop.permute.xlu1 %1024 }
  0xa1   : > { %v6001_v47 = vpop.permute.xlu0 %1019 }
  0xa4   : > { %v6003_v48 = vpop.permute.xlu1 %1184 }
  0xa5   : > { %9445 = vst [vmem:[#allocation2_spill] sm:$0xff] %v6003_v48 }
  0xa7   : > { %v6014_v52 = vpop.permute.xlu0 %1179 }
  0xa8   : > { %9446 = vst [vmem:[#allocation3_spill] sm:$0xff] %v6014_v52  ;;  %v6016_v53 = vpop.permute.xlu1 %1034 }
  0xab   : > { %v6027_v57 = vpop.permute.xlu0 %1029 }
  0xac   : > { %v6029_v58 = vpop.permute.xlu1 %1194 }
  0xb0   : > { %v6051_v8 = vpop.permute.xlu0 %1189 }
  0xb1   : > { %v6053_v9 = vpop.permute.xlu1 %1044 }
  0xb4   : > { %v6072_v24 = vpop.permute.xlu0 %1039 }
  0xb5   : > { %9447 = vst [vmem:[#allocation4_spill] sm:$0xff] %v6072_v24 }
  0xb6   : > { %v6074_v27 = vpop.permute.xlu1 %1204 }
  0xb7   : > { %9448 = vst [vmem:[#allocation5_spill] sm:$0xff] %v6074_v27 }
  0xba   : > { %v6122_v6 = vpop.permute.xlu1 %1054 }
  0xf0   : > { %v444_v60 = vpop.f32.mrb[0].mxu1 }
  0xf1   : > { %v6034_v61 = vpop.f32.mrb[0].mxu0  ;;  %v446_v62 = vpop.f32.mrb[1].mxu1  ;;  %v1077_v28 = vmul.f32 %v5943_v25, %v444_v60 }
  0xf2   : > { %v6036_v63 = vpop.f32.mrb[1].mxu0  ;;  %v448_v1 = vpop.f32.mrb[2].mxu1  ;;  %v1078_v18 = vmul.f32 %v5943_v25, %v446_v62 }
  0xf3   : > { %v6038_v2 = vpop.f32.mrb[2].mxu0  ;;  %v450_v4 = vpop.f32.mrb[3].mxu1  ;;  %v1081_v21 = vmul.f32 %v5962_v32, %v448_v1  ;;  %v6110_v55 = vadd.f32 %v5935_v23, %v1077_v28 }
  0xf4   : > { %v6043_v5 = vpop.f32.mrb[3].mxu0  ;;  %v1082_v22 = vmul.f32 %v5962_v32, %v450_v4  ;;  %v6080_v31 = vadd.f32 %v5935_v23, %v1078_v18  ;;  %v6120_v4 = vpop.permute.xlu0 %1199 }
  0xf5   : > { %v6091_v40 = vadd.f32 %v5945_v26, %v1081_v21  ;;  %9453 = vst [vmem:[#allocation10_spill] sm:$0xff] %v6110_v55  ;;  %9455 = vst [vmem:[#allocation12_spill] sm:$0xff] %v6120_v4  ;;  %v5577_v21 = vld [vmem:[%s9323_s7 + $0x104] ss:$8 sps:$4 sm:$0xff]  }
  0xf6   : > { %9449 = vst [vmem:[#allocation6_spill] sm:$0xff] %v6080_v31  ;;  %v6094_v41 = vadd.f32 %v5945_v26, %v1082_v22  ;;  %v9333_v56 = vmax.f32 %v6080_v31, 0.0  ;;  %v9331_v22 = vmax.f32 %v6110_v55, 0.0  ;;  %2228 = vmatprep.subr.bf16.mxu0 %v5577_v21  ;;  %v1094_v21 = vmul.f32 %v6001_v47, %v6036_v63 }
  0xf7   : > { %9450 = vst [vmem:[#allocation7_spill] sm:$0xff] %v6091_v40  ;;  %v9330_v1 = vmax.f32 %v6091_v40, 0.0  ;;  %v1098_v63 = vmul.f32 %v5990_v43, %v6043_v5 }
  0xf8   : > { %v454_v10 = vpop.f32.mrb[4].mxu1  ;;  %9451 = vst [vmem:[#allocation8_spill] sm:$0xff] %v6094_v41  ;;  %v9332_v3 = vmax.f32 %v6094_v41, 0.0  ;;  %v6203_v5 = vadd.f32 %v6014_v52, %v1094_v21 }
  0xf9   : > { %v6055_v11 = vpop.f32.mrb[4].mxu0  ;;  %v456_v12 = vpop.f32.mrb[5].mxu1 }
  0xfa   : > { %v6057_v13 = vpop.f32.mrb[5].mxu0  ;;  %v458_v14 = vpop.f32.mrb[6].mxu1  ;;  %v1086_v59 = vmul.f32 %v5975_v37, %v456_v12  ;;  %9462 = vst [vmem:[#allocation19_spill] sm:$0xff] %v6203_v5 }
  0xfb   : > { %v6059_v15 = vpop.f32.mrb[6].mxu0  ;;  %v460_v16 = vpop.f32.mrb[7].mxu1  ;;  %v1089_v7 = vmul.f32 %v5964_v33, %v458_v14  ;;  %v1085_v14 = vmul.f32 %v5975_v37, %v454_v10  ;;  %v5255_v10 = vpack.i.bf16 %v9330_v1, %v9331_v22 }
  0xfc   : > { %v6061_v17 = vpop.f32.mrb[7].mxu0  ;;  %v1090_v18 = vmul.f32 %v5964_v33, %v460_v16  ;;  %v6139_v16 = vadd.f32 %v5988_v42, %v1086_v59  ;;  %v6191_v22 = vpop.permute.xlu1 %1214 }
  0xfd   : > { %v6158_v59 = vadd.f32 %v5977_v38, %v1089_v7  ;;  %v6175_v7 = vadd.f32 %v5988_v42, %v1085_v14  ;;  %v6189_v14 = vpop.permute.xlu0 %1049 }
  0xfe   : > { %9456 = vst [vmem:[#allocation13_spill] sm:$0xff] %v6139_v16 }
  0xff   : > { %9457 = vst [vmem:[#allocation14_spill] sm:$0xff] %v6158_v59  ;;  %9460 = vst [vmem:[#allocation17_spill] sm:$0xff] %v6175_v7 }
 0x100   : > { %v497_v29 = vpop.f32.mrb[8].mxu1 }
 0x101   : > { %v6077_v30 = vpop.f32.mrb[8].mxu0  ;;  %v1079_v34 = vmul.f32 %v5943_v25, %v497_v29  ;;  %v6083_v35 = vpop.f32.mrb[9].mxu1 }
 0x102   : > { %v6085_v36 = vpop.f32.mrb[9].mxu0  ;;  %v501_v44 = vpop.f32.mrb[10].mxu1 }
 0x103   : > { %v6096_v45 = vpop.f32.mrb[10].mxu0  ;;  %v6102_v49 = vadd.f32 %v5935_v23, %v1079_v34  ;;  %v1083_v50 = vmul.f32 %v5962_v32, %v501_v44  ;;  %v6105_v51 = vpop.f32.mrb[11].mxu1 }
 0x104   : > { %v6107_v54 = vpop.f32.mrb[11].mxu0 }
 0x105   : > { %9452 = vst [vmem:[#allocation9_spill] sm:$0xff] %v6102_v49  ;;  %v9328_v60 = vmax.f32 %v6102_v49, 0.0  ;;  %v6116_v62 = vadd.f32 %v5945_v26, %v1083_v50 }
 0x107   : > { %9454 = vst [vmem:[#allocation11_spill] sm:$0xff] %v6116_v62  ;;  %v9329_v20 = vmax.f32 %v6116_v62, 0.0  ;;  %v5245_v12 = vpack.i.bf16 %v9328_v60, %v9333_v56 }
 0x108   : > { %v507_v19 = vpop.f32.mrb[12].mxu1 }
 0x109   : > { %v6135_v28 = vpop.f32.mrb[12].mxu0  ;;  %v1087_v29 = vmul.f32 %v5975_v37, %v507_v19  ;;  %5246 = vrot.lane.b32.xlu0 %v5245_v12, %s5652_s19  ;;  %v6145_v39 = vpop.f32.mrb[13].mxu1  ;;  %v5250_v44 = vpack.i.bf16 %v9329_v20, %v9332_v3  ;;  %v6161_v12 = vadd.f32 %v5977_v38, %v1090_v18  ;;  %v9337_v18 = vmax.f32 %v6139_v16, 0.0 }
 0x10a   : > { %v6142_v34 = vpop.f32.mrb[13].mxu0  ;;  %v511_v46 = vpop.f32.mrb[14].mxu1 }
 0x10b   : > { %v6151_v50 = vpop.f32.mrb[14].mxu0  ;;  %9458 = vst [vmem:[#allocation15_spill] sm:$0xff] %v6161_v12  ;;  %v6164_v19 = vadd.f32 %v5988_v42, %v1087_v29  ;;  %v1091_v0 = vmul.f32 %v5964_v33, %v511_v46  ;;  %5251 = vrot.lane.b32.xlu1 %v5250_v44, %s5652_s19  ;;  %v6170_v20 = vpop.f32.mrb[15].mxu1  ;;  %v1093_v44 = vmul.f32 %v6001_v47, %v6034_v61 }
 0x10c   : > { %v6167_v60 = vpop.f32.mrb[15].mxu0  ;;  %v1097_v46 = vmul.f32 %v5990_v43, %v6038_v2 }
 0x10d   : > { %9459 = vst [vmem:[#allocation16_spill] sm:$0xff] %v6164_v19  ;;  %v9336_v1 = vmax.f32 %v6164_v19, 0.0  ;;  %v6180_v29 = vadd.f32 %v5977_v38, %v1091_v0  ;;  %5256 = vrot.lane.b32.xlu0 %v5255_v10, %s5652_s19  ;;  %v9342_v0 = vmax.f32 %v6161_v12, 0.0  ;;  %v6217_v19 = vadd.f32 %v6014_v52, %v1093_v44 }
 0x10e   : > { %v6220_v21 = vadd.f32 %v6003_v48, %v1097_v46  ;;  %v9468_v44 = vmax.f32 %v6175_v7, 0.0  ;;  %v9469_v46 = vmax.f32 %v6158_v59, 0.0  ;;  %v1101_v7 = vmul.f32 %v6027_v57, %v6055_v11 }
 0x10f   : > { %9461 = vst [vmem:[#allocation18_spill] sm:$0xff] %v6180_v29  ;;  %v5260_v61 = vpack.i.bf16 %v9336_v1, %v9337_v18  ;;  %v9463_v1 = vmax.f32 %v6180_v29, 0.0  ;;  %9464 = vst [vmem:[#allocation20_spill] sm:$0xff] %v6217_v19  ;;  %v9349_v29 = vmax.f32 %v6203_v5, 0.0 }
 0x110   : > { %v652_v10 = vpop.f32.mrb[16].mxu1  ;;  %9465 = vst [vmem:[#allocation21_spill] sm:$0xff] %v6220_v21 }
 0x111   : > { %v6200_v2 = vpop.f32.mrb[16].mxu0  ;;  %v1095_v62 = vmul.f32 %v6001_v47, %v652_v10  ;;  %5261 = vrot.lane.b32.xlu1 %v5260_v61, %s5652_s19  ;;  %v6210_v56 = vpop.f32.mrb[17].mxu1  ;;  %v5265_v18 = vpack.i.bf16 %v9463_v1, %v9342_v0  ;;  %v6225_v10 = vadd.f32 %v6003_v48, %v1098_v63  ;;  %v5270_v0 = vpack.i.bf16 %v9469_v46, %v9468_v44 }
 0x112   : > { %v6207_v3 = vpop.f32.mrb[17].mxu0  ;;  %v656_v49 = vpop.f32.mrb[18].mxu1  ;;  %v1102_v63 = vmul.f32 %v6027_v57, %v6057_v13  ;;  %v1105_v44 = vmul.f32 %v6016_v53, %v6059_v15 }
 0x113   : > { %v6222_v16 = vpop.f32.mrb[18].mxu0  ;;  %9466 = vst [vmem:[#allocation22_spill] sm:$0xff] %v6225_v10  ;;  %v6228_v61 = vadd.f32 %v6014_v52, %v1095_v62  ;;  %v1099_v12 = vmul.f32 %v5990_v43, %v656_v49  ;;  %5266 = vrot.lane.b32.xlu0 %v5265_v18, %s5652_s19  ;;  %v6234_v1 = vpop.f32.mrb[19].mxu1  ;;  %v1106_v62 = vmul.f32 %v6016_v53, %v6061_v17 }
 0x114   : > { %v6231_v40 = vpop.f32.mrb[19].mxu0  ;;  %v6248_v18 = vpop.permute.xlu0 %1209  ;;  %v6269_v15 = vadd.f32 %v6051_v8, %v1102_v63  ;;  %v6282_v11 = vadd.f32 %v6029_v58, %v1105_v44  ;;  %v9479_v44 = vmax.f32 %v6220_v21, 0.0  ;;  %v1109_v21 = vmul.f32 %v6072_v24, %v6077_v30 }
 0x115   : > { %9467 = vst [vmem:[#allocation23_spill] sm:$0xff] %v6228_v61  ;;  %v6245_v49 = vadd.f32 %v6003_v48, %v1099_v12  ;;  %5271 = vrot.lane.b32.xlu1 %v5270_v0, %s5652_s19  ;;  %v6254_v46 = vpop.permute.xlu1 %1064  ;;  %v9471_v0 = vmax.f32 %v6228_v61, 0.0  ;;  %v9473_v12 = vmax.f32 %v6225_v10, 0.0  ;;  %v6285_v63 = vadd.f32 %v6029_v58, %v1106_v62 }
 0x116   : > { %9472 = vst [vmem:[#allocation25_spill] sm:$0xff] %v6269_v15  ;;  %9475 = vst [vmem:[#allocation26_spill] sm:$0xff] %v6282_v11  ;;  %v6303_v62 = vadd.f32 %v6051_v8, %v1101_v7 }
 0x117   : > { %9470 = vst [vmem:[#allocation24_spill] sm:$0xff] %v6245_v49  ;;  %v5275_v59 = vpack.i.bf16 %v9471_v0, %v9349_v29  ;;  %v9474_v0 = vmax.f32 %v6245_v49, 0.0  ;;  %9476 = vst [vmem:[#allocation27_spill] sm:$0xff] %v6285_v63 }
 0x118   : > { %v662_v55 = vpop.f32.mrb[20].mxu1  ;;  %v6300_v49 = vpop.permute.xlu0 %1059  ;;  %9480 = vst [vmem:[#allocation29_spill] sm:$0xff] %v6303_v62 }
 0x119   : > { %v6266_v41 = vpop.f32.mrb[20].mxu0  ;;  %v1103_v13 = vmul.f32 %v6027_v57, %v662_v55  ;;  %5276 = vrot.lane.b32.xlu0 %v5275_v59, %s5652_s19  ;;  %v6275_v17 = vpop.f32.mrb[21].mxu1  ;;  %v5280_v29 = vpack.i.bf16 %v9474_v0, %v9473_v12  ;;  %v9478_v12 = vmax.f32 %v6217_v19, 0.0 }
 0x11a   : > { %v6272_v31 = vpop.f32.mrb[21].mxu0  ;;  %v666_v61 = vpop.f32.mrb[22].mxu1 }
 0x11b   : > { %v923_v5 = vpop.f32.mrb[22].mxu0  ;;  %v6288_v55 = vadd.f32 %v6051_v8, %v1103_v13  ;;  %v1107_v59 = vmul.f32 %v6016_v53, %v666_v61  ;;  %5281 = vrot.lane.b32.xlu1 %v5280_v29, %s5652_s19  ;;  %v6294_v10 = vpop.f32.mrb[23].mxu1  ;;  %v5285_v0 = vpack.i.bf16 %v9479_v44, %v9478_v12  ;;  %v1110_v61 = vmul.f32 %v6072_v24, %v6085_v36 }
 0x11c   : > { %v6291_v52 = vpop.f32.mrb[23].mxu0  ;;  %v1113_v12 = vmul.f32 %v6053_v9, %v6096_v45  ;;  %v1114_v44 = vmul.f32 %v6053_v9, %v6107_v54  ;;  %v9482_v36 = vmax.f32 %v6269_v15, 0.0  ;;  %v6324_v19 = vpop.permute.xlu1 %1224  ;;  %v1121_v54 = vmul.f32 %v6122_v6, %v6151_v50 }
 0x11d   : > { %9477 = vst [vmem:[#allocation28_spill] sm:$0xff] %v6288_v55  ;;  %v9359_v48 = vmax.f32 %v6288_v55, 0.0  ;;  %v6310_v29 = vadd.f32 %v6029_v58, %v1107_v59  ;;  %5286 = vrot.lane.b32.xlu0 %v5285_v0, %s5652_s19  ;;  %v6330_v7 = vadd.f32 %v6120_v4, %v1110_v61  ;;  %v6342_v15 = vpop.permute.xlu0 %1219  ;;  %v1117_v61 = vmul.f32 %v6189_v14, %v6135_v28 }
 0x11e   : > { %v6345_v30 = vadd.f32 %v6074_v27, %v1113_v12  ;;  %v9489_v12 = vmax.f32 %v6282_v11, 0.0  ;;  %v6364_v28 = vadd.f32 %v6120_v4, %v1109_v21  ;;  %v1118_v21 = vmul.f32 %v6189_v14, %v6142_v34 }
 0x11f   : > { %9481 = vst [vmem:[#allocation30_spill] sm:$0xff] %v6310_v29  ;;  %v5290_v59 = vpack.i.bf16 %v9359_v48, %v9482_v36  ;;  %9483 = vst [vmem:[#allocation31_spill] sm:$0xff] %v6330_v7  ;;  %v9484_v36 = vmax.f32 %v6285_v63, 0.0  ;;  %v9485_v48 = vmax.f32 %v6310_v29, 0.0  ;;  %v1129_v11 = vmul.f32 %v6254_v46, %v6222_v16 }
 0x120   : > { %v807_v45 = vpop.f32.mrb[24].mxu1  ;;  %9486 = vst [vmem:[#allocation32_spill] sm:$0xff] %v6345_v30  ;;  %v6408_v16 = vadd.f32 %v6248_v18, %v1118_v21 }
 0x121   : > { %v1111_v13 = vmul.f32 %v6072_v24, %v807_v45  ;;  %5291 = vrot.lane.b32.xlu1 %v5290_v59, %s5652_s19  ;;  %v6336_v55 = vpop.f32.mrb[25].mxu1  ;;  %v5295_v0 = vpack.i.bf16 %v9485_v48, %v9484_v36  ;;  %v6350_v45 = vadd.f32 %v6074_v27, %v1114_v44  ;;  %v9488_v36 = vmax.f32 %v6303_v62, 0.0  ;;  %v6391_v62 = vpop.permute.xlu0 %1069 }
 0x122   : > { %v811_v50 = vpop.f32.mrb[26].mxu1  ;;  %v9368_v44 = vmax.f32 %v6330_v7, 0.0  ;;  %v6368_v24 = vadd.f32 %v6191_v22, %v1121_v54  ;;  %v1125_v54 = vmul.f32 %v6300_v49, %v6200_v2 }
 0x123   : > { %v6353_v59 = vadd.f32 %v6120_v4, %v1111_v13  ;;  %v1115_v63 = vmul.f32 %v6053_v9, %v811_v50  ;;  %5296 = vrot.lane.b32.xlu0 %v5295_v0, %s5652_s19  ;;  %v6357_v48 = vpop.f32.mrb[27].mxu1  ;;  %v5300_v29 = vpack.i.bf16 %v9489_v12, %v9488_v36  ;;  %v6375_v0 = vpop.permute.xlu1 %1074  ;;  %v6379_v36 = vadd.f32 %v6248_v18, %v1117_v61 }
 0x124   : > { %9490 = vst [vmem:[#allocation34_spill] sm:$0xff] %v6368_v24  ;;  %v1122_v12 = vmul.f32 %v6122_v6, %v6167_v60  ;;  %v1137_v4 = vmul.f32 %v6375_v0, %v923_v5 }
 0x125   : > { %9487 = vst [vmem:[#allocation33_spill] sm:$0xff] %v6353_v59  ;;  %v9367_v13 = vmax.f32 %v6353_v59, 0.0  ;;  %v6372_v50 = vadd.f32 %v6074_v27, %v1115_v63  ;;  %5301 = vrot.lane.b32.xlu1 %v5300_v29, %s5652_s19  ;;  %9492 = vst [vmem:[#allocation36_spill] sm:$0xff] %v6379_v36 }
 0x126   : > { %v6417_v27 = vadd.f32 %v6191_v22, %v1122_v12 }
 0x127   : > { %9491 = vst [vmem:[#allocation35_spill] sm:$0xff] %v6372_v50  ;;  %v5305_v29 = vpack.i.bf16 %v9367_v13, %v9368_v44  ;;  %v9493_v13 = vmax.f32 %v6350_v45, 0.0  ;;  %v9494_v44 = vmax.f32 %v6372_v50, 0.0  ;;  %v6428_v61 = vpop.permute.xlu1 %1234  ;;  %v6431_v50 = vadd.f32 %v6324_v19, %v1129_v11 }
 0x128   : > { %v817_v34 = vpop.f32.mrb[28].mxu1  ;;  %v6434_v12 = vadd.f32 %v6428_v61, %v1137_v4  ;;  %v1126_v4 = vmul.f32 %v6300_v49, %v6207_v3 }
 0x129   : > { %v1119_v60 = vmul.f32 %v6189_v14, %v817_v34  ;;  %5306 = vrot.lane.b32.xlu0 %v5305_v29, %s5652_s19  ;;  %v6400_v63 = vpop.f32.mrb[29].mxu1  ;;  %v5315_v59 = vpack.i.bf16 %v9494_v44, %v9493_v13  ;;  %v9495_v34 = vmax.f32 %v6364_v28, 0.0  ;;  %v9496_v29 = vmax.f32 %v6345_v30, 0.0 }
 0x12a   : > { %v821_v5 = vpop.f32.mrb[30].mxu1  ;;  %v1133_v44 = vmul.f32 %v6391_v62, %v6266_v41  ;;  %v6449_v30 = vadd.f32 %v6342_v15, %v1125_v54  ;;  %v1092_v54 = vmul.f32 %v5964_v33, %v6170_v20  ;;  %v1080_v33 = vmul.f32 %v5943_v25, %v6083_v35 }
 0x12b   : > { %v5310_v7 = vpack.i.bf16 %v9496_v29, %v9495_v34  ;;  %v6422_v13 = vadd.f32 %v6248_v18, %v1119_v60  ;;  %v1123_v21 = vmul.f32 %v6122_v6, %v821_v5  ;;  %5316 = vrot.lane.b32.xlu1 %v5315_v59, %s5652_s19  ;;  %v6426_v2 = vpop.f32.mrb[31].mxu1  ;;  %v9498_v60 = vmax.f32 %v6379_v36, 0.0  ;;  %v6445_v29 = vpop.permute.xlu0 %1229 }
 0x12c   : > { %v9499_v59 = vmax.f32 %v6368_v24, 0.0  ;;  %v6457_v34 = vadd.f32 %v6445_v29, %v1133_v44  ;;  %v9500_v44 = vmax.f32 %v6408_v16, 0.0  ;;  %v9502_v36 = vmax.f32 %v6417_v27, 0.0 }
 0x12d   : > { %9497 = vst [vmem:[#allocation37_spill] sm:$0xff] %v6422_v13  ;;  %v6438_v41 = vadd.f32 %v6191_v22, %v1123_v21  ;;  %5311 = vrot.lane.b32.xlu0 %v5310_v7, %s5652_s19  ;;  %v1130_v7 = vmul.f32 %v6254_v46, %v6231_v40  ;;  %v1088_v20 = vmul.f32 %v5975_v37, %v6145_v39 }
 0x12e   : > { %v5320_v5 = vpack.i.bf16 %v9499_v59, %v9498_v60  ;;  %v1084_v59 = vmul.f32 %v5962_v32, %v6105_v51  ;;  %v9501_v60 = vmax.f32 %v6422_v13, 0.0  ;;  %v6484_v3 = vadd.f32 %v6342_v15, %v1126_v4 }
 0x12f   : > { %v9503_v32 = vmax.f32 %v6438_v41, 0.0  ;;  %v6487_v13 = vadd.f32 %v6324_v19, %v1130_v7  ;;  %v6500_v35 = vadd.f32 %v5977_v38, %v1092_v54  ;;  %v6518_v38 = vadd.f32 %v5988_v42, %v1088_v20 }
 0x130   : > { %5321 = vrot.lane.b32.xlu1 %v5320_v5, %s5652_s19  ;;  %v962_v11 = vpop.f32.mrb[32].mxu1  ;;  %v5325_v5 = vpack.i.bf16 %v9501_v60, %v9500_v44  ;;  %v9378_v60 = vmax.f32 %v6457_v34, 0.0  ;;  %v6497_v37 = vadd.f32 %v5945_v26, %v1084_v59  ;;  %v6515_v26 = vadd.f32 %v5935_v23, %v1080_v33 }
 0x131   : > { %v1127_v40 = vmul.f32 %v6300_v49, %v962_v11  ;;  %v6468_v24 = vpop.f32.mrb[33].mxu1  ;;  %v5330_v51 = vpack.i.bf16 %v9503_v32, %v9502_v36  ;;  %v9408_v11 = vmax.f32 %v6449_v30, 0.0  ;;  %v1134_v59 = vmul.f32 %v6391_v62, %v6272_v31 }
 0x132   : > { %v966_v21 = vpop.f32.mrb[34].mxu1  ;;  %v9412_v54 = vmax.f32 %v6484_v3, 0.0  ;;  %v9409_v32 = vmax.f32 %v6487_v13, 0.0  ;;  %v9401_v23 = vmax.f32 %v6497_v37, 0.0  ;;  %v1100_v42 = vmul.f32 %v5990_v43, %v6234_v1 }
 0x133   : > { %v6491_v44 = vadd.f32 %v6342_v15, %v1127_v40  ;;  %v1131_v36 = vmul.f32 %v6254_v46, %v966_v21  ;;  %5331 = vrot.lane.b32.xlu0 %v5330_v51, %s5652_s19  ;;  %v968_v25 = vpop.f32.mrb[35].mxu1  ;;  %v9504_v21 = vmax.f32 %v6434_v12, 0.0  ;;  %v9505_v40 = vmax.f32 %v6431_v50, 0.0 }
 0x134   : > { %5326 = vrot.lane.b32.xlu1 %v5325_v5, %s5652_s19  ;;  %v1138_v51 = vmul.f32 %v6375_v0, %v6291_v52  ;;  %v1108_v31 = vmul.f32 %v6016_v53, %v6294_v10  ;;  %v9395_v20 = vmax.f32 %v6500_v35, 0.0  ;;  %v9396_v43 = vmax.f32 %v6515_v26, 0.0 }
 0x135   : > { %v9377_v39 = vmax.f32 %v6491_v44, 0.0  ;;  %v6504_v4 = vadd.f32 %v6324_v19, %v1131_v36  ;;  %v5340_v7 = vpack.i.bf16 %v9504_v21, %v9378_v60  ;;  %v5335_v5 = vpack.i.bf16 %v9505_v40, %v9408_v11 }
 0x136   : > { %v1096_v53 = vmul.f32 %v6001_v47, %v6210_v56  ;;  %v6548_v10 = vadd.f32 %v6445_v29, %v1134_v59  ;;  %v1104_v1 = vmul.f32 %v6027_v57, %v6275_v17  ;;  %v9506_v56 = vld [vmem:[#allocation2_spill] sm:$0xff]  ;;  %v6566_v57 = vadd.f32 %v6029_v58, %v1108_v31  ;;  %v9507_v31 = vld [vmem:[#allocation3_spill] sm:$0xff] }
 0x137   : > { %v9379_v36 = vmax.f32 %v6504_v4, 0.0  ;;  %5336 = vrot.lane.b32.xlu0 %v5335_v5, %s5652_s19  ;;  %v6563_v59 = vadd.f32 %v9506_v56, %v1100_v42  ;;  %v1116_v17 = vmul.f32 %v6053_v9, %v6357_v48  ;;  %v5350_v42 = vpack.i.bf16 %v9401_v23, %v9396_v43  ;;  %v9508_v48 = vld [vmem:[#allocation4_spill] sm:$0xff] }
 0x138   : > { %5341 = vrot.lane.b32.xlu1 %v5340_v7, %s5652_s19  ;;  %v972_v33 = vpop.f32.mrb[36].mxu1  ;;  %v5345_v7 = vpack.i.bf16 %v9377_v39, %v9412_v54  ;;  %v6554_v39 = vadd.f32 %v6428_v61, %v1138_v51  ;;  %v1124_v51 = vmul.f32 %v6122_v6, %v6426_v2  ;;  %v6585_v9 = vadd.f32 %v9507_v31, %v1096_v53  ;;  %v9551_v54 = vld [vmem:[#allocation32_spill] sm:$0xff] }
 0x139   : > { %v1135_v21 = vmul.f32 %v6391_v62, %v972_v33  ;;  %v974_v52 = vpop.f32.mrb[37].mxu1  ;;  %v5355_v40 = vpack.i.bf16 %v9379_v36, %v9409_v32  ;;  %v9394_v33 = vmax.f32 %v6518_v38, 0.0  ;;  %v6588_v6 = vadd.f32 %v6051_v8, %v1104_v1  ;;  %v9509_v1 = vld [vmem:[#allocation5_spill] sm:$0xff] }
 0x13a   : > { %v976_v5 = vpop.f32.mrb[38].mxu1  ;;  %v1112_v2 = vmul.f32 %v9508_v48, %v6336_v55  ;;  %v9392_v53 = vmax.f32 %v6563_v59, 0.0  ;;  %v9389_v8 = vmax.f32 %v6566_v57, 0.0  ;;  %v6602_v31 = vadd.f32 %v9509_v1, %v1116_v17 }
 0x13b   : > { %v6557_v60 = vadd.f32 %v6445_v29, %v1135_v21  ;;  %v1139_v36 = vmul.f32 %v6375_v0, %v976_v5  ;;  %5346 = vrot.lane.b32.xlu0 %v5345_v7, %s5652_s19  ;;  %v978_v47 = vpop.f32.mrb[39].mxu1  ;;  %v5360_v58 = vpack.i.bf16 %v9395_v20, %v9394_v33  ;;  %v9397_v7 = vmax.f32 %v6554_v39, 0.0  ;;  %v9521_v33 = vld [vmem:[#allocation7_spill] sm:$0xff] }
 0x13c   : > { %5356 = vrot.lane.b32.xlu1 %v5355_v40, %s5652_s19  ;;  %v1120_v40 = vmul.f32 %v6189_v14, %v6400_v63  ;;  %v6605_v55 = vadd.f32 %v6191_v22, %v1124_v51  ;;  %v1132_v48 = vmul.f32 %v6254_v46, %v968_v25  ;;  %v1140_v14 = vmul.f32 %v6375_v0, %v978_v47  ;;  %v9510_v22 = vld [vmem:[#allocation12_spill] sm:$0xff] }
 0x13d   : > { %v9393_v21 = vmax.f32 %v6557_v60, 0.0  ;;  %v6574_v5 = vadd.f32 %v6428_v61, %v1139_v36  ;;  %v9398_v36 = vmax.f32 %v6548_v10, 0.0  ;;  %v9391_v17 = vmax.f32 %v6585_v9, 0.0 }
 0x13e   : > { %v6620_v51 = vadd.f32 %v9510_v22, %v1112_v2  ;;  %v6623_v46 = vadd.f32 %v6248_v18, %v1120_v40  ;;  %v1128_v0 = vmul.f32 %v6300_v49, %v6468_v24  ;;  %v1136_v25 = vmul.f32 %v6391_v62, %v974_v52 }
 0x13f   : > { %v9390_v56 = vmax.f32 %v6574_v5, 0.0  ;;  %5351 = vrot.lane.b32.xlu0 %v5350_v42, %s5652_s19  ;;  %v5365_v63 = vpack.i.bf16 %v9393_v21, %v9398_v36  ;;  %v5375_v18 = vpack.i.bf16 %v9392_v53, %v9391_v17  ;;  %v9387_v2 = vmax.f32 %v6602_v31, 0.0  ;;  %v9519_v17 = vld [vmem:[#allocation10_spill] sm:$0xff] }
 0x140   : > { %5361 = vrot.lane.b32.xlu1 %v5360_v58, %s5652_s19  ;;  %v9388_v58 = vmax.f32 %v6588_v6, 0.0  ;;  %v9385_v24 = vmax.f32 %v6605_v55, 0.0  ;;  %v6641_v49 = vadd.f32 %v6324_v19, %v1132_v48  ;;  %v6644_v62 = vadd.f32 %v6428_v61, %v1140_v14 }
 0x141   : > { %v5370_v42 = vpack.i.bf16 %v9390_v56, %v9397_v7  ;;  %v9386_v52 = vmax.f32 %v6620_v51, 0.0  ;;  %v9384_v40 = vmax.f32 %v6623_v46, 0.0  ;;  %v6649_v1 = vadd.f32 %v6342_v15, %v1128_v0 }
 0x142   : > { %v5380_v47 = vpack.i.bf16 %v9389_v8, %v9388_v58  ;;  %9511 = vst [vmem:[#allocation2_spill] sm:$0xff] %v6641_v49  ;;  %9512 = vst [vmem:[#allocation3_spill] sm:$0xff] %v6644_v62  ;;  %v9383_v19 = vmax.f32 %v6641_v49, 0.0  ;;  %v9381_v48 = vmax.f32 %v6644_v62, 0.0  ;;  %v9520_v53 = vmax.f32 %v9519_v17, 0.0  ;;  %v9557_v62 = vld [vmem:[#allocation34_spill] sm:$0xff] }
 0x143   : > { %5371 = vrot.lane.b32.xlu0 %v5370_v42, %s5652_s19  ;;  %9513 = vst [vmem:[#allocation4_spill] sm:$0xff] %v6649_v1  ;;  %v5390_v61 = vpack.i.bf16 %v9385_v24, %v9384_v40  ;;  %v5385_v15 = vpack.i.bf16 %v9387_v2, %v9386_v52  ;;  %v9517_v52 = vld [vmem:[#allocation8_spill] sm:$0xff]  ;;  %v9522_v20 = vmax.f32 %v9521_v33, 0.0 }
 0x144   : > { %5366 = vrot.lane.b32.xlu1 %v5365_v63, %s5652_s19  ;;  %v6652_v63 = vadd.f32 %v6445_v29, %v1136_v25  ;;  %v9382_v29 = vmax.f32 %v6649_v1, 0.0  ;;  %v9518_v2 = vmax.f32 %v9517_v52, 0.0  ;;  %v5580_v33 = vld [vmem:[%s9323_s7 + $0x114] ss:$8 sps:$4 sm:$0xff]  }
 0x146   : > { %9514 = vst [vmem:[#allocation5_spill] sm:$0xff] %v6652_v63  ;;  %v9380_v14 = vmax.f32 %v6652_v63, 0.0  ;;  %v5395_v42 = vpack.i.bf16 %v9383_v19, %v9382_v29  ;;  %v9515_v19 = vld [vmem:[#allocation6_spill] sm:$0xff]  ;;  %v9552_v63 = vmax.f32 %v9551_v54, 0.0  ;;  %v5604_v54 = vld [vmem:[%s9323_s7 + $0x194] ss:$8 sps:$4 sm:$0xff]  }
 0x147   : > { %5376 = vrot.lane.b32.xlu0 %v5375_v18, %s5652_s19  ;;  %v9516_v40 = vmax.f32 %v9515_v19, 0.0 }
 0x148   : > { %5381 = vrot.lane.b32.xlu1 %v5380_v47, %s5652_s19  ;;  %v5400_v22 = vpack.i.bf16 %v9381_v48, %v9380_v14 }
 0x14b   : > { %5386 = vrot.lane.b32.xlu0 %v5385_v15, %s5652_s19 }
 0x14c   : > { %5391 = vrot.lane.b32.xlu1 %v5390_v61, %s5652_s19 }
 0x14f   : > { %5396 = vrot.lane.b32.xlu0 %v5395_v42, %s5652_s19 }
 0x150   : > { %5401 = vrot.lane.b32.xlu1 %v5400_v22, %s5652_s19 }
 0x17b   : > { %v6680_v0 = vpop.permute.xlu0 %5246 }
 0x17c   : > { %v9404_v25 = vunpack.i.h.bf16 %v6680_v0  ;;  %v5248_v47 = vunpack.i.l.bf16 %v6680_v0 }
 0x17d   : > { %v6684_v18 = vpop.permute.xlu1 %5251 }
 0x17e   : > { %v9405_v61 = vunpack.i.h.bf16 %v6684_v18  ;;  %v5253_v15 = vunpack.i.l.bf16 %v6684_v18  ;;  %v1559_v14 = vsel %vm1557_vm2, %v5248_v47, %v9404_v25 }
 0x17f   : > { %v5257_v42 = vpop.permute.xlu0 %5256  ;;  %v1671_v24 = vmax.f32 %v9516_v40, %v1559_v14  ;;  %v9525_v14 = vld [vmem:[#allocation15_spill] sm:$0xff] }
 0x180   : > { %v5259_v48 = vunpack.i.h.bf16 %v5257_v42  ;;  %v5258_v22 = vunpack.i.l.bf16 %v5257_v42  ;;  %v1562_v29 = vsel %vm1557_vm2, %v5253_v15, %v9405_v61 }
 0x181   : > { %v1675_v58 = vmax.f32 %v9518_v2, %v1562_v29  ;;  %v5575_v2 = vld [vmem:[%s9323_s7 + $0x100] ss:$8 sps:$4 sm:$0xff]  }
 0x182   : > { %v1558_v8 = vsel %vm1557_vm2, %v5258_v22, %v5248_v47  ;;  %v1561_v56 = vsel %vm1557_vm2, %v5259_v48, %v5253_v15  ;;  %v9526_v47 = vmax.f32 %v9525_v14, 0.0  ;;  %v5583_v22 = vld [vmem:[%s9323_s7 + $0x124] ss:$8 sps:$4 sm:$0xff]  }
 0x183   : > { %v1670_v21 = vmax.f32 %v9520_v53, %v1558_v8  ;;  %v1674_v42 = vmax.f32 %v9522_v20, %v1561_v56  ;;  %v6704_v43 = vpop.permute.xlu1 %5261  ;;  %v1735_v7 = vpack.c.bf16 %v1675_v58, %v1671_v24  ;;  %v9523_v24 = vld [vmem:[#allocation13_spill] sm:$0xff] }
 0x184   : > { %v9400_v36 = vunpack.i.h.bf16 %v6704_v43  ;;  %v5263_v40 = vunpack.i.l.bf16 %v6704_v43  ;;  %v9524_v48 = vmax.f32 %v9523_v24, 0.0  ;;  %v9529_v24 = vld [vmem:[#allocation14_spill] sm:$0xff] }
 0x185   : > { %v1734_v52 = vpack.c.bf16 %v1674_v42, %v1670_v21  ;;  %2147 = vmatprep.mubr.bf16.mxu0 %v1735_v7  ;;  %v6711_v19 = vpop.permute.xlu0 %5266  ;;  %v5578_v7 = vld [vmem:[%s9323_s7 + $0x110] ss:$8 sps:$4 sm:$0xff]  }
 0x186   : > { %v9399_v20 = vunpack.i.h.bf16 %v6711_v19  ;;  %v5268_v56 = vunpack.i.l.bf16 %v6711_v19  ;;  %v1565_v53 = vsel %vm1557_vm2, %v5263_v40, %v9400_v36 }
 0x187   : > { %2148 = vmatmul.mubr.bf16.vlgmr.msra.gmra.mrb[24].mxu0 %v1734_v52  ;;  %v5272_v8 = vpop.permute.xlu1 %5271  ;;  %v1679_v29 = vmax.f32 %v9524_v48, %v1565_v53  ;;  %v9530_v53 = vmax.f32 %v9529_v24, 0.0 }
 0x188   : > { %v5274_v17 = vunpack.i.h.bf16 %v5272_v8  ;;  %v5273_v58 = vunpack.i.l.bf16 %v5272_v8  ;;  %2229 = vmatpush1.bf16.msra.mxu0 %v5575_v2  ;;  %v1568_v21 = vsel %vm1557_vm2, %v5268_v56, %v9399_v20  ;;  %v9527_v20 = vld [vmem:[#allocation17_spill] sm:$0xff] }
 0x189   : > { %v1683_v15 = vmax.f32 %v9526_v47, %v1568_v21  ;;  %2230 = vmatprep.subr.bf16.mxu0 %v5580_v33  ;;  %v9528_v36 = vmax.f32 %v9527_v20, 0.0 }
 0x18a   : > { %v1564_v42 = vsel %vm1557_vm2, %v5273_v58, %v5263_v40  ;;  %v1567_v2 = vsel %vm1557_vm2, %v5274_v17, %v5268_v56  ;;  %v5581_v40 = vld [vmem:[%s9323_s7 + $0x120] ss:$8 sps:$4 sm:$0xff]  }
 0x18b   : > { %v6736_v52 = vpop.permute.xlu0 %5276  ;;  %v1739_v8 = vpack.c.bf16 %v1683_v15, %v1679_v29  ;;  %v1678_v23 = vmax.f32 %v9528_v36, %v1564_v42  ;;  %v1682_v48 = vmax.f32 %v9530_v53, %v1567_v2  ;;  %v5586_v36 = vld [vmem:[%s9323_s7 + $0x134] ss:$8 sps:$4 sm:$0xff]   ;;  %v5584_v15 = vld [vmem:[%s9323_s7 + $0x130] ss:$8 sps:$4 sm:$0xff]  }
 0x18c   : > { %v9403_v21 = vunpack.i.h.bf16 %v6736_v52  ;;  %v5278_v33 = vunpack.i.l.bf16 %v6736_v52  ;;  %2231 = vmatpush1.bf16.msra.mxu0 %v5578_v7 }
 0x18d   : > { %2157 = vmatprep.mubr.bf16.mxu0 %v1739_v8  ;;  %v6747_v56 = vpop.permute.xlu1 %5281  ;;  %v1738_v17 = vpack.c.bf16 %v1682_v48, %v1678_v23  ;;  %2232 = vmatprep.subr.bf16.mxu0 %v5583_v22  ;;  %v9531_v22 = vld [vmem:[#allocation19_spill] sm:$0xff]  ;;  %v9533_v8 = vld [vmem:[#allocation22_spill] sm:$0xff] }
 0x18e   : > { %v9402_v20 = vunpack.i.h.bf16 %v6747_v56  ;;  %v5283_v58 = vunpack.i.l.bf16 %v6747_v56  ;;  %v1571_v7 = vsel %vm1557_vm2, %v5278_v33, %v9403_v21  ;;  %v9532_v42 = vmax.f32 %v9531_v22, 0.0  ;;  %v5589_v48 = vld [vmem:[%s9323_s7 + $0x144] ss:$8 sps:$4 sm:$0xff]   ;;  %v9535_v21 = vld [vmem:[#allocation20_spill] sm:$0xff]  ;;  %v9537_v22 = vld [vmem:[#allocation21_spill] sm:$0xff] }
 0x18f   : > { %2158 = vmatmul.mubr.bf16.gmra.mrb[28].mxu0 %v1738_v17  ;;  %v5287_v29 = vpop.permute.xlu0 %5286  ;;  %v9534_v24 = vmax.f32 %v9533_v8, 0.0  ;;  %v9536_v25 = vmax.f32 %v9535_v21, 0.0 }
 0x190   : > { %v5289_v14 = vunpack.i.h.bf16 %v5287_v29  ;;  %v5288_v47 = vunpack.i.l.bf16 %v5287_v29  ;;  %2233 = vmatpush1.bf16.msra.mxu0 %v5581_v40  ;;  %v1574_v23 = vsel %vm1557_vm2, %v5283_v58, %v9402_v20  ;;  %v1687_v2 = vmax.f32 %v9532_v42, %v1571_v7 }
 0x191   : > { %v1691_v53 = vmax.f32 %v9534_v24, %v1574_v23  ;;  %2234 = vmatprep.subr.bf16.mxu0 %v5586_v36  ;;  %v9538_v7 = vmax.f32 %v9537_v22, 0.0  ;;  %v5590_v24 = vld [vmem:[%s9323_s7 + $0x150] ss:$8 sps:$4 sm:$0xff]  }
 0x192   : > { %v1570_v40 = vsel %vm1557_vm2, %v5288_v47, %v5278_v33  ;;  %v1573_v17 = vsel %vm1557_vm2, %v5289_v14, %v5283_v58  ;;  %v5587_v33 = vld [vmem:[%s9323_s7 + $0x140] ss:$8 sps:$4 sm:$0xff]  }
 0x193   : > { %v6772_v29 = vpop.permute.xlu1 %5291  ;;  %v1743_v20 = vpack.c.bf16 %v1691_v53, %v1687_v2  ;;  %v1686_v61 = vmax.f32 %v9536_v25, %v1570_v40  ;;  %v1690_v42 = vmax.f32 %v9538_v7, %v1573_v17  ;;  %v5592_v25 = vld [vmem:[%s9323_s7 + $0x154] ss:$8 sps:$4 sm:$0xff]   ;;  %v9541_v17 = vld [vmem:[#allocation27_spill] sm:$0xff] }
 0x194   : > { %v9407_v23 = vunpack.i.h.bf16 %v6772_v29  ;;  %v5293_v36 = vunpack.i.l.bf16 %v6772_v29  ;;  %2235 = vmatpush1.bf16.msra.mxu0 %v5584_v15  ;;  %v9539_v53 = vld [vmem:[#allocation25_spill] sm:$0xff]  ;;  %v9542_v22 = vmax.f32 %v9541_v17, 0.0 }
 0x195   : > { %2167 = vmatprep.mubr.bf16.mxu0 %v1743_v20  ;;  %v6783_v58 = vpop.permute.xlu0 %5296  ;;  %v1742_v14 = vpack.c.bf16 %v1690_v42, %v1686_v61  ;;  %2236 = vmatprep.subr.bf16.mxu0 %v5589_v48  ;;  %v9540_v48 = vmax.f32 %v9539_v53, 0.0  ;;  %v5595_v42 = vld [vmem:[%s9323_s7 + $0x164] ss:$8 sps:$4 sm:$0xff]  }
 0x196   : > { %v9406_v21 = vunpack.i.h.bf16 %v6783_v58  ;;  %v5298_v47 = vunpack.i.l.bf16 %v6783_v58  ;;  %v1577_v15 = vsel %vm1557_vm2, %v5293_v36, %v9407_v23  ;;  %v9543_v23 = vld [vmem:[#allocation29_spill] sm:$0xff]  ;;  %v9545_v53 = vld [vmem:[#allocation26_spill] sm:$0xff] }
 0x197   : > { %2168 = vmatmul.mubr.bf16.gmra.mrb[32].mxu0 %v1742_v14  ;;  %v5302_v2 = vpop.permute.xlu1 %5301  ;;  %v1695_v40 = vmax.f32 %v9540_v48, %v1577_v15  ;;  %v9544_v11 = vmax.f32 %v9543_v23, 0.0  ;;  %v9546_v15 = vmax.f32 %v9545_v53, 0.0  ;;  %v9549_v53 = vmax.f32 %v6350_v45, 0.0  ;;  %v5599_v45 = vld [vmem:[%s9323_s7 + $0x180] ss:$8 sps:$4 sm:$0xff]  }
 0x198   : > { %v5304_v8 = vunpack.i.h.bf16 %v5302_v2  ;;  %v5303_v20 = vunpack.i.l.bf16 %v5302_v2  ;;  %v1580_v61 = vsel %vm1557_vm2, %v5298_v47, %v9406_v21  ;;  %2237 = vmatpush1.bf16.msra.mxu0 %v5587_v33 }
 0x199   : > { %v1699_v7 = vmax.f32 %v9542_v22, %v1580_v61  ;;  %2238 = vmatprep.subr.bf16.mxu0 %v5592_v25  ;;  %v5596_v22 = vld [vmem:[%s9323_s7 + $0x170] ss:$8 sps:$4 sm:$0xff]  }
 0x19a   : > { %v1576_v14 = vsel %vm1557_vm2, %v5303_v20, %v5293_v36  ;;  %v1579_v2 = vsel %vm1557_vm2, %v5304_v8, %v5298_v47  ;;  %v5593_v36 = vld [vmem:[%s9323_s7 + $0x160] ss:$8 sps:$4 sm:$0xff]  }
 0x19b   : > { %v6808_v33 = vpop.permute.xlu0 %5306  ;;  %v1747_v21 = vpack.c.bf16 %v1699_v7, %v1695_v40  ;;  %v1694_v32 = vmax.f32 %v9544_v11, %v1576_v14  ;;  %v1698_v48 = vmax.f32 %v9546_v15, %v1579_v2  ;;  %v5598_v11 = vld [vmem:[%s9323_s7 + $0x174] ss:$8 sps:$4 sm:$0xff]  }
 0x19c   : > { %v9411_v61 = vunpack.i.h.bf16 %v6808_v33  ;;  %v5308_v25 = vunpack.i.l.bf16 %v6808_v33  ;;  %2239 = vmatpush1.bf16.msra.mxu0 %v5590_v24 }
 0x19d   : > { %2177 = vmatprep.mubr.bf16.mxu0 %v1747_v21  ;;  %v6819_v47 = vpop.permute.xlu1 %5316  ;;  %v1746_v8 = vpack.c.bf16 %v1698_v48, %v1694_v32  ;;  %2240 = vmatprep.subr.bf16.mxu0 %v5595_v42  ;;  %v9547_v42 = vld [vmem:[#allocation31_spill] sm:$0xff] }
 0x19e   : > { %v9410_v23 = vunpack.i.h.bf16 %v6819_v47  ;;  %v5318_v20 = vunpack.i.l.bf16 %v6819_v47  ;;  %v1583_v24 = vsel %vm1557_vm2, %v5308_v25, %v9411_v61  ;;  %v9548_v14 = vmax.f32 %v9547_v42, 0.0  ;;  %v5601_v48 = vld [vmem:[%s9323_s7 + $0x184] ss:$8 sps:$4 sm:$0xff]  }
 0x19f   : > { %2178 = vmatmul.mubr.bf16.gmra.mrb[36].mxu0 %v1746_v8  ;;  %v5312_v40 = vpop.permute.xlu0 %5311 }
 0x1a0   : > { %v5314_v17 = vunpack.i.h.bf16 %v5312_v40  ;;  %v5313_v21 = vunpack.i.l.bf16 %v5312_v40  ;;  %v1586_v32 = vsel %vm1557_vm2, %v5318_v20, %v9410_v23  ;;  %2241 = vmatpush1.bf16.msra.mxu0 %v5593_v36  ;;  %v1703_v2 = vmax.f32 %v9548_v14, %v1583_v24 }
 0x1a1   : > { %v1707_v15 = vmax.f32 %v9549_v53, %v1586_v32  ;;  %2242 = vmatprep.subr.bf16.mxu0 %v5598_v11  ;;  %v9550_v23 = vmax.f32 %v6364_v28, 0.0  ;;  %v1818_v11 = vld [vmem:[%s9323_s7 + $0x1a0] sm:$0x33] }
 0x1a2   : > { %v5322_v7 = vpop.permute.xlu1 %5321  ;;  %v1582_v8 = vsel %vm1557_vm2, %v5313_v21, %v5308_v25  ;;  %v1585_v36 = vsel %vm1557_vm2, %v5314_v17, %v5318_v20 }
 0x1a3   : > { %v1751_v40 = vpack.c.bf16 %v1707_v15, %v1703_v2  ;;  %v1702_v61 = vmax.f32 %v9550_v23, %v1582_v8  ;;  %v1706_v42 = vmax.f32 %v9552_v63, %v1585_v36  ;;  %v5324_v24 = vunpack.i.h.bf16 %v5322_v7  ;;  %v5602_v15 = vld [vmem:[%s9323_s7 + $0x190] ss:$8 sps:$4 sm:$0xff]  }
 0x1a4   : > { %2243 = vmatpush1.bf16.msra.mxu0 %v5596_v22  ;;  %v5323_v25 = vunpack.i.l.bf16 %v5322_v7  ;;  %v5077_v22 = vcombine.high %v1818_v11, %v1818_v11  ;;  %v5076_v7 = vcombine.low %v1818_v11, %v1818_v11  ;;  %v9553_v36 = vmax.f32 %v6408_v16, 0.0 }
 0x1a5   : > { %2187 = vmatprep.mubr.bf16.mxu0 %v1751_v40  ;;  %v6856_v17 = vpop.permute.xlu0 %5331  ;;  %v1750_v28 = vpack.c.bf16 %v1706_v42, %v1702_v61  ;;  %2244 = vmatprep.subr.bf16.mxu0 %v5601_v48  ;;  %v9554_v42 = vmax.f32 %v6417_v27, 0.0 }
 0x1a6   : > { %v6854_v20 = vpop.permute.xlu1 %5326  ;;  %v9415_v21 = vunpack.i.h.bf16 %v6856_v17  ;;  %v5333_v32 = vunpack.i.l.bf16 %v6856_v17  ;;  %v2110_v27 = vsel %vm397_vm0, %v5076_v7, 0 }
 0x1a7   : > { %v9414_v63 = vunpack.i.h.bf16 %v6854_v20  ;;  %v5328_v23 = vunpack.i.l.bf16 %v6854_v20  ;;  %2188 = vmatmul.mubr.bf16.gmra.mrb[40].mxu0 %v1750_v28  ;;  %v9555_v28 = vld [vmem:[#allocation36_spill] sm:$0xff] }
 0x1a8   : > { %v1592_v14 = vsel %vm1557_vm2, %v5333_v32, %v9415_v21  ;;  %v1591_v53 = vsel %vm1557_vm2, %v5324_v24, %v5333_v32  ;;  %2245 = vmatpush1.bf16.msra.mxu0 %v5599_v45 }
 0x1a9   : > { %v1589_v61 = vsel %vm1557_vm2, %v5328_v23, %v9414_v63  ;;  %v1588_v2 = vsel %vm1557_vm2, %v5323_v25, %v5328_v23  ;;  %v5337_v8 = vpop.permute.xlu0 %5336  ;;  %v1715_v11 = vmax.f32 %v9554_v42, %v1592_v14  ;;  %v9556_v63 = vmax.f32 %v9555_v28, 0.0  ;;  %2246 = vmatprep.subr.bf16.mxu0 %v5604_v54 }
 0x1aa   : > { %v5342_v48 = vpop.permute.xlu1 %5341  ;;  %v1711_v40 = vmax.f32 %v9553_v36, %v1589_v61  ;;  %v9558_v25 = vmax.f32 %v9557_v62, 0.0  ;;  %v5339_v24 = vunpack.i.h.bf16 %v5337_v8  ;;  %v5338_v32 = vunpack.i.l.bf16 %v5337_v8 }
 0x1ab   : > { %v1710_v21 = vmax.f32 %v9556_v63, %v1588_v2  ;;  %v9560_v36 = vmax.f32 %v6487_v13, 0.0  ;;  %v9561_v42 = vmax.f32 %v6449_v30, 0.0  ;;  %v9562_v28 = vmax.f32 %v6431_v50, 0.0  ;;  %v9565_v30 = vld [vmem:[#allocation11_spill] sm:$0xff]  ;;  %v9567_v50 = vld [vmem:[#allocation9_spill] sm:$0xff] }
 0x1ac   : > { %v1714_v23 = vmax.f32 %v9558_v25, %v1591_v53  ;;  %v1755_v45 = vpack.c.bf16 %v1715_v11, %v1711_v40  ;;  %2247 = vmatpush1.bf16.msra.mxu0 %v5602_v15  ;;  %v9559_v15 = vmax.f32 %v6484_v3, 0.0 }
 0x1ad   : > { %v6884_v1 = vpop.permute.xlu0 %5346  ;;  %5078 = vmatprep.subr.msk.bf16.mxu0 %vm397_vm0, %v5077_v22  ;;  %vm2576_vm0 = vcmask 932864  }
 0x1ae   : > { %2197 = vmatprep.mubr.bf16.mxu0 %v1755_v45  ;;  %v6886_v49 = vpop.permute.xlu1 %5356  ;;  %v1754_v16 = vpack.c.bf16 %v1714_v23, %v1710_v21  ;;  %v5349_v63 = vunpack.i.h.bf16 %v6884_v1  ;;  %v5348_v62 = vunpack.i.l.bf16 %v6884_v1  ;;  %v9606_v1 = vmax.f32 %v6491_v44, 0.0 }
 0x1af   : > { %v5359_v54 = vunpack.i.h.bf16 %v6886_v49  ;;  %v5358_v61 = vunpack.i.l.bf16 %v6886_v49  ;;  %v9608_v49 = vmax.f32 %v6557_v60, 0.0  ;;  %v9610_v44 = vmax.f32 %v6585_v9, 0.0 }
 0x1b0   : > { %2198 = vmatmul.mubr.bf16.gmra.mrb[44].mxu0 %v1754_v16  ;;  %v1595_v14 = vsel %vm1557_vm2, %v5348_v62, %v5349_v63  ;;  %v1594_v22 = vsel %vm1557_vm2, %v5338_v32, %v5348_v62  ;;  %v5344_v16 = vunpack.i.h.bf16 %v5342_v48  ;;  %v9564_v62 = vunpack.i.h.bf16 %v6680_v0 }
 0x1b1   : > { %v1598_v21 = vsel %vm1557_vm2, %v5358_v61, %v5359_v54  ;;  %v1597_v7 = vsel %vm1557_vm2, %v5339_v24, %v5358_v61  ;;  %2249 = vmatpush1.bf16.msra.mxu0 %v2110_v27  ;;  %v5352_v2 = vpop.permute.xlu0 %5351  ;;  %v1719_v8 = vmax.f32 %v9559_v15, %v1595_v14  ;;  %v1718_v11 = vmax.f32 %v9561_v42, %v1594_v22 }
 0x1b2   : > { %v6902_v53 = vpop.permute.xlu1 %5361  ;;  %v1723_v40 = vmax.f32 %v9560_v36, %v1598_v21  ;;  %v1722_v25 = vmax.f32 %v9562_v28, %v1597_v7  ;;  %v5354_v23 = vunpack.i.h.bf16 %v5352_v2  ;;  %v5353_v45 = vunpack.i.l.bf16 %v5352_v2 }
 0x1b3   : > { %v5363_v24 = vunpack.i.l.bf16 %v6902_v53  ;;  %v9563_v27 = vunpack.i.h.bf16 %v6684_v18  ;;  %v5343_v61 = vunpack.i.l.bf16 %v5342_v48  ;;  %v9566_v14 = vmax.f32 %v9565_v30, 0.0 }
 0x1b4   : > { %v1759_v32 = vpack.c.bf16 %v1723_v40, %v1719_v8  ;;  %v1560_v13 = vsel %vm1557_vm2, %v9564_v62, %v5353_v45  ;;  %v9568_v22 = vmax.f32 %v9567_v50, 0.0  ;;  %v1758_v18 = vpack.c.bf16 %v1722_v25, %v1718_v11 }
 0x1b5   : > { %v1563_v3 = vsel %vm1557_vm2, %v9563_v27, %v5354_v23  ;;  %v6929_v15 = vpop.permute.xlu0 %5371  ;;  %v9569_v40 = vmax.f32 %v6497_v37, 0.0  ;;  %v9570_v27 = vunpack.i.h.bf16 %v6704_v43  ;;  %v9571_v43 = vmax.f32 %v6548_v10, 0.0 }
 0x1b6   : > { %v6921_v21 = vmax.f32 %v9566_v14, %v1563_v3  ;;  %v6925_v7 = vmax.f32 %v9568_v22, %v1560_v13  ;;  %2207 = vmatprep.mubr.bf16.mxu0 %v1759_v32  ;;  %v6927_v2 = vpop.permute.xlu1 %5366  ;;  %v5374_v48 = vunpack.i.h.bf16 %v6929_v15  ;;  %v5373_v36 = vunpack.i.l.bf16 %v6929_v15 }
 0x1b7   : > { %v5369_v8 = vunpack.i.h.bf16 %v6927_v2  ;;  %v5368_v0 = vunpack.i.l.bf16 %v6927_v2  ;;  %v1677_v42 = vmax.f32 %v9569_v40, %v5354_v23  ;;  %v5364_v32 = vunpack.i.h.bf16 %v6902_v53 }
 0x1b8   : > { %v1736_v28 = vpack.c.bf16 %v6921_v21, %v6925_v7  ;;  %2208 = vmatmul.mubr.bf16.gmra.mrb[48].mxu0 %v1758_v18  ;;  %v1566_v11 = vsel %vm1557_vm2, %v9570_v27, %v5363_v24  ;;  %v1604_v3 = vsel %vm1557_vm2, %v5373_v36, %v5374_v48  ;;  %v1603_v23 = vsel %vm1557_vm2, %v5344_v16, %v5373_v36 }
 0x1b9   : > { %v1601_v25 = vsel %vm1557_vm2, %v5368_v0, %v5369_v8  ;;  %v1600_v37 = vsel %vm1557_vm2, %v5343_v61, %v5368_v0  ;;  %v6953_v53 = vpop.permute.xlu0 %5376  ;;  %v9572_v30 = vmax.f32 %v6554_v39, 0.0  ;;  %v9573_v50 = vmax.f32 %v6457_v34, 0.0 }
 0x1ba   : > { %v6951_v62 = vpop.permute.xlu1 %5381  ;;  %v1727_v13 = vmax.f32 %v9571_v43, %v1601_v25  ;;  %v9574_v18 = vmax.f32 %v6434_v12, 0.0  ;;  %v9575_v61 = vmax.f32 %v6515_v26, 0.0  ;;  %v5379_v36 = vunpack.i.h.bf16 %v6953_v53  ;;  %v9579_v43 = vld [vmem:[#allocation18_spill] sm:$0xff] }
 0x1bb   : > { %v1731_v14 = vmax.f32 %v9572_v30, %v1604_v3  ;;  %v1726_v22 = vmax.f32 %v9573_v50, %v1600_v37  ;;  %v5383_v16 = vunpack.i.l.bf16 %v6951_v62  ;;  %v5378_v27 = vunpack.i.l.bf16 %v6953_v53  ;;  %v9577_v3 = vld [vmem:[#allocation16_spill] sm:$0xff] }
 0x1bc   : > { %v1730_v40 = vmax.f32 %v9574_v18, %v1603_v23  ;;  %v1673_v0 = vmax.f32 %v9575_v61, %v5353_v45  ;;  %v9576_v25 = vunpack.i.h.bf16 %v6711_v19  ;;  %v9578_v34 = vmax.f32 %v9577_v3, 0.0  ;;  %v9586_v3 = vld [vmem:[#allocation24_spill] sm:$0xff] }
 0x1bd   : > { %v1763_v10 = vpack.c.bf16 %v1731_v14, %v1727_v13  ;;  %v5384_v12 = vunpack.i.h.bf16 %v6951_v62  ;;  %v6976_v26 = vpop.permute.xlu0 %5386  ;;  %v9580_v30 = vmax.f32 %v9579_v43, 0.0  ;;  %v9581_v13 = vunpack.i.h.bf16 %v6736_v52  ;;  %v9584_v52 = vld [vmem:[#allocation23_spill] sm:$0xff] }
 0x1be   : > { %v1569_v39 = vsel %vm1557_vm2, %v9576_v25, %v5364_v32  ;;  %v1680_v37 = vmax.f32 %v9578_v34, %v1566_v11  ;;  %v6974_v23 = vpop.permute.xlu1 %5391  ;;  %v1762_v45 = vpack.c.bf16 %v1730_v40, %v1726_v22  ;;  %v9582_v14 = vunpack.i.h.bf16 %v6747_v56 }
 0x1bf   : > { %2217 = vmatprep.mubr.bf16.mxu0 %v1763_v10  ;;  %v1684_v53 = vmax.f32 %v9580_v30, %v1569_v39  ;;  %v1572_v19 = vsel %vm1557_vm2, %v9581_v13, %v5378_v27  ;;  %v5389_v50 = vunpack.i.h.bf16 %v6976_v26  ;;  %v1737_v18 = vpack.c.bf16 %v1677_v42, %v1673_v0 }
 0x1c0   : > { %v1575_v11 = vsel %vm1557_vm2, %v9582_v14, %v5379_v36  ;;  %v9583_v61 = vunpack.i.h.bf16 %v6772_v29  ;;  %v5388_v40 = vunpack.i.l.bf16 %v6976_v26  ;;  %2218 = vmatmul.mubr.bf16.gmra.mrb[52].mxu0 %v1762_v45  ;;  %v9585_v25 = vmax.f32 %v9584_v52, 0.0 }
 0x1c1   : > { %v1740_v10 = vpack.c.bf16 %v1684_v53, %v1680_v37  ;;  %v9587_v56 = vmax.f32 %v9586_v3, 0.0  ;;  %5079 = vmatprep.mubr.msk.bf16.mxu0 %vm2084_vm3, %v1737_v18  ;;  %v9588_v42 = vmax.f32 %v6500_v35, 0.0  ;;  %v5397_v43 = vpop.permute.xlu0 %5396  ;;  %v9589_v13 = vunpack.i.h.bf16 %v6783_v58  ;;  %v9590_v37 = vld [vmem:[#allocation28_spill] sm:$0xff] }
 0x1c2   : > { %v1578_v22 = vsel %vm1557_vm2, %v9583_v61, %v5383_v16  ;;  %v1688_v39 = vmax.f32 %v9585_v25, %v1572_v19  ;;  %v7000_v30 = vpop.permute.xlu1 %5401  ;;  %v9591_v45 = vmax.f32 %v9590_v37, 0.0  ;;  %v9592_v19 = vmax.f32 %v6518_v38, 0.0  ;;  %v9593_v61 = vld [vmem:[#allocation30_spill] sm:$0xff] }
 0x1c3   : > { %v1692_v34 = vmax.f32 %v9587_v56, %v1575_v11  ;;  %v1685_v0 = vmax.f32 %v9588_v42, %v5364_v32  ;;  %v1581_v26 = vsel %vm1557_vm2, %v9589_v13, %v5384_v12  ;;  %v5394_v11 = vunpack.i.h.bf16 %v6974_v23 }
 0x1c4   : > { %v1696_v53 = vmax.f32 %v9591_v45, %v1578_v22  ;;  %v1681_v14 = vmax.f32 %v9592_v19, %v5363_v24  ;;  %v5393_v18 = vunpack.i.l.bf16 %v6974_v23  ;;  %v5398_v35 = vunpack.i.l.bf16 %v5397_v43 }
 0x1c5   : > { %v1744_v29 = vpack.c.bf16 %v1692_v34, %v1688_v39  ;;  %v5399_v32 = vunpack.i.h.bf16 %v5397_v43  ;;  %v9594_v52 = vmax.f32 %v9593_v61, 0.0  ;;  %v9595_v39 = vunpack.i.h.bf16 %v6808_v33  ;;  %v9597_v34 = vld [vmem:[#allocation33_spill] sm:$0xff]  ;;  %v9599_v43 = vld [vmem:[#allocation35_spill] sm:$0xff] }
 0x1c6   : > { %v9596_v3 = vunpack.i.h.bf16 %v6819_v47  ;;  %v5403_v38 = vunpack.i.l.bf16 %v7000_v30  ;;  %v5404_v24 = vunpack.i.h.bf16 %v7000_v30  ;;  %v9598_v23 = vmax.f32 %v9597_v34, 0.0  ;;  %v9603_v61 = vld [vmem:[#allocation37_spill] sm:$0xff] }
 0x1c7   : > { %v1700_v25 = vmax.f32 %v9594_v52, %v1581_v26  ;;  %v1584_v58 = vsel %vm1557_vm2, %v9595_v39, %v5388_v40  ;;  %v9600_v13 = vmax.f32 %v9599_v43, 0.0  ;;  %v1741_v26 = vpack.c.bf16 %v1685_v0, %v1681_v14 }
 0x1c8   : > { %v1587_v22 = vsel %vm1557_vm2, %v9596_v3, %v5389_v50  ;;  %v1704_v42 = vmax.f32 %v9598_v23, %v1584_v58  ;;  %v9601_v33 = vunpack.i.h.bf16 %v6854_v20  ;;  %v9602_v47 = vunpack.i.h.bf16 %v6856_v17  ;;  %2261 = vmatmul.mubr.bf16.vlgmr.msra.gmra.mrb[24].mxu0 %v1736_v28 }
 0x1c9   : > { %v1748_v56 = vpack.c.bf16 %v1700_v25, %v1696_v53  ;;  %v1708_v37 = vmax.f32 %v9600_v13, %v1587_v22  ;;  %v1596_v30 = vsel %vm1557_vm2, %v5349_v63, %v5398_v35  ;;  %v9604_v52 = vmax.f32 %v9603_v61, 0.0  ;;  %5080 = vmatprep.mubr.msk.bf16.mxu0 %vm2084_vm3, %v1741_v26  ;;  %v9624_v13 = vld [vmem:[#allocation5_spill] sm:$0xff] }
 0x1ca   : > { %v1590_v45 = vsel %vm1557_vm2, %v9601_v33, %v5393_v18  ;;  %v1593_v19 = vsel %vm1557_vm2, %v9602_v47, %v5394_v11  ;;  %v9605_v20 = vmax.f32 %v6438_v41, 0.0  ;;  %v1599_v17 = vsel %vm1557_vm2, %v5359_v54, %v5399_v32 }
 0x1cb   : > { %v1752_v53 = vpack.c.bf16 %v1708_v37, %v1704_v42  ;;  %v1712_v0 = vmax.f32 %v9604_v52, %v1590_v45  ;;  %v1720_v63 = vmax.f32 %v9606_v1, %v1596_v30  ;;  %v9607_v25 = vmax.f32 %v6504_v4, 0.0  ;;  %v9620_v42 = vld [vmem:[#allocation4_spill] sm:$0xff] }
 0x1cc   : > { %v1716_v14 = vmax.f32 %v9605_v20, %v1593_v19  ;;  %v1602_v7 = vsel %vm1557_vm2, %v5369_v8, %v5403_v38  ;;  %v1605_v41 = vsel %vm1557_vm2, %v5374_v48, %v5404_v24  ;;  %v9609_v39 = vmax.f32 %v6563_v59, 0.0 }
 0x1cd   : > { %v1724_v21 = vmax.f32 %v9607_v25, %v1599_v17  ;;  %v1728_v54 = vmax.f32 %v9608_v49, %v1602_v7  ;;  %v1689_v3 = vmax.f32 %v9610_v44, %v5378_v27  ;;  %v9611_v22 = vmax.f32 %v6574_v5, 0.0 }
 0x1ce   : > { %v1756_v28 = vpack.c.bf16 %v1716_v14, %v1712_v0  ;;  %v1693_v58 = vmax.f32 %v9609_v39, %v5379_v36  ;;  %v9612_v15 = vmax.f32 %v6566_v57, 0.0  ;;  %v9613_v60 = vmax.f32 %v6588_v6, 0.0 }
 0x1cf   : > { %v1760_v4 = vpack.c.bf16 %v1724_v21, %v1720_v63  ;;  %v1732_v2 = vmax.f32 %v9611_v22, %v1605_v41  ;;  %v9614_v5 = vmax.f32 %v6602_v31, 0.0  ;;  %v9615_v27 = vmax.f32 %v6620_v51, 0.0 }
 0x1d0   : > { %v1745_v8 = vpack.c.bf16 %v1693_v58, %v1689_v3  ;;  %2271 = vmatmul.mubr.bf16.gmra.mrb[28].mxu0 %v1740_v10  ;;  %v1701_v48 = vmax.f32 %v9612_v15, %v5384_v12  ;;  %v1697_v59 = vmax.f32 %v9613_v60, %v5383_v16  ;;  %v9616_v57 = vmax.f32 %v6605_v55, 0.0 }
 0x1d1   : > { %v1764_v34 = vpack.c.bf16 %v1732_v2, %v1728_v54  ;;  %v1709_v9 = vmax.f32 %v9614_v5, %v5389_v50  ;;  %v1705_v10 = vmax.f32 %v9615_v27, %v5388_v40  ;;  %v9617_v6 = vmax.f32 %v6623_v46, 0.0 }
 0x1d2   : > { %5081 = vmatprep.mubr.msk.bf16.mxu0 %vm2084_vm3, %v1745_v8  ;;  %v1749_v36 = vpack.c.bf16 %v1701_v48, %v1697_v59  ;;  %v1717_v62 = vmax.f32 %v9616_v57, %v5394_v11  ;;  %v9621_v51 = vmax.f32 %v9620_v42, 0.0  ;;  %v9625_v46 = vmax.f32 %v9624_v13, 0.0 }
 0x1d3   : > { %v1753_v23 = vpack.c.bf16 %v1709_v9, %v1705_v10  ;;  %v1713_v16 = vmax.f32 %v9617_v6, %v5393_v18 }
 0x1d4   : > { %v1721_v40 = vmax.f32 %v9621_v51, %v5398_v35  ;;  %v1729_v18 = vmax.f32 %v9625_v46, %v5403_v38 }
 0x1d5   : > { %v1757_v12 = vpack.c.bf16 %v1717_v62, %v1713_v16  ;;  %v5609_v16 = vld [vmem:[%s9320_s4 + $0x4] ss:$20 sps:$4 sm:$0xff]  }
 0x1d6   : > { %2739 = vmatprep.mubr.bf16.mxu1 %v5609_v16 }
 0x1d8   : > { %2281 = vmatmul.mubr.bf16.gmra.mrb[32].mxu0 %v1744_v29  ;;  %v9618_v29 = vld [vmem:[#allocation2_spill] sm:$0xff] }
 0x1d9   : > { %5082 = vmatprep.mubr.msk.bf16.mxu0 %vm2084_vm3, %v1749_v36  ;;  %v9619_v31 = vmax.f32 %v9618_v29, 0.0 }
 0x1db   : > { %v1725_v50 = vmax.f32 %v9619_v31, %v5399_v32 }
 0x1dd   : > { %v1761_v43 = vpack.c.bf16 %v1725_v50, %v1721_v40 }
 0x1e0   : > { %2291 = vmatmul.mubr.bf16.gmra.mrb[36].mxu0 %v1748_v56  ;;  %v9622_v56 = vld [vmem:[#allocation3_spill] sm:$0xff] }
 0x1e1   : > { %5083 = vmatprep.mubr.msk.bf16.mxu0 %vm2084_vm3, %v1753_v23  ;;  %v9623_v55 = vmax.f32 %v9622_v56, 0.0 }
 0x1e3   : > { %v1733_v11 = vmax.f32 %v9623_v55, %v5404_v24 }
 0x1e5   : > { %v1765_v37 = vpack.c.bf16 %v1733_v11, %v1729_v18 }
 0x1e8   : > { %2301 = vmatmul.mubr.bf16.gmra.mrb[40].mxu0 %v1752_v53 }
 0x1e9   : > { %5084 = vmatprep.mubr.msk.bf16.mxu0 %vm2084_vm3, %v1757_v12 }
 0x1f0   : > { %2311 = vmatmul.mubr.bf16.gmra.mrb[44].mxu0 %v1756_v28 }
 0x1f1   : > { %5085 = vmatprep.mubr.msk.bf16.mxu0 %vm2084_vm3, %v1761_v43 }
 0x1f8   : > { %2321 = vmatmul.mubr.bf16.gmra.mrb[48].mxu0 %v1760_v4 }
 0x1f9   : > { %5086 = vmatprep.mubr.msk.bf16.mxu0 %vm2084_vm3, %v1765_v37  ;;  %vm2630_vm3 = vcmask 916480  }
 0x200   : > { %2331 = vmatmul.mubr.bf16.gmra.mrb[52].mxu0 %v1764_v34 }
 0x201   : > { %3168 = vmatprep.mubr.bf16.mxu0 %v5609_v16 }
 0x29b   : > { %v2262_v26 = vpop.f32.mrb[24].mxu0 }
 0x29c   : > { %v2264_v32 = vpop.f32.mrb[25].mxu0 }
 0x29d   : > { %v2266_v33 = vpop.f32.mrb[26].mxu0 }
 0x29e   : > { %v7091_v45 = vpack.c.bf16 %v2266_v33, %v2262_v26  ;;  %v2268_v35 = vpop.f32.mrb[27].mxu0 }
 0x29f   : > { %v7093_v47 = vpack.c.bf16 %v2268_v35, %v2264_v32 }
 0x2a0   : > { %2373 = vrot.lane.b32.xlu0 %v7091_v45, %s5652_s19 }
 0x2a1   : > { %2707 = vmatprep.subr.bf16.mxu1 %v7093_v47  ;;  %2375 = vrot.lane.b32.xlu1 %v7093_v47, %s5652_s19 }
 0x2a2   : > { %2708 = vmatpush1.bf16.msra.mxu1 %v7091_v45 }
 0x2a3   : > { %v2272_v38 = vpop.f32.mrb[28].mxu0 }
 0x2a4   : > { %2388 = vrot.lane.b32.xlu0 %v7091_v45, %s5653_s25  ;;  %v2274_v24 = vpop.f32.mrb[29].mxu0 }
 0x2a5   : > { %v2276_v19 = vpop.f32.mrb[30].mxu0  ;;  %2390 = vrot.lane.b32.xlu1 %v7093_v47, %s5653_s25 }
 0x2a6   : > { %v7105_v30 = vpack.c.bf16 %v2276_v19, %v2272_v38  ;;  %v2278_v53 = vpop.f32.mrb[31].mxu0 }
 0x2a7   : > { %v7107_v61 = vpack.c.bf16 %v2278_v53, %v2274_v24 }
 0x2a8   : > { %2403 = vrot.lane.b32.xlu0 %v7091_v45, %s5654_s26 }
 0x2a9   : > { %2709 = vmatprep.subr.bf16.mxu1 %v7107_v61  ;;  %2405 = vrot.lane.b32.xlu1 %v7093_v47, %s5654_s26 }
 0x2aa   : > { %2710 = vmatpush1.bf16.msra.mxu1 %v7105_v30 }
 0x2ab   : > { %v2282_v52 = vpop.f32.mrb[32].mxu0 }
 0x2ac   : > { %2418 = vrot.lane.b32.xlu0 %v7091_v45, %s5655_s27  ;;  %v2284_v0 = vpop.f32.mrb[33].mxu0 }
 0x2ad   : > { %v2286_v20 = vpop.f32.mrb[34].mxu0  ;;  %2420 = vrot.lane.b32.xlu1 %v7093_v47, %s5655_s27 }
 0x2ae   : > { %v7119_v14 = vpack.c.bf16 %v2286_v20, %v2282_v52  ;;  %v2288_v17 = vpop.f32.mrb[35].mxu0 }
 0x2af   : > { %v7121_v1 = vpack.c.bf16 %v2288_v17, %v2284_v0 }
 0x2b0   : > { %2433 = vrot.lane.b32.xlu0 %v7091_v45, %s5656_s28 }
 0x2b1   : > { %3136 = vmatprep.subr.bf16.mxu0 %v7121_v1  ;;  %2435 = vrot.lane.b32.xlu1 %v7093_v47, %s5656_s28 }
 0x2b2   : > { %3137 = vmatpush1.bf16.msra.mxu0 %v7119_v14 }
 0x2b3   : > { %v2292_v63 = vpop.f32.mrb[36].mxu0 }
 0x2b4   : > { %2448 = vrot.lane.b32.xlu0 %v7091_v45, %s5657_s29  ;;  %v2294_v25 = vpop.f32.mrb[37].mxu0 }
 0x2b5   : > { %v2296_v21 = vpop.f32.mrb[38].mxu0  ;;  %2450 = vrot.lane.b32.xlu1 %v7093_v47, %s5657_s29 }
 0x2b6   : > { %v7133_v7 = vpack.c.bf16 %v2296_v21, %v2292_v63  ;;  %v2298_v28 = vpop.f32.mrb[39].mxu0 }
 0x2b7   : > { %v7135_v41 = vpack.c.bf16 %v2298_v28, %v2294_v25 }
 0x2b8   : > { %2463 = vrot.lane.b32.xlu0 %v7091_v45, %s5658_s23 }
 0x2b9   : > { %3138 = vmatprep.subr.bf16.mxu0 %v7135_v41  ;;  %2465 = vrot.lane.b32.xlu1 %v7093_v47, %s5658_s23 }
 0x2ba   : > { %3139 = vmatpush1.bf16.msra.mxu0 %v7133_v7 }
 0x2bb   : > { %v2302_v49 = vpop.f32.mrb[40].mxu0 }
 0x2bc   : > { %2478 = vrot.lane.b32.xlu0 %v7091_v45, %s5659_s11  ;;  %v2304_v54 = vpop.f32.mrb[41].mxu0 }
 0x2bd   : > { %v2306_v39 = vpop.f32.mrb[42].mxu0  ;;  %2480 = vrot.lane.b32.xlu1 %v7093_v47, %s5659_s11 }
 0x2be   : > { %v7147_v58 = vpack.c.bf16 %v2306_v39, %v2302_v49  ;;  %v2308_v44 = vpop.f32.mrb[43].mxu0 }
 0x2bf   : > { %v7149_v3 = vpack.c.bf16 %v2308_v44, %v2304_v54 }
 0x2c0   : > { %9626 = vst [vmem:[#allocation12_spill] sm:$0xff] %v7147_v58  ;;  %2493 = vrot.lane.b32.xlu0 %v7091_v45, %s5660_s12 }
 0x2c1   : > { %9627 = vst [vmem:[#allocation6_spill] sm:$0xff] %v7149_v3  ;;  %2495 = vrot.lane.b32.xlu1 %v7093_v47, %s5660_s12 }
 0x2c3   : > { %v2312_v4 = vpop.f32.mrb[44].mxu0 }
 0x2c4   : > { %2508 = vrot.lane.b32.xlu0 %v7091_v45, %s5661_s13  ;;  %v2314_v22 = vpop.f32.mrb[45].mxu0 }
 0x2c5   : > { %v2316_v2 = vpop.f32.mrb[46].mxu0  ;;  %2510 = vrot.lane.b32.xlu1 %v7093_v47, %s5661_s13 }
 0x2c6   : > { %v7159_v34 = vpack.c.bf16 %v2316_v2, %v2312_v4  ;;  %v2318_v8 = vpop.f32.mrb[47].mxu0 }
 0x2c7   : > { %v7161_v15 = vpack.c.bf16 %v2318_v8, %v2314_v22 }
 0x2c8   : > { %9628 = vst [vmem:[#allocation8_spill] sm:$0xff] %v7159_v34  ;;  %2523 = vrot.lane.b32.xlu0 %v7091_v45, %s5662_s14 }
 0x2c9   : > { %2525 = vrot.lane.b32.xlu1 %v7093_v47, %s5662_s14 }
 0x2cb   : > { %v2322_v48 = vpop.f32.mrb[48].mxu0 }
 0x2cc   : > { %2538 = vrot.lane.b32.xlu0 %v7091_v45, %s5663_s15  ;;  %v2324_v60 = vpop.f32.mrb[49].mxu0 }
 0x2cd   : > { %v2326_v59 = vpop.f32.mrb[50].mxu0  ;;  %2540 = vrot.lane.b32.xlu1 %v7093_v47, %s5663_s15 }
 0x2ce   : > { %v7171_v36 = vpack.c.bf16 %v2326_v59, %v2322_v48  ;;  %v2328_v5 = vpop.f32.mrb[51].mxu0 }
 0x2cf   : > { %v7173_v9 = vpack.c.bf16 %v2328_v5, %v2324_v60 }
 0x2d0   : > { %2553 = vrot.lane.b32.xlu0 %v7091_v45, %s5664_s16 }
 0x2d1   : > { %2555 = vrot.lane.b32.xlu1 %v7093_v47, %s5664_s16 }
 0x2d3   : > { %v2332_v27 = vpop.f32.mrb[52].mxu0 }
 0x2d4   : > { %2568 = vrot.lane.b32.xlu0 %v7091_v45, %s5665_s17  ;;  %v2334_v10 = vpop.f32.mrb[53].mxu0 }
 0x2d5   : > { %2570 = vrot.lane.b32.xlu1 %v7093_v47, %s5665_s17  ;;  %v2336_v23 = vpop.f32.mrb[54].mxu0 }
 0x2d6   : > { %v7183_v57 = vpack.c.bf16 %v2336_v23, %v2332_v27  ;;  %v2338_v62 = vpop.f32.mrb[55].mxu0 }
 0x2d7   : > { %v7185_v6 = vpack.c.bf16 %v2338_v62, %v2334_v10 }
 0x2d8   : > { %2583 = vrot.lane.b32.xlu0 %v7091_v45, %s5666_s18 }
 0x2d9   : > { %2585 = vrot.lane.b32.xlu1 %v7093_v47, %s5666_s18 }
 0x2dc   : > { %2598 = vrot.lane.b32.xlu0 %v7091_v45, %s5667_s20 }
 0x2dd   : > { %2600 = vrot.lane.b32.xlu1 %v7093_v47, %s5667_s20 }
 0x2e0   : > { %2377 = vrot.lane.b32.xlu0 %v7105_v30, %s5652_s19 }
 0x2e1   : > { %2379 = vrot.lane.b32.xlu1 %v7107_v61, %s5652_s19 }
 0x2e4   : > { %2392 = vrot.lane.b32.xlu0 %v7105_v30, %s5653_s25 }
 0x2e5   : > { %2394 = vrot.lane.b32.xlu1 %v7107_v61, %s5653_s25 }
 0x2e8   : > { %2407 = vrot.lane.b32.xlu0 %v7105_v30, %s5654_s26 }
 0x2e9   : > { %2409 = vrot.lane.b32.xlu1 %v7107_v61, %s5654_s26 }
 0x2ec   : > { %2422 = vrot.lane.b32.xlu0 %v7105_v30, %s5655_s27 }
 0x2ed   : > { %2424 = vrot.lane.b32.xlu1 %v7107_v61, %s5655_s27 }
 0x2f0   : > { %2437 = vrot.lane.b32.xlu0 %v7105_v30, %s5656_s28 }
 0x2f1   : > { %2439 = vrot.lane.b32.xlu1 %v7107_v61, %s5656_s28 }
 0x2f4   : > { %2452 = vrot.lane.b32.xlu0 %v7105_v30, %s5657_s29 }
 0x2f5   : > { %2454 = vrot.lane.b32.xlu1 %v7107_v61, %s5657_s29 }
 0x2f8   : > { %2467 = vrot.lane.b32.xlu0 %v7105_v30, %s5658_s23 }
 0x2f9   : > { %2469 = vrot.lane.b32.xlu1 %v7107_v61, %s5658_s23 }
 0x2fc   : > { %2482 = vrot.lane.b32.xlu0 %v7105_v30, %s5659_s11 }
 0x2fd   : > { %2484 = vrot.lane.b32.xlu1 %v7107_v61, %s5659_s11 }
 0x300   : > { %2497 = vrot.lane.b32.xlu0 %v7105_v30, %s5660_s12 }
 0x301   : > { %2499 = vrot.lane.b32.xlu1 %v7107_v61, %s5660_s12 }
 0x304   : > { %2512 = vrot.lane.b32.xlu0 %v7105_v30, %s5661_s13 }
 0x305   : > { %2514 = vrot.lane.b32.xlu1 %v7107_v61, %s5661_s13 }
 0x308   : > { %2527 = vrot.lane.b32.xlu0 %v7105_v30, %s5662_s14 }
 0x309   : > { %2529 = vrot.lane.b32.xlu1 %v7107_v61, %s5662_s14 }
 0x30c   : > { %2542 = vrot.lane.b32.xlu0 %v7105_v30, %s5663_s15 }
 0x30d   : > { %2544 = vrot.lane.b32.xlu1 %v7107_v61, %s5663_s15 }
 0x310   : > { %2557 = vrot.lane.b32.xlu0 %v7105_v30, %s5664_s16 }
 0x311   : > { %2559 = vrot.lane.b32.xlu1 %v7107_v61, %s5664_s16 }
 0x312   : > { %v2374_v12 = vpop.permute.xlu0 %2373 }
 0x313   : > { %v7250_v29 = vpop.permute.xlu1 %2375 }
 0x314   : > { %2572 = vrot.lane.b32.xlu0 %v7105_v30, %s5665_s17  ;;  %2711 = vmatprep.subr.bf16.mxu1 %v7250_v29  ;;  %v7257_v31 = vsel %vm1557_vm2, %v2374_v12, %v7250_v29 }
 0x315   : > { %2574 = vrot.lane.b32.xlu1 %v7107_v61, %s5665_s17  ;;  %2712 = vmatpush1.bf16.msra.mxu1 %v7257_v31 }
 0x316   : > { %v7262_v50 = vpop.permute.xlu0 %2388 }
 0x317   : > { %v7264_v42 = vpop.permute.xlu1 %2390 }
 0x318   : > { %2587 = vrot.lane.b32.xlu0 %v7105_v30, %s5666_s18  ;;  %v7402_v44 = vsel %vm2396_vm4, %v7262_v50, %v7264_v42 }
 0x319   : > { %2589 = vrot.lane.b32.xlu1 %v7107_v61, %s5666_s18 }
 0x31a   : > { %v7270_v51 = vpop.permute.xlu0 %2403 }
 0x31b   : > { %v7272_v40 = vpop.permute.xlu1 %2405 }
 0x31c   : > { %2602 = vrot.lane.b32.xlu0 %v7105_v30, %s5667_s20 }
 0x31d   : > { %2604 = vrot.lane.b32.xlu1 %v7107_v61, %s5667_s20 }
 0x31e   : > { %v7278_v43 = vpop.permute.xlu0 %2418 }
 0x31f   : > { %v7280_v56 = vpop.permute.xlu1 %2420 }
 0x320   : > { %2870 = vrot.lane.b32.xlu0 %v7119_v14, %s5652_s19  ;;  %v2427_v10 = vsel %vm2426_vm6, %v7278_v43, %v7280_v56 }
 0x321   : > { %2872 = vrot.lane.b32.xlu1 %v7121_v1, %s5652_s19 }
 0x322   : > { %v7286_v55 = vpop.permute.xlu0 %2433 }
 0x323   : > { %v7288_v11 = vpop.permute.xlu1 %2435 }
 0x324   : > { %2884 = vrot.lane.b32.xlu0 %v7119_v14, %s5653_s25 }
 0x325   : > { %2886 = vrot.lane.b32.xlu1 %v7121_v1, %s5653_s25 }
 0x326   : > { %v7294_v13 = vpop.permute.xlu0 %2448 }
 0x327   : > { %v7296_v46 = vpop.permute.xlu1 %2450 }
 0x328   : > { %2898 = vrot.lane.b32.xlu0 %v7119_v14, %s5654_s26 }
 0x329   : > { %2900 = vrot.lane.b32.xlu1 %v7121_v1, %s5654_s26 }
 0x32a   : > { %v7302_v18 = vpop.permute.xlu0 %2463 }
 0x32b   : > { %v7304_v37 = vpop.permute.xlu1 %2465 }
 0x32c   : > { %2912 = vrot.lane.b32.xlu0 %v7119_v14, %s5655_s27 }
 0x32d   : > { %2914 = vrot.lane.b32.xlu1 %v7121_v1, %s5655_s27 }
 0x32e   : > { %v7310_v26 = vpop.permute.xlu0 %2478 }
 0x32f   : > { %v7312_v32 = vpop.permute.xlu1 %2480 }
 0x330   : > { %2926 = vrot.lane.b32.xlu0 %v7119_v14, %s5656_s28 }
 0x331   : > { %2928 = vrot.lane.b32.xlu1 %v7121_v1, %s5656_s28 }
 0x332   : > { %v7318_v33 = vpop.permute.xlu0 %2493 }
 0x333   : > { %v7320_v45 = vpop.permute.xlu1 %2495 }
 0x334   : > { %2940 = vrot.lane.b32.xlu0 %v7119_v14, %s5657_s29 }
 0x335   : > { %2942 = vrot.lane.b32.xlu1 %v7121_v1, %s5657_s29 }
 0x336   : > { %v7326_v35 = vpop.permute.xlu0 %2508 }
 0x337   : > { %v7328_v47 = vpop.permute.xlu1 %2510 }
 0x338   : > { %2954 = vrot.lane.b32.xlu0 %v7119_v14, %s5658_s23 }
 0x339   : > { %2956 = vrot.lane.b32.xlu1 %v7121_v1, %s5658_s23 }
 0x33a   : > { %v7334_v38 = vpop.permute.xlu0 %2523 }
 0x33b   : > { %v7336_v24 = vpop.permute.xlu1 %2525 }
 0x33c   : > { %2968 = vrot.lane.b32.xlu0 %v7119_v14, %s5659_s11 }
 0x33d   : > { %2970 = vrot.lane.b32.xlu1 %v7121_v1, %s5659_s11 }
 0x33e   : > { %v7342_v19 = vpop.permute.xlu0 %2538 }
 0x33f   : > { %v7344_v30 = vpop.permute.xlu1 %2540 }
 0x340   : > { %2982 = vrot.lane.b32.xlu0 %v7119_v14, %s5660_s12 }
 0x341   : > { %2984 = vrot.lane.b32.xlu1 %v7121_v1, %s5660_s12 }
 0x342   : > { %v7350_v53 = vpop.permute.xlu0 %2553 }
 0x343   : > { %v7352_v61 = vpop.permute.xlu1 %2555 }
 0x344   : > { %2996 = vrot.lane.b32.xlu0 %v7119_v14, %s5661_s13 }
 0x345   : > { %2998 = vrot.lane.b32.xlu1 %v7121_v1, %s5661_s13 }
 0x346   : > { %v7358_v52 = vpop.permute.xlu0 %2568 }
 0x347   : > { %v7360_v0 = vpop.permute.xlu1 %2570 }
 0x348   : > { %3010 = vrot.lane.b32.xlu0 %v7119_v14, %s5662_s14 }
 0x349   : > { %3012 = vrot.lane.b32.xlu1 %v7121_v1, %s5662_s14 }
 0x34a   : > { %v7366_v20 = vpop.permute.xlu0 %2583 }
 0x34b   : > { %v7368_v17 = vpop.permute.xlu1 %2585 }
 0x34c   : > { %3024 = vrot.lane.b32.xlu0 %v7119_v14, %s5663_s15 }
 0x34d   : > { %3026 = vrot.lane.b32.xlu1 %v7121_v1, %s5663_s15 }
 0x34e   : > { %v7374_v63 = vpop.permute.xlu0 %2598 }
 0x34f   : > { %v7376_v25 = vpop.permute.xlu1 %2600 }
 0x350   : > { %3038 = vrot.lane.b32.xlu0 %v7119_v14, %s5664_s16 }
 0x351   : > { %3040 = vrot.lane.b32.xlu1 %v7121_v1, %s5664_s16 }
 0x352   : > { %v2378_v21 = vpop.permute.xlu0 %2377 }
 0x353   : > { %v7382_v28 = vpop.permute.xlu1 %2379 }
 0x354   : > { %3052 = vrot.lane.b32.xlu0 %v7119_v14, %s5665_s17  ;;  %2713 = vmatprep.subr.bf16.mxu1 %v7382_v28  ;;  %v7389_v49 = vsel %vm1557_vm2, %v2378_v21, %v7382_v28 }
 0x355   : > { %3054 = vrot.lane.b32.xlu1 %v7121_v1, %s5665_s17  ;;  %2714 = vmatpush1.bf16.msra.mxu1 %v7389_v49 }
 0x356   : > { %v2393_v54 = vpop.permute.xlu0 %2392  ;;  %2715 = vmatprep.subr.bf16.mxu1 %v7264_v42 }
 0x357   : > { %v7395_v39 = vpop.permute.xlu1 %2394 }
 0x358   : > { %3066 = vrot.lane.b32.xlu0 %v7119_v14, %s5666_s18  ;;  %v7414_v2 = vsel %vm2396_vm4, %v2393_v54, %v7395_v39  ;;  %v2457_v54 = vsel %vm2456_vm8, %v7294_v13, %v7296_v46 }
 0x359   : > { %3068 = vrot.lane.b32.xlu1 %v7121_v1, %s5666_s18  ;;  %2716 = vmatpush1.bf16.msra.mxu1 %v7402_v44 }
 0x35a   : > { %v2408_v4 = vpop.permute.xlu0 %2407  ;;  %2717 = vmatprep.subr.bf16.mxu1 %v7395_v39 }
 0x35b   : > { %v7408_v22 = vpop.permute.xlu1 %2409 }
 0x35c   : > { %3080 = vrot.lane.b32.xlu0 %v7119_v14, %s5667_s20  ;;  %v7425_v14 = vsel %vm2411_vm5, %v7270_v51, %v7272_v40  ;;  %v7435_v59 = vsel %vm2411_vm5, %v2408_v4, %v7408_v22  ;;  %v2442_v51 = vsel %vm2441_vm7, %v7286_v55, %v7288_v11 }
 0x35d   : > { %3082 = vrot.lane.b32.xlu1 %v7121_v1, %s5667_s20  ;;  %2718 = vmatpush1.bf16.msra.mxu1 %v7414_v2 }
 0x35e   : > { %v2423_v8 = vpop.permute.xlu0 %2422  ;;  %2719 = vmatprep.subr.bf16.mxu1 %v7272_v40 }
 0x35f   : > { %v2425_v48 = vpop.permute.xlu1 %2424 }
 0x360   : > { %2874 = vrot.lane.b32.xlu0 %v7133_v7, %s5652_s19  ;;  %v2428_v16 = vsel %vm2426_vm6, %v2423_v8, %v2425_v48 }
 0x361   : > { %2876 = vrot.lane.b32.xlu1 %v7135_v41, %s5652_s19  ;;  %2720 = vmatpush1.bf16.msra.mxu1 %v7425_v14 }
 0x362   : > { %v2438_v1 = vpop.permute.xlu0 %2437  ;;  %2721 = vmatprep.subr.bf16.mxu1 %v7408_v22 }
 0x363   : > { %v2440_v60 = vpop.permute.xlu1 %2439 }
 0x364   : > { %2888 = vrot.lane.b32.xlu0 %v7133_v7, %s5653_s25  ;;  %v2443_v21 = vsel %vm2441_vm7, %v2438_v1, %v2440_v60  ;;  %v2472_v1 = vsel %vm2471_vm9, %v7302_v18, %v7304_v37 }
 0x365   : > { %2890 = vrot.lane.b32.xlu1 %v7135_v41, %s5653_s25  ;;  %2722 = vmatpush1.bf16.msra.mxu1 %v7435_v59 }
 0x366   : > { %v2453_v5 = vpop.permute.xlu0 %2452  ;;  %2723 = vmatprep.subr.bf16.mxu1 %v7280_v56 }
 0x367   : > { %v2455_v27 = vpop.permute.xlu1 %2454 }
 0x368   : > { %2902 = vrot.lane.b32.xlu0 %v7133_v7, %s5654_s26 }
 0x369   : > { %2904 = vrot.lane.b32.xlu1 %v7135_v41, %s5654_s26  ;;  %2724 = vmatpush1.bf16.msra.mxu1 %v2427_v10  ;;  %v7513_v10 = vld [vmem:[%s9320_s4] ss:$20 sps:$4 sm:$0xff]  }
 0x36a   : > { %v2468_v23 = vpop.permute.xlu0 %2467  ;;  %2725 = vmatprep.subr.bf16.mxu1 %v2425_v48  ;;  %v2458_v48 = vsel %vm2456_vm8, %v2453_v5, %v2455_v27 }
 0x36b   : > { %v2470_v62 = vpop.permute.xlu1 %2469 }
 0x36c   : > { %2916 = vrot.lane.b32.xlu0 %v7133_v7, %s5655_s27 }
 0x36d   : > { %2918 = vrot.lane.b32.xlu1 %v7135_v41, %s5655_s27  ;;  %2726 = vmatpush1.bf16.msra.mxu1 %v2428_v16 }
 0x36e   : > { %v2483_v12 = vpop.permute.xlu0 %2482  ;;  %2727 = vmatprep.subr.bf16.mxu1 %v7288_v11 }
 0x36f   : > { %v2485_v50 = vpop.permute.xlu1 %2484 }
 0x370   : > { %2930 = vrot.lane.b32.xlu0 %v7133_v7, %s5656_s28 }
 0x371   : > { %2932 = vrot.lane.b32.xlu1 %v7135_v41, %s5656_s28  ;;  %2728 = vmatpush1.bf16.msra.mxu1 %v2442_v51 }
 0x372   : > { %v7461_v43 = vpop.permute.xlu0 %2497  ;;  %2729 = vmatprep.subr.bf16.mxu1 %v2440_v60 }
 0x373   : > { %v7463_v56 = vpop.permute.xlu1 %2499 }
 0x374   : > { %2944 = vrot.lane.b32.xlu0 %v7133_v7, %s5657_s29 }
 0x375   : > { %2946 = vrot.lane.b32.xlu1 %v7135_v41, %s5657_s29  ;;  %2730 = vmatpush1.bf16.msra.mxu1 %v2443_v21  ;;  %v2488_v21 = vsel %vm2486_vm10, %v2483_v12, %v2485_v50 }
 0x376   : > { %v7470_v55 = vpop.permute.xlu0 %2512  ;;  %2731 = vmatprep.subr.bf16.mxu1 %v7296_v46 }
 0x377   : > { %v7473_v11 = vpop.permute.xlu1 %2514 }
 0x378   : > { %2958 = vrot.lane.b32.xlu0 %v7133_v7, %s5658_s23 }
 0x379   : > { %2960 = vrot.lane.b32.xlu1 %v7135_v41, %s5658_s23  ;;  %2732 = vmatpush1.bf16.msra.mxu1 %v2457_v54  ;;  %v7556_v54 = vld [vmem:[%s9320_s4 + $0xc] ss:$20 sps:$4 sm:$0xff]  }
 0x37a   : > { %v7482_v4 = vpop.permute.xlu0 %2527  ;;  %2733 = vmatprep.subr.bf16.mxu1 %v2455_v27  ;;  %v2473_v27 = vsel %vm2471_vm9, %v2468_v23, %v2470_v62 }
 0x37b   : > { %v7484_v8 = vpop.permute.xlu1 %2529 }
 0x37c   : > { %2972 = vrot.lane.b32.xlu0 %v7133_v7, %s5659_s11 }
 0x37d   : > { %2974 = vrot.lane.b32.xlu1 %v7135_v41, %s5659_s11  ;;  %2734 = vmatpush1.bf16.msra.mxu1 %v2458_v48 }
 0x37e   : > { %v7491_v13 = vpop.permute.xlu0 %2542  ;;  %2735 = vmatprep.subr.bf16.mxu1 %v7304_v37  ;;  %v7523_v37 = vld [vmem:[%s9320_s4 + $0x2c] ss:$20 sps:$4 sm:$0xff]  }
 0x37f   : > { %v7494_v46 = vpop.permute.xlu1 %2544 }
 0x380   : > { %2986 = vrot.lane.b32.xlu0 %v7133_v7, %s5660_s12 }
 0x381   : > { %2988 = vrot.lane.b32.xlu1 %v7135_v41, %s5660_s12  ;;  %2736 = vmatpush1.bf16.msra.mxu1 %v2472_v1 }
 0x382   : > { %v7503_v60 = vpop.permute.xlu0 %2557  ;;  %2737 = vmatprep.subr.bf16.mxu1 %v2470_v62  ;;  %v2487_v62 = vsel %vm2486_vm10, %v7310_v26, %v7312_v32  ;;  %v7546_v26 = vld [vmem:[%s9320_s4 + $0x28] ss:$20 sps:$4 sm:$0xff]  }
 0x383   : > { %v7505_v5 = vpop.permute.xlu1 %2559 }
 0x384   : > { %3000 = vrot.lane.b32.xlu0 %v7133_v7, %s5661_s13 }
 0x385   : > { %3002 = vrot.lane.b32.xlu1 %v7135_v41, %s5661_s13  ;;  %2738 = vmatpush1.bf16.msra.mxu1 %v2473_v27 }
 0x386   : > { %v7517_v18 = vpop.permute.xlu0 %2572  ;;  %2760 = vmatprep.subr.bf16.mxu1 %v7312_v32 }
 0x387   : > { %v7525_v23 = vpop.permute.xlu1 %2574 }
 0x388   : > { %3014 = vrot.lane.b32.xlu0 %v7133_v7, %s5662_s14  ;;  %2740 = vmatmul.mubr.bf16.vlgmr.msra.gmra.mrb[40].mxu1 %v7513_v10 }
 0x389   : > { %3016 = vrot.lane.b32.xlu1 %v7135_v41, %s5662_s14  ;;  %2761 = vmatpush1.bf16.msra.mxu1 %v2487_v62 }
 0x38a   : > { %v7535_v16 = vpop.permute.xlu0 %2587  ;;  %2762 = vmatprep.subr.bf16.mxu1 %v2485_v50  ;;  %2749 = vmatprep.mubr.bf16.mxu1 %v7523_v37  ;;  %v2502_v50 = vsel %vm2501_vm11, %v7318_v33, %v7320_v45  ;;  %v2503_v33 = vsel %vm2501_vm11, %v7461_v43, %v7463_v56  ;;  %v2517_v43 = vsel %vm2516_vm12, %v7326_v35, %v7328_v47 }
 0x38b   : > { %v7538_v51 = vpop.permute.xlu1 %2589 }
 0x38c   : > { %3028 = vrot.lane.b32.xlu0 %v7133_v7, %s5663_s15 }
 0x38d   : > { %3030 = vrot.lane.b32.xlu1 %v7135_v41, %s5663_s15  ;;  %2763 = vmatpush1.bf16.msra.mxu1 %v2488_v21 }
 0x38e   : > { %v7550_v32 = vpop.permute.xlu0 %2602  ;;  %2764 = vmatprep.subr.bf16.mxu1 %v7320_v45 }
 0x38f   : > { %v7558_v12 = vpop.permute.xlu1 %2604 }
 0x390   : > { %3042 = vrot.lane.b32.xlu0 %v7133_v7, %s5664_s16  ;;  %2750 = vmatmul.mubr.bf16.gmra.mrb[44].mxu1 %v7546_v26 }
 0x391   : > { %3044 = vrot.lane.b32.xlu1 %v7135_v41, %s5664_s16  ;;  %2765 = vmatpush1.bf16.msra.mxu1 %v2502_v50  ;;  %v2518_v50 = vsel %vm2516_vm12, %v7470_v55, %v7473_v11 }
 0x392   : > { %v2871_v48 = vpop.permute.xlu0 %2870  ;;  %2766 = vmatprep.subr.bf16.mxu1 %v7463_v56  ;;  %2792 = vmatprep.mubr.bf16.mxu1 %v7556_v54 }
 0x393   : > { %v7570_v1 = vpop.permute.xlu1 %2872 }
 0x394   : > { %3056 = vrot.lane.b32.xlu0 %v7133_v7, %s5665_s17  ;;  %3140 = vmatprep.subr.bf16.mxu0 %v7570_v1  ;;  %v7580_v45 = vsel %vm1557_vm2, %v2871_v48, %v7570_v1  ;;  %v2547_v48 = vsel %vm2546_vm14, %v7342_v19, %v7344_v30 }
 0x395   : > { %3058 = vrot.lane.b32.xlu1 %v7135_v41, %s5665_s17  ;;  %2767 = vmatpush1.bf16.msra.mxu1 %v2503_v33  ;;  %v2548_v33 = vsel %vm2546_vm14, %v7491_v13, %v7494_v46 }
 0x396   : > { %3141 = vmatpush1.bf16.msra.mxu0 %v7580_v45  ;;  %v7585_v27 = vpop.permute.xlu0 %2884  ;;  %2768 = vmatprep.subr.bf16.mxu1 %v7328_v47 }
 0x397   : > { %v7588_v62 = vpop.permute.xlu1 %2886 }
 0x398   : > { %3070 = vrot.lane.b32.xlu0 %v7133_v7, %s5666_s18 }
 0x399   : > { %3072 = vrot.lane.b32.xlu1 %v7135_v41, %s5666_s18  ;;  %2769 = vmatpush1.bf16.msra.mxu1 %v2517_v43  ;;  %v2562_v43 = vsel %vm2561_vm15, %v7350_v53, %v7352_v61 }
 0x39a   : > { %v7597_v56 = vpop.permute.xlu0 %2898  ;;  %2770 = vmatprep.subr.bf16.mxu1 %v7473_v11  ;;  %v2533_v11 = vsel %vm2531_vm13, %v7482_v4, %v7484_v8 }
 0x39b   : > { %v7600_v21 = vpop.permute.xlu1 %2900 }
 0x39c   : > { %9629 = vst [vmem:[#allocation10_spill] sm:$0xff] %v7600_v21  ;;  %3084 = vrot.lane.b32.xlu0 %v7133_v7, %s5667_s20  ;;  %v2532_v7 = vsel %vm2531_vm13, %v7334_v38, %v7336_v24 }
 0x39d   : > { %3086 = vrot.lane.b32.xlu1 %v7135_v41, %s5667_s20  ;;  %2771 = vmatpush1.bf16.msra.mxu1 %v2518_v50  ;;  %v2563_v50 = vsel %vm2561_vm15, %v7503_v60, %v7505_v5 }
 0x39e   : > { %v7609_v35 = vpop.permute.xlu0 %2912  ;;  %2772 = vmatprep.subr.bf16.mxu1 %v7336_v24 }
 0x39f   : > { %v7612_v47 = vpop.permute.xlu1 %2914 }
 0x3a0   : > { %3299 = vrot.lane.b32.xlu0 %v7147_v58, %s5652_s19 }
 0x3a1   : > { %3301 = vrot.lane.b32.xlu1 %v7149_v3, %s5652_s19  ;;  %2773 = vmatpush1.bf16.msra.mxu1 %v2532_v7  ;;  %v2577_v7 = vsel %vm2576_vm0, %v7358_v52, %v7360_v0 }
 0x3a2   : > { %v7621_v41 = vpop.permute.xlu0 %2926  ;;  %2774 = vmatprep.subr.bf16.mxu1 %v7484_v8 }
 0x3a3   : > { %v7624_v55 = vpop.permute.xlu1 %2928 }
 0x3a4   : > { %3313 = vrot.lane.b32.xlu0 %v7147_v58, %s5653_s25 }
 0x3a5   : > { %3315 = vrot.lane.b32.xlu1 %v7149_v3, %s5653_s25  ;;  %2775 = vmatpush1.bf16.msra.mxu1 %v2533_v11  ;;  %v2578_v11 = vsel %vm2576_vm0, %v7517_v18, %v7525_v23 }
 0x3a6   : > { %v7633_v38 = vpop.permute.xlu0 %2940  ;;  %2776 = vmatprep.subr.bf16.mxu1 %v7344_v30 }
 0x3a7   : > { %v7636_v24 = vpop.permute.xlu1 %2942 }
 0x3a8   : > { %3327 = vrot.lane.b32.xlu0 %v7147_v58, %s5654_s26 }
 0x3a9   : > { %3329 = vrot.lane.b32.xlu1 %v7149_v3, %s5654_s26  ;;  %2777 = vmatpush1.bf16.msra.mxu1 %v2547_v48  ;;  %v2592_v48 = vsel %vm2591_vm1, %v7366_v20, %v7368_v17  ;;  %v7730_v20 = vld [vmem:[%s9320_s4 + $0x8] ss:$20 sps:$4 sm:$0xff]  }
 0x3aa   : > { %v7645_v4 = vpop.permute.xlu0 %2954  ;;  %2778 = vmatprep.subr.bf16.mxu1 %v7494_v46 }
 0x3ab   : > { %v7648_v8 = vpop.permute.xlu1 %2956 }
 0x3ac   : > { %3341 = vrot.lane.b32.xlu0 %v7147_v58, %s5655_s27 }
 0x3ad   : > { %3343 = vrot.lane.b32.xlu1 %v7149_v3, %s5655_s27  ;;  %2779 = vmatpush1.bf16.msra.mxu1 %v2548_v33  ;;  %v2593_v33 = vsel %vm2591_vm1, %v7535_v16, %v7538_v51  ;;  %v2631_v16 = vsel %vm2630_vm3, %v7374_v63, %v7376_v25 }
 0x3ae   : > { %v7657_v19 = vpop.permute.xlu0 %2968  ;;  %2780 = vmatprep.subr.bf16.mxu1 %v7352_v61 }
 0x3af   : > { %v7660_v30 = vpop.permute.xlu1 %2970 }
 0x3b0   : > { %3355 = vrot.lane.b32.xlu0 %v7147_v58, %s5656_s28 }
 0x3b1   : > { %3357 = vrot.lane.b32.xlu1 %v7149_v3, %s5656_s28  ;;  %2781 = vmatpush1.bf16.msra.mxu1 %v2562_v43 }
 0x3b2   : > { %v7669_v13 = vpop.permute.xlu0 %2982  ;;  %2782 = vmatprep.subr.bf16.mxu1 %v7505_v5 }
 0x3b3   : > { %v7672_v46 = vpop.permute.xlu1 %2984 }
 0x3b4   : > { %3369 = vrot.lane.b32.xlu0 %v7147_v58, %s5657_s29 }
 0x3b5   : > { %3371 = vrot.lane.b32.xlu1 %v7149_v3, %s5657_s29  ;;  %2783 = vmatpush1.bf16.msra.mxu1 %v2563_v50 }
 0x3b6   : > { %v7681_v53 = vpop.permute.xlu0 %2996  ;;  %2784 = vmatprep.subr.bf16.mxu1 %v7360_v0 }
 0x3b7   : > { %v7684_v61 = vpop.permute.xlu1 %2998 }
 0x3b8   : > { %3383 = vrot.lane.b32.xlu0 %v7147_v58, %s5658_s23 }
 0x3b9   : > { %3385 = vrot.lane.b32.xlu1 %v7149_v3, %s5658_s23  ;;  %2785 = vmatpush1.bf16.msra.mxu1 %v2577_v7  ;;  %v2632_v7 = vsel %vm2630_vm3, %v7550_v32, %v7558_v12 }
 0x3ba   : > { %v7693_v60 = vpop.permute.xlu0 %3010  ;;  %2786 = vmatprep.subr.bf16.mxu1 %v7525_v23 }
 0x3bb   : > { %v7696_v5 = vpop.permute.xlu1 %3012 }
 0x3bc   : > { %3397 = vrot.lane.b32.xlu0 %v7147_v58, %s5659_s11 }
 0x3bd   : > { %3399 = vrot.lane.b32.xlu1 %v7149_v3, %s5659_s11  ;;  %2787 = vmatpush1.bf16.msra.mxu1 %v2578_v11 }
 0x3be   : > { %v7705_v52 = vpop.permute.xlu0 %3024  ;;  %2788 = vmatprep.subr.bf16.mxu1 %v7368_v17 }
 0x3bf   : > { %v7708_v0 = vpop.permute.xlu1 %3026 }
 0x3c0   : > { %3411 = vrot.lane.b32.xlu0 %v7147_v58, %s5660_s12 }
 0x3c1   : > { %3413 = vrot.lane.b32.xlu1 %v7149_v3, %s5660_s12  ;;  %2789 = vmatpush1.bf16.msra.mxu1 %v2592_v48 }
 0x3c2   : > { %v7717_v18 = vpop.permute.xlu0 %3038  ;;  %2790 = vmatprep.subr.bf16.mxu1 %v7538_v51 }
 0x3c3   : > { %v7720_v23 = vpop.permute.xlu1 %3040 }
 0x3c4   : > { %3425 = vrot.lane.b32.xlu0 %v7147_v58, %s5661_s13 }
 0x3c5   : > { %3427 = vrot.lane.b32.xlu1 %v7149_v3, %s5661_s13  ;;  %2791 = vmatpush1.bf16.msra.mxu1 %v2593_v33 }
 0x3c6   : > { %v7734_v17 = vpop.permute.xlu0 %3052  ;;  %2813 = vmatprep.subr.bf16.mxu1 %v7376_v25 }
 0x3c7   : > { %v7737_v43 = vpop.permute.xlu1 %3054 }
 0x3c8   : > { %3303 = vrot.lane.b32.xlu0 %v7159_v34, %s5652_s19  ;;  %2793 = vmatmul.mubr.bf16.vlgmr.msra.gmra.mrb[40].mxu1 %v7730_v20 }
 0x3c9   : > { %3305 = vrot.lane.b32.xlu1 %v7161_v15, %s5652_s19  ;;  %2814 = vmatpush1.bf16.msra.mxu1 %v2631_v16  ;;  %v7787_v16 = vsel %vm2396_vm4, %v7585_v27, %v7588_v62 }
 0x3ca   : > { %v7747_v51 = vpop.permute.xlu0 %3066  ;;  %2815 = vmatprep.subr.bf16.mxu1 %v7558_v12 }
 0x3cb   : > { %v7750_v50 = vpop.permute.xlu1 %3068 }
 0x3cc   : > { %3317 = vrot.lane.b32.xlu0 %v7159_v34, %s5653_s25 }
 0x3cd   : > { %3319 = vrot.lane.b32.xlu1 %v7161_v15, %s5653_s25  ;;  %2816 = vmatpush1.bf16.msra.mxu1 %v2632_v7 }
 0x3ce   : > { %v7759_v63 = vpop.permute.xlu0 %3080 }
 0x3cf   : > { %v7761_v25 = vpop.permute.xlu1 %3082 }
 0x3d0   : > { %3331 = vrot.lane.b32.xlu0 %v7159_v34, %s5654_s26 }
 0x3d1   : > { %3333 = vrot.lane.b32.xlu1 %v7161_v15, %s5654_s26 }
 0x3d2   : > { %v2875_v11 = vpop.permute.xlu0 %2874 }
 0x3d3   : > { %v7767_v48 = vpop.permute.xlu1 %2876 }
 0x3d4   : > { %9630 = vst [vmem:[#allocation7_spill] sm:$0xff] %v7767_v48  ;;  %3345 = vrot.lane.b32.xlu0 %v7159_v34, %s5655_s27  ;;  %3142 = vmatprep.subr.bf16.mxu0 %v7767_v48  ;;  %v7774_v32 = vsel %vm1557_vm2, %v2875_v11, %v7767_v48  ;;  %v7810_v48 = vsel %vm2411_vm5, %v7597_v56, %v7600_v21 }
 0x3d5   : > { %9631 = vst [vmem:[#allocation13_spill] sm:$0xff] %v7774_v32  ;;  %3347 = vrot.lane.b32.xlu1 %v7161_v15, %s5655_s27  ;;  %3143 = vmatpush1.bf16.msra.mxu0 %v7774_v32 }
 0x3d6   : > { %v2889_v12 = vpop.permute.xlu0 %2888  ;;  %3144 = vmatprep.subr.bf16.mxu0 %v7588_v62 }
 0x3d7   : > { %v7780_v33 = vpop.permute.xlu1 %2890 }
 0x3d8   : > { %9632 = vst [vmem:[#allocation15_spill] sm:$0xff] %v7780_v33  ;;  %3359 = vrot.lane.b32.xlu0 %v7159_v34, %s5656_s28  ;;  %v7799_v3 = vsel %vm2396_vm4, %v2889_v12, %v7780_v33 }
 0x3d9   : > { %3361 = vrot.lane.b32.xlu1 %v7161_v15, %s5656_s28  ;;  %3145 = vmatpush1.bf16.msra.mxu0 %v7787_v16  ;;  %9634 = vst [vmem:[#allocation14_spill] sm:$0xff] %v7799_v3 }
 0x3da   : > { %v2903_v7 = vpop.permute.xlu0 %2902  ;;  %3146 = vmatprep.subr.bf16.mxu0 %v7780_v33 }
 0x3db   : > { %v7793_v11 = vpop.permute.xlu1 %2904 }
 0x3dc   : > { %9633 = vst [vmem:[#allocation17_spill] sm:$0xff] %v7793_v11  ;;  %3373 = vrot.lane.b32.xlu0 %v7159_v34, %s5657_s29  ;;  %v7820_v33 = vsel %vm2411_vm5, %v2903_v7, %v7793_v11 }
 0x3dd   : > { %3375 = vrot.lane.b32.xlu1 %v7161_v15, %s5657_s29  ;;  %3147 = vmatpush1.bf16.msra.mxu0 %v7799_v3  ;;  %9635 = vst [vmem:[#allocation19_spill] sm:$0xff] %v7820_v33 }
 0x3de   : > { %v2917_v27 = vpop.permute.xlu0 %2916  ;;  %3148 = vmatprep.subr.bf16.mxu0 %v7600_v21  ;;  %v2920_v21 = vsel %vm2426_vm6, %v7609_v35, %v7612_v47 }
 0x3df   : > { %v2919_v58 = vpop.permute.xlu1 %2918 }
 0x3e0   : > { %3387 = vrot.lane.b32.xlu0 %v7159_v34, %s5658_s23 }
 0x3e1   : > { %3389 = vrot.lane.b32.xlu1 %v7161_v15, %s5658_s23  ;;  %3149 = vmatpush1.bf16.msra.mxu0 %v7810_v48 }
 0x3e2   : > { %v2931_v12 = vpop.permute.xlu0 %2930  ;;  %3150 = vmatprep.subr.bf16.mxu0 %v7793_v11 }
 0x3e3   : > { %v2933_v3 = vpop.permute.xlu1 %2932 }
 0x3e4   : > { %3401 = vrot.lane.b32.xlu0 %v7159_v34, %s5659_s11 }
 0x3e5   : > { %3403 = vrot.lane.b32.xlu1 %v7161_v15, %s5659_s11  ;;  %3151 = vmatpush1.bf16.msra.mxu0 %v7820_v33  ;;  %v2921_v33 = vsel %vm2426_vm6, %v2917_v27, %v2919_v58 }
 0x3e6   : > { %v2945_v56 = vpop.permute.xlu0 %2944  ;;  %3152 = vmatprep.subr.bf16.mxu0 %v7612_v47 }
 0x3e7   : > { %v2947_v32 = vpop.permute.xlu1 %2946 }
 0x3e8   : > { %3415 = vrot.lane.b32.xlu0 %v7159_v34, %s5660_s12 }
 0x3e9   : > { %3417 = vrot.lane.b32.xlu1 %v7161_v15, %s5660_s12  ;;  %3153 = vmatpush1.bf16.msra.mxu0 %v2920_v21  ;;  %v2934_v21 = vsel %vm2441_vm7, %v7621_v41, %v7624_v55 }
 0x3ea   : > { %v2959_v7 = vpop.permute.xlu0 %2958  ;;  %3154 = vmatprep.subr.bf16.mxu0 %v2919_v58 }
 0x3eb   : > { %v2961_v11 = vpop.permute.xlu1 %2960 }
 0x3ec   : > { %3728 = vrot.lane.b32.xlu0 %v7171_v36, %s5652_s19 }
 0x3ed   : > { %3730 = vrot.lane.b32.xlu1 %v7173_v9, %s5652_s19  ;;  %3155 = vmatpush1.bf16.msra.mxu0 %v2921_v33  ;;  %v2935_v33 = vsel %vm2441_vm7, %v2931_v12, %v2933_v3 }
 0x3ee   : > { %v2973_v34 = vpop.permute.xlu0 %2972  ;;  %3156 = vmatprep.subr.bf16.mxu0 %v7624_v55  ;;  %v2948_v55 = vsel %vm2456_vm8, %v7633_v38, %v7636_v24 }
 0x3ef   : > { %v2975_v35 = vpop.permute.xlu1 %2974 }
 0x3f0   : > { %3742 = vrot.lane.b32.xlu0 %v7171_v36, %s5653_s25 }
 0x3f1   : > { %3744 = vrot.lane.b32.xlu1 %v7173_v9, %s5653_s25  ;;  %3157 = vmatpush1.bf16.msra.mxu0 %v2934_v21  ;;  %v2949_v21 = vsel %vm2456_vm8, %v2945_v56, %v2947_v32 }
 0x3f2   : > { %v7846_v58 = vpop.permute.xlu0 %2986  ;;  %3158 = vmatprep.subr.bf16.mxu0 %v2933_v3 }
 0x3f3   : > { %v7848_v47 = vpop.permute.xlu1 %2988 }
 0x3f4   : > { %3756 = vrot.lane.b32.xlu0 %v7171_v36, %s5654_s26 }
 0x3f5   : > { %3758 = vrot.lane.b32.xlu1 %v7173_v9, %s5654_s26  ;;  %3159 = vmatpush1.bf16.msra.mxu0 %v2935_v33 }
 0x3f6   : > { %v7855_v27 = vpop.permute.xlu0 %3000  ;;  %3160 = vmatprep.subr.bf16.mxu0 %v7636_v24  ;;  %v2962_v24 = vsel %vm2471_vm9, %v7645_v4, %v7648_v8 }
 0x3f7   : > { %v7858_v41 = vpop.permute.xlu1 %3002 }
 0x3f8   : > { %3770 = vrot.lane.b32.xlu0 %v7171_v36, %s5655_s27 }
 0x3f9   : > { %3772 = vrot.lane.b32.xlu1 %v7173_v9, %s5655_s27  ;;  %3161 = vmatpush1.bf16.msra.mxu0 %v2948_v55  ;;  %v2963_v55 = vsel %vm2471_vm9, %v2959_v7, %v2961_v11 }
 0x3fa   : > { %v7867_v3 = vpop.permute.xlu0 %3014  ;;  %3162 = vmatprep.subr.bf16.mxu0 %v2947_v32 }
 0x3fb   : > { %v7869_v12 = vpop.permute.xlu1 %3016 }
 0x3fc   : > { %3784 = vrot.lane.b32.xlu0 %v7171_v36, %s5656_s28 }
 0x3fd   : > { %3786 = vrot.lane.b32.xlu1 %v7173_v9, %s5656_s28  ;;  %3163 = vmatpush1.bf16.msra.mxu0 %v2949_v21 }
 0x3fe   : > { %v7876_v33 = vpop.permute.xlu0 %3028  ;;  %3164 = vmatprep.subr.bf16.mxu0 %v7648_v8  ;;  %v2976_v8 = vsel %vm2486_vm10, %v7657_v19, %v7660_v30 }
 0x3ff   : > { %v7879_v38 = vpop.permute.xlu1 %3030 }
 0x400   : > { %3798 = vrot.lane.b32.xlu0 %v7171_v36, %s5657_s29 }
 0x401   : > { %3800 = vrot.lane.b32.xlu1 %v7173_v9, %s5657_s29  ;;  %3165 = vmatpush1.bf16.msra.mxu0 %v2962_v24  ;;  %v3005_v24 = vsel %vm2516_vm12, %v7855_v27, %v7858_v41 }
 0x402   : > { %v7888_v32 = vpop.permute.xlu0 %3042  ;;  %3166 = vmatprep.subr.bf16.mxu0 %v2961_v11 }
 0x403   : > { %v7890_v56 = vpop.permute.xlu1 %3044 }
 0x404   : > { %3812 = vrot.lane.b32.xlu0 %v7171_v36, %s5658_s23 }
 0x405   : > { %3814 = vrot.lane.b32.xlu1 %v7173_v9, %s5658_s23  ;;  %3167 = vmatpush1.bf16.msra.mxu0 %v2963_v55  ;;  %v3018_v55 = vsel %vm2531_vm13, %v7693_v60, %v7696_v5 }
 0x406   : > { %v7897_v21 = vpop.permute.xlu0 %3056  ;;  %3189 = vmatprep.subr.bf16.mxu0 %v7660_v30 }
 0x407   : > { %v7900_v4 = vpop.permute.xlu1 %3058 }
 0x408   : > { %3826 = vrot.lane.b32.xlu0 %v7171_v36, %s5659_s11  ;;  %3169 = vmatmul.mubr.bf16.vlgmr.msra.gmra.mrb[56].mxu0 %v7513_v10  ;;  %v2977_v10 = vsel %vm2486_vm10, %v2973_v34, %v2975_v35 }
 0x409   : > { %3828 = vrot.lane.b32.xlu1 %v7173_v9, %s5659_s11  ;;  %3190 = vmatpush1.bf16.msra.mxu0 %v2976_v8  ;;  %v3019_v8 = vsel %vm2531_vm13, %v7867_v3, %v7869_v12 }
 0x40a   : > { %v7910_v11 = vpop.permute.xlu0 %3070  ;;  %3191 = vmatprep.subr.bf16.mxu0 %v2975_v35  ;;  %3178 = vmatprep.mubr.bf16.mxu0 %v7523_v37  ;;  %v2990_v37 = vsel %vm2501_vm11, %v7669_v13, %v7672_v46  ;;  %v2991_v13 = vsel %vm2501_vm11, %v7846_v58, %v7848_v47 }
 0x40b   : > { %v7913_v7 = vpop.permute.xlu1 %3072 }
 0x40c   : > { %3732 = vrot.lane.b32.xlu0 %v7183_v57, %s5652_s19 }
 0x40d   : > { %3192 = vmatpush1.bf16.msra.mxu0 %v2977_v10  ;;  %3734 = vrot.lane.b32.xlu1 %v7185_v6, %s5652_s19  ;;  %v3032_v10 = vsel %vm2546_vm14, %v7705_v52, %v7708_v0 }
 0x40e   : > { %v7920_v19 = vpop.permute.xlu0 %3084  ;;  %3193 = vmatprep.subr.bf16.mxu0 %v7672_v46 }
 0x40f   : > { %v7923_v30 = vpop.permute.xlu1 %3086 }
 0x410   : > { %3746 = vrot.lane.b32.xlu0 %v7183_v57, %s5653_s25  ;;  %3179 = vmatmul.mubr.bf16.gmra.mrb[60].mxu0 %v7546_v26 }
 0x411   : > { %3194 = vmatpush1.bf16.msra.mxu0 %v2990_v37  ;;  %3748 = vrot.lane.b32.xlu1 %v7185_v6, %s5653_s25  ;;  %v9650_v37 = vld [vmem:[#allocation17_spill] sm:$0xff] }
 0x412   : > { %v7933_v34 = vpop.permute.xlu0 %3299  ;;  %3195 = vmatprep.subr.bf16.mxu0 %v7848_v47  ;;  %3221 = vmatprep.mubr.bf16.mxu0 %v7556_v54  ;;  %v3004_v54 = vsel %vm2516_vm12, %v7681_v53, %v7684_v61 }
 0x413   : > { %v7937_v35 = vpop.permute.xlu1 %3301 }
 0x414   : > { %3760 = vrot.lane.b32.xlu0 %v7183_v57, %s5654_s26 }
 0x415   : > { %3196 = vmatpush1.bf16.msra.mxu0 %v2991_v13  ;;  %3762 = vrot.lane.b32.xlu1 %v7185_v6, %s5654_s26 }
 0x416   : > { %v7946_v26 = vpop.permute.xlu0 %3313  ;;  %3197 = vmatprep.subr.bf16.mxu0 %v7684_v61 }
 0x417   : > { %v7949_v46 = vpop.permute.xlu1 %3315 }
 0x418   : > { %3774 = vrot.lane.b32.xlu0 %v7183_v57, %s5655_s27 }
 0x419   : > { %3198 = vmatpush1.bf16.msra.mxu0 %v3004_v54  ;;  %3776 = vrot.lane.b32.xlu1 %v7185_v6, %s5655_s27 }
 0x41a   : > { %v7958_v58 = vpop.permute.xlu0 %3327  ;;  %3199 = vmatprep.subr.bf16.mxu0 %v7858_v41 }
 0x41b   : > { %v7961_v47 = vpop.permute.xlu1 %3329 }
 0x41c   : > { %3788 = vrot.lane.b32.xlu0 %v7183_v57, %s5656_s28 }
 0x41d   : > { %3200 = vmatpush1.bf16.msra.mxu0 %v3005_v24  ;;  %3790 = vrot.lane.b32.xlu1 %v7185_v6, %s5656_s28 }
 0x41e   : > { %v7970_v53 = vpop.permute.xlu0 %3341  ;;  %3201 = vmatprep.subr.bf16.mxu0 %v7696_v5 }
 0x41f   : > { %v7973_v61 = vpop.permute.xlu1 %3343 }
 0x420   : > { %3802 = vrot.lane.b32.xlu0 %v7183_v57, %s5657_s29 }
 0x421   : > { %3202 = vmatpush1.bf16.msra.mxu0 %v3018_v55  ;;  %3804 = vrot.lane.b32.xlu1 %v7185_v6, %s5657_s29 }
 0x422   : > { %v7982_v27 = vpop.permute.xlu0 %3355  ;;  %3203 = vmatprep.subr.bf16.mxu0 %v7869_v12 }
 0x423   : > { %v7985_v41 = vpop.permute.xlu1 %3357 }
 0x424   : > { %3816 = vrot.lane.b32.xlu0 %v7183_v57, %s5658_s23 }
 0x425   : > { %3204 = vmatpush1.bf16.msra.mxu0 %v3019_v8  ;;  %3818 = vrot.lane.b32.xlu1 %v7185_v6, %s5658_s23  ;;  %v9655_v8 = vld [vmem:[#allocation19_spill] sm:$0xff] }
 0x426   : > { %v7994_v60 = vpop.permute.xlu0 %3369  ;;  %3205 = vmatprep.subr.bf16.mxu0 %v7708_v0 }
 0x427   : > { %v7997_v5 = vpop.permute.xlu1 %3371 }
 0x428   : > { %2606 = vrot.lane.b32.xlu0 %v7257_v31, %s5667_s20  ;;  %v3033_v31 = vsel %vm2546_vm14, %v7876_v33, %v7879_v38 }
 0x429   : > { %3206 = vmatpush1.bf16.msra.mxu0 %v3032_v10  ;;  %2608 = vrot.lane.b32.xlu1 %v7250_v29, %s5667_s20 }
 0x42a   : > { %v8006_v3 = vpop.permute.xlu0 %3383  ;;  %3207 = vmatprep.subr.bf16.mxu0 %v7879_v38  ;;  %v9642_v38 = vmov 0  }
 0x42b   : > { %v8009_v12 = vpop.permute.xlu1 %3385 }
 0x42c   : > { %2614 = vrot.lane.b32.xlu0 %v7402_v44, %s5667_s20  ;;  %v3046_v44 = vsel %vm2561_vm15, %v7717_v18, %v7720_v23 }
 0x42d   : > { %3208 = vmatpush1.bf16.msra.mxu0 %v3033_v31  ;;  %2616 = vrot.lane.b32.xlu1 %v7264_v42, %s5667_s20  ;;  %v5616_v42 = vld [vmem:[%s9320_s4 + $0x34] ss:$20 sps:$4 sm:$0xff]  }
 0x42e   : > { %v8018_v52 = vpop.permute.xlu0 %3397  ;;  %3209 = vmatprep.subr.bf16.mxu0 %v7720_v23  ;;  %2802 = vmatprep.mubr.bf16.mxu1 %v5616_v42 }
 0x42f   : > { %9636 = vst [vmem:[#allocation22_spill] sm:$0xff] %v8018_v52  ;;  %v8021_v29 = vpop.permute.xlu1 %3399 }
 0x430   : > { %9637 = vst [vmem:[#allocation20_spill] sm:$0xff] %v8021_v29  ;;  %2622 = vrot.lane.b32.xlu0 %v7425_v14, %s5667_s20  ;;  %v5618_v14 = vld [vmem:[%s9320_s4 + $0x30] ss:$20 sps:$4 sm:$0xff]  }
 0x431   : > { %3210 = vmatpush1.bf16.msra.mxu0 %v3046_v44  ;;  %2624 = vrot.lane.b32.xlu1 %v7272_v40, %s5667_s20  ;;  %v3047_v40 = vsel %vm2561_vm15, %v7888_v32, %v7890_v56  ;;  %v9656_v44 = vld [vmem:[#allocation12_spill] sm:$0xff] }
 0x432   : > { %v8030_v0 = vpop.permute.xlu0 %3411  ;;  %3211 = vmatprep.subr.bf16.mxu0 %v7890_v56  ;;  %2803 = vmatmul.mubr.bf16.gmra.mrb[44].mxu1 %v5618_v14 }
 0x433   : > { %9638 = vst [vmem:[#allocation21_spill] sm:$0xff] %v8030_v0  ;;  %v8036_v33 = vpop.permute.xlu1 %3413  ;;  %2845 = vmatprep.mubr.bf16.mxu1 %v9642_v38 }
 0x434   : > { %9639 = vst [vmem:[#allocation25_spill] sm:$0xff] %v8036_v33  ;;  %2610 = vrot.lane.b32.xlu0 %v7389_v49, %s5667_s20  ;;  %v3060_v49 = vsel %vm2576_vm0, %v7734_v17, %v7737_v43 }
 0x435   : > { %3212 = vmatpush1.bf16.msra.mxu0 %v3047_v40  ;;  %2612 = vrot.lane.b32.xlu1 %v7382_v28, %s5667_s20 }
 0x436   : > { %v8048_v18 = vpop.permute.xlu0 %3425  ;;  %3213 = vmatprep.subr.bf16.mxu0 %v7737_v43 }
 0x437   : > { %9640 = vst [vmem:[#allocation27_spill] sm:$0xff] %v8048_v18  ;;  %v8051_v23 = vpop.permute.xlu1 %3427 }
 0x438   : > { %9641 = vst [vmem:[#allocation29_spill] sm:$0xff] %v8051_v23  ;;  %2618 = vrot.lane.b32.xlu0 %v7414_v2, %s5667_s20  ;;  %v3061_v2 = vsel %vm2576_vm0, %v7897_v21, %v7900_v4  ;;  %v9644_v21 = vld [vmem:[#allocation13_spill] sm:$0xff] }
 0x439   : > { %3214 = vmatpush1.bf16.msra.mxu0 %v3060_v49  ;;  %2620 = vrot.lane.b32.xlu1 %v7395_v39, %s5667_s20 }
 0x43a   : > { %v8061_v28 = vpop.permute.xlu0 %3303  ;;  %3215 = vmatprep.subr.bf16.mxu0 %v7900_v4  ;;  %v9646_v4 = vld [vmem:[#allocation8_spill] sm:$0xff] }
 0x43b   : > { %v8064_v32 = vpop.permute.xlu1 %3305 }
 0x43c   : > { %2626 = vrot.lane.b32.xlu0 %v7435_v59, %s5667_s20  ;;  %v3074_v59 = vsel %vm2591_vm1, %v7747_v51, %v7750_v50 }
 0x43d   : > { %3216 = vmatpush1.bf16.msra.mxu0 %v3061_v2  ;;  %2628 = vrot.lane.b32.xlu1 %v7408_v22, %s5667_s20 }
 0x43e   : > { %v8073_v17 = vpop.permute.xlu0 %3317  ;;  %3217 = vmatprep.subr.bf16.mxu0 %v7750_v50  ;;  %v3112_v50 = vsel %vm2630_vm3, %v7759_v63, %v7761_v25  ;;  %v9645_v63 = vld [vmem:[#allocation7_spill] sm:$0xff] }
 0x43f   : > { %v8076_v39 = vpop.permute.xlu1 %3319 }
 0x440   : > { %3088 = vrot.lane.b32.xlu0 %v7580_v45, %s5667_s20  ;;  %v3075_v45 = vsel %vm2591_vm1, %v7910_v11, %v7913_v7  ;;  %v9647_v11 = vld [vmem:[#allocation15_spill] sm:$0xff] }
 0x441   : > { %3218 = vmatpush1.bf16.msra.mxu0 %v3074_v59  ;;  %3090 = vrot.lane.b32.xlu1 %v7570_v1, %s5667_s20 }
 0x442   : > { %v8085_v43 = vpop.permute.xlu0 %3331  ;;  %3219 = vmatprep.subr.bf16.mxu0 %v7913_v7 }
 0x443   : > { %v8088_v22 = vpop.permute.xlu1 %3333 }
 0x444   : > { %3096 = vrot.lane.b32.xlu0 %v7787_v16, %s5667_s20  ;;  %v9643_v16 = vld [vmem:[#allocation10_spill] sm:$0xff] }
 0x445   : > { %3220 = vmatpush1.bf16.msra.mxu0 %v3075_v45  ;;  %3098 = vrot.lane.b32.xlu1 %v7588_v62, %s5667_s20 }
 0x446   : > { %v8097_v51 = vpop.permute.xlu0 %3345  ;;  %3242 = vmatprep.subr.bf16.mxu0 %v7761_v25 }
 0x447   : > { %v8100_v1 = vpop.permute.xlu1 %3347 }
 0x448   : > { %3104 = vrot.lane.b32.xlu0 %v7810_v48, %s5667_s20  ;;  %3222 = vmatmul.mubr.bf16.vlgmr.msra.gmra.mrb[56].mxu0 %v7730_v20  ;;  %v3113_v20 = vsel %vm2630_vm3, %v7920_v19, %v7923_v30 }
 0x449   : > { %3243 = vmatpush1.bf16.msra.mxu0 %v3112_v50  ;;  %3106 = vrot.lane.b32.xlu1 %v9643_v16, %s5667_s20 }
 0x44a   : > { %v8110_v62 = vpop.permute.xlu0 %3359  ;;  %3244 = vmatprep.subr.bf16.mxu0 %v7923_v30  ;;  %3231 = vmatprep.mubr.bf16.mxu0 %v5616_v42  ;;  %v9649_v30 = vld [vmem:[#allocation14_spill] sm:$0xff] }
 0x44b   : > { %v8113_v56 = vpop.permute.xlu1 %3361  ;;  %v9657_v42 = vld [vmem:[#allocation6_spill] sm:$0xff] }
 0x44c   : > { %3092 = vrot.lane.b32.xlu0 %v9644_v21, %s5667_s20 }
 0x44d   : > { %3245 = vmatpush1.bf16.msra.mxu0 %v3113_v20  ;;  %3094 = vrot.lane.b32.xlu1 %v9645_v63, %s5667_s20 }
 0x44e   : > { %v8122_v25 = vpop.permute.xlu0 %3373 }
 0x44f   : > { %v8124_v48 = vpop.permute.xlu1 %3375 }
 0x450   : > { %3429 = vrot.lane.b32.xlu0 %v9646_v4, %s5661_s13  ;;  %3232 = vmatmul.mubr.bf16.gmra.mrb[60].mxu0 %v5618_v14 }
 0x451   : > { %3102 = vrot.lane.b32.xlu1 %v9647_v11, %s5667_s20  ;;  %3274 = vmatprep.mubr.bf16.mxu0 %v9642_v38 }
 0x452   : > { %v8131_v7 = vpop.permute.xlu0 %3387 }
 0x453   : > { %9648 = vst [vmem:[#allocation26_spill] sm:$0xff] %v8131_v7  ;;  %v8133_v19 = vpop.permute.xlu1 %3389 }
 0x454   : > { %3100 = vrot.lane.b32.xlu0 %v9649_v30, %s5667_s20 }
 0x455   : > { %3110 = vrot.lane.b32.xlu1 %v9650_v37, %s5667_s20 }
 0x456   : > { %v8139_v13 = vpop.permute.xlu0 %3401 }
 0x457   : > { %9651 = vst [vmem:[#allocation31_spill] sm:$0xff] %v8139_v13  ;;  %v8141_v54 = vpop.permute.xlu1 %3403 }
 0x458   : > { %9652 = vst [vmem:[#allocation32_spill] sm:$0xff] %v8141_v54  ;;  %3830 = vrot.lane.b32.xlu0 %v7183_v57, %s5659_s11 }
 0x459   : > { %3431 = vrot.lane.b32.xlu1 %v7161_v15, %s5661_s13 }
 0x45a   : > { %v8147_v24 = vpop.permute.xlu0 %3415 }
 0x45b   : > { %9653 = vst [vmem:[#allocation36_spill] sm:$0xff] %v8147_v24  ;;  %v8149_v55 = vpop.permute.xlu1 %3417 }
 0x45c   : > { %9654 = vst [vmem:[#allocation34_spill] sm:$0xff] %v8149_v55  ;;  %3108 = vrot.lane.b32.xlu0 %v9655_v8, %s5667_s20 }
 0x45d   : > { %3832 = vrot.lane.b32.xlu1 %v7185_v6, %s5659_s11 }
 0x45e   : > { %v8155_v10 = vpop.permute.xlu0 %3728 }
 0x45f   : > { %v8157_v31 = vpop.permute.xlu1 %3730 }
 0x460   : > { %3439 = vrot.lane.b32.xlu0 %v9656_v44, %s5662_s14 }
 0x461   : > { %3441 = vrot.lane.b32.xlu1 %v9657_v42, %s5662_s14 }
 0x462   : > { %v8163_v14 = vpop.permute.xlu0 %3742 }
 0x463   : > { %v8165_v40 = vpop.permute.xlu1 %3744 }
 0x464   : > { %3840 = vrot.lane.b32.xlu0 %v7171_v36, %s5660_s12 }
 0x465   : > { %3842 = vrot.lane.b32.xlu1 %v7173_v9, %s5660_s12 }
 0x466   : > { %v8171_v49 = vpop.permute.xlu0 %3756 }
 0x467   : > { %v8173_v2 = vpop.permute.xlu1 %3758 }
 0x468   : > { %3443 = vrot.lane.b32.xlu0 %v9646_v4, %s5662_s14 }
 0x469   : > { %3445 = vrot.lane.b32.xlu1 %v7161_v15, %s5662_s14 }
 0x46a   : > { %v8179_v59 = vpop.permute.xlu0 %3770 }
 0x46b   : > { %v8181_v45 = vpop.permute.xlu1 %3772 }
 0x46c   : > { %3844 = vrot.lane.b32.xlu0 %v7183_v57, %s5660_s12 }
 0x46d   : > { %3846 = vrot.lane.b32.xlu1 %v7185_v6, %s5660_s12 }
 0x46e   : > { %v8187_v50 = vpop.permute.xlu0 %3784 }
 0x46f   : > { %9658 = vst [vmem:[#allocation11_spill] sm:$0xff] %v8187_v50  ;;  %v8189_v16 = vpop.permute.xlu1 %3786 }
 0x470   : > { %9659 = vst [vmem:[#allocation9_spill] sm:$0xff] %v8189_v16  ;;  %3453 = vrot.lane.b32.xlu0 %v9656_v44, %s5663_s15 }
 0x471   : > { %3455 = vrot.lane.b32.xlu1 %v9657_v42, %s5663_s15 }
 0x472   : > { %v8195_v21 = vpop.permute.xlu0 %3798 }
 0x473   : > { %9660 = vst [vmem:[#allocation16_spill] sm:$0xff] %v8195_v21  ;;  %v8197_v20 = vpop.permute.xlu1 %3800 }
 0x474   : > { %9661 = vst [vmem:[#allocation18_spill] sm:$0xff] %v8197_v20  ;;  %3854 = vrot.lane.b32.xlu0 %v7171_v36, %s5661_s13 }
 0x475   : > { %3856 = vrot.lane.b32.xlu1 %v7173_v9, %s5661_s13 }
 0x476   : > { %v8203_v63 = vpop.permute.xlu0 %3812 }
 0x477   : > { %9662 = vst [vmem:[#allocation23_spill] sm:$0xff] %v8203_v63  ;;  %v8205_v11 = vpop.permute.xlu1 %3814 }
 0x478   : > { %9663 = vst [vmem:[#allocation24_spill] sm:$0xff] %v8205_v11  ;;  %3457 = vrot.lane.b32.xlu0 %v9646_v4, %s5663_s15 }
 0x479   : > { %3459 = vrot.lane.b32.xlu1 %v7161_v15, %s5663_s15 }
 0x47a   : > { %v8211_v30 = vpop.permute.xlu0 %3826 }
 0x47b   : > { %9664 = vst [vmem:[#allocation28_spill] sm:$0xff] %v8211_v30  ;;  %v8213_v37 = vpop.permute.xlu1 %3828 }
 0x47c   : > { %9665 = vst [vmem:[#allocation30_spill] sm:$0xff] %v8213_v37  ;;  %3858 = vrot.lane.b32.xlu0 %v7183_v57, %s5661_s13 }
 0x47d   : > { %3860 = vrot.lane.b32.xlu1 %v7185_v6, %s5661_s13 }
 0x47e   : > { %v8219_v8 = vpop.permute.xlu0 %3732 }
 0x47f   : > { %v8221_v63 = vpop.permute.xlu1 %3734 }
 0x480   : > { %3467 = vrot.lane.b32.xlu0 %v9656_v44, %s5664_s16 }
 0x481   : > { %3469 = vrot.lane.b32.xlu1 %v9657_v42, %s5664_s16 }
 0x482   : > { %v8227_v18 = vpop.permute.xlu0 %3746 }
 0x483   : > { %v8229_v30 = vpop.permute.xlu1 %3748 }
 0x484   : > { %3868 = vrot.lane.b32.xlu0 %v7171_v36, %s5662_s14 }
 0x485   : > { %3870 = vrot.lane.b32.xlu1 %v7173_v9, %s5662_s14 }
 0x486   : > { %v8235_v37 = vpop.permute.xlu0 %3760 }
 0x487   : > { %v8237_v11 = vpop.permute.xlu1 %3762 }
 0x488   : > { %3471 = vrot.lane.b32.xlu0 %v9646_v4, %s5664_s16 }
 0x489   : > { %3473 = vrot.lane.b32.xlu1 %v7161_v15, %s5664_s16 }
 0x48a   : > { %v8243_v23 = vpop.permute.xlu0 %3774 }
 0x48b   : > { %v8245_v24 = vpop.permute.xlu1 %3776 }
 0x48c   : > { %3872 = vrot.lane.b32.xlu0 %v7183_v57, %s5662_s14 }
 0x48d   : > { %3874 = vrot.lane.b32.xlu1 %v7185_v6, %s5662_s14 }
 0x48e   : > { %v8251_v55 = vpop.permute.xlu0 %3788 }
 0x48f   : > { %9666 = vst [vmem:[#allocation33_spill] sm:$0xff] %v8251_v55  ;;  %v8253_v21 = vpop.permute.xlu1 %3790 }
 0x490   : > { %9667 = vst [vmem:[#allocation35_spill] sm:$0xff] %v8253_v21  ;;  %3481 = vrot.lane.b32.xlu0 %v9656_v44, %s5665_s17 }
 0x491   : > { %3483 = vrot.lane.b32.xlu1 %v9657_v42, %s5665_s17 }
 0x492   : > { %v8259_v0 = vpop.permute.xlu0 %3802 }
 0x493   : > { %9668 = vst [vmem:[#allocation37_spill] sm:$0xff] %v8259_v0  ;;  %v8261_v20 = vpop.permute.xlu1 %3804 }
 0x494   : > { %9669 = vst [vmem:[#allocation2_spill] sm:$0xff] %v8261_v20  ;;  %3882 = vrot.lane.b32.xlu0 %v7171_v36, %s5663_s15 }
 0x495   : > { %3884 = vrot.lane.b32.xlu1 %v7173_v9, %s5663_s15 }
 0x496   : > { %v8267_v33 = vpop.permute.xlu0 %3816 }
 0x497   : > { %9670 = vst [vmem:[#allocation4_spill] sm:$0xff] %v8267_v33  ;;  %v8269_v55 = vpop.permute.xlu1 %3818 }
 0x498   : > { %9671 = vst [vmem:[#allocation3_spill] sm:$0xff] %v8269_v55  ;;  %3485 = vrot.lane.b32.xlu0 %v9646_v4, %s5665_s17 }
 0x499   : > { %3487 = vrot.lane.b32.xlu1 %v7161_v15, %s5665_s17 }
 0x49a   : > { %v2607_v13 = vpop.permute.xlu0 %2606 }
 0x49b   : > { %v2609_v0 = vpop.permute.xlu1 %2608 }
 0x49c   : > { %3886 = vrot.lane.b32.xlu0 %v7183_v57, %s5663_s15  ;;  %2817 = vmatprep.subr.bf16.mxu1 %v2609_v0  ;;  %v2633_v20 = vsel %vm2630_vm3, %v2607_v13, %v2609_v0 }
 0x49d   : > { %3888 = vrot.lane.b32.xlu1 %v7185_v6, %s5663_s15  ;;  %2818 = vmatpush1.bf16.msra.mxu1 %v2633_v20 }
 0x49e   : > { %v2615_v33 = vpop.permute.xlu0 %2614 }
 0x49f   : > { %v2617_v55 = vpop.permute.xlu1 %2616 }
 0x4a0   : > { %3495 = vrot.lane.b32.xlu0 %v9656_v44, %s5666_s18  ;;  %v2635_v29 = vsel %vm2630_vm3, %v2615_v33, %v2617_v55 }
 0x4a1   : > { %3497 = vrot.lane.b32.xlu1 %v9657_v42, %s5666_s18 }
 0x4a2   : > { %v2623_v21 = vpop.permute.xlu0 %2622 }
 0x4a3   : > { %v2625_v54 = vpop.permute.xlu1 %2624 }
 0x4a4   : > { %3896 = vrot.lane.b32.xlu0 %v7171_v36, %s5664_s16 }
 0x4a5   : > { %3898 = vrot.lane.b32.xlu1 %v7173_v9, %s5664_s16 }
 0x4a6   : > { %v2611_v0 = vpop.permute.xlu0 %2610 }
 0x4a7   : > { %v2613_v13 = vpop.permute.xlu1 %2612 }
 0x4a8   : > { %3499 = vrot.lane.b32.xlu0 %v9646_v4, %s5666_s18  ;;  %2819 = vmatprep.subr.bf16.mxu1 %v2613_v13  ;;  %v2634_v20 = vsel %vm2630_vm3, %v2611_v0, %v2613_v13 }
 0x4a9   : > { %3501 = vrot.lane.b32.xlu1 %v7161_v15, %s5666_s18  ;;  %2820 = vmatpush1.bf16.msra.mxu1 %v2634_v20 }
 0x4aa   : > { %v2619_v50 = vpop.permute.xlu0 %2618  ;;  %2821 = vmatprep.subr.bf16.mxu1 %v2617_v55 }
 0x4ab   : > { %v2621_v52 = vpop.permute.xlu1 %2620 }
 0x4ac   : > { %3900 = vrot.lane.b32.xlu0 %v7183_v57, %s5664_s16  ;;  %v2636_v0 = vsel %vm2630_vm3, %v2619_v50, %v2621_v52 }
 0x4ad   : > { %3902 = vrot.lane.b32.xlu1 %v7185_v6, %s5664_s16  ;;  %2822 = vmatpush1.bf16.msra.mxu1 %v2635_v29  ;;  %v2637_v29 = vsel %vm2630_vm3, %v2623_v21, %v2625_v54 }
 0x4ae   : > { %v2627_v16 = vpop.permute.xlu0 %2626  ;;  %2823 = vmatprep.subr.bf16.mxu1 %v2621_v52 }
 0x4af   : > { %v2629_v7 = vpop.permute.xlu1 %2628 }
 0x4b0   : > { %3509 = vrot.lane.b32.xlu0 %v9656_v44, %s5667_s20  ;;  %v2638_v50 = vsel %vm2630_vm3, %v2627_v16, %v2629_v7 }
 0x4b1   : > { %3511 = vrot.lane.b32.xlu1 %v9657_v42, %s5667_s20  ;;  %2824 = vmatpush1.bf16.msra.mxu1 %v2636_v0  ;;  %v8315_v0 = vld [vmem:[%s9320_s4 + $0x10] ss:$20 sps:$4 sm:$0xff]  }
 0x4b2   : > { %v3089_v13 = vpop.permute.xlu0 %3088  ;;  %2825 = vmatprep.subr.bf16.mxu1 %v2625_v54 }
 0x4b3   : > { %v3091_v20 = vpop.permute.xlu1 %3090 }
 0x4b4   : > { %3910 = vrot.lane.b32.xlu0 %v7171_v36, %s5665_s17  ;;  %3246 = vmatprep.subr.bf16.mxu0 %v3091_v20  ;;  %v3114_v33 = vsel %vm2630_vm3, %v3089_v13, %v3091_v20  ;;  %v8334_v13 = vld [vmem:[%s9320_s4 + $0x38] ss:$20 sps:$4 sm:$0xff]  }
 0x4b5   : > { %3912 = vrot.lane.b32.xlu1 %v7173_v9, %s5665_s17  ;;  %2826 = vmatpush1.bf16.msra.mxu1 %v2637_v29 }
 0x4b6   : > { %3247 = vmatpush1.bf16.msra.mxu0 %v3114_v33  ;;  %v3097_v52 = vpop.permute.xlu0 %3096  ;;  %2827 = vmatprep.subr.bf16.mxu1 %v2629_v7 }
 0x4b7   : > { %v3099_v55 = vpop.permute.xlu1 %3098 }
 0x4b8   : > { %3513 = vrot.lane.b32.xlu0 %v9646_v4, %s5667_s20  ;;  %v3116_v20 = vsel %vm2630_vm3, %v3097_v52, %v3099_v55  ;;  %v5635_v52 = vld [vmem:[%s9320_s4 + $0x4] ss:$20 sps:$4 sm:$0xff]  }
 0x4b9   : > { %3515 = vrot.lane.b32.xlu1 %v7161_v15, %s5667_s20  ;;  %2828 = vmatpush1.bf16.msra.mxu1 %v2638_v50 }
 0x4ba   : > { %v3105_v54 = vpop.permute.xlu0 %3104  ;;  %3565 = vmatprep.subr.bf16.mxu1 %v9657_v42 }
 0x4bb   : > { %v3107_v21 = vpop.permute.xlu1 %3106 }
 0x4bc   : > { %3914 = vrot.lane.b32.xlu0 %v7183_v57, %s5665_s17  ;;  %2846 = vmatmul.mubr.bf16.vlgmr.msra.gmra.mrb[40].mxu1 %v8315_v0 }
 0x4bd   : > { %3916 = vrot.lane.b32.xlu1 %v7185_v6, %s5665_s17  ;;  %3566 = vmatpush1.bf16.msra.mxu1 %v9656_v44 }
 0x4be   : > { %v3093_v7 = vpop.permute.xlu0 %3092  ;;  %3567 = vmatprep.subr.bf16.mxu1 %v7161_v15  ;;  %2855 = vmatprep.mubr.bf16.mxu1 %v9642_v38 }
 0x4bf   : > { %v3095_v16 = vpop.permute.xlu1 %3094 }
 0x4c0   : > { %3924 = vrot.lane.b32.xlu0 %v7171_v36, %s5666_s18  ;;  %3248 = vmatprep.subr.bf16.mxu0 %v3095_v16  ;;  %v3115_v42 = vsel %vm2630_vm3, %v3093_v7, %v3095_v16  ;;  %v3118_v16 = vsel %vm2630_vm3, %v3105_v54, %v3107_v21  ;;  %v3322_v54 = vsel %vm2396_vm4, %v8073_v17, %v8076_v39 }
 0x4c1   : > { %3926 = vrot.lane.b32.xlu1 %v7173_v9, %s5666_s18  ;;  %3249 = vmatpush1.bf16.msra.mxu0 %v3115_v42 }
 0x4c2   : > { %3568 = vmatpush1.bf16.msra.mxu1 %v9646_v4  ;;  %v8339_v15 = vpop.permute.xlu0 %3429  ;;  %3250 = vmatprep.subr.bf16.mxu0 %v3099_v55  ;;  %v3307_v4 = vsel %vm1557_vm2, %v7933_v34, %v7937_v35  ;;  %v3308_v34 = vsel %vm1557_vm2, %v8061_v28, %v8064_v32  ;;  %v3321_v28 = vsel %vm2396_vm4, %v7946_v26, %v7949_v46 }
 0x4c3   : > { %3569 = vmatprep.subr.bf16.mxu1 %v7937_v35  ;;  %v3103_v44 = vpop.permute.xlu1 %3102 }
 0x4c4   : > { %3928 = vrot.lane.b32.xlu0 %v7183_v57, %s5666_s18  ;;  %2856 = vmatmul.mubr.bf16.gmra.mrb[44].mxu1 %v8334_v13 }
 0x4c5   : > { %3930 = vrot.lane.b32.xlu1 %v7185_v6, %s5666_s18  ;;  %3251 = vmatpush1.bf16.msra.mxu0 %v3116_v20 }
 0x4c6   : > { %3570 = vmatpush1.bf16.msra.mxu1 %v3307_v4  ;;  %v3101_v29 = vpop.permute.xlu0 %3100  ;;  %3252 = vmatprep.subr.bf16.mxu0 %v3103_v44 }
 0x4c7   : > { %v3117_v33 = vsel %vm2630_vm3, %v3101_v29, %v3103_v44  ;;  %3571 = vmatprep.subr.bf16.mxu1 %v8064_v32  ;;  %v3111_v50 = vpop.permute.xlu1 %3110  ;;  %3597 = vmatprep.mubr.bf16.mxu1 %v5635_v52 }
 0x4c8   : > { %3938 = vrot.lane.b32.xlu0 %v7171_v36, %s5667_s20 }
 0x4c9   : > { %3940 = vrot.lane.b32.xlu1 %v7173_v9, %s5667_s20  ;;  %3253 = vmatpush1.bf16.msra.mxu0 %v3117_v33 }
 0x4ca   : > { %3572 = vmatpush1.bf16.msra.mxu1 %v3308_v34  ;;  %v8363_v55 = vpop.permute.xlu0 %3830  ;;  %3254 = vmatprep.subr.bf16.mxu0 %v3107_v21 }
 0x4cb   : > { %3573 = vmatprep.subr.bf16.mxu1 %v7949_v46  ;;  %v8366_v7 = vpop.permute.xlu1 %3431 }
 0x4cc   : > { %3942 = vrot.lane.b32.xlu0 %v7183_v57, %s5667_s20 }
 0x4cd   : > { %3944 = vrot.lane.b32.xlu1 %v7185_v6, %s5667_s20  ;;  %3255 = vmatpush1.bf16.msra.mxu0 %v3118_v16  ;;  %v9678_v16 = vld [vmem:[#allocation35_spill] sm:$0xff] }
 0x4ce   : > { %3574 = vmatpush1.bf16.msra.mxu1 %v3321_v28  ;;  %v3109_v42 = vpop.permute.xlu0 %3108  ;;  %3256 = vmatprep.subr.bf16.mxu0 %v3111_v50 }
 0x4cf   : > { %v3119_v44 = vsel %vm2630_vm3, %v3109_v42, %v3111_v50  ;;  %3575 = vmatprep.subr.bf16.mxu1 %v8076_v39  ;;  %v8378_v20 = vpop.permute.xlu1 %3832  ;;  %v4153_v50 = vld [vmem:[%s9321_s5] sm:$0xff] }
 0x4d0   : > { %3517 = vrot.lane.b32.xlu0 %v3307_v4, %s5667_s20  ;;  %v9674_v4 = vld [vmem:[#allocation20_spill] sm:$0xff]  ;;  %v8571_v42 = vld [vmem:[%s9320_s4 + $0x2c] ss:$20 sps:$4 sm:$0xff]  }
 0x4d1   : > { %3519 = vrot.lane.b32.xlu1 %v7937_v35, %s5667_s20  ;;  %3257 = vmatpush1.bf16.msra.mxu0 %v3119_v44  ;;  %v3335_v35 = vsel %vm2411_vm5, %v7958_v58, %v7961_v47  ;;  %v3736_v58 = vsel %vm1557_vm2, %v8155_v10, %v8157_v31  ;;  %v9679_v44 = vld [vmem:[#allocation31_spill] sm:$0xff] }
 0x4d2   : > { %3576 = vmatpush1.bf16.msra.mxu1 %v3322_v54  ;;  %v8386_v26 = vpop.permute.xlu0 %3439  ;;  %3994 = vmatprep.subr.bf16.mxu0 %v7173_v9 }
 0x4d3   : > { %3577 = vmatprep.subr.bf16.mxu1 %v7961_v47  ;;  %v8390_v21 = vpop.permute.xlu1 %3441 }
 0x4d4   : > { %3525 = vrot.lane.b32.xlu0 %v3321_v28, %s5667_s20  ;;  %3275 = vmatmul.mubr.bf16.vlgmr.msra.gmra.mrb[56].mxu0 %v8315_v0 }
 0x4d5   : > { %3527 = vrot.lane.b32.xlu1 %v7949_v46, %s5667_s20  ;;  %3995 = vmatpush1.bf16.msra.mxu0 %v7171_v36  ;;  %v3336_v36 = vsel %vm2411_vm5, %v8085_v43, %v8088_v22 }
 0x4d6   : > { %3578 = vmatpush1.bf16.msra.mxu1 %v3335_v35  ;;  %v8400_v17 = vpop.permute.xlu0 %3840  ;;  %3996 = vmatprep.subr.bf16.mxu0 %v7185_v6 }
 0x4d7   : > { %3579 = vmatprep.subr.bf16.mxu1 %v8088_v22  ;;  %v8404_v9 = vpop.permute.xlu1 %3842  ;;  %3284 = vmatprep.mubr.bf16.mxu0 %v9642_v38 }
 0x4d8   : > { %3533 = vrot.lane.b32.xlu0 %v3335_v35, %s5667_s20  ;;  %v9680_v35 = vld [vmem:[#allocation33_spill] sm:$0xff] }
 0x4d9   : > { %3535 = vrot.lane.b32.xlu1 %v7961_v47, %s5667_s20  ;;  %3997 = vmatpush1.bf16.msra.mxu0 %v7183_v57  ;;  %v3349_v57 = vsel %vm2426_vm6, %v7970_v53, %v7973_v61  ;;  %v3350_v53 = vsel %vm2426_vm6, %v8097_v51, %v8100_v1  ;;  %v3363_v51 = vsel %vm2441_vm7, %v7982_v27, %v7985_v41 }
 0x4da   : > { %3580 = vmatpush1.bf16.msra.mxu1 %v3336_v36  ;;  %v8414_v46 = vpop.permute.xlu0 %3443  ;;  %3998 = vmatprep.subr.bf16.mxu0 %v8157_v31  ;;  %v3364_v27 = vsel %vm2441_vm7, %v8110_v62, %v8113_v56  ;;  %v3377_v62 = vsel %vm2456_vm8, %v7994_v60, %v7997_v5  ;;  %v3378_v60 = vsel %vm2456_vm8, %v8122_v25, %v8124_v48 }
 0x4db   : > { %3581 = vmatprep.subr.bf16.mxu1 %v7973_v61  ;;  %v8418_v6 = vpop.permute.xlu1 %3445  ;;  %v3391_v25 = vsel %vm2471_vm9, %v8006_v3, %v8009_v12  ;;  %v9672_v3 = vld [vmem:[#allocation26_spill] sm:$0xff] }
 0x4dc   : > { %3521 = vrot.lane.b32.xlu0 %v3308_v34, %s5667_s20  ;;  %3285 = vmatmul.mubr.bf16.gmra.mrb[60].mxu0 %v8334_v13  ;;  %v9677_v34 = vld [vmem:[#allocation32_spill] sm:$0xff] }
 0x4dd   : > { %3523 = vrot.lane.b32.xlu1 %v8064_v32, %s5667_s20  ;;  %3999 = vmatpush1.bf16.msra.mxu0 %v3736_v58  ;;  %v3737_v32 = vsel %vm1557_vm2, %v8219_v8, %v8221_v63 }
 0x4de   : > { %3582 = vmatpush1.bf16.msra.mxu1 %v3349_v57  ;;  %v8430_v47 = vpop.permute.xlu0 %3844  ;;  %4000 = vmatprep.subr.bf16.mxu0 %v8221_v63 }
 0x4df   : > { %3583 = vmatprep.subr.bf16.mxu1 %v8100_v1  ;;  %v8434_v43 = vpop.permute.xlu1 %3846  ;;  %4026 = vmatprep.mubr.bf16.mxu0 %v5635_v52  ;;  %v4154_v52 = vld [vmem:[%s9321_s5 + $0x8] sm:$0xff] }
 0x4e0   : > { %3529 = vrot.lane.b32.xlu0 %v3322_v54, %s5667_s20  ;;  %v3406_v54 = vsel %vm2486_vm10, %v9679_v44, %v9677_v34 }
 0x4e1   : > { %3531 = vrot.lane.b32.xlu1 %v8076_v39, %s5667_s20  ;;  %4001 = vmatpush1.bf16.msra.mxu0 %v3737_v32  ;;  %v3750_v39 = vsel %vm2396_vm4, %v8163_v14, %v8165_v40 }
 0x4e2   : > { %3584 = vmatpush1.bf16.msra.mxu1 %v3350_v53  ;;  %v8445_v61 = vpop.permute.xlu0 %3453  ;;  %4002 = vmatprep.subr.bf16.mxu0 %v8165_v40  ;;  %v9681_v53 = vld [vmem:[#allocation25_spill] sm:$0xff] }
 0x4e3   : > { %3585 = vmatprep.subr.bf16.mxu1 %v7985_v41  ;;  %v8449_v10 = vpop.permute.xlu1 %3455 }
 0x4e4   : > { %3537 = vrot.lane.b32.xlu0 %v3336_v36, %s5667_s20  ;;  %v3793_v36 = vsel %vm2441_vm7, %v9680_v35, %v9678_v16 }
 0x4e5   : > { %3539 = vrot.lane.b32.xlu1 %v8088_v22, %s5667_s20  ;;  %4003 = vmatpush1.bf16.msra.mxu0 %v3750_v39  ;;  %v3751_v22 = vsel %vm2396_vm4, %v8227_v18, %v8229_v30  ;;  %v3764_v18 = vsel %vm2411_vm5, %v8171_v49, %v8173_v2  ;;  %v3765_v49 = vsel %vm2411_vm5, %v8235_v37, %v8237_v11  ;;  %vm4766_vm4 = vcmask 1040384  }
 0x4e6   : > { %3586 = vmatpush1.bf16.msra.mxu1 %v3363_v51  ;;  %v8460_v1 = vpop.permute.xlu0 %3854  ;;  %4004 = vmatprep.subr.bf16.mxu0 %v8229_v30  ;;  %vm4741_vm5 = vcmask 670720  }
 0x4e7   : > { %3587 = vmatprep.subr.bf16.mxu1 %v8113_v56  ;;  %v8464_v8 = vpop.permute.xlu1 %3856 }
 0x4e8   : > { %3946 = vrot.lane.b32.xlu0 %v3736_v58, %s5667_s20  ;;  %v4281_v58 = vld [vmem:[%s9322_s6] sm:$0xff] }
 0x4e9   : > { %3948 = vrot.lane.b32.xlu1 %v8157_v31, %s5667_s20  ;;  %4005 = vmatpush1.bf16.msra.mxu0 %v3751_v22 }
 0x4ea   : > { %3588 = vmatpush1.bf16.msra.mxu1 %v3364_v27  ;;  %v8475_v41 = vpop.permute.xlu0 %3457  ;;  %4006 = vmatprep.subr.bf16.mxu0 %v8173_v2 }
 0x4eb   : > { %3589 = vmatprep.subr.bf16.mxu1 %v7997_v5  ;;  %v8479_v14 = vpop.permute.xlu1 %3459 }
 0x4ec   : > { %3950 = vrot.lane.b32.xlu0 %v3737_v32, %s5667_s20  ;;  %v4282_v32 = vld [vmem:[%s9322_s6 + $0x8] sm:$0xff] }
 0x4ed   : > { %3952 = vrot.lane.b32.xlu1 %v8221_v63, %s5667_s20  ;;  %4007 = vmatpush1.bf16.msra.mxu0 %v3764_v18 }
 0x4ee   : > { %3590 = vmatpush1.bf16.msra.mxu1 %v3377_v62  ;;  %v8490_v56 = vpop.permute.xlu0 %3858  ;;  %4008 = vmatprep.subr.bf16.mxu0 %v8237_v11 }
 0x4ef   : > { %3591 = vmatprep.subr.bf16.mxu1 %v8124_v48  ;;  %v8494_v31 = vpop.permute.xlu1 %3860 }
 0x4f0   : > { %3954 = vrot.lane.b32.xlu0 %v3750_v39, %s5667_s20  ;;  %v9682_v39 = vld [vmem:[#allocation18_spill] sm:$0xff] }
 0x4f1   : > { %3956 = vrot.lane.b32.xlu1 %v8165_v40, %s5667_s20  ;;  %4009 = vmatpush1.bf16.msra.mxu0 %v3765_v49  ;;  %v3778_v40 = vsel %vm2426_vm6, %v8179_v59, %v8181_v45  ;;  %v3779_v59 = vsel %vm2426_vm6, %v8243_v23, %v8245_v24  ;;  %v8547_v23 = vld [vmem:[%s9320_s4] ss:$20 sps:$4 sm:$0xff]  }
 0x4f2   : > { %3592 = vmatpush1.bf16.msra.mxu1 %v3378_v60  ;;  %v8505_v5 = vpop.permute.xlu0 %3467  ;;  %4010 = vmatprep.subr.bf16.mxu0 %v8181_v45  ;;  %v8604_v60 = vld [vmem:[%s9320_s4 + $0x28] ss:$20 sps:$4 sm:$0xff]  }
 0x4f3   : > { %3593 = vmatprep.subr.bf16.mxu1 %v8009_v12  ;;  %v8509_v63 = vpop.permute.xlu1 %3469  ;;  %v3392_v12 = vsel %vm2471_vm9, %v9672_v3, %v8133_v19  ;;  %v9686_v3 = vld [vmem:[#allocation2_spill] sm:$0xff] }
 0x4f4   : > { %3958 = vrot.lane.b32.xlu0 %v3751_v22, %s5667_s20  ;;  %v9683_v22 = vld [vmem:[#allocation21_spill] sm:$0xff] }
 0x4f5   : > { %3960 = vrot.lane.b32.xlu1 %v8229_v30, %s5667_s20  ;;  %4011 = vmatpush1.bf16.msra.mxu0 %v3778_v40  ;;  %v9673_v30 = vld [vmem:[#allocation9_spill] sm:$0xff]  ;;  %v3419_v27 = vsel %vm2501_vm11, %v9683_v22, %v9681_v53  ;;  %v9693_v22 = vld [vmem:[#allocation3_spill] sm:$0xff] }
 0x4f6   : > { %3594 = vmatpush1.bf16.msra.mxu1 %v3391_v25  ;;  %v8520_v48 = vpop.permute.xlu0 %3868  ;;  %4012 = vmatprep.subr.bf16.mxu0 %v8245_v24  ;;  %v4156_v25 = vld [vmem:[%s9321_s5 + $0x18] sm:$0xff] }
 0x4f7   : > { %3595 = vmatprep.subr.bf16.mxu1 %v8133_v19  ;;  %v8524_v37 = vpop.permute.xlu1 %3870  ;;  %v9675_v19 = vld [vmem:[#allocation22_spill] sm:$0xff] }
 0x4f8   : > { %3962 = vrot.lane.b32.xlu0 %v3764_v18, %s5667_s20  ;;  %v3405_v24 = vsel %vm2486_vm10, %v9675_v19, %v9674_v4  ;;  %v9684_v18 = vld [vmem:[#allocation16_spill] sm:$0xff] }
 0x4f9   : > { %3964 = vrot.lane.b32.xlu1 %v8173_v2, %s5667_s20  ;;  %4013 = vmatpush1.bf16.msra.mxu0 %v3779_v59  ;;  %v9676_v2 = vld [vmem:[#allocation11_spill] sm:$0xff]  ;;  %v3806_v62 = vsel %vm2456_vm8, %v9684_v18, %v9682_v39  ;;  %v9685_v59 = vld [vmem:[#allocation34_spill] sm:$0xff]  ;;  %v3434_v18 = vsel %vm2516_vm12, %v8339_v15, %v8366_v7 }
 0x4fa   : > { %3596 = vmatpush1.bf16.msra.mxu1 %v3392_v12  ;;  %v8535_v45 = vpop.permute.xlu0 %3471  ;;  %4014 = vmatprep.subr.bf16.mxu0 %v9673_v30  ;;  %v3792_v33 = vsel %vm2441_vm7, %v9676_v2, %v9673_v30  ;;  %v8619_v30 = vld [vmem:[%s9320_s4 + $0xc] ss:$20 sps:$4 sm:$0xff]  }
 0x4fb   : > { %3618 = vmatprep.subr.bf16.mxu1 %v9674_v4  ;;  %v8539_v29 = vpop.permute.xlu1 %3473  ;;  %v9687_v4 = vld [vmem:[#allocation36_spill] sm:$0xff] }
 0x4fc   : > { %3966 = vrot.lane.b32.xlu0 %v3765_v49, %s5667_s20  ;;  %v4155_v49 = vld [vmem:[%s9321_s5 + $0x10] sm:$0xff]  ;;  %v3420_v19 = vsel %vm2501_vm11, %v9687_v4, %v9685_v59  ;;  %v9695_v4 = vld [vmem:[#allocation30_spill] sm:$0xff] }
 0x4fd   : > { %3968 = vrot.lane.b32.xlu1 %v8237_v11, %s5667_s20  ;;  %3598 = vmatmul.mubr.bf16.vlgmr.msra.gmra.mrb[48].mxu1 %v8547_v23 }
 0x4fe   : > { %3619 = vmatpush1.bf16.msra.mxu1 %v3405_v24  ;;  %4015 = vmatpush1.bf16.msra.mxu0 %v3792_v33  ;;  %v8559_v11 = vpop.permute.xlu0 %3872  ;;  %v9688_v24 = vld [vmem:[#allocation37_spill] sm:$0xff]  ;;  %v4283_v33 = vld [vmem:[%s9322_s6 + $0x10] sm:$0xff] }
 0x4ff   : > { %3620 = vmatprep.subr.bf16.mxu1 %v9677_v34  ;;  %4016 = vmatprep.subr.bf16.mxu0 %v9678_v16  ;;  %v8566_v28 = vpop.permute.xlu1 %3874  ;;  %v3807_v2 = vsel %vm2456_vm8, %v9688_v24, %v9686_v3  ;;  %v9689_v34 = vld [vmem:[#allocation29_spill] sm:$0xff]  ;;  %v9690_v16 = vld [vmem:[#allocation24_spill] sm:$0xff] }
 0x500   : > { %4171 = vperm.xlu0 %5243, %v4153_v50   ;;  %3607 = vmatprep.mubr.bf16.mxu1 %v8571_v42 }
 0x501   : > { %4176 = vperm.xlu1 %5244, %v4154_v52   ;;  %v4284_v52 = vld [vmem:[%s9322_s6 + $0x18] sm:$0xff] }
 0x502   : > { %3621 = vmatpush1.bf16.msra.mxu1 %v3406_v54  ;;  %4017 = vmatpush1.bf16.msra.mxu0 %v3793_v36  ;;  %v8583_v57 = vpop.permute.xlu0 %3481  ;;  %v9691_v54 = vld [vmem:[#allocation27_spill] sm:$0xff] }
 0x503   : > { %3622 = vmatprep.subr.bf16.mxu1 %v9681_v53  ;;  %4018 = vmatprep.subr.bf16.mxu0 %v9682_v39  ;;  %v8590_v51 = vpop.permute.xlu1 %3483  ;;  %v3433_v35 = vsel %vm2516_vm12, %v9691_v54, %v9689_v34  ;;  %v9692_v36 = vld [vmem:[#allocation23_spill] sm:$0xff] }
 0x504   : > { %4299 = vperm.xlu0 %5243, %v4281_v58   ;;  %v3820_v58 = vsel %vm2471_vm9, %v9692_v36, %v9690_v16  ;;  %v4158_v39 = vld [vmem:[%s9321_s5 + $0x28] sm:$0xff] }
 0x505   : > { %4304 = vperm.xlu1 %5244, %v4282_v32   ;;  %3608 = vmatmul.mubr.bf16.gmra.mrb[52].mxu1 %v8604_v60  ;;  %v4157_v32 = vld [vmem:[%s9321_s5 + $0x20] sm:$0xff] }
 0x506   : > { %3623 = vmatpush1.bf16.msra.mxu1 %v3419_v27  ;;  %4019 = vmatpush1.bf16.msra.mxu0 %v3806_v62  ;;  %v8607_v40 = vpop.permute.xlu0 %3882  ;;  %v9694_v62 = vld [vmem:[#allocation4_spill] sm:$0xff] }
 0x507   : > { %3624 = vmatprep.subr.bf16.mxu1 %v9685_v59  ;;  %4020 = vmatprep.subr.bf16.mxu0 %v9686_v3  ;;  %v8614_v12 = vpop.permute.xlu1 %3884  ;;  %v4286_v3 = vld [vmem:[%s9322_s6 + $0x28] sm:$0xff] }
 0x508   : > { %4181 = vperm.xlu0 %5243, %v4155_v49   ;;  %3650 = vmatprep.mubr.bf16.mxu1 %v8619_v30  ;;  %v3821_v49 = vsel %vm2471_vm9, %v9694_v62, %v9693_v22 }
 0x509   : > { %4186 = vperm.xlu1 %5244, %v4156_v25   ;;  %v4285_v25 = vld [vmem:[%s9322_s6 + $0x20] sm:$0xff] }
 0x50a   : > { %3625 = vmatpush1.bf16.msra.mxu1 %v3420_v19  ;;  %4021 = vmatpush1.bf16.msra.mxu0 %v3807_v2  ;;  %v8631_v50 = vpop.permute.xlu0 %3485  ;;  %v9696_v19 = vld [vmem:[#allocation28_spill] sm:$0xff] }
 0x50b   : > { %3626 = vmatprep.subr.bf16.mxu1 %v9689_v34  ;;  %4022 = vmatprep.subr.bf16.mxu0 %v9690_v16  ;;  %v8638_v44 = vpop.permute.xlu1 %3487  ;;  %v3834_v24 = vsel %vm2486_vm10, %v9696_v19, %v9695_v4  ;;  %v4159_v2 = vld [vmem:[%s9321_s5 + $0x30] sm:$0xff] }
 0x50c   : > { %4309 = vperm.xlu0 %5243, %v4283_v33   ;;  %v4287_v34 = vld [vmem:[%s9322_s6 + $0x30] sm:$0xff] }
 0x50d   : > { %4314 = vperm.xlu1 %5244, %v4284_v52   ;;  %v4160_v52 = vld [vmem:[%s9321_s5 + $0x38] sm:$0xff] }
 0x50e   : > { %3627 = vmatpush1.bf16.msra.mxu1 %v3433_v35  ;;  %4023 = vmatpush1.bf16.msra.mxu0 %v3820_v58  ;;  %v8649_v53 = vpop.permute.xlu0 %3886  ;;  %v4162_v35 = vld [vmem:[%s9321_s5 + $0x48] sm:$0xff]  ;;  %v4164_v58 = vld [vmem:[%s9321_s5 + $0x58] sm:$0xff] }
 0x50f   : > { %3628 = vmatprep.subr.bf16.mxu1 %v8366_v7  ;;  %4024 = vmatprep.subr.bf16.mxu0 %v9693_v22  ;;  %v8656_v27 = vpop.permute.xlu1 %3888  ;;  %v3447_v7 = vsel %vm2531_vm13, %v8386_v26, %v8390_v21 }
 0x510   : > { %4191 = vperm.xlu0 %5243, %v4157_v32  }
 0x511   : > { %4196 = vperm.xlu1 %5244, %v4158_v39   ;;  %v4292_v39 = vld [vmem:[%s9322_s6 + $0x58] sm:$0xff] }
 0x512   : > { %3629 = vmatpush1.bf16.msra.mxu1 %v3434_v18  ;;  %4025 = vmatpush1.bf16.msra.mxu0 %v3821_v49  ;;  %v8667_v59 = vpop.permute.xlu0 %3495  ;;  %v4166_v18 = vld [vmem:[%s9321_s5 + $0x68] sm:$0xff] }
 0x513   : > { %3630 = vmatprep.subr.bf16.mxu1 %v8390_v21  ;;  %4047 = vmatprep.subr.bf16.mxu0 %v9695_v4  ;;  %v8674_v15 = vpop.permute.xlu1 %3497  ;;  %v3448_v21 = vsel %vm2531_vm13, %v8414_v46, %v8418_v6  ;;  %v4294_v49 = vld [vmem:[%s9322_s6 + $0x68] sm:$0xff]  ;;  %v4295_v4 = vld [vmem:[%s9322_s6 + $0x70] sm:$0xff] }
 0x514   : > { %4319 = vperm.xlu0 %5243, %v4285_v25  }
 0x515   : > { %4324 = vperm.xlu1 %5244, %v4286_v3   ;;  %4027 = vmatmul.mubr.bf16.vlgmr.msra.gmra.mrb[64].mxu0 %v8547_v23  ;;  %v3835_v23 = vsel %vm2486_vm10, %v8363_v55, %v8378_v20  ;;  %v3461_v55 = vsel %vm2546_vm14, %v8445_v61, %v8449_v10  ;;  %v4168_v3 = vld [vmem:[%s9321_s5 + $0x78] sm:$0xff] }
 0x516   : > { %3631 = vmatpush1.bf16.msra.mxu1 %v3447_v7  ;;  %4048 = vmatpush1.bf16.msra.mxu0 %v3834_v24  ;;  %v8686_v33 = vpop.permute.xlu0 %3896  ;;  %v4296_v7 = vld [vmem:[%s9322_s6 + $0x78] sm:$0xff] }
 0x517   : > { %3632 = vmatprep.subr.bf16.mxu1 %v8418_v6  ;;  %4049 = vmatprep.subr.bf16.mxu0 %v8378_v20  ;;  %v8693_v26 = vpop.permute.xlu1 %3898  ;;  %v3848_v20 = vsel %vm2501_vm11, %v8400_v17, %v8404_v9  ;;  %v4161_v6 = vld [vmem:[%s9321_s5 + $0x40] sm:$0xff]  ;;  %v3462_v17 = vsel %vm2546_vm14, %v8475_v41, %v8479_v14  ;;  %v5640_v24 = vld [vmem:[%s9320_s4 + $0x8] ss:$20 sps:$4 sm:$0xff]  }
 0x518   : > { %4201 = vperm.xlu0 %5243, %v4159_v2   ;;  %4036 = vmatprep.mubr.bf16.mxu0 %v8571_v42  ;;  %v4288_v42 = vld [vmem:[%s9322_s6 + $0x38] sm:$0xff] }
 0x519   : > { %4206 = vperm.xlu1 %5244, %v4160_v52  }
 0x51a   : > { %3633 = vmatpush1.bf16.msra.mxu1 %v3448_v21  ;;  %4050 = vmatpush1.bf16.msra.mxu0 %v3835_v23  ;;  %v8705_v16 = vpop.permute.xlu0 %3499 }
 0x51b   : > { %3634 = vmatprep.subr.bf16.mxu1 %v8449_v10  ;;  %4051 = vmatprep.subr.bf16.mxu0 %v8404_v9  ;;  %v8712_v46 = vpop.permute.xlu1 %3501  ;;  %v3849_v9 = vsel %vm2501_vm11, %v8430_v47, %v8434_v43  ;;  %v4289_v10 = vld [vmem:[%s9322_s6 + $0x40] sm:$0xff]  ;;  %v3475_v47 = vsel %vm2561_vm15, %v8505_v5, %v8509_v63 }
 0x51c   : > { %4329 = vperm.xlu0 %5243, %v4287_v34  }
 0x51d   : > { %4334 = vperm.xlu1 %5244, %v4288_v42   ;;  %4037 = vmatmul.mubr.bf16.gmra.mrb[68].mxu0 %v8604_v60 }
 0x51e   : > { %3635 = vmatpush1.bf16.msra.mxu1 %v3461_v55  ;;  %4052 = vmatpush1.bf16.msra.mxu0 %v3848_v20  ;;  %v8724_v54 = vpop.permute.xlu0 %3900 }
 0x51f   : > { %3636 = vmatprep.subr.bf16.mxu1 %v8479_v14  ;;  %4053 = vmatprep.subr.bf16.mxu0 %v8434_v43  ;;  %v8731_v61 = vpop.permute.xlu1 %3902  ;;  %v3862_v43 = vsel %vm2516_vm12, %v8460_v1, %v8464_v8  ;;  %v4163_v14 = vld [vmem:[%s9321_s5 + $0x50] sm:$0xff]  ;;  %v3476_v1 = vsel %vm2561_vm15, %v8535_v45, %v8539_v29 }
 0x520   : > { %4211 = vperm.xlu0 %5243, %v4161_v6   ;;  %4079 = vmatprep.mubr.bf16.mxu0 %v8619_v30  ;;  %v4290_v30 = vld [vmem:[%s9322_s6 + $0x48] sm:$0xff] }
 0x521   : > { %4216 = vperm.xlu1 %5244, %v4162_v35  }
 0x522   : > { %3637 = vmatpush1.bf16.msra.mxu1 %v3462_v17  ;;  %4054 = vmatpush1.bf16.msra.mxu0 %v3849_v9  ;;  %v8743_v60 = vpop.permute.xlu0 %3509 }
 0x523   : > { %3638 = vmatprep.subr.bf16.mxu1 %v8509_v63  ;;  %4055 = vmatprep.subr.bf16.mxu0 %v8464_v8  ;;  %v8750_v41 = vpop.permute.xlu1 %3511  ;;  %v3863_v8 = vsel %vm2516_vm12, %v8490_v56, %v8494_v31  ;;  %v4291_v63 = vld [vmem:[%s9322_s6 + $0x50] sm:$0xff]  ;;  %v3489_v56 = vsel %vm2576_vm0, %v8583_v57, %v8590_v51 }
 0x524   : > { %4339 = vperm.xlu0 %5243, %v4289_v10   ;;  %v3541_v19 = vsel %vm2630_vm3, %v8743_v60, %v8750_v41 }
 0x525   : > { %4344 = vperm.xlu1 %5244, %v4290_v30  }
 0x526   : > { %3639 = vmatpush1.bf16.msra.mxu1 %v3475_v47  ;;  %4056 = vmatpush1.bf16.msra.mxu0 %v3862_v43  ;;  %v8761_v36 = vpop.permute.xlu0 %3910 }
 0x527   : > { %3640 = vmatprep.subr.bf16.mxu1 %v8539_v29  ;;  %4057 = vmatprep.subr.bf16.mxu0 %v8494_v31  ;;  %v8768_v5 = vpop.permute.xlu1 %3912  ;;  %v3876_v31 = vsel %vm2531_vm13, %v8520_v48, %v8524_v37  ;;  %v4165_v29 = vld [vmem:[%s9321_s5 + $0x60] sm:$0xff]  ;;  %v3490_v48 = vsel %vm2576_vm0, %v8631_v50, %v8638_v44 }
 0x528   : > { %4221 = vperm.xlu0 %5243, %v4163_v14   ;;  %v3918_v42 = vsel %vm2576_vm0, %v8761_v36, %v8768_v5 }
 0x529   : > { %4226 = vperm.xlu1 %5244, %v4164_v58  }
 0x52a   : > { %3641 = vmatpush1.bf16.msra.mxu1 %v3476_v1  ;;  %4058 = vmatpush1.bf16.msra.mxu0 %v3863_v8  ;;  %v8779_v32 = vpop.permute.xlu0 %3513 }
 0x52b   : > { %3642 = vmatprep.subr.bf16.mxu1 %v8590_v51  ;;  %4059 = vmatprep.subr.bf16.mxu0 %v8524_v37  ;;  %v8786_v45 = vpop.permute.xlu1 %3515  ;;  %v3877_v37 = vsel %vm2531_vm13, %v8559_v11, %v8566_v28  ;;  %v4293_v51 = vld [vmem:[%s9322_s6 + $0x60] sm:$0xff]  ;;  %v3503_v11 = vsel %vm2591_vm1, %v8667_v59, %v8674_v15 }
 0x52c   : > { %4349 = vperm.xlu0 %5243, %v4291_v63   ;;  %v3542_v21 = vsel %vm2630_vm3, %v8779_v32, %v8786_v45 }
 0x52d   : > { %4354 = vperm.xlu1 %5244, %v4292_v39  }
 0x52e   : > { %3643 = vmatpush1.bf16.msra.mxu1 %v3489_v56  ;;  %4060 = vmatpush1.bf16.msra.mxu0 %v3876_v31  ;;  %v8797_v22 = vpop.permute.xlu0 %3914 }
 0x52f   : > { %3644 = vmatprep.subr.bf16.mxu1 %v8638_v44  ;;  %4061 = vmatprep.subr.bf16.mxu0 %v8566_v28  ;;  %v8804_v57 = vpop.permute.xlu1 %3916  ;;  %v3890_v28 = vsel %vm2546_vm14, %v8607_v40, %v8614_v12  ;;  %v4167_v44 = vld [vmem:[%s9321_s5 + $0x70] sm:$0xff]  ;;  %v3891_v40 = vsel %vm2546_vm14, %v8649_v53, %v8656_v27 }
 0x530   : > { %4231 = vperm.xlu0 %5243, %v4165_v29   ;;  %v3919_v6 = vsel %vm2576_vm0, %v8797_v22, %v8804_v57  ;;  %v5621_v29 = vld [vmem:[%s9324_s8] sm:$0xff]  }
 0x531   : > { %4236 = vperm.xlu1 %5244, %v4166_v18  }
 0x532   : > { %3645 = vmatpush1.bf16.msra.mxu1 %v3490_v48  ;;  %4062 = vmatpush1.bf16.msra.mxu0 %v3877_v37  ;;  %v8815_v62 = vpop.permute.xlu0 %3924  ;;  %v5622_v48 = vld [vmem:[%s9324_s8 + $0x8] sm:$0xff]  }
 0x533   : > { %3646 = vmatprep.subr.bf16.mxu1 %v8674_v15  ;;  %4063 = vmatprep.subr.bf16.mxu0 %v8614_v12  ;;  %v8822_v50 = vpop.permute.xlu1 %3926  ;;  %v3504_v12 = vsel %vm2591_vm1, %v8705_v16, %v8712_v46 }
 0x534   : > { %4359 = vperm.xlu0 %5243, %v4293_v51  }
 0x535   : > { %4364 = vperm.xlu1 %5244, %v4294_v49   ;;  %v5623_v49 = vld [vmem:[%s9324_s8 + $0x10] sm:$0xff]  }
 0x536   : > { %3647 = vmatpush1.bf16.msra.mxu1 %v3503_v11  ;;  %4064 = vmatpush1.bf16.msra.mxu0 %v3890_v28  ;;  %v3929_v25 = vpop.permute.xlu0 %3928 }
 0x537   : > { %3648 = vmatprep.subr.bf16.mxu1 %v8712_v46  ;;  %4065 = vmatprep.subr.bf16.mxu0 %v8656_v27  ;;  %v3931_v59 = vpop.permute.xlu1 %3930  ;;  %v3904_v27 = vsel %vm2561_vm15, %v8686_v33, %v8693_v26  ;;  %v5641_v33 = vld [vmem:[%s9320_s4 + $0x34] ss:$20 sps:$4 sm:$0xff]   ;;  %v5642_v46 = vld [vmem:[%s9320_s4 + $0x30] ss:$20 sps:$4 sm:$0xff]  }
 0x538   : > { %4241 = vperm.xlu0 %5243, %v4167_v44   ;;  %v3933_v60 = vsel %vm2591_vm1, %v3929_v25, %v3931_v59  ;;  %v5624_v44 = vld [vmem:[%s9324_s8 + $0x18] sm:$0xff]  }
 0x539   : > { %4246 = vperm.xlu1 %5244, %v4168_v3  }
 0x53a   : > { %3649 = vmatpush1.bf16.msra.mxu1 %v3504_v12  ;;  %4066 = vmatpush1.bf16.msra.mxu0 %v3891_v40  ;;  %v3939_v15 = vpop.permute.xlu0 %3938  ;;  %v5625_v40 = vld [vmem:[%s9324_s8 + $0x20] sm:$0xff]   ;;  %v5626_v12 = vld [vmem:[%s9324_s8 + $0x28] sm:$0xff]  }
 0x53b   : > { %3671 = vmatprep.subr.bf16.mxu1 %v8750_v41  ;;  %4067 = vmatprep.subr.bf16.mxu0 %v8693_v26  ;;  %v3941_v53 = vpop.permute.xlu1 %3940  ;;  %v3905_v26 = vsel %vm2561_vm15, %v8724_v54, %v8731_v61 }
 0x53c   : > { %4369 = vperm.xlu0 %5243, %v4295_v4   ;;  %v3970_v43 = vsel %vm2630_vm3, %v3939_v15, %v3941_v53  ;;  %v5627_v4 = vld [vmem:[%s9324_s8 + $0x30] sm:$0xff]   ;;  %v5629_v15 = vld [vmem:[%s9324_s8 + $0x40] sm:$0xff]  }
 0x53d   : > { %4374 = vperm.xlu1 %5244, %v4296_v7   ;;  %3651 = vmatmul.mubr.bf16.vlgmr.msra.gmra.mrb[48].mxu1 %v5640_v24  ;;  %v5630_v7 = vld [vmem:[%s9324_s8 + $0x48] sm:$0xff]  }
 0x53e   : > { %3672 = vmatpush1.bf16.msra.mxu1 %v3541_v19  ;;  %4068 = vmatpush1.bf16.msra.mxu0 %v3904_v27  ;;  %v3943_v2 = vpop.permute.xlu0 %3942  ;;  %v5631_v27 = vld [vmem:[%s9324_s8 + $0x50] sm:$0xff]  }
 0x53f   : > { %3673 = vmatprep.subr.bf16.mxu1 %v8786_v45  ;;  %4069 = vmatprep.subr.bf16.mxu0 %v8731_v61  ;;  %v3945_v52 = vpop.permute.xlu1 %3944  ;;  %v3932_v61 = vsel %vm2591_vm1, %v8815_v62, %v8822_v50 }
 0x540   : > { %3660 = vmatprep.mubr.bf16.mxu1 %v5641_v33 }
 0x542   : > { %3674 = vmatpush1.bf16.msra.mxu1 %v3542_v21  ;;  %4070 = vmatpush1.bf16.msra.mxu0 %v3905_v26  ;;  %v3518_v23 = vpop.permute.xlu0 %3517 }
 0x543   : > { %4071 = vmatprep.subr.bf16.mxu0 %v8768_v5  ;;  %v3520_v34 = vpop.permute.xlu1 %3519  ;;  %v3971_v5 = vsel %vm2630_vm3, %v3943_v2, %v3945_v52 }
 0x544   : > { %v3543_v16 = vsel %vm2630_vm3, %v3518_v23, %v3520_v34  ;;  %3675 = vmatprep.subr.bf16.mxu1 %v3520_v34 }
 0x545   : > { %3661 = vmatmul.mubr.bf16.gmra.mrb[52].mxu1 %v5642_v46 }
 0x546   : > { %3676 = vmatpush1.bf16.msra.mxu1 %v3543_v16  ;;  %4072 = vmatpush1.bf16.msra.mxu0 %v3918_v42  ;;  %v3526_v55 = vpop.permute.xlu0 %3525 }
 0x547   : > { %4073 = vmatprep.subr.bf16.mxu0 %v8804_v57  ;;  %v3528_v20 = vpop.permute.xlu1 %3527  ;;  %3703 = vmatprep.mubr.bf16.mxu1 %v9642_v38 }
 0x548   : > { %v3545_v47 = vsel %vm2630_vm3, %v3526_v55, %v3528_v20 }
 0x54a   : > { %4074 = vmatpush1.bf16.msra.mxu0 %v3919_v6  ;;  %v3534_v54 = vpop.permute.xlu0 %3533  ;;  %v5633_v6 = vld [vmem:[%s9324_s8 + $0x60] sm:$0xff]  }
 0x54b   : > { %4075 = vmatprep.subr.bf16.mxu0 %v8822_v50  ;;  %v3536_v35 = vpop.permute.xlu1 %3535 }
 0x54c   : > { %v3547_v63 = vsel %vm2630_vm3, %v3534_v54, %v3536_v35  ;;  %v5634_v54 = vld [vmem:[%s9324_s8 + $0x68] ss:$0 sps:$4 sm:$0x11]  }
 0x54e   : > { %4076 = vmatpush1.bf16.msra.mxu0 %v3932_v61  ;;  %v3522_v17 = vpop.permute.xlu0 %3521 }
 0x54f   : > { %4077 = vmatprep.subr.bf16.mxu0 %v3931_v59  ;;  %v3524_v9 = vpop.permute.xlu1 %3523 }
 0x550   : > { %v3544_v10 = vsel %vm2630_vm3, %v3522_v17, %v3524_v9  ;;  %3677 = vmatprep.subr.bf16.mxu1 %v3524_v9 }
 0x551   : > { %3678 = vmatpush1.bf16.msra.mxu1 %v3544_v10 }
 0x552   : > { %4078 = vmatpush1.bf16.msra.mxu0 %v3933_v60  ;;  %v3530_v30 = vpop.permute.xlu0 %3529  ;;  %3679 = vmatprep.subr.bf16.mxu1 %v3528_v20 }
 0x553   : > { %4100 = vmatprep.subr.bf16.mxu0 %v3941_v53  ;;  %v3532_v41 = vpop.permute.xlu1 %3531 }
 0x554   : > { %v3546_v58 = vsel %vm2630_vm3, %v3530_v30, %v3532_v41  ;;  %v4768_v30 = vsel %vm4766_vm4, %v5634_v54, 0 }
 0x555   : > { %3680 = vmatpush1.bf16.msra.mxu1 %v3545_v47  ;;  %4080 = vmatmul.mubr.bf16.vlgmr.msra.gmra.mrb[64].mxu0 %v5640_v24  ;;  %v5632_v24 = vld [vmem:[%s9324_s8 + $0x58] sm:$0xff]  }
 0x556   : > { %4101 = vmatpush1.bf16.msra.mxu0 %v3970_v43  ;;  %v3538_v14 = vpop.permute.xlu0 %3537  ;;  %3681 = vmatprep.subr.bf16.mxu1 %v3532_v41 }
 0x557   : > { %4102 = vmatprep.subr.bf16.mxu0 %v3945_v52  ;;  %v3540_v36 = vpop.permute.xlu1 %3539  ;;  %4089 = vmatprep.mubr.bf16.mxu0 %v5641_v33 }
 0x558   : > { %v3548_v56 = vsel %vm2630_vm3, %v3538_v14, %v3540_v36 }
 0x559   : > { %3682 = vmatpush1.bf16.msra.mxu1 %v3546_v58 }
 0x55a   : > { %4103 = vmatpush1.bf16.msra.mxu0 %v3971_v5  ;;  %v3947_v1 = vpop.permute.xlu0 %3946  ;;  %3683 = vmatprep.subr.bf16.mxu1 %v3536_v35 }
 0x55b   : > { %v3949_v8 = vpop.permute.xlu1 %3948 }
 0x55c   : > { %v3972_v32 = vsel %vm2630_vm3, %v3947_v1, %v3949_v8  ;;  %4104 = vmatprep.subr.bf16.mxu0 %v3949_v8 }
 0x55d   : > { %3684 = vmatpush1.bf16.msra.mxu1 %v3547_v63  ;;  %4090 = vmatmul.mubr.bf16.gmra.mrb[68].mxu0 %v5642_v46 }
 0x55e   : > { %4105 = vmatpush1.bf16.msra.mxu0 %v3972_v32  ;;  %v3951_v39 = vpop.permute.xlu0 %3950  ;;  %3685 = vmatprep.subr.bf16.mxu1 %v3540_v36 }
 0x55f   : > { %v3953_v45 = vpop.permute.xlu1 %3952  ;;  %4132 = vmatprep.mubr.bf16.mxu0 %v9642_v38 }
 0x560   : > { %v3973_v31 = vsel %vm2630_vm3, %v3951_v39, %v3953_v45  ;;  %4106 = vmatprep.subr.bf16.mxu0 %v3953_v45 }
 0x561   : > { %3686 = vmatpush1.bf16.msra.mxu1 %v3548_v56 }
 0x562   : > { %4107 = vmatpush1.bf16.msra.mxu0 %v3973_v31  ;;  %v3955_v22 = vpop.permute.xlu0 %3954  ;;  %4770 = vmatprep.subr.bf16.mxu1 %v9642_v38 }
 0x563   : > { %v3957_v18 = vpop.permute.xlu1 %3956 }
 0x564   : > { %v3974_v57 = vsel %vm2630_vm3, %v3955_v22, %v3957_v18  ;;  %3704 = vmatmul.mubr.bf16.vlgmr.msra.gmra.mrb[48].mxu1 %v8315_v0  ;;  %4108 = vmatprep.subr.bf16.mxu0 %v3957_v18 }
 0x565   : > { %3713 = vmatprep.mubr.bf16.mxu1 %v9642_v38  ;;  %4771 = vmatpush1.bf16.msra.mxu1 %v5621_v29 }
 0x566   : > { %4109 = vmatpush1.bf16.msra.mxu0 %v3974_v57  ;;  %v3959_v37 = vpop.permute.xlu0 %3958  ;;  %4772 = vmatprep.subr.bf16.mxu1 %v9642_v38 }
 0x567   : > { %v3961_v51 = vpop.permute.xlu1 %3960 }
 0x568   : > { %v3975_v62 = vsel %vm2630_vm3, %v3959_v37, %v3961_v51  ;;  %4110 = vmatprep.subr.bf16.mxu0 %v3961_v51 }
 0x569   : > { %4773 = vmatpush1.bf16.msra.mxu1 %v5622_v48 }
 0x56a   : > { %4111 = vmatpush1.bf16.msra.mxu0 %v3975_v62  ;;  %v3963_v50 = vpop.permute.xlu0 %3962  ;;  %4774 = vmatprep.subr.bf16.mxu1 %v9642_v38 }
 0x56b   : > { %v3965_v11 = vpop.permute.xlu1 %3964 }
 0x56c   : > { %v3976_v28 = vsel %vm2630_vm3, %v3963_v50, %v3965_v11  ;;  %3714 = vmatmul.mubr.bf16.gmra.mrb[52].mxu1 %v8334_v13  ;;  %4112 = vmatprep.subr.bf16.mxu0 %v3965_v11 }
 0x56d   : > { %4775 = vmatpush1.bf16.msra.mxu1 %v5623_v49 }
 0x56e   : > { %4113 = vmatpush1.bf16.msra.mxu0 %v3976_v28  ;;  %v3967_v25 = vpop.permute.xlu0 %3966  ;;  %4776 = vmatprep.subr.bf16.mxu1 %v9642_v38 }
 0x56f   : > { %v3969_v3 = vpop.permute.xlu1 %3968 }
 0x570   : > { %v3977_v59 = vsel %vm2630_vm3, %v3967_v25, %v3969_v3  ;;  %4114 = vmatprep.subr.bf16.mxu0 %v3969_v3 }
 0x571   : > { %4777 = vmatpush1.bf16.msra.mxu1 %v5624_v44 }
 0x572   : > { %4115 = vmatpush1.bf16.msra.mxu0 %v3977_v59  ;;  %4778 = vmatprep.subr.bf16.mxu1 %v9642_v38 }
 0x575   : > { %4133 = vmatmul.mubr.bf16.vlgmr.msra.gmra.mrb[64].mxu0 %v8315_v0  ;;  %4779 = vmatpush1.bf16.msra.mxu1 %v5625_v40  ;;  %v5628_v0 = vld [vmem:[%s9324_s8 + $0x38] sm:$0xff]  }
 0x576   : > { %4142 = vmatprep.mubr.bf16.mxu0 %v9642_v38  ;;  %4780 = vmatprep.subr.bf16.mxu1 %v9642_v38 }
 0x579   : > { %4781 = vmatpush1.bf16.msra.mxu1 %v5626_v12 }
 0x57a   : > { %4782 = vmatprep.subr.bf16.mxu1 %v9642_v38 }
 0x57d   : > { %4143 = vmatmul.mubr.bf16.gmra.mrb[68].mxu0 %v8334_v13  ;;  %4783 = vmatpush1.bf16.msra.mxu1 %v5627_v4 }
 0x57e   : > { %4784 = vmatprep.subr.bf16.mxu1 %v9642_v38 }
 0x57f   : > { %v4172_v13 = vpop.permute.xlu0 %4171 }
 0x580   : > { %v4177_v53 = vpop.permute.xlu1 %4176 }
 0x581   : > { %4785 = vmatpush1.bf16.msra.mxu1 %v5628_v0 }
 0x582   : > { %4786 = vmatprep.subr.bf16.mxu1 %v9642_v38 }
 0x583   : > { %v4300_v19 = vpop.permute.xlu0 %4299 }
 0x584   : > { %v4305_v2 = vpop.permute.xlu1 %4304 }
 0x585   : > { %4787 = vmatpush1.bf16.msra.mxu1 %v5629_v15 }
 0x586   : > { %4788 = vmatprep.subr.bf16.mxu1 %v9642_v38 }
 0x587   : > { %v4182_v46 = vpop.permute.xlu0 %4181 }
 0x588   : > { %v4187_v17 = vpop.permute.xlu1 %4186 }
 0x589   : > { %4789 = vmatpush1.bf16.msra.mxu1 %v5630_v7 }
 0x58a   : > { %4790 = vmatprep.subr.bf16.mxu1 %v9642_v38 }
 0x58b   : > { %v4310_v58 = vpop.permute.xlu0 %4309 }
 0x58c   : > { %v4315_v39 = vpop.permute.xlu1 %4314 }
 0x58d   : > { %4791 = vmatpush1.bf16.msra.mxu1 %v5631_v27 }
 0x58e   : > { %4792 = vmatprep.subr.bf16.mxu1 %v9642_v38 }
 0x58f   : > { %v2847_v52 = vpop.f32.mrb[40].mxu1  ;;  %v4192_v48 = vpop.permute.xlu0 %4191 }
 0x590   : > { %v4249_v33 = vmul.f32 %v4172_v13, %v2847_v52  ;;  %v2849_v26 = vpop.f32.mrb[41].mxu1  ;;  %v4197_v62 = vpop.permute.xlu1 %4196 }
 0x591   : > { %v4250_v21 = vmul.f32 %v4172_v13, %v2849_v26  ;;  %v2851_v23 = vpop.f32.mrb[42].mxu1  ;;  %4793 = vmatpush1.bf16.msra.mxu1 %v5632_v24 }
 0x592   : > { %v8958_v34 = vadd.f32 %v4300_v19, %v4249_v33  ;;  %v4251_v16 = vmul.f32 %v4177_v53, %v2851_v23  ;;  %v2853_v42 = vpop.f32.mrb[43].mxu1  ;;  %4794 = vmatprep.subr.bf16.mxu1 %v9642_v38 }
 0x593   : > { %v8961_v55 = vadd.f32 %v4300_v19, %v4250_v21  ;;  %v4252_v20 = vmul.f32 %v4177_v53, %v2853_v42  ;;  %v4320_v50 = vpop.permute.xlu0 %4319 }
 0x594   : > { %v4409_v35 = vmax.f32 %v8958_v34, 0.0  ;;  %v8970_v61 = vadd.f32 %v4305_v2, %v4251_v16  ;;  %v4325_v11 = vpop.permute.xlu1 %4324 }
 0x595   : > { %v4410_v9 = vmax.f32 %v8961_v55, 0.0  ;;  %v8973_v10 = vadd.f32 %v4305_v2, %v4252_v20  ;;  %4795 = vmatpush1.bf16.msra.mxu1 %v5633_v6 }
 0x596   : > { %v4411_v60 = vmax.f32 %v8970_v61, 0.0  ;;  %4796 = vmatprep.subr.bf16.mxu1 %v9642_v38 }
 0x597   : > { %v5405_v41 = vpack.i.bf16 %v4410_v9, %v4409_v35  ;;  %v4412_v47 = vmax.f32 %v8973_v10, 0.0  ;;  %v2857_v43 = vpop.f32.mrb[44].mxu1  ;;  %v4202_v0 = vpop.permute.xlu0 %4201 }
 0x598   : > { %v4253_v14 = vmul.f32 %v4182_v46, %v2857_v43  ;;  %v2859_v36 = vpop.f32.mrb[45].mxu1  ;;  %v4207_v27 = vpop.permute.xlu1 %4206 }
 0x599   : > { %v5410_v5 = vpack.i.bf16 %v4412_v47, %v4411_v60  ;;  %v4254_v1 = vmul.f32 %v4182_v46, %v2859_v36  ;;  %5406 = vrot.lane.b32.xlu0 %v5405_v41, %s5652_s19  ;;  %v2861_v38 = vpop.f32.mrb[46].mxu1  ;;  %4797 = vmatpush1.bf16.msra.mxu1 %v4768_v30 }
 0x59a   : > { %v8987_v8 = vadd.f32 %v4310_v58, %v4253_v14  ;;  %v4255_v63 = vmul.f32 %v4187_v17, %v2861_v38  ;;  %v2863_v32 = vpop.f32.mrb[47].mxu1 }
 0x59b   : > { %v8989_v45 = vadd.f32 %v4310_v58, %v4254_v1  ;;  %v4256_v56 = vmul.f32 %v4187_v17, %v2863_v32  ;;  %5411 = vrot.lane.b32.xlu1 %v5410_v5, %s5652_s19  ;;  %v4330_v16 = vpop.permute.xlu0 %4329 }
 0x59c   : > { %v4413_v31 = vmax.f32 %v8987_v8, 0.0  ;;  %v8993_v29 = vadd.f32 %v4315_v39, %v4255_v63  ;;  %v4335_v30 = vpop.permute.xlu1 %4334 }
 0x59d   : > { %v4414_v22 = vmax.f32 %v8989_v45, 0.0  ;;  %v8996_v18 = vadd.f32 %v4315_v39, %v4256_v56 }
 0x59e   : > { %v4415_v57 = vmax.f32 %v8993_v29, 0.0 }
 0x59f   : > { %v5415_v37 = vpack.i.bf16 %v4414_v22, %v4413_v31  ;;  %v4416_v51 = vmax.f32 %v8996_v18, 0.0  ;;  %v9054_v39 = vpop.permute.xlu0 %4211 }
 0x5a0   : > { %v9056_v56 = vpop.permute.xlu1 %4216 }
 0x5a1   : > { %v5420_v49 = vpack.i.bf16 %v4416_v51, %v4415_v57  ;;  %5416 = vrot.lane.b32.xlu0 %v5415_v37, %s5652_s19 }
 0x5a3   : > { %5421 = vrot.lane.b32.xlu1 %v5420_v49, %s5652_s19 }
 0x5a4   : > { %v9060_v37 = vpop.permute.xlu1 %4344 }
 0x5a7   : > { %v3276_v28 = vpop.f32.mrb[56].mxu0 }
 0x5a8   : > { %v4257_v44 = vmul.f32 %v4192_v48, %v3276_v28  ;;  %v3278_v25 = vpop.f32.mrb[57].mxu0  ;;  %v9064_v49 = vpop.permute.xlu1 %4226 }
 0x5a9   : > { %v4258_v3 = vmul.f32 %v4192_v48, %v3278_v25  ;;  %v3280_v59 = vpop.f32.mrb[58].mxu0  ;;  %v9058_v48 = vpop.permute.xlu0 %4339 }
 0x5aa   : > { %v9010_v40 = vadd.f32 %v4320_v50, %v4257_v44  ;;  %v4259_v12 = vmul.f32 %v4197_v62, %v3280_v59  ;;  %v3282_v4 = vpop.f32.mrb[59].mxu0 }
 0x5ab   : > { %v9012_v15 = vadd.f32 %v4320_v50, %v4258_v3  ;;  %v4260_v7 = vmul.f32 %v4197_v62, %v3282_v4 }
 0x5ac   : > { %v4417_v13 = vmax.f32 %v9010_v40, 0.0  ;;  %v9015_v53 = vadd.f32 %v4325_v11, %v4259_v12 }
 0x5ad   : > { %v4418_v19 = vmax.f32 %v9012_v15, 0.0  ;;  %v9018_v24 = vadd.f32 %v4325_v11, %v4260_v7  ;;  %v9062_v62 = vpop.permute.xlu0 %4221  ;;  %v9068_v11 = vpop.permute.xlu1 %4354 }
 0x5ae   : > { %v4419_v2 = vmax.f32 %v9015_v53, 0.0 }
 0x5af   : > { %v5425_v52 = vpack.i.bf16 %v4418_v19, %v4417_v13  ;;  %v4420_v33 = vmax.f32 %v9018_v24, 0.0  ;;  %v3286_v26 = vpop.f32.mrb[60].mxu0 }
 0x5b0   : > { %v4261_v21 = vmul.f32 %v4202_v0, %v3286_v26  ;;  %v3288_v23 = vpop.f32.mrb[61].mxu0 }
 0x5b1   : > { %v5430_v42 = vpack.i.bf16 %v4420_v33, %v4419_v2  ;;  %v4262_v46 = vmul.f32 %v4202_v0, %v3288_v23  ;;  %5426 = vrot.lane.b32.xlu0 %v5425_v52, %s5652_s19  ;;  %v3290_v20 = vpop.f32.mrb[62].mxu0  ;;  %v9066_v50 = vpop.permute.xlu0 %4349 }
 0x5b2   : > { %v9031_v6 = vadd.f32 %v4330_v16, %v4261_v21  ;;  %v4263_v54 = vmul.f32 %v4207_v27, %v3290_v20  ;;  %v3292_v17 = vpop.f32.mrb[63].mxu0  ;;  %v9072_v44 = vpop.permute.xlu1 %4236 }
 0x5b3   : > { %v9033_v41 = vadd.f32 %v4330_v16, %v4262_v46  ;;  %v4264_v43 = vmul.f32 %v4207_v27, %v3292_v17  ;;  %5431 = vrot.lane.b32.xlu1 %v5430_v42, %s5652_s19 }
 0x5b4   : > { %v4421_v14 = vmax.f32 %v9031_v6, 0.0  ;;  %v9037_v36 = vadd.f32 %v4335_v30, %v4263_v54 }
 0x5b5   : > { %v4422_v58 = vmax.f32 %v9033_v41, 0.0  ;;  %v9040_v5 = vadd.f32 %v4335_v30, %v4264_v43  ;;  %v9070_v28 = vpop.permute.xlu0 %4231 }
 0x5b6   : > { %v4423_v1 = vmax.f32 %v9037_v36, 0.0  ;;  %v9076_v3 = vpop.permute.xlu1 %4364 }
 0x5b7   : > { %v5435_v38 = vpack.i.bf16 %v4422_v58, %v4421_v14  ;;  %v4424_v63 = vmax.f32 %v9040_v5, 0.0 }
 0x5b9   : > { %v5440_v32 = vpack.i.bf16 %v4424_v63, %v4423_v1  ;;  %5436 = vrot.lane.b32.xlu0 %v5435_v38, %s5652_s19  ;;  %v9074_v25 = vpop.permute.xlu0 %4359 }
 0x5ba   : > { %v9080_v12 = vpop.permute.xlu1 %4246 }
 0x5bb   : > { %5441 = vrot.lane.b32.xlu1 %v5440_v32, %s5652_s19 }
 0x5bd   : > { %v9078_v59 = vpop.permute.xlu0 %4241 }
 0x5be   : > { %v9084_v0 = vpop.permute.xlu1 %4374 }
 0x5c1   : > { %v9082_v4 = vpop.permute.xlu0 %4369 }
 0x60b   : > { %v5407_v7 = vpop.permute.xlu0 %5406 }
 0x60c   : > { %v5409_v27 = vunpack.i.h.bf16 %v5407_v7  ;;  %v5408_v52 = vunpack.i.l.bf16 %v5407_v7 }
 0x60d   : > { %v5412_v26 = vpop.permute.xlu1 %5411 }
 0x60e   : > { %v4537_v21 = vsel %vm1557_vm2, %v5408_v52, %v5409_v27  ;;  %v5414_v23 = vunpack.i.h.bf16 %v5412_v26  ;;  %v5413_v16 = vunpack.i.l.bf16 %v5412_v26  ;;  %v4586_v42 = vmax.f32 %v4410_v9, %v5409_v27 }
 0x60f   : > { %v4585_v54 = vmax.f32 %v4409_v35, %v4537_v21 }
 0x610   : > { %v4588_v46 = vmax.f32 %v4412_v47, %v5414_v23  ;;  %v4538_v20 = vsel %vm1557_vm2, %v5413_v16, %v5414_v23 }
 0x611   : > { %v4587_v17 = vmax.f32 %v4411_v60, %v4538_v20 }
 0x612   : > { %v4618_v30 = vpack.c.bf16 %v4588_v46, %v4586_v42 }
 0x613   : > { %v4617_v43 = vpack.c.bf16 %v4587_v17, %v4585_v54  ;;  %v5417_v38 = vpop.permute.xlu0 %5416 }
 0x614   : > { %v5419_v32 = vunpack.i.h.bf16 %v5417_v38  ;;  %v5418_v7 = vunpack.i.l.bf16 %v5417_v38  ;;  %5111 = vmatprep.mubr.msk.bf16.mxu1 %vm4741_vm5, %v4618_v30 }
 0x615   : > { %v5422_v55 = vpop.permute.xlu1 %5421  ;;  %4803 = vmatmul.mubr.bf16.vlgmr.msra.gmra.mrb[56].mxu1 %v4617_v43 }
 0x616   : > { %v4539_v9 = vsel %vm1557_vm2, %v5418_v7, %v5419_v32  ;;  %v5424_v10 = vunpack.i.h.bf16 %v5422_v55  ;;  %v5423_v47 = vunpack.i.l.bf16 %v5422_v55  ;;  %v4590_v34 = vmax.f32 %v4414_v22, %v5419_v32 }
 0x617   : > { %v4589_v60 = vmax.f32 %v4413_v31, %v4539_v9 }
 0x618   : > { %v4592_v35 = vmax.f32 %v4416_v51, %v5424_v10  ;;  %v4540_v61 = vsel %vm1557_vm2, %v5423_v47, %v5424_v10 }
 0x619   : > { %v4591_v27 = vmax.f32 %v4415_v57, %v4540_v61 }
 0x61a   : > { %v4620_v52 = vpack.c.bf16 %v4592_v35, %v4590_v34 }
 0x61b   : > { %v4619_v26 = vpack.c.bf16 %v4591_v27, %v4589_v60 }
 0x61c   : > { %5112 = vmatprep.mubr.msk.bf16.mxu1 %vm4741_vm5, %v4620_v52 }
 0x61d   : > { %4811 = vmatmul.mubr.bf16.gmra.mrb[60].mxu1 %v4619_v26 }
 0x623   : > { %v5427_v21 = vpop.permute.xlu0 %5426 }
 0x624   : > { %v5429_v23 = vunpack.i.h.bf16 %v5427_v21  ;;  %v5428_v45 = vunpack.i.l.bf16 %v5427_v21 }
 0x625   : > { %v5432_v22 = vpop.permute.xlu1 %5431 }
 0x626   : > { %v4541_v18 = vsel %vm1557_vm2, %v5428_v45, %v5429_v23  ;;  %v5434_v51 = vunpack.i.h.bf16 %v5432_v22  ;;  %v5433_v16 = vunpack.i.l.bf16 %v5432_v22  ;;  %v4594_v8 = vmax.f32 %v4418_v19, %v5429_v23 }
 0x627   : > { %v4593_v57 = vmax.f32 %v4417_v13, %v4541_v18 }
 0x628   : > { %v4596_v31 = vmax.f32 %v4420_v33, %v5434_v51  ;;  %v4542_v29 = vsel %vm1557_vm2, %v5433_v16, %v5434_v51 }
 0x629   : > { %v4595_v42 = vmax.f32 %v4419_v2, %v4542_v29 }
 0x62a   : > { %v4622_v46 = vpack.c.bf16 %v4596_v31, %v4594_v8 }
 0x62b   : > { %v5437_v20 = vpop.permute.xlu0 %5436  ;;  %v4621_v54 = vpack.c.bf16 %v4595_v42, %v4593_v57 }
 0x62c   : > { %v5439_v17 = vunpack.i.h.bf16 %v5437_v20  ;;  %v5438_v30 = vunpack.i.l.bf16 %v5437_v20  ;;  %5113 = vmatprep.mubr.msk.bf16.mxu1 %vm4741_vm5, %v4622_v46 }
 0x62d   : > { %v5442_v15 = vpop.permute.xlu1 %5441  ;;  %4819 = vmatmul.mubr.bf16.gmra.mrb[64].mxu1 %v4621_v54 }
 0x62e   : > { %v4543_v19 = vsel %vm1557_vm2, %v5438_v30, %v5439_v17  ;;  %v5444_v24 = vunpack.i.h.bf16 %v5442_v15  ;;  %v5443_v33 = vunpack.i.l.bf16 %v5442_v15  ;;  %v4598_v40 = vmax.f32 %v4422_v58, %v5439_v17 }
 0x62f   : > { %v4597_v2 = vmax.f32 %v4421_v14, %v4543_v19 }
 0x630   : > { %v4600_v13 = vmax.f32 %v4424_v63, %v5444_v24  ;;  %v4544_v53 = vsel %vm1557_vm2, %v5443_v33, %v5444_v24 }
 0x631   : > { %v4599_v43 = vmax.f32 %v4423_v1, %v4544_v53 }
 0x632   : > { %v4624_v38 = vpack.c.bf16 %v4600_v13, %v4598_v40 }
 0x633   : > { %v4623_v32 = vpack.c.bf16 %v4599_v43, %v4597_v2 }
 0x634   : > { %5114 = vmatprep.mubr.msk.bf16.mxu1 %vm4741_vm5, %v4624_v38 }
 0x635   : > { %4827 = vmatmul.mubr.bf16.gmra.mrb[68].mxu1 %v4623_v32 }
 0x637   : > { %v3705_v7 = vpop.f32.mrb[48].mxu1 }
 0x638   : > { %v4265_v41 = vmul.f32 %v9054_v39, %v3705_v7  ;;  %v3707_v58 = vpop.f32.mrb[49].mxu1 }
 0x639   : > { %v4266_v5 = vmul.f32 %v9054_v39, %v3707_v58  ;;  %v3709_v63 = vpop.f32.mrb[50].mxu1 }
 0x63a   : > { %v9133_v55 = vadd.f32 %v9058_v48, %v4265_v41  ;;  %v4267_v6 = vmul.f32 %v9056_v56, %v3709_v63  ;;  %v3711_v14 = vpop.f32.mrb[51].mxu1 }
 0x63b   : > { %v9137_v36 = vadd.f32 %v9058_v48, %v4266_v5  ;;  %v4268_v1 = vmul.f32 %v9056_v56, %v3711_v14 }
 0x63c   : > { %v4425_v9 = vmax.f32 %v9133_v55, 0.0  ;;  %v9142_v10 = vadd.f32 %v9060_v37, %v4267_v6 }
 0x63d   : > { %v4426_v47 = vmax.f32 %v9137_v36, 0.0  ;;  %v9146_v39 = vadd.f32 %v9060_v37, %v4268_v1 }
 0x63e   : > { %v4427_v34 = vmax.f32 %v9142_v10, 0.0 }
 0x63f   : > { %v5445_v48 = vpack.i.bf16 %v4426_v47, %v4425_v9  ;;  %v4428_v35 = vmax.f32 %v9146_v39, 0.0  ;;  %v3715_v56 = vpop.f32.mrb[52].mxu1 }
 0x640   : > { %v4269_v61 = vmul.f32 %v9062_v62, %v3715_v56  ;;  %v3717_v60 = vpop.f32.mrb[53].mxu1 }
 0x641   : > { %v5450_v27 = vpack.i.bf16 %v4428_v35, %v4427_v34  ;;  %v4270_v37 = vmul.f32 %v9062_v62, %v3717_v60  ;;  %5446 = vrot.lane.b32.xlu0 %v5445_v48, %s5652_s19  ;;  %v3719_v52 = vpop.f32.mrb[54].mxu1 }
 0x642   : > { %v9162_v26 = vadd.f32 %v9066_v50, %v4269_v61  ;;  %v4271_v21 = vmul.f32 %v9064_v49, %v3719_v52  ;;  %v3721_v23 = vpop.f32.mrb[55].mxu1 }
 0x643   : > { %v9166_v45 = vadd.f32 %v9066_v50, %v4270_v37  ;;  %v4272_v22 = vmul.f32 %v9064_v49, %v3721_v23  ;;  %5451 = vrot.lane.b32.xlu1 %v5450_v27, %s5652_s19 }
 0x644   : > { %v4429_v18 = vmax.f32 %v9162_v26, 0.0  ;;  %v9172_v62 = vadd.f32 %v9068_v11, %v4271_v21 }
 0x645   : > { %v4430_v51 = vmax.f32 %v9166_v45, 0.0  ;;  %v9176_v16 = vadd.f32 %v9068_v11, %v4272_v22 }
 0x646   : > { %v4431_v8 = vmax.f32 %v9172_v62, 0.0 }
 0x647   : > { %v5455_v50 = vpack.i.bf16 %v4430_v51, %v4429_v18  ;;  %v4432_v49 = vmax.f32 %v9176_v16, 0.0 }
 0x648   : > { %v4134_v31 = vpop.f32.mrb[64].mxu0 }
 0x649   : > { %v5460_v29 = vpack.i.bf16 %v4432_v49, %v4431_v8  ;;  %v4273_v57 = vmul.f32 %v9070_v28, %v4134_v31  ;;  %v4136_v42 = vpop.f32.mrb[65].mxu0  ;;  %5456 = vrot.lane.b32.xlu0 %v5455_v50, %s5652_s19 }
 0x64a   : > { %v4274_v11 = vmul.f32 %v9070_v28, %v4136_v42  ;;  %v4138_v46 = vpop.f32.mrb[66].mxu0 }
 0x64b   : > { %v9192_v20 = vadd.f32 %v9074_v25, %v4273_v57  ;;  %v4275_v54 = vmul.f32 %v9072_v44, %v4138_v46  ;;  %v4140_v17 = vpop.f32.mrb[67].mxu0  ;;  %5461 = vrot.lane.b32.xlu1 %v5460_v29, %s5652_s19 }
 0x64c   : > { %v9197_v30 = vadd.f32 %v9074_v25, %v4274_v11  ;;  %v4276_v15 = vmul.f32 %v9072_v44, %v4140_v17 }
 0x64d   : > { %v4433_v19 = vmax.f32 %v9192_v20, 0.0  ;;  %v9202_v24 = vadd.f32 %v9076_v3, %v4275_v54 }
 0x64e   : > { %v4434_v28 = vmax.f32 %v9197_v30, 0.0  ;;  %v9206_v33 = vadd.f32 %v9076_v3, %v4276_v15 }
 0x64f   : > { %v4435_v40 = vmax.f32 %v9202_v24, 0.0 }
 0x650   : > { %v5465_v25 = vpack.i.bf16 %v4434_v28, %v4433_v19  ;;  %v4436_v13 = vmax.f32 %v9206_v33, 0.0  ;;  %v4144_v44 = vpop.f32.mrb[68].mxu0 }
 0x651   : > { %v4277_v53 = vmul.f32 %v9078_v59, %v4144_v44  ;;  %v4146_v2 = vpop.f32.mrb[69].mxu0 }
 0x652   : > { %v5470_v43 = vpack.i.bf16 %v4436_v13, %v4435_v40  ;;  %v4278_v3 = vmul.f32 %v9078_v59, %v4146_v2  ;;  %5466 = vrot.lane.b32.xlu0 %v5465_v25, %s5652_s19  ;;  %v4148_v38 = vpop.f32.mrb[70].mxu0 }
 0x653   : > { %v9222_v32 = vadd.f32 %v9082_v4, %v4277_v53  ;;  %v4279_v7 = vmul.f32 %v9080_v12, %v4148_v38  ;;  %v4150_v41 = vpop.f32.mrb[71].mxu0 }
 0x654   : > { %v9226_v58 = vadd.f32 %v9082_v4, %v4278_v3  ;;  %v4280_v5 = vmul.f32 %v9080_v12, %v4150_v41  ;;  %5471 = vrot.lane.b32.xlu1 %v5470_v43, %s5652_s19 }
 0x655   : > { %v4437_v63 = vmax.f32 %v9222_v32, 0.0  ;;  %v9232_v59 = vadd.f32 %v9084_v0, %v4279_v7 }
 0x656   : > { %v4438_v6 = vmax.f32 %v9226_v58, 0.0  ;;  %v9236_v14 = vadd.f32 %v9084_v0, %v4280_v5 }
 0x657   : > { %v4439_v1 = vmax.f32 %v9232_v59, 0.0 }
 0x658   : > { %v5475_v4 = vpack.i.bf16 %v4438_v6, %v4437_v63  ;;  %v4440_v12 = vmax.f32 %v9236_v14, 0.0 }
 0x65a   : > { %v5480_v48 = vpack.i.bf16 %v4440_v12, %v4439_v1  ;;  %5476 = vrot.lane.b32.xlu0 %v5475_v4, %s5652_s19 }
 0x65c   : > { %5481 = vrot.lane.b32.xlu1 %v5480_v48, %s5652_s19  ;;  %s9697_s19 = sadd.s32 4294967295, %s5649_s30  }
 0x65d   : > { %s4946_s27 = sshll.u32 %s9697_s19, 4 }
 0x65e   : > { %p334_p4 = scmp.lt.s32.totalorder %s4946_s27, 31 }
 0x660   : > { %s9701_s27 = smov (!%p334_p4, %s4946_s27), 31 }
 0x661   : > { %s4947_s28 = sshll.u32 %s9701_s27, 3 }
 0x662   : > { %s9295_s11 = scalar_lea.vmem %s9325_s9, %s4947_s28 }
 0x6b3   : > { %v5447_v56 = vpop.permute.xlu0 %5446 }
 0x6b4   : > { %v5449_v61 = vunpack.i.h.bf16 %v5447_v56  ;;  %v5448_v0 = vunpack.i.l.bf16 %v5447_v56 }
 0x6b5   : > { %v5452_v60 = vpop.permute.xlu1 %5451 }
 0x6b6   : > { %v4545_v27 = vsel %vm1557_vm2, %v5448_v0, %v5449_v61  ;;  %v5454_v37 = vunpack.i.h.bf16 %v5452_v60  ;;  %v5453_v52 = vunpack.i.l.bf16 %v5452_v60  ;;  %v4602_v21 = vmax.f32 %v4426_v47, %v5449_v61 }
 0x6b7   : > { %v4601_v50 = vmax.f32 %v4425_v9, %v4545_v27 }
 0x6b8   : > { %v4604_v23 = vmax.f32 %v4428_v35, %v5454_v37  ;;  %v4546_v22 = vsel %vm1557_vm2, %v5453_v52, %v5454_v37 }
 0x6b9   : > { %v4603_v31 = vmax.f32 %v4427_v34, %v4546_v22 }
 0x6ba   : > { %v4626_v29 = vpack.c.bf16 %v4604_v23, %v4602_v21 }
 0x6bb   : > { %v5457_v57 = vpop.permute.xlu0 %5456  ;;  %v4625_v42 = vpack.c.bf16 %v4603_v31, %v4601_v50 }
 0x6bc   : > { %v5459_v11 = vunpack.i.h.bf16 %v5457_v57  ;;  %v5458_v46 = vunpack.i.l.bf16 %v5457_v57  ;;  %5115 = vmatprep.mubr.msk.bf16.mxu1 %vm4741_vm5, %v4626_v29 }
 0x6bd   : > { %v5462_v36 = vpop.permute.xlu1 %5461  ;;  %4835 = vmatmul.mubr.bf16.gmra.mrb[72].mxu1 %v4625_v42 }
 0x6be   : > { %v4547_v47 = vsel %vm1557_vm2, %v5458_v46, %v5459_v11  ;;  %v5464_v39 = vunpack.i.h.bf16 %v5462_v36  ;;  %v5463_v35 = vunpack.i.l.bf16 %v5462_v36  ;;  %v4606_v55 = vmax.f32 %v4430_v51, %v5459_v11 }
 0x6bf   : > { %v4605_v34 = vmax.f32 %v4429_v18, %v4547_v47 }
 0x6c0   : > { %v4608_v9 = vmax.f32 %v4432_v49, %v5464_v39  ;;  %v4548_v10 = vsel %vm1557_vm2, %v5463_v35, %v5464_v39 }
 0x6c1   : > { %v4607_v54 = vmax.f32 %v4431_v8, %v4548_v10 }
 0x6c2   : > { %v4628_v17 = vpack.c.bf16 %v4608_v9, %v4606_v55 }
 0x6c3   : > { %v4627_v15 = vpack.c.bf16 %v4607_v54, %v4605_v34 }
 0x6c4   : > { %v5467_v25 = vpop.permute.xlu0 %5466  ;;  %5116 = vmatprep.mubr.msk.bf16.mxu1 %vm4741_vm5, %v4628_v17 }
 0x6c5   : > { %v5469_v44 = vunpack.i.h.bf16 %v5467_v25  ;;  %v5468_v53 = vunpack.i.l.bf16 %v5467_v25  ;;  %4843 = vmatmul.mubr.bf16.gmra.mrb[76].mxu1 %v4627_v15 }
 0x6c6   : > { %v5472_v45 = vpop.permute.xlu1 %5471 }
 0x6c7   : > { %v4549_v51 = vsel %vm1557_vm2, %v5468_v53, %v5469_v44  ;;  %v5474_v16 = vunpack.i.h.bf16 %v5472_v45  ;;  %v5473_v49 = vunpack.i.l.bf16 %v5472_v45  ;;  %v4610_v26 = vmax.f32 %v4434_v28, %v5469_v44 }
 0x6c8   : > { %v4609_v8 = vmax.f32 %v4433_v19, %v4549_v51 }
 0x6c9   : > { %v4612_v18 = vmax.f32 %v4436_v13, %v5474_v16  ;;  %v4550_v62 = vsel %vm1557_vm2, %v5473_v49, %v5474_v16 }
 0x6ca   : > { %v4611_v2 = vmax.f32 %v4435_v40, %v4550_v62 }
 0x6cb   : > { %v4630_v43 = vpack.c.bf16 %v4612_v18, %v4610_v26 }
 0x6cc   : > { %v5477_v3 = vpop.permute.xlu0 %5476  ;;  %v4629_v38 = vpack.c.bf16 %v4611_v2, %v4609_v8 }
 0x6cd   : > { %v5479_v7 = vunpack.i.h.bf16 %v5477_v3  ;;  %v5478_v41 = vunpack.i.l.bf16 %v5477_v3  ;;  %5117 = vmatprep.mubr.msk.bf16.mxu1 %vm4741_vm5, %v4630_v43 }
 0x6ce   : > { %v5482_v30 = vpop.permute.xlu1 %5481  ;;  %4851 = vmatmul.mubr.bf16.gmra.mrb[80].mxu1 %v4629_v38 }
 0x6cf   : > { %v4551_v28 = vsel %vm1557_vm2, %v5478_v41, %v5479_v7  ;;  %v5484_v33 = vunpack.i.h.bf16 %v5482_v30  ;;  %v5483_v13 = vunpack.i.l.bf16 %v5482_v30  ;;  %v4614_v20 = vmax.f32 %v4438_v6, %v5479_v7 }
 0x6d0   : > { %v4613_v40 = vmax.f32 %v4437_v63, %v4551_v28 }
 0x6d1   : > { %v4616_v19 = vmax.f32 %v4440_v12, %v5484_v33  ;;  %v4552_v24 = vsel %vm1557_vm2, %v5483_v13, %v5484_v33 }
 0x6d2   : > { %v4615_v5 = vmax.f32 %v4439_v1, %v4552_v24 }
 0x6d3   : > { %v4632_v14 = vpack.c.bf16 %v4616_v19, %v4614_v20 }
 0x6d4   : > { %v4631_v4 = vpack.c.bf16 %v4615_v5, %v4613_v40 }
 0x6d5   : > { %5118 = vmatprep.mubr.msk.bf16.mxu1 %vm4741_vm5, %v4632_v14 }
 0x6d6   : > { %4859 = vmatmul.mubr.bf16.gmra.mrb[84].mxu1 %v4631_v4 }
 0x6e8   : > { %v4804_v32 = vpop.f32.mrb[56].mxu1 }
 0x6e9   : > { %4867 = vst [vmem:[%s9295_s11] sm:$0xff] %v4804_v32  ;;  %v4806_v58 = vpop.f32.mrb[57].mxu1 }
 0x6ea   : > { %v4807_v63 = vpop.f32.mrb[58].mxu1 }
 0x6eb   : > { %4868 = vst [vmem:[%s9295_s11 + $0x8] sm:$0xff] %v4807_v63  ;;  %v4809_v59 = vpop.f32.mrb[59].mxu1 }
 0x6f0   : > { %v4812_v6 = vpop.f32.mrb[60].mxu1 }
 0x6f1   : > { %4869 = vst [vmem:[%s9295_s11 + $0x10] sm:$0xff] %v4812_v6  ;;  %v4814_v1 = vpop.f32.mrb[61].mxu1 }
 0x6f2   : > { %v4815_v12 = vpop.f32.mrb[62].mxu1 }
 0x6f3   : > { %4870 = vst [vmem:[%s9295_s11 + $0x18] sm:$0xff] %v4815_v12  ;;  %v4817_v48 = vpop.f32.mrb[63].mxu1 }
 0x700   : > { %v4820_v56 = vpop.f32.mrb[64].mxu1 }
 0x701   : > { %4871 = vst [vmem:[%s9295_s11 + $0x20] sm:$0xff] %v4820_v56  ;;  %v4822_v61 = vpop.f32.mrb[65].mxu1 }
 0x702   : > { %v4823_v0 = vpop.f32.mrb[66].mxu1 }
 0x703   : > { %4872 = vst [vmem:[%s9295_s11 + $0x28] sm:$0xff] %v4823_v0  ;;  %v4825_v60 = vpop.f32.mrb[67].mxu1 }
 0x708   : > { %v4828_v27 = vpop.f32.mrb[68].mxu1 }
 0x709   : > { %4873 = vst [vmem:[%s9295_s11 + $0x30] sm:$0xff] %v4828_v27  ;;  %v4830_v37 = vpop.f32.mrb[69].mxu1 }
 0x70a   : > { %v4831_v52 = vpop.f32.mrb[70].mxu1 }
 0x70b   : > { %4874 = vst [vmem:[%s9295_s11 + $0x38] sm:$0xff] %v4831_v52  ;;  %v4833_v21 = vpop.f32.mrb[71].mxu1 }
 0x790   : > { %v4836_v23 = vpop.f32.mrb[72].mxu1 }
 0x791   : > { %4875 = vst [vmem:[%s9295_s11 + $0x40] sm:$0xff] %v4836_v23  ;;  %v4838_v22 = vpop.f32.mrb[73].mxu1 }
 0x792   : > { %v4839_v50 = vpop.f32.mrb[74].mxu1 }
 0x793   : > { %4876 = vst [vmem:[%s9295_s11 + $0x48] sm:$0xff] %v4839_v50  ;;  %v4841_v31 = vpop.f32.mrb[75].mxu1 }
 0x798   : > { %v4844_v29 = vpop.f32.mrb[76].mxu1 }
 0x799   : > { %4877 = vst [vmem:[%s9295_s11 + $0x50] sm:$0xff] %v4844_v29  ;;  %v4846_v57 = vpop.f32.mrb[77].mxu1 }
 0x79a   : > { %v4847_v42 = vpop.f32.mrb[78].mxu1 }
 0x79b   : > { %4878 = vst [vmem:[%s9295_s11 + $0x58] sm:$0xff] %v4847_v42  ;;  %v4849_v11 = vpop.f32.mrb[79].mxu1 }
 0x7a1   : > { %v4852_v46 = vpop.f32.mrb[80].mxu1 }
 0x7a2   : > { %4879 = vst [vmem:[%s9295_s11 + $0x60] sm:$0xff] %v4852_v46  ;;  %v4854_v36 = vpop.f32.mrb[81].mxu1 }
 0x7a3   : > { %v4855_v47 = vpop.f32.mrb[82].mxu1 }
 0x7a4   : > { %4880 = vst [vmem:[%s9295_s11 + $0x68] sm:$0xff] %v4855_v47  ;;  %v4857_v39 = vpop.f32.mrb[83].mxu1 }
 0x7a9   : > { %v4860_v35 = vpop.f32.mrb[84].mxu1 }
 0x7aa   : > { %4881 = vst [vmem:[%s9295_s11 + $0x70] sm:$0xff] %v4860_v35  ;;  %v4862_v55 = vpop.f32.mrb[85].mxu1 }
 0x7ab   : > { %v4863_v9 = vpop.f32.mrb[86].mxu1 }
 0x7ac   : > { %4882 = vst [vmem:[%s9295_s11 + $0x78] sm:$0xff] %v4863_v9  ;;  %v4865_v10 = vpop.f32.mrb[87].mxu1 }
 0x7ad PF: > { %s19_s30 = sadd.s32 1, %s5649_s30  }
 0x7ae   : > { %p16_p5 = scmp.ge.s32.totalorder %s19_s30, 4  }
 0x7b0   :  { %18 = sbr.rel (!%p16_p5) target bundleno = 1 (0x1), region = 89 }

// kernel: con_net_forward.3
= control target key start
LH: loop header
LB: loop body
LE: loop exit
PB: predicated region body
PF: predicated region fallthrough
CT: control target
= control target key end

     0   :  { %s4786_s0 = inlined_call_operand.vmem [shape: f32[8,4096], index: 0, kind: input, shape index: {}]   ;;  %s4787_s1 = inlined_call_operand.vmem [shape: bf16[4096,128], index: 1, kind: input, shape index: {}]   ;;  %s4788_s2 = inlined_call_operand.vmem [shape: f32[1,128], index: 2, kind: input, shape index: {}]   ;;  %s4789_s3 = inlined_call_operand.vmem [shape: bf16[128,128], index: 3, kind: input, shape index: {}]   ;;  %s4790_s4 = inlined_call_operand.vmem [shape: f32[1,128], index: 4, kind: input, shape index: {}]   ;;  %s4791_s5 = inlined_call_operand.hbm [shape: f32[8,128], index: 5, kind: output, shape index: {}]  }
   0x1   :  { %v3559_v0 = vld [vmem:[%s4787_s1 + $0x40] sm:$0xff]   ;;  %v3563_v4 = vld [vmem:[%s4787_s1 + $0x48] sm:$0xff]   ;;  %v3567_v8 = vld [vmem:[%s4787_s1 + $0x50] sm:$0xff]  }
   0x2   :  { %v3560_v1 = vld [vmem:[%s4787_s1 + $0xc0] sm:$0xff]   ;;  %3175 = vmatprep.subr.bf16.mxu0 %v3559_v0  ;;  %v3564_v5 = vld [vmem:[%s4787_s1 + $0xc8] sm:$0xff]   ;;  %v3568_v9 = vld [vmem:[%s4787_s1 + $0xd0] sm:$0xff]  }
   0x3   :  { %v3561_v2 = vld [vmem:[%s4787_s1] sm:$0xff]   ;;  %3197 = vmatprep.subr.bf16.mxu1 %v3560_v1  ;;  %v3565_v6 = vld [vmem:[%s4787_s1 + $0x8] sm:$0xff]   ;;  %v3569_v10 = vld [vmem:[%s4787_s1 + $0x10] sm:$0xff]  }
   0x4   :  { %v3562_v3 = vld [vmem:[%s4787_s1 + $0x80] sm:$0xff]   ;;  %3176 = vmatpush3.bf16.msra.mxu0 %v3561_v2  ;;  %v3566_v7 = vld [vmem:[%s4787_s1 + $0x88] sm:$0xff]   ;;  %v3570_v11 = vld [vmem:[%s4787_s1 + $0x90] sm:$0xff]  }
   0x5   :  { %3198 = vmatpush3.bf16.msra.mxu1 %v3562_v3  ;;  %3177 = vmatprep.subr.bf16.mxu0 %v3563_v4  ;;  %v3571_v12 = vld [vmem:[%s4787_s1 + $0x58] sm:$0xff]   ;;  %v3575_v16 = vld [vmem:[%s4787_s1 + $0x60] sm:$0xff]   ;;  %v3579_v20 = vld [vmem:[%s4787_s1 + $0x68] sm:$0xff]  }
   0x6   :  { %3199 = vmatprep.subr.bf16.mxu1 %v3564_v5  ;;  %v3572_v13 = vld [vmem:[%s4787_s1 + $0xd8] sm:$0xff]   ;;  %v3576_v17 = vld [vmem:[%s4787_s1 + $0xe0] sm:$0xff]   ;;  %v3580_v21 = vld [vmem:[%s4787_s1 + $0xe8] sm:$0xff]  }
   0x7   :  { %v3573_v14 = vld [vmem:[%s4787_s1 + $0x18] sm:$0xff]   ;;  %v3577_v18 = vld [vmem:[%s4787_s1 + $0x20] sm:$0xff]   ;;  %v3581_v22 = vld [vmem:[%s4787_s1 + $0x28] sm:$0xff]  }
   0x8   :  { %3178 = vmatpush3.bf16.msra.mxu0 %v3565_v6  ;;  %v3574_v15 = vld [vmem:[%s4787_s1 + $0x98] sm:$0xff]   ;;  %v3578_v19 = vld [vmem:[%s4787_s1 + $0xa0] sm:$0xff]   ;;  %v3582_v23 = vld [vmem:[%s4787_s1 + $0xa8] sm:$0xff]  }
   0x9   :  { %3200 = vmatpush3.bf16.msra.mxu1 %v3566_v7  ;;  %3179 = vmatprep.subr.bf16.mxu0 %v3567_v8  ;;  %v3583_v24 = vld [vmem:[%s4787_s1 + $0x70] sm:$0xff]   ;;  %v3587_v28 = vld [vmem:[%s4787_s1 + $0x78] sm:$0xff]   ;;  %v23_v32 = vld [vmem:[%s4786_s0 + $0x8] sm:$0xff] }
   0xa   :  { %3201 = vmatprep.subr.bf16.mxu1 %v3568_v9  ;;  %v3584_v25 = vld [vmem:[%s4787_s1 + $0xf0] sm:$0xff]   ;;  %v3588_v29 = vld [vmem:[%s4787_s1 + $0xf8] sm:$0xff]   ;;  %v22_v34 = vld [vmem:[%s4786_s0] sm:$0xff]  ;;  %v55_v35 = vpack.c.bf16 %v23_v32, %v23_v32 }
   0xb   :  { %v3585_v26 = vld [vmem:[%s4787_s1 + $0x30] sm:$0xff]   ;;  %v3589_v30 = vld [vmem:[%s4787_s1 + $0x38] sm:$0xff]   ;;  %v54_v37 = vpack.c.bf16 %v22_v34, %v22_v34  ;;  %v3591_v40 = vld [vmem:[%s4787_s1 + $0x140] sm:$0xff]  }
   0xc   :  { %3180 = vmatpush3.bf16.msra.mxu0 %v3569_v10  ;;  %v3586_v27 = vld [vmem:[%s4787_s1 + $0xb0] sm:$0xff]   ;;  %v3590_v31 = vld [vmem:[%s4787_s1 + $0xb8] sm:$0xff]   ;;  %2173 = vmatprep.mubr.bf16.mxu0 %v55_v35  ;;  %v3592_v41 = vld [vmem:[%s4787_s1 + $0x1c0] sm:$0xff]  }
   0xd   :  { %3202 = vmatpush3.bf16.msra.mxu1 %v3570_v11  ;;  %3181 = vmatprep.subr.bf16.mxu0 %v3571_v12  ;;  %v25_v33 = vld [vmem:[%s4786_s0 + $0x18] sm:$0xff]  ;;  %v24_v38 = vld [vmem:[%s4786_s0 + $0x10] sm:$0xff]  ;;  %v3593_v42 = vld [vmem:[%s4787_s1 + $0x100] sm:$0xff]  }
   0xe   :  { %3203 = vmatprep.subr.bf16.mxu1 %v3572_v13  ;;  %v57_v36 = vpack.c.bf16 %v25_v33, %v25_v33  ;;  %v56_v39 = vpack.c.bf16 %v24_v38, %v24_v38  ;;  %v3594_v43 = vld [vmem:[%s4787_s1 + $0x180] sm:$0xff]   ;;  %v3595_v44 = vld [vmem:[%s4787_s1 + $0x148] sm:$0xff]   ;;  %v3599_v48 = vld [vmem:[%s4787_s1 + $0x150] sm:$0xff]  }
   0xf   :  { %v3596_v45 = vld [vmem:[%s4787_s1 + $0x1c8] sm:$0xff]   ;;  %v3600_v49 = vld [vmem:[%s4787_s1 + $0x1d0] sm:$0xff]   ;;  %v3603_v52 = vld [vmem:[%s4787_s1 + $0x158] sm:$0xff]  }
  0x10   :  { %3182 = vmatpush3.bf16.msra.mxu0 %v3573_v14  ;;  %2213 = vmatprep.mubr.bf16.mxu1 %v57_v36  ;;  %v3597_v46 = vld [vmem:[%s4787_s1 + $0x108] sm:$0xff]   ;;  %v3601_v50 = vld [vmem:[%s4787_s1 + $0x110] sm:$0xff]   ;;  %v3604_v53 = vld [vmem:[%s4787_s1 + $0x1d8] sm:$0xff]  }
  0x11   :  { %3204 = vmatpush3.bf16.msra.mxu1 %v3574_v15  ;;  %3183 = vmatprep.subr.bf16.mxu0 %v3575_v16  ;;  %v3598_v47 = vld [vmem:[%s4787_s1 + $0x188] sm:$0xff]   ;;  %v3602_v51 = vld [vmem:[%s4787_s1 + $0x190] sm:$0xff]   ;;  %v3605_v54 = vld [vmem:[%s4787_s1 + $0x118] sm:$0xff]  }
  0x12   :  { %3205 = vmatprep.subr.bf16.mxu1 %v3576_v17  ;;  %v3606_v55 = vld [vmem:[%s4787_s1 + $0x198] sm:$0xff]   ;;  %v3607_v56 = vld [vmem:[%s4787_s1 + $0x160] sm:$0xff]   ;;  %v3611_v60 = vld [vmem:[%s4787_s1 + $0x168] sm:$0xff]  }
  0x13   :  { %v3608_v57 = vld [vmem:[%s4787_s1 + $0x1e0] sm:$0xff]   ;;  %v3612_v61 = vld [vmem:[%s4787_s1 + $0x1e8] sm:$0xff]   ;;  %v3615_v0 = vld [vmem:[%s4787_s1 + $0x170] sm:$0xff]  }
  0x14   :  { %3184 = vmatpush3.bf16.msra.mxu0 %v3577_v18  ;;  %v3609_v58 = vld [vmem:[%s4787_s1 + $0x120] sm:$0xff]   ;;  %v3613_v62 = vld [vmem:[%s4787_s1 + $0x128] sm:$0xff]   ;;  %v3616_v1 = vld [vmem:[%s4787_s1 + $0x1f0] sm:$0xff]  }
  0x15   :  { %3206 = vmatpush3.bf16.msra.mxu1 %v3578_v19  ;;  %3185 = vmatprep.subr.bf16.mxu0 %v3579_v20  ;;  %v3610_v59 = vld [vmem:[%s4787_s1 + $0x1a0] sm:$0xff]   ;;  %v3614_v63 = vld [vmem:[%s4787_s1 + $0x1a8] sm:$0xff]   ;;  %v3617_v2 = vld [vmem:[%s4787_s1 + $0x130] sm:$0xff]  }
  0x16   :  { %3207 = vmatprep.subr.bf16.mxu1 %v3580_v21  ;;  %v3618_v3 = vld [vmem:[%s4787_s1 + $0x1b0] sm:$0xff]   ;;  %v3619_v4 = vld [vmem:[%s4787_s1 + $0x178] sm:$0xff]   ;;  %v27_v8 = vld [vmem:[%s4786_s0 + $0x28] sm:$0xff] }
  0x17   :  { %v3620_v5 = vld [vmem:[%s4787_s1 + $0x1f8] sm:$0xff]   ;;  %v59_v10 = vpack.c.bf16 %v27_v8, %v27_v8  ;;  %v26_v12 = vld [vmem:[%s4786_s0 + $0x20] sm:$0xff]  ;;  %v28_v13 = vld [vmem:[%s4786_s0 + $0x30] sm:$0xff] }
  0x18   :  { %3186 = vmatpush3.bf16.msra.mxu0 %v3581_v22  ;;  %v3621_v6 = vld [vmem:[%s4787_s1 + $0x138] sm:$0xff]   ;;  %v58_v14 = vpack.c.bf16 %v26_v12, %v26_v12  ;;  %v60_v15 = vpack.c.bf16 %v28_v13, %v28_v13  ;;  %v3623_v16 = vld [vmem:[%s4787_s1 + $0x240] sm:$0xff]   ;;  %v3627_v20 = vld [vmem:[%s4787_s1 + $0x248] sm:$0xff]  }
  0x19   :  { %3208 = vmatpush3.bf16.msra.mxu1 %v3582_v23  ;;  %3187 = vmatprep.subr.bf16.mxu0 %v3583_v24  ;;  %v3622_v7 = vld [vmem:[%s4787_s1 + $0x1b8] sm:$0xff]   ;;  %v3624_v17 = vld [vmem:[%s4787_s1 + $0x2c0] sm:$0xff]   ;;  %v3628_v21 = vld [vmem:[%s4787_s1 + $0x2c8] sm:$0xff]  }
  0x1a   :  { %3209 = vmatprep.subr.bf16.mxu1 %v3584_v25  ;;  %v29_v9 = vld [vmem:[%s4786_s0 + $0x38] sm:$0xff]  ;;  %v3625_v18 = vld [vmem:[%s4787_s1 + $0x200] sm:$0xff]   ;;  %v3629_v22 = vld [vmem:[%s4787_s1 + $0x208] sm:$0xff]  }
  0x1b   :  { %v61_v11 = vpack.c.bf16 %v29_v9, %v29_v9  ;;  %v3626_v19 = vld [vmem:[%s4787_s1 + $0x280] sm:$0xff]   ;;  %v3630_v23 = vld [vmem:[%s4787_s1 + $0x288] sm:$0xff]   ;;  %v3631_v24 = vld [vmem:[%s4787_s1 + $0x250] sm:$0xff]  }
  0x1c   :  { %3188 = vmatpush3.bf16.msra.mxu0 %v3585_v26  ;;  %v3632_v25 = vld [vmem:[%s4787_s1 + $0x2d0] sm:$0xff]   ;;  %v3639_v32 = vld [vmem:[%s4787_s1 + $0x260] sm:$0xff]   ;;  %v3643_v36 = vld [vmem:[%s4787_s1 + $0x268] sm:$0xff]  }
  0x1d   :  { %3210 = vmatpush3.bf16.msra.mxu1 %v3586_v27  ;;  %3189 = vmatprep.subr.bf16.mxu0 %v3587_v28  ;;  %v3633_v26 = vld [vmem:[%s4787_s1 + $0x210] sm:$0xff]   ;;  %v3635_v28 = vld [vmem:[%s4787_s1 + $0x258] sm:$0xff]   ;;  %v3640_v33 = vld [vmem:[%s4787_s1 + $0x2e0] sm:$0xff]  }
  0x1e   :  { %3211 = vmatprep.subr.bf16.mxu1 %v3588_v29  ;;  %v3634_v27 = vld [vmem:[%s4787_s1 + $0x290] sm:$0xff]   ;;  %v3636_v29 = vld [vmem:[%s4787_s1 + $0x2d8] sm:$0xff]   ;;  %v3641_v34 = vld [vmem:[%s4787_s1 + $0x220] sm:$0xff]  }
  0x1f   :  { %v3642_v35 = vld [vmem:[%s4787_s1 + $0x2a0] sm:$0xff]   ;;  %v3645_v38 = vld [vmem:[%s4787_s1 + $0x228] sm:$0xff]  }
  0x20   :  { %3190 = vmatpush3.bf16.msra.mxu0 %v3589_v30  ;;  %v3637_v30 = vld [vmem:[%s4787_s1 + $0x218] sm:$0xff]   ;;  %v3671_v8 = vld [vmem:[%s4787_s1 + $0x360] sm:$0xff]   ;;  %v3675_v12 = vld [vmem:[%s4787_s1 + $0x368] sm:$0xff]  }
  0x21   :  { %3212 = vmatpush3.bf16.msra.mxu1 %v3590_v31  ;;  %3219 = vmatprep.subr.bf16.mxu0 %v3591_v40  ;;  %v3638_v31 = vld [vmem:[%s4787_s1 + $0x298] sm:$0xff]   ;;  %v3647_v40 = vld [vmem:[%s4787_s1 + $0x270] sm:$0xff]   ;;  %v3672_v9 = vld [vmem:[%s4787_s1 + $0x3e0] sm:$0xff]  }
  0x22   :  { %3241 = vmatprep.subr.bf16.mxu1 %v3592_v41  ;;  %v3648_v41 = vld [vmem:[%s4787_s1 + $0x2f0] sm:$0xff]   ;;  %v3676_v13 = vld [vmem:[%s4787_s1 + $0x3e8] sm:$0xff]  }
  0x23   :  { %2174 = vmatmul.mubr.bf16.vlgmr.msra.gmra.mrb[0].mxu0 %v54_v37  ;;  %v3644_v37 = vld [vmem:[%s4787_s1 + $0x2e8] sm:$0xff]  }
  0x24   :  { %2214 = vmatmul.mubr.bf16.vlgmr.msra.gmra.mrb[0].mxu1 %v56_v39  ;;  %3220 = vmatpush3.bf16.msra.mxu0 %v3593_v42  ;;  %v3646_v39 = vld [vmem:[%s4787_s1 + $0x2a8] sm:$0xff]   ;;  %v3649_v42 = vld [vmem:[%s4787_s1 + $0x230] sm:$0xff]  }
  0x25   :  { %3242 = vmatpush3.bf16.msra.mxu1 %v3594_v43  ;;  %3221 = vmatprep.subr.bf16.mxu0 %v3595_v44  ;;  %v3650_v43 = vld [vmem:[%s4787_s1 + $0x2b0] sm:$0xff]   ;;  %v3651_v44 = vld [vmem:[%s4787_s1 + $0x278] sm:$0xff]  }
  0x26   :  { %3243 = vmatprep.subr.bf16.mxu1 %v3596_v45  ;;  %2253 = vmatprep.mubr.bf16.mxu0 %v59_v10  ;;  %v3652_v45 = vld [vmem:[%s4787_s1 + $0x2f8] sm:$0xff]   ;;  %v3673_v10 = vld [vmem:[%s4787_s1 + $0x320] sm:$0xff]  }
  0x27   :  { %2293 = vmatprep.mubr.bf16.mxu1 %v61_v11  ;;  %v3674_v11 = vld [vmem:[%s4787_s1 + $0x3a0] sm:$0xff]  }
  0x28   :  { %3222 = vmatpush3.bf16.msra.mxu0 %v3597_v46  ;;  %v3653_v46 = vld [vmem:[%s4787_s1 + $0x238] sm:$0xff]  }
  0x29   :  { %3244 = vmatpush3.bf16.msra.mxu1 %v3598_v47  ;;  %3223 = vmatprep.subr.bf16.mxu0 %v3599_v48  ;;  %v3654_v47 = vld [vmem:[%s4787_s1 + $0x2b8] sm:$0xff]   ;;  %v31_v48 = vld [vmem:[%s4786_s0 + $0x48] sm:$0xff] }
  0x2a   :  { %3245 = vmatprep.subr.bf16.mxu1 %v3600_v49  ;;  %v63_v49 = vpack.c.bf16 %v31_v48, %v31_v48  ;;  %v3703_v48 = vld [vmem:[%s4787_s1 + $0x460] sm:$0xff]  }
  0x2c   :  { %3224 = vmatpush3.bf16.msra.mxu0 %v3601_v50  ;;  %v33_v50 = vld [vmem:[%s4786_s0 + $0x58] sm:$0xff] }
  0x2d   :  { %3246 = vmatpush3.bf16.msra.mxu1 %v3602_v51  ;;  %3225 = vmatprep.subr.bf16.mxu0 %v3603_v52  ;;  %v30_v51 = vld [vmem:[%s4786_s0 + $0x40] sm:$0xff]  ;;  %v32_v52 = vld [vmem:[%s4786_s0 + $0x50] sm:$0xff] }
  0x2e   :  { %3247 = vmatprep.subr.bf16.mxu1 %v3604_v53  ;;  %v65_v53 = vpack.c.bf16 %v33_v50, %v33_v50  ;;  %v3705_v50 = vld [vmem:[%s4787_s1 + $0x420] sm:$0xff]  }
  0x30   :  { %3226 = vmatpush3.bf16.msra.mxu0 %v3605_v54  ;;  %v62_v54 = vpack.c.bf16 %v30_v51, %v30_v51  ;;  %v3706_v51 = vld [vmem:[%s4787_s1 + $0x4a0] sm:$0xff]  }
  0x31   :  { %3248 = vmatpush3.bf16.msra.mxu1 %v3606_v55  ;;  %3227 = vmatprep.subr.bf16.mxu0 %v3607_v56  ;;  %v64_v55 = vpack.c.bf16 %v32_v52, %v32_v52  ;;  %v3655_v56 = vld [vmem:[%s4787_s1 + $0x340] sm:$0xff]   ;;  %v3707_v52 = vld [vmem:[%s4787_s1 + $0x468] sm:$0xff]  }
  0x32   :  { %3249 = vmatprep.subr.bf16.mxu1 %v3608_v57  ;;  %v3656_v57 = vld [vmem:[%s4787_s1 + $0x3c0] sm:$0xff]  }
  0x34   :  { %3228 = vmatpush3.bf16.msra.mxu0 %v3609_v58  ;;  %v3657_v58 = vld [vmem:[%s4787_s1 + $0x300] sm:$0xff]  }
  0x35   :  { %3250 = vmatpush3.bf16.msra.mxu1 %v3610_v59  ;;  %3229 = vmatprep.subr.bf16.mxu0 %v3611_v60  ;;  %v3658_v59 = vld [vmem:[%s4787_s1 + $0x380] sm:$0xff]   ;;  %v3659_v60 = vld [vmem:[%s4787_s1 + $0x348] sm:$0xff]  }
  0x36   :  { %3251 = vmatprep.subr.bf16.mxu1 %v3612_v61  ;;  %v3660_v61 = vld [vmem:[%s4787_s1 + $0x3c8] sm:$0xff]  }
  0x38   :  { %3230 = vmatpush3.bf16.msra.mxu0 %v3613_v62  ;;  %v3661_v62 = vld [vmem:[%s4787_s1 + $0x308] sm:$0xff]  }
  0x39   :  { %3252 = vmatpush3.bf16.msra.mxu1 %v3614_v63  ;;  %3231 = vmatprep.subr.bf16.mxu0 %v3615_v0  ;;  %v3662_v63 = vld [vmem:[%s4787_s1 + $0x388] sm:$0xff]   ;;  %v3663_v0 = vld [vmem:[%s4787_s1 + $0x350] sm:$0xff]  }
  0x3a   :  { %3253 = vmatprep.subr.bf16.mxu1 %v3616_v1  ;;  %v3664_v1 = vld [vmem:[%s4787_s1 + $0x3d0] sm:$0xff]  }
  0x3c   :  { %3232 = vmatpush3.bf16.msra.mxu0 %v3617_v2  ;;  %v3665_v2 = vld [vmem:[%s4787_s1 + $0x310] sm:$0xff]  }
  0x3d   :  { %3254 = vmatpush3.bf16.msra.mxu1 %v3618_v3  ;;  %3233 = vmatprep.subr.bf16.mxu0 %v3619_v4  ;;  %v3666_v3 = vld [vmem:[%s4787_s1 + $0x390] sm:$0xff]   ;;  %v3667_v4 = vld [vmem:[%s4787_s1 + $0x358] sm:$0xff]  }
  0x3e   :  { %3255 = vmatprep.subr.bf16.mxu1 %v3620_v5  ;;  %v3668_v5 = vld [vmem:[%s4787_s1 + $0x3d8] sm:$0xff]  }
  0x40   :  { %3234 = vmatpush3.bf16.msra.mxu0 %v3621_v6  ;;  %v3669_v6 = vld [vmem:[%s4787_s1 + $0x318] sm:$0xff]  }
  0x41   :  { %3256 = vmatpush3.bf16.msra.mxu1 %v3622_v7  ;;  %3263 = vmatprep.subr.bf16.mxu0 %v3623_v16  ;;  %v3670_v7 = vld [vmem:[%s4787_s1 + $0x398] sm:$0xff]   ;;  %v3679_v16 = vld [vmem:[%s4787_s1 + $0x370] sm:$0xff]  }
  0x42   :  { %3285 = vmatprep.subr.bf16.mxu1 %v3624_v17  ;;  %v3680_v17 = vld [vmem:[%s4787_s1 + $0x3f0] sm:$0xff]  }
  0x43   :  { %2254 = vmatmul.mubr.bf16.vlgmr.msra.gmra.mrb[4].mxu0 %v58_v14  ;;  %v3677_v14 = vld [vmem:[%s4787_s1 + $0x328] sm:$0xff]  }
  0x44   :  { %2294 = vmatmul.mubr.bf16.vlgmr.msra.gmra.mrb[4].mxu1 %v60_v15  ;;  %3264 = vmatpush3.bf16.msra.mxu0 %v3625_v18  ;;  %v3678_v15 = vld [vmem:[%s4787_s1 + $0x3a8] sm:$0xff]   ;;  %v3681_v18 = vld [vmem:[%s4787_s1 + $0x330] sm:$0xff]  }
  0x45   :  { %3286 = vmatpush3.bf16.msra.mxu1 %v3626_v19  ;;  %3265 = vmatprep.subr.bf16.mxu0 %v3627_v20  ;;  %v3682_v19 = vld [vmem:[%s4787_s1 + $0x3b0] sm:$0xff]   ;;  %v3683_v20 = vld [vmem:[%s4787_s1 + $0x378] sm:$0xff]  }
  0x46   :  { %3287 = vmatprep.subr.bf16.mxu1 %v3628_v21  ;;  %2333 = vmatprep.mubr.bf16.mxu0 %v63_v49  ;;  %v3684_v21 = vld [vmem:[%s4787_s1 + $0x3f8] sm:$0xff]   ;;  %v3704_v49 = vld [vmem:[%s4787_s1 + $0x4e0] sm:$0xff]  }
  0x47   :  { %2373 = vmatprep.mubr.bf16.mxu1 %v65_v53  ;;  %v3708_v53 = vld [vmem:[%s4787_s1 + $0x4e8] sm:$0xff]  }
  0x48   :  { %3266 = vmatpush3.bf16.msra.mxu0 %v3629_v22  ;;  %v3685_v22 = vld [vmem:[%s4787_s1 + $0x338] sm:$0xff]  }
  0x49   :  { %3288 = vmatpush3.bf16.msra.mxu1 %v3630_v23  ;;  %3267 = vmatprep.subr.bf16.mxu0 %v3631_v24  ;;  %v3686_v23 = vld [vmem:[%s4787_s1 + $0x3b8] sm:$0xff]   ;;  %v35_v24 = vld [vmem:[%s4786_s0 + $0x68] sm:$0xff] }
  0x4a   :  { %3289 = vmatprep.subr.bf16.mxu1 %v3632_v25  ;;  %v37_v25 = vld [vmem:[%s4786_s0 + $0x78] sm:$0xff] }
  0x4c   :  { %3268 = vmatpush3.bf16.msra.mxu0 %v3633_v26  ;;  %v34_v26 = vld [vmem:[%s4786_s0 + $0x60] sm:$0xff] }
  0x4d   :  { %3290 = vmatpush3.bf16.msra.mxu1 %v3634_v27  ;;  %3269 = vmatprep.subr.bf16.mxu0 %v3635_v28  ;;  %v67_v27 = vpack.c.bf16 %v35_v24, %v35_v24  ;;  %v69_v28 = vpack.c.bf16 %v37_v25, %v37_v25  ;;  %v3735_v24 = vld [vmem:[%s4787_s1 + $0x560] sm:$0xff]  }
  0x4e   :  { %3291 = vmatprep.subr.bf16.mxu1 %v3636_v29  ;;  %v66_v29 = vpack.c.bf16 %v34_v26, %v34_v26  ;;  %v3736_v25 = vld [vmem:[%s4787_s1 + $0x5e0] sm:$0xff]  }
  0x4f   :  { %v3737_v26 = vld [vmem:[%s4787_s1 + $0x520] sm:$0xff]  }
  0x50   :  { %3270 = vmatpush3.bf16.msra.mxu0 %v3637_v30  ;;  %v36_v30 = vld [vmem:[%s4786_s0 + $0x70] sm:$0xff] }
  0x51   :  { %3292 = vmatpush3.bf16.msra.mxu1 %v3638_v31  ;;  %3271 = vmatprep.subr.bf16.mxu0 %v3639_v32  ;;  %v68_v31 = vpack.c.bf16 %v36_v30, %v36_v30  ;;  %v3687_v32 = vld [vmem:[%s4787_s1 + $0x440] sm:$0xff]   ;;  %v3741_v30 = vld [vmem:[%s4787_s1 + $0x528] sm:$0xff]  }
  0x52   :  { %3293 = vmatprep.subr.bf16.mxu1 %v3640_v33  ;;  %v3688_v33 = vld [vmem:[%s4787_s1 + $0x4c0] sm:$0xff]  }
  0x54   :  { %3272 = vmatpush3.bf16.msra.mxu0 %v3641_v34  ;;  %v3689_v34 = vld [vmem:[%s4787_s1 + $0x400] sm:$0xff]  }
  0x55   :  { %3294 = vmatpush3.bf16.msra.mxu1 %v3642_v35  ;;  %3273 = vmatprep.subr.bf16.mxu0 %v3643_v36  ;;  %v3690_v35 = vld [vmem:[%s4787_s1 + $0x480] sm:$0xff]   ;;  %v3691_v36 = vld [vmem:[%s4787_s1 + $0x448] sm:$0xff]  }
  0x56   :  { %3295 = vmatprep.subr.bf16.mxu1 %v3644_v37  ;;  %v3692_v37 = vld [vmem:[%s4787_s1 + $0x4c8] sm:$0xff]  }
  0x58   :  { %3274 = vmatpush3.bf16.msra.mxu0 %v3645_v38  ;;  %v3693_v38 = vld [vmem:[%s4787_s1 + $0x408] sm:$0xff]  }
  0x59   :  { %3296 = vmatpush3.bf16.msra.mxu1 %v3646_v39  ;;  %3275 = vmatprep.subr.bf16.mxu0 %v3647_v40  ;;  %v3694_v39 = vld [vmem:[%s4787_s1 + $0x488] sm:$0xff]   ;;  %v3695_v40 = vld [vmem:[%s4787_s1 + $0x450] sm:$0xff]  }
  0x5a   :  { %3297 = vmatprep.subr.bf16.mxu1 %v3648_v41  ;;  %v3696_v41 = vld [vmem:[%s4787_s1 + $0x4d0] sm:$0xff]  }
  0x5c   :  { %3276 = vmatpush3.bf16.msra.mxu0 %v3649_v42  ;;  %v3697_v42 = vld [vmem:[%s4787_s1 + $0x410] sm:$0xff]  }
  0x5d   :  { %3298 = vmatpush3.bf16.msra.mxu1 %v3650_v43  ;;  %3277 = vmatprep.subr.bf16.mxu0 %v3651_v44  ;;  %v3698_v43 = vld [vmem:[%s4787_s1 + $0x490] sm:$0xff]   ;;  %v3699_v44 = vld [vmem:[%s4787_s1 + $0x458] sm:$0xff]  }
  0x5e   :  { %3299 = vmatprep.subr.bf16.mxu1 %v3652_v45  ;;  %v3700_v45 = vld [vmem:[%s4787_s1 + $0x4d8] sm:$0xff]  }
  0x60   :  { %3278 = vmatpush3.bf16.msra.mxu0 %v3653_v46  ;;  %v3701_v46 = vld [vmem:[%s4787_s1 + $0x418] sm:$0xff]  }
  0x61   :  { %3300 = vmatpush3.bf16.msra.mxu1 %v3654_v47  ;;  %3307 = vmatprep.subr.bf16.mxu0 %v3655_v56  ;;  %v3702_v47 = vld [vmem:[%s4787_s1 + $0x498] sm:$0xff]   ;;  %v3711_v56 = vld [vmem:[%s4787_s1 + $0x470] sm:$0xff]  }
  0x62   :  { %3329 = vmatprep.subr.bf16.mxu1 %v3656_v57  ;;  %v3712_v57 = vld [vmem:[%s4787_s1 + $0x4f0] sm:$0xff]  }
  0x63   :  { %2334 = vmatmul.mubr.bf16.vlgmr.msra.gmra.mrb[8].mxu0 %v62_v54  ;;  %v3709_v54 = vld [vmem:[%s4787_s1 + $0x428] sm:$0xff]  }
  0x64   :  { %2374 = vmatmul.mubr.bf16.vlgmr.msra.gmra.mrb[8].mxu1 %v64_v55  ;;  %3308 = vmatpush3.bf16.msra.mxu0 %v3657_v58  ;;  %v3710_v55 = vld [vmem:[%s4787_s1 + $0x4a8] sm:$0xff]   ;;  %v3713_v58 = vld [vmem:[%s4787_s1 + $0x430] sm:$0xff]  }
  0x65   :  { %3330 = vmatpush3.bf16.msra.mxu1 %v3658_v59  ;;  %3309 = vmatprep.subr.bf16.mxu0 %v3659_v60  ;;  %v3714_v59 = vld [vmem:[%s4787_s1 + $0x4b0] sm:$0xff]   ;;  %v3715_v60 = vld [vmem:[%s4787_s1 + $0x478] sm:$0xff]  }
  0x66   :  { %3331 = vmatprep.subr.bf16.mxu1 %v3660_v61  ;;  %2413 = vmatprep.mubr.bf16.mxu0 %v67_v27  ;;  %v3716_v61 = vld [vmem:[%s4787_s1 + $0x4f8] sm:$0xff]   ;;  %v3738_v27 = vld [vmem:[%s4787_s1 + $0x5a0] sm:$0xff]  }
  0x67   :  { %2453 = vmatprep.mubr.bf16.mxu1 %v69_v28  ;;  %v3739_v28 = vld [vmem:[%s4787_s1 + $0x568] sm:$0xff]  }
  0x68   :  { %3310 = vmatpush3.bf16.msra.mxu0 %v3661_v62  ;;  %v3717_v62 = vld [vmem:[%s4787_s1 + $0x438] sm:$0xff]  }
  0x69   :  { %3332 = vmatpush3.bf16.msra.mxu1 %v3662_v63  ;;  %3311 = vmatprep.subr.bf16.mxu0 %v3663_v0  ;;  %v3718_v63 = vld [vmem:[%s4787_s1 + $0x4b8] sm:$0xff]   ;;  %v39_v0 = vld [vmem:[%s4786_s0 + $0x88] sm:$0xff] }
  0x6a   :  { %3333 = vmatprep.subr.bf16.mxu1 %v3664_v1  ;;  %v41_v1 = vld [vmem:[%s4786_s0 + $0x98] sm:$0xff] }
  0x6c   :  { %3312 = vmatpush3.bf16.msra.mxu0 %v3665_v2  ;;  %v71_v2 = vpack.c.bf16 %v39_v0, %v39_v0  ;;  %v3767_v0 = vld [vmem:[%s4787_s1 + $0x660] sm:$0xff]  }
  0x6d   :  { %3334 = vmatpush3.bf16.msra.mxu1 %v3666_v3  ;;  %3313 = vmatprep.subr.bf16.mxu0 %v3667_v4  ;;  %v73_v3 = vpack.c.bf16 %v41_v1, %v41_v1  ;;  %v38_v4 = vld [vmem:[%s4786_s0 + $0x80] sm:$0xff] }
  0x6e   :  { %3335 = vmatprep.subr.bf16.mxu1 %v3668_v5  ;;  %v40_v5 = vld [vmem:[%s4786_s0 + $0x90] sm:$0xff]  ;;  %v3768_v1 = vld [vmem:[%s4787_s1 + $0x6e0] sm:$0xff]  }
  0x70   :  { %3314 = vmatpush3.bf16.msra.mxu0 %v3669_v6  ;;  %v70_v6 = vpack.c.bf16 %v38_v4, %v38_v4  ;;  %v3771_v4 = vld [vmem:[%s4787_s1 + $0x668] sm:$0xff]  }
  0x71   :  { %3336 = vmatpush3.bf16.msra.mxu1 %v3670_v7  ;;  %3315 = vmatprep.subr.bf16.mxu0 %v3671_v8  ;;  %v72_v7 = vpack.c.bf16 %v40_v5, %v40_v5  ;;  %v3719_v8 = vld [vmem:[%s4787_s1 + $0x540] sm:$0xff]   ;;  %v3772_v5 = vld [vmem:[%s4787_s1 + $0x6e8] sm:$0xff]  }
  0x72   :  { %3337 = vmatprep.subr.bf16.mxu1 %v3672_v9  ;;  %v3720_v9 = vld [vmem:[%s4787_s1 + $0x5c0] sm:$0xff]  }
  0x74   :  { %3316 = vmatpush3.bf16.msra.mxu0 %v3673_v10  ;;  %v3721_v10 = vld [vmem:[%s4787_s1 + $0x500] sm:$0xff]  }
  0x75   :  { %3338 = vmatpush3.bf16.msra.mxu1 %v3674_v11  ;;  %3317 = vmatprep.subr.bf16.mxu0 %v3675_v12  ;;  %v3722_v11 = vld [vmem:[%s4787_s1 + $0x580] sm:$0xff]   ;;  %v3723_v12 = vld [vmem:[%s4787_s1 + $0x548] sm:$0xff]  }
  0x76   :  { %3339 = vmatprep.subr.bf16.mxu1 %v3676_v13  ;;  %v3724_v13 = vld [vmem:[%s4787_s1 + $0x5c8] sm:$0xff]  }
  0x78   :  { %3318 = vmatpush3.bf16.msra.mxu0 %v3677_v14  ;;  %v3725_v14 = vld [vmem:[%s4787_s1 + $0x508] sm:$0xff]  }
  0x79   :  { %3340 = vmatpush3.bf16.msra.mxu1 %v3678_v15  ;;  %3319 = vmatprep.subr.bf16.mxu0 %v3679_v16  ;;  %v3726_v15 = vld [vmem:[%s4787_s1 + $0x588] sm:$0xff]   ;;  %v3727_v16 = vld [vmem:[%s4787_s1 + $0x550] sm:$0xff]  }
  0x7a   :  { %3341 = vmatprep.subr.bf16.mxu1 %v3680_v17  ;;  %v3728_v17 = vld [vmem:[%s4787_s1 + $0x5d0] sm:$0xff]  }
  0x7c   :  { %3320 = vmatpush3.bf16.msra.mxu0 %v3681_v18  ;;  %v3729_v18 = vld [vmem:[%s4787_s1 + $0x510] sm:$0xff]  }
  0x7d   :  { %3342 = vmatpush3.bf16.msra.mxu1 %v3682_v19  ;;  %3321 = vmatprep.subr.bf16.mxu0 %v3683_v20  ;;  %v3730_v19 = vld [vmem:[%s4787_s1 + $0x590] sm:$0xff]   ;;  %v3731_v20 = vld [vmem:[%s4787_s1 + $0x558] sm:$0xff]  }
  0x7e   :  { %3343 = vmatprep.subr.bf16.mxu1 %v3684_v21  ;;  %v3732_v21 = vld [vmem:[%s4787_s1 + $0x5d8] sm:$0xff]  }
  0x80   :  { %3322 = vmatpush3.bf16.msra.mxu0 %v3685_v22  ;;  %v3733_v22 = vld [vmem:[%s4787_s1 + $0x518] sm:$0xff]  }
  0x81   :  { %3344 = vmatpush3.bf16.msra.mxu1 %v3686_v23  ;;  %3351 = vmatprep.subr.bf16.mxu0 %v3687_v32  ;;  %v3734_v23 = vld [vmem:[%s4787_s1 + $0x598] sm:$0xff]   ;;  %v3743_v32 = vld [vmem:[%s4787_s1 + $0x570] sm:$0xff]  }
  0x82   :  { %3373 = vmatprep.subr.bf16.mxu1 %v3688_v33  ;;  %v3744_v33 = vld [vmem:[%s4787_s1 + $0x5f0] sm:$0xff]  }
  0x83   :  { %2414 = vmatmul.mubr.bf16.vlgmr.msra.gmra.mrb[12].mxu0 %v66_v29  ;;  %v3740_v29 = vld [vmem:[%s4787_s1 + $0x5e8] sm:$0xff]  }
  0x84   :  { %2454 = vmatmul.mubr.bf16.vlgmr.msra.gmra.mrb[12].mxu1 %v68_v31  ;;  %3352 = vmatpush3.bf16.msra.mxu0 %v3689_v34  ;;  %v3742_v31 = vld [vmem:[%s4787_s1 + $0x5a8] sm:$0xff]   ;;  %v3745_v34 = vld [vmem:[%s4787_s1 + $0x530] sm:$0xff]  }
  0x85   :  { %3374 = vmatpush3.bf16.msra.mxu1 %v3690_v35  ;;  %3353 = vmatprep.subr.bf16.mxu0 %v3691_v36  ;;  %v3746_v35 = vld [vmem:[%s4787_s1 + $0x5b0] sm:$0xff]   ;;  %v3747_v36 = vld [vmem:[%s4787_s1 + $0x578] sm:$0xff]  }
  0x86   :  { %3375 = vmatprep.subr.bf16.mxu1 %v3692_v37  ;;  %2493 = vmatprep.mubr.bf16.mxu0 %v71_v2  ;;  %v3748_v37 = vld [vmem:[%s4787_s1 + $0x5f8] sm:$0xff]   ;;  %v3769_v2 = vld [vmem:[%s4787_s1 + $0x620] sm:$0xff]  }
  0x87   :  { %2533 = vmatprep.mubr.bf16.mxu1 %v73_v3  ;;  %v3770_v3 = vld [vmem:[%s4787_s1 + $0x6a0] sm:$0xff]  }
  0x88   :  { %3354 = vmatpush3.bf16.msra.mxu0 %v3693_v38  ;;  %v3749_v38 = vld [vmem:[%s4787_s1 + $0x538] sm:$0xff]  }
  0x89   :  { %3376 = vmatpush3.bf16.msra.mxu1 %v3694_v39  ;;  %3355 = vmatprep.subr.bf16.mxu0 %v3695_v40  ;;  %v3750_v39 = vld [vmem:[%s4787_s1 + $0x5b8] sm:$0xff]   ;;  %v43_v40 = vld [vmem:[%s4786_s0 + $0xa8] sm:$0xff] }
  0x8a   :  { %3377 = vmatprep.subr.bf16.mxu1 %v3696_v41  ;;  %v75_v41 = vpack.c.bf16 %v43_v40, %v43_v40 }
  0x8c   :  { %3356 = vmatpush3.bf16.msra.mxu0 %v3697_v42  ;;  %v45_v42 = vld [vmem:[%s4786_s0 + $0xb8] sm:$0xff] }
  0x8d   :  { %3378 = vmatpush3.bf16.msra.mxu1 %v3698_v43  ;;  %3357 = vmatprep.subr.bf16.mxu0 %v3699_v44  ;;  %v42_v43 = vld [vmem:[%s4786_s0 + $0xa0] sm:$0xff]  ;;  %v44_v44 = vld [vmem:[%s4786_s0 + $0xb0] sm:$0xff] }
  0x8e   :  { %3379 = vmatprep.subr.bf16.mxu1 %v3700_v45  ;;  %v77_v45 = vpack.c.bf16 %v45_v42, %v45_v42 }
  0x90   :  { %3358 = vmatpush3.bf16.msra.mxu0 %v3701_v46  ;;  %v74_v46 = vpack.c.bf16 %v42_v43, %v42_v43  ;;  %v3799_v43 = vld [vmem:[%s4787_s1 + $0x760] sm:$0xff]  }
  0x91   :  { %3380 = vmatpush3.bf16.msra.mxu1 %v3702_v47  ;;  %3359 = vmatprep.subr.bf16.mxu0 %v3703_v48  ;;  %v76_v47 = vpack.c.bf16 %v44_v44, %v44_v44  ;;  %v3751_v48 = vld [vmem:[%s4787_s1 + $0x640] sm:$0xff]  }
  0x92   :  { %3381 = vmatprep.subr.bf16.mxu1 %v3704_v49  ;;  %v3752_v49 = vld [vmem:[%s4787_s1 + $0x6c0] sm:$0xff]  }
  0x94   :  { %3360 = vmatpush3.bf16.msra.mxu0 %v3705_v50  ;;  %v3753_v50 = vld [vmem:[%s4787_s1 + $0x600] sm:$0xff]  }
  0x95   :  { %3382 = vmatpush3.bf16.msra.mxu1 %v3706_v51  ;;  %3361 = vmatprep.subr.bf16.mxu0 %v3707_v52  ;;  %v3754_v51 = vld [vmem:[%s4787_s1 + $0x680] sm:$0xff]   ;;  %v3755_v52 = vld [vmem:[%s4787_s1 + $0x648] sm:$0xff]  }
  0x96   :  { %3383 = vmatprep.subr.bf16.mxu1 %v3708_v53  ;;  %v3756_v53 = vld [vmem:[%s4787_s1 + $0x6c8] sm:$0xff]  }
  0x98   :  { %3362 = vmatpush3.bf16.msra.mxu0 %v3709_v54  ;;  %v3757_v54 = vld [vmem:[%s4787_s1 + $0x608] sm:$0xff]  }
  0x99   :  { %3384 = vmatpush3.bf16.msra.mxu1 %v3710_v55  ;;  %3363 = vmatprep.subr.bf16.mxu0 %v3711_v56  ;;  %v3758_v55 = vld [vmem:[%s4787_s1 + $0x688] sm:$0xff]   ;;  %v3759_v56 = vld [vmem:[%s4787_s1 + $0x650] sm:$0xff]  }
  0x9a   :  { %3385 = vmatprep.subr.bf16.mxu1 %v3712_v57  ;;  %v3760_v57 = vld [vmem:[%s4787_s1 + $0x6d0] sm:$0xff]  }
  0x9c   :  { %3364 = vmatpush3.bf16.msra.mxu0 %v3713_v58  ;;  %v3761_v58 = vld [vmem:[%s4787_s1 + $0x610] sm:$0xff]  }
  0x9d   :  { %3386 = vmatpush3.bf16.msra.mxu1 %v3714_v59  ;;  %3365 = vmatprep.subr.bf16.mxu0 %v3715_v60  ;;  %v3762_v59 = vld [vmem:[%s4787_s1 + $0x690] sm:$0xff]   ;;  %v3763_v60 = vld [vmem:[%s4787_s1 + $0x658] sm:$0xff]  }
  0x9e   :  { %3387 = vmatprep.subr.bf16.mxu1 %v3716_v61  ;;  %v3764_v61 = vld [vmem:[%s4787_s1 + $0x6d8] sm:$0xff]  }
  0xa0   :  { %3366 = vmatpush3.bf16.msra.mxu0 %v3717_v62  ;;  %v3765_v62 = vld [vmem:[%s4787_s1 + $0x618] sm:$0xff]  }
  0xa1   :  { %3388 = vmatpush3.bf16.msra.mxu1 %v3718_v63  ;;  %3395 = vmatprep.subr.bf16.mxu0 %v3719_v8  ;;  %v3766_v63 = vld [vmem:[%s4787_s1 + $0x698] sm:$0xff]   ;;  %v3775_v8 = vld [vmem:[%s4787_s1 + $0x670] sm:$0xff]  }
  0xa2   :  { %3417 = vmatprep.subr.bf16.mxu1 %v3720_v9  ;;  %v3776_v9 = vld [vmem:[%s4787_s1 + $0x6f0] sm:$0xff]  }
  0xa3   :  { %2494 = vmatmul.mubr.bf16.vlgmr.msra.gmra.mrb[16].mxu0 %v70_v6  ;;  %v3773_v6 = vld [vmem:[%s4787_s1 + $0x628] sm:$0xff]  }
  0xa4   :  { %2534 = vmatmul.mubr.bf16.vlgmr.msra.gmra.mrb[16].mxu1 %v72_v7  ;;  %3396 = vmatpush3.bf16.msra.mxu0 %v3721_v10  ;;  %v3774_v7 = vld [vmem:[%s4787_s1 + $0x6a8] sm:$0xff]   ;;  %v3777_v10 = vld [vmem:[%s4787_s1 + $0x630] sm:$0xff]  }
  0xa5   :  { %3418 = vmatpush3.bf16.msra.mxu1 %v3722_v11  ;;  %3397 = vmatprep.subr.bf16.mxu0 %v3723_v12  ;;  %v3778_v11 = vld [vmem:[%s4787_s1 + $0x6b0] sm:$0xff]   ;;  %v3779_v12 = vld [vmem:[%s4787_s1 + $0x678] sm:$0xff]  }
  0xa6   :  { %3419 = vmatprep.subr.bf16.mxu1 %v3724_v13  ;;  %2573 = vmatprep.mubr.bf16.mxu0 %v75_v41  ;;  %v3780_v13 = vld [vmem:[%s4787_s1 + $0x6f8] sm:$0xff]  }
  0xa7   :  { %2613 = vmatprep.mubr.bf16.mxu1 %v77_v45  ;;  %v3798_v41 = vld [vmem:[%s4787_s1 + $0x798] sm:$0xff]  }
  0xa8   :  { %3398 = vmatpush3.bf16.msra.mxu0 %v3725_v14  ;;  %v3781_v14 = vld [vmem:[%s4787_s1 + $0x638] sm:$0xff]  }
  0xa9   :  { %3420 = vmatpush3.bf16.msra.mxu1 %v3726_v15  ;;  %3399 = vmatprep.subr.bf16.mxu0 %v3727_v16  ;;  %v3782_v15 = vld [vmem:[%s4787_s1 + $0x6b8] sm:$0xff]   ;;  %v47_v16 = vld [vmem:[%s4786_s0 + $0xc8] sm:$0xff] }
  0xaa   :  { %3421 = vmatprep.subr.bf16.mxu1 %v3728_v17  ;;  %v49_v17 = vld [vmem:[%s4786_s0 + $0xd8] sm:$0xff] }
  0xac   :  { %3400 = vmatpush3.bf16.msra.mxu0 %v3729_v18  ;;  %v46_v18 = vld [vmem:[%s4786_s0 + $0xc0] sm:$0xff] }
  0xad   :  { %3422 = vmatpush3.bf16.msra.mxu1 %v3730_v19  ;;  %3401 = vmatprep.subr.bf16.mxu0 %v3731_v20  ;;  %v79_v19 = vpack.c.bf16 %v47_v16, %v47_v16  ;;  %v81_v20 = vpack.c.bf16 %v49_v17, %v49_v17 }
  0xae   :  { %3423 = vmatprep.subr.bf16.mxu1 %v3732_v21  ;;  %v78_v21 = vpack.c.bf16 %v46_v18, %v46_v18 }
  0xb0   :  { %3402 = vmatpush3.bf16.msra.mxu0 %v3733_v22  ;;  %v48_v22 = vld [vmem:[%s4786_s0 + $0xd0] sm:$0xff] }
  0xb1   :  { %3424 = vmatpush3.bf16.msra.mxu1 %v3734_v23  ;;  %3403 = vmatprep.subr.bf16.mxu0 %v3735_v24  ;;  %v80_v23 = vpack.c.bf16 %v48_v22, %v48_v22  ;;  %v3783_v24 = vld [vmem:[%s4787_s1 + $0x740] sm:$0xff]  }
  0xb2   :  { %3425 = vmatprep.subr.bf16.mxu1 %v3736_v25  ;;  %v3784_v25 = vld [vmem:[%s4787_s1 + $0x7c0] sm:$0xff]  }
  0xb4   :  { %3404 = vmatpush3.bf16.msra.mxu0 %v3737_v26  ;;  %v3785_v26 = vld [vmem:[%s4787_s1 + $0x700] sm:$0xff]  }
  0xb5   :  { %3426 = vmatpush3.bf16.msra.mxu1 %v3738_v27  ;;  %3405 = vmatprep.subr.bf16.mxu0 %v3739_v28  ;;  %v3786_v27 = vld [vmem:[%s4787_s1 + $0x780] sm:$0xff]   ;;  %v3787_v28 = vld [vmem:[%s4787_s1 + $0x748] sm:$0xff]  }
  0xb6   :  { %3427 = vmatprep.subr.bf16.mxu1 %v3740_v29  ;;  %v3788_v29 = vld [vmem:[%s4787_s1 + $0x7c8] sm:$0xff]  }
  0xb8   :  { %3406 = vmatpush3.bf16.msra.mxu0 %v3741_v30  ;;  %v3789_v30 = vld [vmem:[%s4787_s1 + $0x708] sm:$0xff]  }
  0xb9   :  { %3428 = vmatpush3.bf16.msra.mxu1 %v3742_v31  ;;  %3407 = vmatprep.subr.bf16.mxu0 %v3743_v32  ;;  %v3790_v31 = vld [vmem:[%s4787_s1 + $0x788] sm:$0xff]   ;;  %v3791_v32 = vld [vmem:[%s4787_s1 + $0x750] sm:$0xff]  }
  0xba   :  { %3429 = vmatprep.subr.bf16.mxu1 %v3744_v33  ;;  %v3792_v33 = vld [vmem:[%s4787_s1 + $0x7d0] sm:$0xff]  }
  0xbc   :  { %3408 = vmatpush3.bf16.msra.mxu0 %v3745_v34  ;;  %v3793_v34 = vld [vmem:[%s4787_s1 + $0x710] sm:$0xff]  }
  0xbd   :  { %3430 = vmatpush3.bf16.msra.mxu1 %v3746_v35  ;;  %3409 = vmatprep.subr.bf16.mxu0 %v3747_v36  ;;  %v3794_v35 = vld [vmem:[%s4787_s1 + $0x790] sm:$0xff]   ;;  %v3795_v36 = vld [vmem:[%s4787_s1 + $0x758] sm:$0xff]  }
  0xbe   :  { %3431 = vmatprep.subr.bf16.mxu1 %v3748_v37  ;;  %v3796_v37 = vld [vmem:[%s4787_s1 + $0x7d8] sm:$0xff]  }
  0xc0   :  { %3410 = vmatpush3.bf16.msra.mxu0 %v3749_v38 }
  0xc1   :  { %3432 = vmatpush3.bf16.msra.mxu1 %v3750_v39  ;;  %3439 = vmatprep.subr.bf16.mxu0 %v3751_v48  ;;  %v3797_v39 = vld [vmem:[%s4787_s1 + $0x718] sm:$0xff]  }
  0xc2   :  { %3461 = vmatprep.subr.bf16.mxu1 %v3752_v49  ;;  %v3801_v49 = vld [vmem:[%s4787_s1 + $0x720] sm:$0xff]  }
  0xc3   :  { %2574 = vmatmul.mubr.bf16.vlgmr.msra.gmra.mrb[20].mxu0 %v74_v46  ;;  %v3800_v46 = vld [vmem:[%s4787_s1 + $0x7e0] sm:$0xff]  }
  0xc4   :  { %2614 = vmatmul.mubr.bf16.vlgmr.msra.gmra.mrb[20].mxu1 %v76_v47  ;;  %3440 = vmatpush3.bf16.msra.mxu0 %v3753_v50 }
  0xc5   :  { %3462 = vmatpush3.bf16.msra.mxu1 %v3754_v51  ;;  %3441 = vmatprep.subr.bf16.mxu0 %v3755_v52  ;;  %v3802_v51 = vld [vmem:[%s4787_s1 + $0x7a0] sm:$0xff]  }
  0xc6   :  { %3463 = vmatprep.subr.bf16.mxu1 %v3756_v53  ;;  %2653 = vmatprep.mubr.bf16.mxu0 %v79_v19  ;;  %v2909_v52 = vld [vmem:[%s4788_s2] ss:$0 sm:$0xff] }
  0xc7   :  { %2693 = vmatprep.mubr.bf16.mxu1 %v81_v20 }
  0xc8   :  { %3442 = vmatpush3.bf16.msra.mxu0 %v3757_v54 }
  0xc9   :  { %3464 = vmatpush3.bf16.msra.mxu1 %v3758_v55  ;;  %3443 = vmatprep.subr.bf16.mxu0 %v3759_v56  ;;  %v3803_v55 = vld [vmem:[%s4787_s1 + $0x768] sm:$0xff]  }
  0xca   :  { %3465 = vmatprep.subr.bf16.mxu1 %v3760_v57  ;;  %v3804_v57 = vld [vmem:[%s4787_s1 + $0x7e8] sm:$0xff]  }
  0xcc   :  { %3444 = vmatpush3.bf16.msra.mxu0 %v3761_v58 }
  0xcd   :  { %3466 = vmatpush3.bf16.msra.mxu1 %v3762_v59  ;;  %3445 = vmatprep.subr.bf16.mxu0 %v3763_v60  ;;  %v3805_v59 = vld [vmem:[%s4787_s1 + $0x728] sm:$0xff]  }
  0xce   :  { %3467 = vmatprep.subr.bf16.mxu1 %v3764_v61  ;;  %v3806_v60 = vld [vmem:[%s4787_s1 + $0x7a8] sm:$0xff]   ;;  %v3807_v61 = vld [vmem:[%s4787_s1 + $0x770] sm:$0xff]  }
  0xd0   :  { %3446 = vmatpush3.bf16.msra.mxu0 %v3765_v62  ;;  %v3808_v62 = vld [vmem:[%s4787_s1 + $0x7f0] sm:$0xff]  }
  0xd1   :  { %3468 = vmatpush3.bf16.msra.mxu1 %v3766_v63  ;;  %3447 = vmatprep.subr.bf16.mxu0 %v3767_v0  ;;  %v3809_v63 = vld [vmem:[%s4787_s1 + $0x730] sm:$0xff]  }
  0xd2   :  { %3469 = vmatprep.subr.bf16.mxu1 %v3768_v1  ;;  %v3810_v0 = vld [vmem:[%s4787_s1 + $0x7b0] sm:$0xff]   ;;  %v3811_v1 = vld [vmem:[%s4787_s1 + $0x778] sm:$0xff]  }
  0xd4   :  { %3448 = vmatpush3.bf16.msra.mxu0 %v3769_v2  ;;  %v3812_v2 = vld [vmem:[%s4787_s1 + $0x7f8] sm:$0xff]  }
  0xd5   :  { %3470 = vmatpush3.bf16.msra.mxu1 %v3770_v3  ;;  %3449 = vmatprep.subr.bf16.mxu0 %v3771_v4  ;;  %v3813_v3 = vld [vmem:[%s4787_s1 + $0x738] sm:$0xff]  }
  0xd6   :  { %3471 = vmatprep.subr.bf16.mxu1 %v3772_v5  ;;  %v3814_v4 = vld [vmem:[%s4787_s1 + $0x7b8] sm:$0xff]   ;;  %v51_v5 = vld [vmem:[%s4786_s0 + $0xe8] sm:$0xff] }
  0xd8   :  { %3450 = vmatpush3.bf16.msra.mxu0 %v3773_v6  ;;  %v83_v6 = vpack.c.bf16 %v51_v5, %v51_v5 }
  0xd9   :  { %3472 = vmatpush3.bf16.msra.mxu1 %v3774_v7  ;;  %3451 = vmatprep.subr.bf16.mxu0 %v3775_v8  ;;  %v53_v7 = vld [vmem:[%s4786_s0 + $0xf8] sm:$0xff]  ;;  %v50_v8 = vld [vmem:[%s4786_s0 + $0xe0] sm:$0xff] }
  0xda   :  { %3473 = vmatprep.subr.bf16.mxu1 %v3776_v9  ;;  %v52_v9 = vld [vmem:[%s4786_s0 + $0xf0] sm:$0xff] }
  0xdc   :  { %3452 = vmatpush3.bf16.msra.mxu0 %v3777_v10  ;;  %v85_v10 = vpack.c.bf16 %v53_v7, %v53_v7 }
  0xdd   :  { %3474 = vmatpush3.bf16.msra.mxu1 %v3778_v11  ;;  %3453 = vmatprep.subr.bf16.mxu0 %v3779_v12  ;;  %v82_v11 = vpack.c.bf16 %v50_v8, %v50_v8  ;;  %v84_v12 = vpack.c.bf16 %v52_v9, %v52_v9 }
  0xde   :  { %3475 = vmatprep.subr.bf16.mxu1 %v3780_v13 }
  0xe0   :  { %3454 = vmatpush3.bf16.msra.mxu0 %v3781_v14 }
  0xe1   :  { %3476 = vmatpush3.bf16.msra.mxu1 %v3782_v15  ;;  %3483 = vmatprep.subr.bf16.mxu0 %v3783_v24 }
  0xe2   :  { %3505 = vmatprep.subr.bf16.mxu1 %v3784_v25 }
  0xe3   :  { %2654 = vmatmul.mubr.bf16.vlgmr.msra.gmra.mrb[24].mxu0 %v78_v21 }
  0xe4   :  { %2694 = vmatmul.mubr.bf16.vlgmr.msra.gmra.mrb[24].mxu1 %v80_v23  ;;  %3484 = vmatpush3.bf16.msra.mxu0 %v3785_v26 }
  0xe5   :  { %3506 = vmatpush3.bf16.msra.mxu1 %v3786_v27  ;;  %3485 = vmatprep.subr.bf16.mxu0 %v3787_v28 }
  0xe6   :  { %3507 = vmatprep.subr.bf16.mxu1 %v3788_v29  ;;  %2733 = vmatprep.mubr.bf16.mxu0 %v83_v6 }
  0xe7   :  { %2773 = vmatprep.mubr.bf16.mxu1 %v85_v10 }
  0xe8   :  { %3486 = vmatpush3.bf16.msra.mxu0 %v3789_v30 }
  0xe9   :  { %3508 = vmatpush3.bf16.msra.mxu1 %v3790_v31  ;;  %3487 = vmatprep.subr.bf16.mxu0 %v3791_v32 }
  0xea   :  { %3509 = vmatprep.subr.bf16.mxu1 %v3792_v33 }
  0xec   :  { %3488 = vmatpush3.bf16.msra.mxu0 %v3793_v34 }
  0xed   :  { %3510 = vmatpush3.bf16.msra.mxu1 %v3794_v35  ;;  %3489 = vmatprep.subr.bf16.mxu0 %v3795_v36 }
  0xee   :  { %3511 = vmatprep.subr.bf16.mxu1 %v3796_v37 }
  0xf0   :  { %3490 = vmatpush3.bf16.msra.mxu0 %v3797_v39 }
  0xf1   :  { %3512 = vmatpush3.bf16.msra.mxu1 %v3798_v41  ;;  %3491 = vmatprep.subr.bf16.mxu0 %v3799_v43 }
  0xf2   :  { %3513 = vmatprep.subr.bf16.mxu1 %v3800_v46 }
  0xf4   :  { %3492 = vmatpush3.bf16.msra.mxu0 %v3801_v49 }
  0xf5   :  { %3514 = vmatpush3.bf16.msra.mxu1 %v3802_v51  ;;  %3493 = vmatprep.subr.bf16.mxu0 %v3803_v55 }
  0xf6   :  { %v3191_v38 = vpop.f32.mrb[0].mxu0  ;;  %3515 = vmatprep.subr.bf16.mxu1 %v3804_v57 }
  0xf7   :  { %v3213_v40 = vpop.f32.mrb[0].mxu1  ;;  %v3192_v42 = vpop.f32.mrb[1].mxu0 }
  0xf8   :  { %v3193_v44 = vadd.f32 %v3192_v42, %v3191_v38  ;;  %v3214_v45 = vpop.f32.mrb[1].mxu1  ;;  %v3194_v48 = vpop.f32.mrb[2].mxu0  ;;  %3494 = vmatpush3.bf16.msra.mxu0 %v3805_v59 }
  0xf9   :  { %v3215_v47 = vadd.f32 %v3214_v45, %v3213_v40  ;;  %v3216_v50 = vpop.f32.mrb[2].mxu1  ;;  %v3195_v53 = vpop.f32.mrb[3].mxu0  ;;  %3516 = vmatpush3.bf16.msra.mxu1 %v3806_v60  ;;  %3495 = vmatprep.subr.bf16.mxu0 %v3807_v61 }
  0xfa   :  { %v2176_v54 = vadd.f32 %v3193_v44, %v2909_v52  ;;  %v3217_v56 = vpop.f32.mrb[3].mxu1  ;;  %3517 = vmatprep.subr.bf16.mxu1 %v3808_v62 }
  0xfc   :  { %v2216_v58 = vadd.f32 %v3215_v47, %v2176_v54  ;;  %3496 = vmatpush3.bf16.msra.mxu0 %v3809_v63 }
  0xfd   :  { %3518 = vmatpush3.bf16.msra.mxu1 %v3810_v0  ;;  %3497 = vmatprep.subr.bf16.mxu0 %v3811_v1 }
  0xfe   :  { %3519 = vmatprep.subr.bf16.mxu1 %v3812_v2 }
 0x100   :  { %3498 = vmatpush3.bf16.msra.mxu0 %v3813_v3 }
 0x101   :  { %3520 = vmatpush3.bf16.msra.mxu1 %v3814_v4 }
 0x103   :  { %2734 = vmatmul.mubr.bf16.vlgmr.msra.gmra.mrb[28].mxu0 %v82_v11 }
 0x104   :  { %2774 = vmatmul.mubr.bf16.vlgmr.msra.gmra.mrb[28].mxu1 %v84_v12 }
 0x105   :  { %10 = vsyncpa [#allocation3], 0  ;;  %v3815_v37 = vld [vmem:[%s4789_s3] sm:$0xff]   ;;  %v3847_v38 = vmov 0.0   ;;  %v3816_v39 = vld [vmem:[%s4789_s3 + $0x8] sm:$0xff]   ;;  %vm3848_vm0 = vmmov 0  }
 0x106   :  { %3536 = vmatprep.subr.bf16.mxu0 %v3847_v38  ;;  %v3817_v40 = vld [vmem:[%s4789_s3 + $0x10] sm:$0xff]   ;;  %v3818_v41 = vld [vmem:[%s4789_s3 + $0x18] sm:$0xff]   ;;  %v3819_v42 = vld [vmem:[%s4789_s3 + $0x20] sm:$0xff]   ;;  %3552 = vmatprep.mubr.msk.bf16.mxu0 %vm3848_vm0, %v3847_v38  ;;  %s3849_s9 = smov [#allocation2]  }
 0x107   :  { %3537 = vmatpush3.bf16.msra.mxu0 %v3815_v37  ;;  %v3820_v54 = vld [vmem:[%s4789_s3 + $0x28] sm:$0xff]   ;;  %v3821_v56 = vld [vmem:[%s4789_s3 + $0x30] sm:$0xff]   ;;  %v3822_v57 = vld [vmem:[%s4789_s3 + $0x38] sm:$0xff]   ;;  %s2901_s10 = sshll.u32 %s3849_s9, 4  ;;  %s2902_s10 = int_to_ptr.vmem [resolvable:$true] %s2901_s10 }
 0x108   :  { %3538 = vmatprep.subr.bf16.mxu0 %v3847_v38  ;;  %s3823_s11 = scalar_lea.vmem %s2902_s10, 128  ;;  %p3828_p1 = scmp.lt.s32.totalorder %s2902_s10, %s2902_s10 }
 0x109   :  { %p3824_p0 = scmp.ne.s32.totalorder %s2902_s10, %s3823_s11  ;;  %p3829_p2 = scmp.lt.s32.totalorder %s3823_s11, %s3823_s11 }
 0x10b   :  { %3539 = vmatpush3.bf16.msra.mxu0 %v3816_v39  ;;  %p3830_p3 = por %p3829_p2, %p3828_p1 }
 0x10c   :  { %3540 = vmatprep.subr.bf16.mxu0 %v3847_v38 }
 0x10d   :  { %p3831_p4 = pnand %p3830_p3, %p3824_p0 }
 0x10f   :  { %3541 = vmatpush3.bf16.msra.mxu0 %v3817_v40 }
 0x110   :  { %3542 = vmatprep.subr.bf16.mxu0 %v3847_v38 }
 0x113   :  { %3543 = vmatpush3.bf16.msra.mxu0 %v3818_v41 }
 0x114   :  { %3544 = vmatprep.subr.bf16.mxu0 %v3847_v38 }
 0x116   :  { %v3235_v13 = vpop.f32.mrb[4].mxu0 }
 0x117   :  { %v3257_v14 = vpop.f32.mrb[4].mxu1  ;;  %v3236_v15 = vpop.f32.mrb[5].mxu0  ;;  %3545 = vmatpush3.bf16.msra.mxu0 %v3819_v42 }
 0x118   :  { %v3237_v16 = vadd.f32 %v3236_v15, %v3235_v13  ;;  %v3258_v17 = vpop.f32.mrb[5].mxu1  ;;  %v3238_v18 = vpop.f32.mrb[6].mxu0  ;;  %3546 = vmatprep.subr.bf16.mxu0 %v3847_v38 }
 0x119   :  { %v3259_v19 = vadd.f32 %v3258_v17, %v3257_v14  ;;  %v3260_v20 = vpop.f32.mrb[6].mxu1  ;;  %v3239_v21 = vpop.f32.mrb[7].mxu0 }
 0x11a   :  { %v2256_v22 = vadd.f32 %v3237_v16, %v2216_v58  ;;  %v3261_v23 = vpop.f32.mrb[7].mxu1 }
 0x11b   :  { %3547 = vmatpush3.bf16.msra.mxu0 %v3820_v54 }
 0x11c   :  { %v2296_v24 = vadd.f32 %v3259_v19, %v2256_v22  ;;  %3548 = vmatprep.subr.bf16.mxu0 %v3847_v38 }
 0x11f   :  { %3549 = vmatpush3.bf16.msra.mxu0 %v3821_v56 }
 0x120   :  { %3550 = vmatprep.subr.bf16.mxu0 %v3847_v38 }
 0x123   :  { %3551 = vmatpush3.bf16.msra.mxu0 %v3822_v57 }
 0x136   :  { %v3279_v25 = vpop.f32.mrb[8].mxu0 }
 0x137   :  { %v3301_v26 = vpop.f32.mrb[8].mxu1  ;;  %v3280_v27 = vpop.f32.mrb[9].mxu0 }
 0x138   :  { %v3281_v28 = vadd.f32 %v3280_v27, %v3279_v25  ;;  %v3302_v29 = vpop.f32.mrb[9].mxu1  ;;  %v3282_v30 = vpop.f32.mrb[10].mxu0 }
 0x139   :  { %v3303_v31 = vadd.f32 %v3302_v29, %v3301_v26  ;;  %v3304_v32 = vpop.f32.mrb[10].mxu1  ;;  %v3283_v33 = vpop.f32.mrb[11].mxu0 }
 0x13a   :  { %v2336_v34 = vadd.f32 %v3281_v28, %v2296_v24  ;;  %v3305_v35 = vpop.f32.mrb[11].mxu1 }
 0x13c   :  { %v2376_v36 = vadd.f32 %v3303_v31, %v2336_v34 }
 0x156   :  { %v3323_v43 = vpop.f32.mrb[12].mxu0 }
 0x157   :  { %v3345_v44 = vpop.f32.mrb[12].mxu1  ;;  %v3324_v45 = vpop.f32.mrb[13].mxu0 }
 0x158   :  { %v3346_v46 = vpop.f32.mrb[13].mxu1  ;;  %v3325_v47 = vadd.f32 %v3324_v45, %v3323_v43  ;;  %v3326_v49 = vpop.f32.mrb[14].mxu0 }
 0x159   :  { %v3347_v48 = vadd.f32 %v3346_v46, %v3345_v44  ;;  %v3348_v50 = vpop.f32.mrb[14].mxu1  ;;  %v3327_v51 = vpop.f32.mrb[15].mxu0  ;;  %v3166_v44 = vld [vmem:[%s4790_s4] ss:$0 sm:$0xff] }
 0x15a   :  { %v3349_v52 = vpop.f32.mrb[15].mxu1  ;;  %v2416_v53 = vadd.f32 %v3325_v47, %v2376_v36 }
 0x15c   :  { %v2456_v55 = vadd.f32 %v3347_v48, %v2416_v53 }
 0x176   :  { %v3367_v58 = vpop.f32.mrb[16].mxu0 }
 0x177   :  { %v3389_v59 = vpop.f32.mrb[16].mxu1  ;;  %v3368_v60 = vpop.f32.mrb[17].mxu0 }
 0x178   :  { %v3369_v61 = vadd.f32 %v3368_v60, %v3367_v58  ;;  %v3390_v62 = vpop.f32.mrb[17].mxu1  ;;  %v3370_v63 = vpop.f32.mrb[18].mxu0 }
 0x179   :  { %v3391_v0 = vadd.f32 %v3390_v62, %v3389_v59  ;;  %v3392_v1 = vpop.f32.mrb[18].mxu1  ;;  %v3371_v2 = vpop.f32.mrb[19].mxu0 }
 0x17a   :  { %v2496_v3 = vadd.f32 %v3369_v61, %v2456_v55  ;;  %v3393_v4 = vpop.f32.mrb[19].mxu1 }
 0x17c   :  { %v2536_v5 = vadd.f32 %v3391_v0, %v2496_v3 }
 0x196   :  { %v3411_v6 = vpop.f32.mrb[20].mxu0 }
 0x197   :  { %v3433_v7 = vpop.f32.mrb[20].mxu1  ;;  %v3412_v8 = vpop.f32.mrb[21].mxu0 }
 0x198   :  { %v3413_v9 = vadd.f32 %v3412_v8, %v3411_v6  ;;  %v3434_v10 = vpop.f32.mrb[21].mxu1  ;;  %v3414_v11 = vpop.f32.mrb[22].mxu0 }
 0x199   :  { %v3435_v12 = vadd.f32 %v3434_v10, %v3433_v7  ;;  %v3436_v13 = vpop.f32.mrb[22].mxu1  ;;  %v3415_v14 = vpop.f32.mrb[23].mxu0 }
 0x19a   :  { %v2576_v15 = vadd.f32 %v3413_v9, %v2536_v5  ;;  %v3437_v16 = vpop.f32.mrb[23].mxu1 }
 0x19c   :  { %v2616_v17 = vadd.f32 %v3435_v12, %v2576_v15 }
 0x1b6   :  { %v3455_v18 = vpop.f32.mrb[24].mxu0 }
 0x1b7   :  { %v3477_v19 = vpop.f32.mrb[24].mxu1  ;;  %v3456_v20 = vpop.f32.mrb[25].mxu0 }
 0x1b8   :  { %v3478_v21 = vpop.f32.mrb[25].mxu1  ;;  %v3457_v22 = vadd.f32 %v3456_v20, %v3455_v18  ;;  %v3458_v24 = vpop.f32.mrb[26].mxu0 }
 0x1b9   :  { %v3479_v23 = vadd.f32 %v3478_v21, %v3477_v19  ;;  %v3480_v25 = vpop.f32.mrb[26].mxu1  ;;  %v3459_v26 = vpop.f32.mrb[27].mxu0 }
 0x1ba   :  { %v3481_v27 = vpop.f32.mrb[27].mxu1  ;;  %v2656_v28 = vadd.f32 %v3457_v22, %v2616_v17 }
 0x1bc   :  { %v2696_v29 = vadd.f32 %v3479_v23, %v2656_v28 }
 0x1d6   :  { %v3499_v30 = vpop.f32.mrb[28].mxu0 }
 0x1d7   :  { %v3521_v31 = vpop.f32.mrb[28].mxu1  ;;  %v3500_v32 = vpop.f32.mrb[29].mxu0 }
 0x1d8   :  { %v3501_v33 = vadd.f32 %v3500_v32, %v3499_v30  ;;  %v3522_v34 = vpop.f32.mrb[29].mxu1  ;;  %v3502_v35 = vpop.f32.mrb[30].mxu0 }
 0x1d9   :  { %v3523_v36 = vadd.f32 %v3522_v34, %v3521_v31  ;;  %v3524_v37 = vpop.f32.mrb[30].mxu1  ;;  %v3503_v38 = vpop.f32.mrb[31].mxu0 }
 0x1da   :  { %v2736_v39 = vadd.f32 %v3501_v33, %v2696_v29  ;;  %v3525_v40 = vpop.f32.mrb[31].mxu1 }
 0x1dc   :  { %v2776_v41 = vadd.f32 %v3523_v36, %v2736_v39 }
 0x1de   :  { %v2781_v42 = vmax.f32 %v2776_v41, 0.0 }
 0x1e0   :  { %v2782_v43 = vpack.c.bf16 %v2781_v42, %v2781_v42 }
 0x1e2   :  { %3553 = vmatmul.mubr.bf16.vlgmr.msra.gmra.mrb[32].mxu0 %v2782_v43 }
 0x2b5   :  { %v2888_v45 = vpop.f32.mrb[32].mxu0 }
 0x2b6   :  { %v2889_v46 = vadd.f32 %v3166_v44, %v2888_v45  ;;  %v3554_v47 = vpop.f32.mrb[33].mxu0 }
 0x2b7   :  { %v2891_v48 = vpop.f32.mrb[34].mxu0 }
 0x2b8   :  { %2894 = vst [vmem:[#allocation2] sm:$0xff] %v2889_v46  ;;  %v3555_v49 = vpop.f32.mrb[35].mxu0 }
 0x2b9   :  { %3834 = shalt.err (!%p3831_p4)
}
 0x2ba   :  { %s3835_s4 = scalar_lea.hbm %s4791_s5, 128 }
 0x2bb   :  { %p3836_p5 = scmp.ne.s32.totalorder %s4791_s5, %s3835_s4  ;;  %p3839_p6 = scmp.lt.u32.totalorder %s3835_s4, %s4791_s5 }
 0x2bd   :  { %p3841_p7 = pnand %p3839_p6, %p3836_p5 }
 0x2bf   :  { %3844 = shalt.err (!%p3841_p7)
}
 0x2c0   :  { %2904 = dma.vmem_to_hbm [thread:$0]  %s2902_s10, 128, %s4791_s5, [#allocation3]  }
 0x2c1   :  { %3845 = dma.done.wait [#allocation3], 128  }
 0x2c2   :  { %3846 = vsyncadd [#allocation3], 4294967168 }
 0x2c3   :  { %2908 = vsyncpa [#allocation3], 1 }

</bundles_post_ra>
